<compile_context>
chip_gen: v5e
topology: v5e:2x2
jax: 0.10.0
libtpu: 0.0.40
codegen_flags: <defaults>
</compile_context>

<pallas_src>
import jax
import jax.numpy as jnp
import numpy as np
from jax.experimental import pallas as pl
from jax.experimental.pallas import tpu as pltpu


# ----------------------------------------------------------------------------
# Fused conv1 -> relu -> pool -> conv2 -> relu -> width-pool   (one kernel)
# ----------------------------------------------------------------------------
def _fused_conv_kernel(xw0_ref, xw1_ref, xw2_ref, w1_ref, b1_ref,
                       w2e_ref, w2o_ref, b2_ref, o_ref, y1_scr):
    M = o_ref.shape[0]                     # b_tile * 12 rows = (sample, pooled conv1 row)

    # ---- conv1 (5x5, Cin=1) fused with its full 2x2 max-pool ----------------
    # Four pool-parity accumulators; each is a sum of three fat matmuls over
    # row-pair windows of the pre-paired input (no strided loads, no reshapes).
    slabs = (xw0_ref[...], xw1_ref[...], xw2_ref[...])      # each (M, 56)
    y1 = None
    for p in range(4):                                      # (row, col) pool parity
        acc = jnp.zeros((M, 384), jnp.float32)
        for j in range(3):                                  # row-pair window
            acc = acc + jnp.dot(slabs[j], w1_ref[4 * j + p],
                                preferred_element_type=jnp.float32)
        y1 = acc if y1 is None else jnp.maximum(y1, acc)
    y1 = jnp.maximum(y1 + b1_ref[...], 0.0)                 # (M, 384): lanes = (w=12, c=32)

    # Stage into scratch with 8 zero pad rows so conv2's shifted row windows
    # stay in bounds (pad rows only ever feed scrap output rows).
    y1_scr[0:M, :] = y1
    y1_scr[M:M + 8, :] = jnp.zeros((8, 384), jnp.float32)

    # ---- conv2 (5x5, Cin=32) fused with the width half of its 2x2 pool ------
    acc_e = jnp.zeros((M, 256), jnp.float32)
    acc_o = jnp.zeros((M, 256), jnp.float32)
    for kh in range(5):                                     # row-shifted window
        slab = y1_scr[kh:kh + M, :]                         # (M, 384) static slice
        acc_e = acc_e + jnp.dot(slab, w2e_ref[kh], preferred_element_type=jnp.float32)
        acc_o = acc_o + jnp.dot(slab, w2o_ref[kh], preferred_element_type=jnp.float32)
    y2 = jnp.maximum(jnp.maximum(acc_e, acc_o) + b2_ref[...], 0.0)
    # (M, 256): row (b*12 + oh2) is valid for oh2 < 8; lanes = (pooled ow=4, c=64).
    # The cheap 8->4 row max-pool + flatten happens in the XLA wrapper.
    o_ref[...] = y2


def conv_features(xw0, xw1, xw2, p, b_tile):
    rows = xw0.shape[0]                    # n_pad * 12
    bm = b_tile * 12
    return pl.pallas_call(
        _fused_conv_kernel,
        out_shape=jax.ShapeDtypeStruct((rows, 256), jnp.float32),
        grid_spec=pltpu.PrefetchScalarGridSpec(
            num_scalar_prefetch=0,
            grid=(rows // bm,),
            in_specs=[
                pl.BlockSpec((bm, 56), lambda i: (i, 0)),
                pl.BlockSpec((bm, 56), lambda i: (i, 0)),
                pl.BlockSpec((bm, 56), lambda i: (i, 0)),
                pl.BlockSpec((12, 56, 384), lambda i: (0, 0, 0)),   # conv1 bands (resident)
                pl.BlockSpec((1, 384), lambda i: (0, 0)),
                pl.BlockSpec((5, 384, 256), lambda i: (0, 0, 0)),   # conv2 even bands
                pl.BlockSpec((5, 384, 256), lambda i: (0, 0, 0)),   # conv2 odd bands
                pl.BlockSpec((1, 256), lambda i: (0, 0)),
            ],
            out_specs=pl.BlockSpec((bm, 256), lambda i: (i, 0)),
            scratch_shapes=[pltpu.VMEM((bm + 8, 384), jnp.float32)],
        ),
        compiler_params=pltpu.CompilerParams(
            dimension_semantics=("parallel",),
            vmem_limit_bytes=64 * 1024 * 1024),
    )(xw0, xw1, xw2, p["w1b"], p["b1t"], p["w2e"], p["w2o"], p["b2t"])


# ----------------------------------------------------------------------------
# fc1 -> relu -> (dropout: identity in eval) -> fc2, row-tiled over batch
# ----------------------------------------------------------------------------
def _mlp_kernel(x_ref, w1_ref, b1_ref, w2_ref, b2_ref, o_ref):
    h = jnp.dot(x_ref[...], w1_ref[...], preferred_element_type=jnp.float32)
    h = jnp.maximum(h + b1_ref[...], 0.0)
    # TODO(synk): nn.Dropout(p=0.5) is identity in eval mode; add
    # pltpu.prng_random_bits masking here if train-mode dropout is needed.
    o_ref[...] = jnp.dot(h, w2_ref[...],
                         preferred_element_type=jnp.float32) + b2_ref[...]


def mlp(x, w1, b1, w2, b2, tm):
    n, d = x.shape
    h = w1.shape[1]
    o = w2.shape[1]
    return pl.pallas_call(
        _mlp_kernel,
        out_shape=jax.ShapeDtypeStruct((n, o), jnp.float32),
        grid_spec=pltpu.PrefetchScalarGridSpec(
            num_scalar_prefetch=0,
            grid=(n // tm,),
            in_specs=[
                pl.BlockSpec((tm, d), lambda i: (i, 0)),
                pl.BlockSpec((d, h), lambda i: (0, 0)),     # weights stay resident
                pl.BlockSpec((1, h), lambda i: (0, 0)),
                pl.BlockSpec((h, o), lambda i: (0, 0)),
                pl.BlockSpec((1, o), lambda i: (0, 0)),
            ],
            out_specs=pl.BlockSpec((tm, o), lambda i: (i, 0)),
        ),
        compiler_params=pltpu.CompilerParams(
            dimension_semantics=("parallel",),
            vmem_limit_bytes=64 * 1024 * 1024),
    )(x, w1, b1, w2, b2)


# ----------------------------------------------------------------------------
# One-time host-side parameter prep (outside jit)
# ----------------------------------------------------------------------------
def prepare_params(params):
    """Banded conv weights, tiled biases, pre-transposed / permuted FC weights."""
    w1 = np.asarray(params["conv1_w"], np.float32)     # (5,5,1,32)  HWIO
    w2 = np.asarray(params["conv2_w"], np.float32)     # (5,5,32,64) HWIO

    # conv1 bands: one (56, 384) matrix per (row-pair window j, row parity ph,
    # col parity pw).  Input lanes = (row-in-pair rl, width w); output lanes =
    # (pooled ow owp, channel c).
    w1b = np.zeros((12, 56, 384), np.float32)
    for ph in range(2):
        for pw in range(2):
            for kh in range(5):
                j, rl = divmod(kh + ph, 2)              # 2*j + rl = kh + ph
                for kw in range(5):
                    for owp in range(12):
                        w = 2 * owp + pw + kw           # always < 28
                        w1b[4 * j + 2 * ph + pw, rl * 28 + w,
                            owp * 32:(owp + 1) * 32] = w1[kh, kw, 0]

    # conv2 bands: (kh, input_w(12)*Cin(32)=384, pooled_ow(4)*Cout(64)=256),
    # separate matrices for even / odd output columns (width pool parity).
    w2e = np.zeros((5, 384, 256), np.float32)
    w2o = np.zeros((5, 384, 256), np.float32)
    for kh in range(5):
        for kw in range(5):
            for owp in range(4):
                r_e = 2 * owp + kw
                r_o = 2 * owp + 1 + kw
                w2e[kh, r_e * 32:(r_e + 1) * 32, owp * 64:(owp + 1) * 64] = w2[kh, kw]
                w2o[kh, r_o * 32:(r_o + 1) * 32, owp * 64:(owp + 1) * 64] = w2[kh, kw]

    b1t = np.tile(np.asarray(params["conv1_b"], np.float32), 12)[None, :]   # (1,384)
    b2t = np.tile(np.asarray(params["conv2_b"], np.float32), 4)[None, :]    # (1,256)

    # fc1 columns are in torch NCHW-flatten order; the kernel emits the NHWC
    # flatten, so permute fc1's input axis once here (and pre-transpose).
    perm = np.transpose(np.arange(1024).reshape(64, 4, 4), (1, 2, 0)).reshape(-1)
    fc1_w = np.asarray(params["fc1_w"], np.float32).T[perm]                 # (1024,1024)
    fc1_b = np.asarray(params["fc1_b"], np.float32)[None, :]
    # fc2 padded to 128 lane-dense output columns (extra columns are zeros).
    fc2_w = np.zeros((1024, 128), np.float32)
    fc2_w[:, :10] = np.asarray(params["fc2_w"], np.float32).T
    fc2_b = np.zeros((1, 128), np.float32)
    fc2_b[0, :10] = np.asarray(params["fc2_b"], np.float32)

    arrays = dict(w1b=w1b, b1t=b1t, w2e=w2e, w2o=w2o, b2t=b2t,
                  fc1_w=fc1_w, fc1_b=fc1_b, fc2_w=fc2_w, fc2_b=fc2_b)
    return {k: jnp.asarray(v) for k, v in arrays.items()}


def _conv_batch_tile(n_pad):
    # Single block for small batches; otherwise 8 (n_pad is a multiple of 8).
    return n_pad if n_pad <= 8 else 8


def _mlp_batch_tile(n_pad):
    if n_pad <= 128:
        return n_pad
    for t in (128, 64, 32, 16, 8):
        if n_pad % t == 0:
            return t
    return 8


@jax.jit
def cnn_forward(x_nchw, p):
    n = x_nchw.shape[0]
    x = x_nchw.reshape(n, 28, 28)                    # Cin == 1: drop channel dim
    n_pad = n if (n % 8 == 0 or n <= 8) else ((n + 7) // 8) * 8
    if n_pad != n:
        x = jnp.pad(x, ((0, n_pad - n), (0, 0), (0, 0)))

    # Pair image rows (free reshape) and take three 12-row windows (cheap XLA
    # slices) so every conv1 slab inside the kernel is a plain 2-D block.
    xp = x.reshape(n_pad, 14, 56)
    xw0 = xp[:, 0:12, :].reshape(n_pad * 12, 56)
    xw1 = xp[:, 1:13, :].reshape(n_pad * 12, 56)
    xw2 = xp[:, 2:14, :].reshape(n_pad * 12, 56)

    conv_out = conv_features(xw0, xw1, xw2, p, _conv_batch_tile(n_pad))   # (n*12, 256)

    # Drop scrap rows, finish the conv2 2x2 pool (row half) and flatten (NHWC).
    y = conv_out.reshape(n_pad, 12, 256)[:, :8, :]
    y = y.reshape(n_pad, 4, 2, 256).max(axis=2)                          # (n, 4, 256)
    feat = y.reshape(n_pad, 1024)

    out = mlp(feat, p["fc1_w"], p["fc1_b"], p["fc2_w"], p["fc2_b"],
              tm=_mlp_batch_tile(n_pad))
    return out[:n, :10]


# ----------------------------------------------------------------------------
# Pure-JAX reference mirroring the PyTorch forward (eval mode)
# ----------------------------------------------------------------------------
def cnn_reference(x_nchw, params):
    hi = jax.lax.Precision.HIGHEST
    x = jnp.transpose(x_nchw, (0, 2, 3, 1))

    def conv_block(x, w, b):
        y = jax.lax.conv_general_dilated(
            x, w, (1, 1), "VALID",
            dimension_numbers=("NHWC", "HWIO", "NHWC"), precision=hi) + b
        y = jax.nn.relu(y)
        n, h, wd, c = y.shape
        return y.reshape(n, h // 2, 2, wd // 2, 2, c).max(axis=(2, 4))

    y = conv_block(x, params["conv1_w"], params["conv1_b"])
    y = conv_block(y, params["conv2_w"], params["conv2_b"])
    feat = jnp.transpose(y, (0, 3, 1, 2)).reshape(x.shape[0], -1)   # torch NCHW flatten
    h = jax.nn.relu(jnp.dot(feat, params["fc1_w"].T, precision=hi)
                    + params["fc1_b"])
    return jnp.dot(h, params["fc2_w"].T, precision=hi) + params["fc2_b"]


if __name__ == "__main__":
    key = jax.random.PRNGKey(0)
    ks = jax.random.split(key, 9)
    # MNIST-shaped input: the .view(-1, 1024) in the module forces 1x28x28.
    x = jax.random.normal(ks[0], (2, 1, 28, 28), jnp.float32)
    params = {
        # conv weights kept in HWIO (kernel layout); fc weights in torch (out,in).
        "conv1_w": 0.10 * jax.random.normal(ks[1], (5, 5, 1, 32), jnp.float32),
        "conv1_b": 0.10 * jax.random.normal(ks[2], (32,), jnp.float32),
        "conv2_w": 0.05 * jax.random.normal(ks[3], (5, 5, 32, 64), jnp.float32),
        "conv2_b": 0.05 * jax.random.normal(ks[4], (64,), jnp.float32),
        "fc1_w": 0.03 * jax.random.normal(ks[5], (1024, 1024), jnp.float32),
        "fc1_b": 0.03 * jax.random.normal(ks[6], (1024,), jnp.float32),
        "fc2_w": 0.03 * jax.random.normal(ks[7], (10, 1024), jnp.float32),
        "fc2_b": 0.03 * jax.random.normal(ks[8], (10,), jnp.float32),
    }

    prepped = prepare_params(params)          # one-time host-side prep (outside jit)
    out = cnn_forward(x, prepped)
    jax.block_until_ready(out)
    assert out.shape == (2, 10) and out.dtype == jnp.float32

    ref = cnn_reference(x, params)
    assert jnp.allclose(out, ref, rtol=1e-2, atol=1e-2), (
        f"max abs err {jnp.max(jnp.abs(out - ref))}")
    print("KERNEL_OK")
</pallas_src>

<mosaic_0001>
module attributes {stable_mosaic.version = 11 : i64} {
  func.func @_fused_conv_kernel(%arg0: i32, %arg1: memref<24x56xf32, #tpu.memory_space<vmem>>, %arg2: memref<24x56xf32, #tpu.memory_space<vmem>>, %arg3: memref<24x56xf32, #tpu.memory_space<vmem>>, %arg4: memref<12x56x384xf32, #tpu.memory_space<vmem>>, %arg5: memref<1x384xf32, #tpu.memory_space<vmem>>, %arg6: memref<5x384x256xf32, #tpu.memory_space<vmem>>, %arg7: memref<5x384x256xf32, #tpu.memory_space<vmem>>, %arg8: memref<1x256xf32, #tpu.memory_space<vmem>>, %arg9: memref<24x256xf32, #tpu.memory_space<vmem>>, %arg10: memref<32x384xf32, #tpu.memory_space<vmem>>) attributes {dimension_semantics = [#tpu.dimension_semantics<parallel>], iteration_bounds = array<i64: 1>, scalar_prefetch = 0 : i64, scratch_operands = 1 : i64, tpu.core_type = #tpu.core_type<tc>, window_params = [{transform_indices = @transform_0, window_bounds = array<i64: 24, 56>}, {transform_indices = @transform_1, window_bounds = array<i64: 24, 56>}, {transform_indices = @transform_2, window_bounds = array<i64: 24, 56>}, {pipeline_mode = #tpu.pipeline_mode<synchronous>, transform_indices = @transform_3, window_bounds = array<i64: 12, 56, 384>}, {pipeline_mode = #tpu.pipeline_mode<synchronous>, transform_indices = @transform_4, window_bounds = array<i64: 1, 384>}, {pipeline_mode = #tpu.pipeline_mode<synchronous>, transform_indices = @transform_5, window_bounds = array<i64: 5, 384, 256>}, {pipeline_mode = #tpu.pipeline_mode<synchronous>, transform_indices = @transform_6, window_bounds = array<i64: 5, 384, 256>}, {pipeline_mode = #tpu.pipeline_mode<synchronous>, transform_indices = @transform_7, window_bounds = array<i64: 1, 256>}, {transform_indices = @transform_8, window_bounds = array<i64: 24, 256>}]} {
    %c0 = arith.constant 0 : index
    %c0_0 = arith.constant 0 : index
    %0 = vector.load %arg1[%c0, %c0_0] : memref<24x56xf32, #tpu.memory_space<vmem>>, vector<24x56xf32>
    %c0_1 = arith.constant 0 : index
    %c0_2 = arith.constant 0 : index
    %1 = vector.load %arg2[%c0_1, %c0_2] : memref<24x56xf32, #tpu.memory_space<vmem>>, vector<24x56xf32>
    %c0_3 = arith.constant 0 : index
    %c0_4 = arith.constant 0 : index
    %2 = vector.load %arg3[%c0_3, %c0_4] : memref<24x56xf32, #tpu.memory_space<vmem>>, vector<24x56xf32>
    %cst = arith.constant 0.000000e+00 : f32
    %3 = vector.broadcast %cst : f32 to vector<24x384xf32>
    %c0_5 = arith.constant 0 : index
    %c0_6 = arith.constant 0 : index
    %c0_7 = arith.constant 0 : index
    %4 = vector.load %arg4[%c0_5, %c0_6, %c0_7] : memref<12x56x384xf32, #tpu.memory_space<vmem>>, vector<1x56x384xf32>
    %5 = vector.shape_cast %4 : vector<1x56x384xf32> to vector<56x384xf32>
    %cst_8 = arith.constant dense<0.000000e+00> : vector<24x384xf32>
    %6 = tpu.matmul %0, %5, %cst_8 {dimension_numbers = #tpu.dot_dimension_numbers<[1], [0], [0], [1], [0, 0, 1, 1], [], []>} : vector<24x56xf32>, vector<56x384xf32>, vector<24x384xf32> -> vector<24x384xf32>
    %7 = arith.addf %3, %6 : vector<24x384xf32>
    %c4 = arith.constant 4 : index
    %c0_9 = arith.constant 0 : index
    %c0_10 = arith.constant 0 : index
    %8 = vector.load %arg4[%c4, %c0_9, %c0_10] : memref<12x56x384xf32, #tpu.memory_space<vmem>>, vector<1x56x384xf32>
    %9 = vector.shape_cast %8 : vector<1x56x384xf32> to vector<56x384xf32>
    %cst_11 = arith.constant dense<0.000000e+00> : vector<24x384xf32>
    %10 = tpu.matmul %1, %9, %cst_11 {dimension_numbers = #tpu.dot_dimension_numbers<[1], [0], [0], [1], [0, 0, 1, 1], [], []>} : vector<24x56xf32>, vector<56x384xf32>, vector<24x384xf32> -> vector<24x384xf32>
    %11 = arith.addf %7, %10 : vector<24x384xf32>
    %c8 = arith.constant 8 : index
    %c0_12 = arith.constant 0 : index
    %c0_13 = arith.constant 0 : index
    %12 = vector.load %arg4[%c8, %c0_12, %c0_13] : memref<12x56x384xf32, #tpu.memory_space<vmem>>, vector<1x56x384xf32>
    %13 = vector.shape_cast %12 : vector<1x56x384xf32> to vector<56x384xf32>
    %cst_14 = arith.constant dense<0.000000e+00> : vector<24x384xf32>
    %14 = tpu.matmul %2, %13, %cst_14 {dimension_numbers = #tpu.dot_dimension_numbers<[1], [0], [0], [1], [0, 0, 1, 1], [], []>} : vector<24x56xf32>, vector<56x384xf32>, vector<24x384xf32> -> vector<24x384xf32>
    %15 = arith.addf %11, %14 : vector<24x384xf32>
    %cst_15 = arith.constant 0.000000e+00 : f32
    %16 = vector.broadcast %cst_15 : f32 to vector<24x384xf32>
    %c1 = arith.constant 1 : index
    %c0_16 = arith.constant 0 : index
    %c0_17 = arith.constant 0 : index
    %17 = vector.load %arg4[%c1, %c0_16, %c0_17] : memref<12x56x384xf32, #tpu.memory_space<vmem>>, vector<1x56x384xf32>
    %18 = vector.shape_cast %17 : vector<1x56x384xf32> to vector<56x384xf32>
    %cst_18 = arith.constant dense<0.000000e+00> : vector<24x384xf32>
    %19 = tpu.matmul %0, %18, %cst_18 {dimension_numbers = #tpu.dot_dimension_numbers<[1], [0], [0], [1], [0, 0, 1, 1], [], []>} : vector<24x56xf32>, vector<56x384xf32>, vector<24x384xf32> -> vector<24x384xf32>
    %20 = arith.addf %16, %19 : vector<24x384xf32>
    %c5 = arith.constant 5 : index
    %c0_19 = arith.constant 0 : index
    %c0_20 = arith.constant 0 : index
    %21 = vector.load %arg4[%c5, %c0_19, %c0_20] : memref<12x56x384xf32, #tpu.memory_space<vmem>>, vector<1x56x384xf32>
    %22 = vector.shape_cast %21 : vector<1x56x384xf32> to vector<56x384xf32>
    %cst_21 = arith.constant dense<0.000000e+00> : vector<24x384xf32>
    %23 = tpu.matmul %1, %22, %cst_21 {dimension_numbers = #tpu.dot_dimension_numbers<[1], [0], [0], [1], [0, 0, 1, 1], [], []>} : vector<24x56xf32>, vector<56x384xf32>, vector<24x384xf32> -> vector<24x384xf32>
    %24 = arith.addf %20, %23 : vector<24x384xf32>
    %c9 = arith.constant 9 : index
    %c0_22 = arith.constant 0 : index
    %c0_23 = arith.constant 0 : index
    %25 = vector.load %arg4[%c9, %c0_22, %c0_23] : memref<12x56x384xf32, #tpu.memory_space<vmem>>, vector<1x56x384xf32>
    %26 = vector.shape_cast %25 : vector<1x56x384xf32> to vector<56x384xf32>
    %cst_24 = arith.constant dense<0.000000e+00> : vector<24x384xf32>
    %27 = tpu.matmul %2, %26, %cst_24 {dimension_numbers = #tpu.dot_dimension_numbers<[1], [0], [0], [1], [0, 0, 1, 1], [], []>} : vector<24x56xf32>, vector<56x384xf32>, vector<24x384xf32> -> vector<24x384xf32>
    %28 = arith.addf %24, %27 : vector<24x384xf32>
    %29 = arith.maximumf %15, %28 : vector<24x384xf32>
    %cst_25 = arith.constant 0.000000e+00 : f32
    %30 = vector.broadcast %cst_25 : f32 to vector<24x384xf32>
    %c2 = arith.constant 2 : index
    %c0_26 = arith.constant 0 : index
    %c0_27 = arith.constant 0 : index
    %31 = vector.load %arg4[%c2, %c0_26, %c0_27] : memref<12x56x384xf32, #tpu.memory_space<vmem>>, vector<1x56x384xf32>
    %32 = vector.shape_cast %31 : vector<1x56x384xf32> to vector<56x384xf32>
    %cst_28 = arith.constant dense<0.000000e+00> : vector<24x384xf32>
    %33 = tpu.matmul %0, %32, %cst_28 {dimension_numbers = #tpu.dot_dimension_numbers<[1], [0], [0], [1], [0, 0, 1, 1], [], []>} : vector<24x56xf32>, vector<56x384xf32>, vector<24x384xf32> -> vector<24x384xf32>
    %34 = arith.addf %30, %33 : vector<24x384xf32>
    %c6 = arith.constant 6 : index
    %c0_29 = arith.constant 0 : index
    %c0_30 = arith.constant 0 : index
    %35 = vector.load %arg4[%c6, %c0_29, %c0_30] : memref<12x56x384xf32, #tpu.memory_space<vmem>>, vector<1x56x384xf32>
    %36 = vector.shape_cast %35 : vector<1x56x384xf32> to vector<56x384xf32>
    %cst_31 = arith.constant dense<0.000000e+00> : vector<24x384xf32>
    %37 = tpu.matmul %1, %36, %cst_31 {dimension_numbers = #tpu.dot_dimension_numbers<[1], [0], [0], [1], [0, 0, 1, 1], [], []>} : vector<24x56xf32>, vector<56x384xf32>, vector<24x384xf32> -> vector<24x384xf32>
    %38 = arith.addf %34, %37 : vector<24x384xf32>
    %c10 = arith.constant 10 : index
    %c0_32 = arith.constant 0 : index
    %c0_33 = arith.constant 0 : index
    %39 = vector.load %arg4[%c10, %c0_32, %c0_33] : memref<12x56x384xf32, #tpu.memory_space<vmem>>, vector<1x56x384xf32>
    %40 = vector.shape_cast %39 : vector<1x56x384xf32> to vector<56x384xf32>
    %cst_34 = arith.constant dense<0.000000e+00> : vector<24x384xf32>
    %41 = tpu.matmul %2, %40, %cst_34 {dimension_numbers = #tpu.dot_dimension_numbers<[1], [0], [0], [1], [0, 0, 1, 1], [], []>} : vector<24x56xf32>, vector<56x384xf32>, vector<24x384xf32> -> vector<24x384xf32>
    %42 = arith.addf %38, %41 : vector<24x384xf32>
    %43 = arith.maximumf %29, %42 : vector<24x384xf32>
    %cst_35 = arith.constant 0.000000e+00 : f32
    %44 = vector.broadcast %cst_35 : f32 to vector<24x384xf32>
    %c3 = arith.constant 3 : index
    %c0_36 = arith.constant 0 : index
    %c0_37 = arith.constant 0 : index
    %45 = vector.load %arg4[%c3, %c0_36, %c0_37] : memref<12x56x384xf32, #tpu.memory_space<vmem>>, vector<1x56x384xf32>
    %46 = vector.shape_cast %45 : vector<1x56x384xf32> to vector<56x384xf32>
    %cst_38 = arith.constant dense<0.000000e+00> : vector<24x384xf32>
    %47 = tpu.matmul %0, %46, %cst_38 {dimension_numbers = #tpu.dot_dimension_numbers<[1], [0], [0], [1], [0, 0, 1, 1], [], []>} : vector<24x56xf32>, vector<56x384xf32>, vector<24x384xf32> -> vector<24x384xf32>
    %48 = arith.addf %44, %47 : vector<24x384xf32>
    %c7 = arith.constant 7 : index
    %c0_39 = arith.constant 0 : index
    %c0_40 = arith.constant 0 : index
    %49 = vector.load %arg4[%c7, %c0_39, %c0_40] : memref<12x56x384xf32, #tpu.memory_space<vmem>>, vector<1x56x384xf32>
    %50 = vector.shape_cast %49 : vector<1x56x384xf32> to vector<56x384xf32>
    %cst_41 = arith.constant dense<0.000000e+00> : vector<24x384xf32>
    %51 = tpu.matmul %1, %50, %cst_41 {dimension_numbers = #tpu.dot_dimension_numbers<[1], [0], [0], [1], [0, 0, 1, 1], [], []>} : vector<24x56xf32>, vector<56x384xf32>, vector<24x384xf32> -> vector<24x384xf32>
    %52 = arith.addf %48, %51 : vector<24x384xf32>
    %c11 = arith.constant 11 : index
    %c0_42 = arith.constant 0 : index
    %c0_43 = arith.constant 0 : index
    %53 = vector.load %arg4[%c11, %c0_42, %c0_43] : memref<12x56x384xf32, #tpu.memory_space<vmem>>, vector<1x56x384xf32>
    %54 = vector.shape_cast %53 : vector<1x56x384xf32> to vector<56x384xf32>
    %cst_44 = arith.constant dense<0.000000e+00> : vector<24x384xf32>
    %55 = tpu.matmul %2, %54, %cst_44 {dimension_numbers = #tpu.dot_dimension_numbers<[1], [0], [0], [1], [0, 0, 1, 1], [], []>} : vector<24x56xf32>, vector<56x384xf32>, vector<24x384xf32> -> vector<24x384xf32>
    %56 = arith.addf %52, %55 : vector<24x384xf32>
    %57 = arith.maximumf %43, %56 : vector<24x384xf32>
    %c0_45 = arith.constant 0 : index
    %c0_46 = arith.constant 0 : index
    %58 = vector.load %arg5[%c0_45, %c0_46] : memref<1x384xf32, #tpu.memory_space<vmem>>, vector<1x384xf32>
    %59 = vector.broadcast %58 : vector<1x384xf32> to vector<24x384xf32>
    %60 = arith.addf %57, %59 : vector<24x384xf32>
    %cst_47 = arith.constant 0.000000e+00 : f32
    %61 = vector.broadcast %cst_47 : f32 to vector<24x384xf32>
    %62 = arith.maximumf %60, %61 : vector<24x384xf32>
    %c0_48 = arith.constant 0 : index
    %c0_49 = arith.constant 0 : index
    %63 = vector.load %arg10[%c0_48, %c0_49] : memref<32x384xf32, #tpu.memory_space<vmem>>, vector<24x384xf32>
    tpu.vector_store %arg10[%c0_48, %c0_49], %62 {strides = array<i32>} : memref<32x384xf32, #tpu.memory_space<vmem>>, vector<24x384xf32>,
    %cst_50 = arith.constant 0.000000e+00 : f32
    %64 = vector.broadcast %cst_50 : f32 to vector<8x384xf32>
    %c24 = arith.constant 24 : index
    %c0_51 = arith.constant 0 : index
    %65 = vector.load %arg10[%c24, %c0_51] : memref<32x384xf32, #tpu.memory_space<vmem>>, vector<8x384xf32>
    tpu.vector_store %arg10[%c24, %c0_51], %64 {strides = array<i32>} : memref<32x384xf32, #tpu.memory_space<vmem>>, vector<8x384xf32>,
    %cst_52 = arith.constant 0.000000e+00 : f32
    %66 = vector.broadcast %cst_52 : f32 to vector<24x256xf32>
    %cst_53 = arith.constant 0.000000e+00 : f32
    %67 = vector.broadcast %cst_53 : f32 to vector<24x256xf32>
    %c0_54 = arith.constant 0 : index
    %c0_55 = arith.constant 0 : index
    %68 = vector.load %arg10[%c0_54, %c0_55] : memref<32x384xf32, #tpu.memory_space<vmem>>, vector<24x384xf32>
    %c0_56 = arith.constant 0 : index
    %c0_57 = arith.constant 0 : index
    %c0_58 = arith.constant 0 : index
    %69 = vector.load %arg6[%c0_56, %c0_57, %c0_58] : memref<5x384x256xf32, #tpu.memory_space<vmem>>, vector<1x384x256xf32>
    %70 = vector.shape_cast %69 : vector<1x384x256xf32> to vector<384x256xf32>
    %cst_59 = arith.constant dense<0.000000e+00> : vector<24x256xf32>
    %71 = tpu.matmul %68, %70, %cst_59 {dimension_numbers = #tpu.dot_dimension_numbers<[1], [0], [0], [1], [0, 0, 1, 1], [], []>} : vector<24x384xf32>, vector<384x256xf32>, vector<24x256xf32> -> vector<24x256xf32>
    %72 = arith.addf %66, %71 : vector<24x256xf32>
    %c0_60 = arith.constant 0 : index
    %c0_61 = arith.constant 0 : index
    %c0_62 = arith.constant 0 : index
    %73 = vector.load %arg7[%c0_60, %c0_61, %c0_62] : memref<5x384x256xf32, #tpu.memory_space<vmem>>, vector<1x384x256xf32>
    %74 = vector.shape_cast %73 : vector<1x384x256xf32> to vector<384x256xf32>
    %cst_63 = arith.constant dense<0.000000e+00> : vector<24x256xf32>
    %75 = tpu.matmul %68, %74, %cst_63 {dimension_numbers = #tpu.dot_dimension_numbers<[1], [0], [0], [1], [0, 0, 1, 1], [], []>} : vector<24x384xf32>, vector<384x256xf32>, vector<24x256xf32> -> vector<24x256xf32>
    %76 = arith.addf %67, %75 : vector<24x256xf32>
    %c1_64 = arith.constant 1 : index
    %c0_65 = arith.constant 0 : index
    %77 = vector.load %arg10[%c1_64, %c0_65] : memref<32x384xf32, #tpu.memory_space<vmem>>, vector<24x384xf32>
    %c1_66 = arith.constant 1 : index
    %c0_67 = arith.constant 0 : index
    %c0_68 = arith.constant 0 : index
    %78 = vector.load %arg6[%c1_66, %c0_67, %c0_68] : memref<5x384x256xf32, #tpu.memory_space<vmem>>, vector<1x384x256xf32>
    %79 = vector.shape_cast %78 : vector<1x384x256xf32> to vector<384x256xf32>
    %cst_69 = arith.constant dense<0.000000e+00> : vector<24x256xf32>
    %80 = tpu.matmul %77, %79, %cst_69 {dimension_numbers = #tpu.dot_dimension_numbers<[1], [0], [0], [1], [0, 0, 1, 1], [], []>} : vector<24x384xf32>, vector<384x256xf32>, vector<24x256xf32> -> vector<24x256xf32>
    %81 = arith.addf %72, %80 : vector<24x256xf32>
    %c1_70 = arith.constant 1 : index
    %c0_71 = arith.constant 0 : index
    %c0_72 = arith.constant 0 : index
    %82 = vector.load %arg7[%c1_70, %c0_71, %c0_72] : memref<5x384x256xf32, #tpu.memory_space<vmem>>, vector<1x384x256xf32>
    %83 = vector.shape_cast %82 : vector<1x384x256xf32> to vector<384x256xf32>
    %cst_73 = arith.constant dense<0.000000e+00> : vector<24x256xf32>
    %84 = tpu.matmul %77, %83, %cst_73 {dimension_numbers = #tpu.dot_dimension_numbers<[1], [0], [0], [1], [0, 0, 1, 1], [], []>} : vector<24x384xf32>, vector<384x256xf32>, vector<24x256xf32> -> vector<24x256xf32>
    %85 = arith.addf %76, %84 : vector<24x256xf32>
    %c2_74 = arith.constant 2 : index
    %c0_75 = arith.constant 0 : index
    %86 = vector.load %arg10[%c2_74, %c0_75] : memref<32x384xf32, #tpu.memory_space<vmem>>, vector<24x384xf32>
    %c2_76 = arith.constant 2 : index
    %c0_77 = arith.constant 0 : index
    %c0_78 = arith.constant 0 : index
    %87 = vector.load %arg6[%c2_76, %c0_77, %c0_78] : memref<5x384x256xf32, #tpu.memory_space<vmem>>, vector<1x384x256xf32>
    %88 = vector.shape_cast %87 : vector<1x384x256xf32> to vector<384x256xf32>
    %cst_79 = arith.constant dense<0.000000e+00> : vector<24x256xf32>
    %89 = tpu.matmul %86, %88, %cst_79 {dimension_numbers = #tpu.dot_dimension_numbers<[1], [0], [0], [1], [0, 0, 1, 1], [], []>} : vector<24x384xf32>, vector<384x256xf32>, vector<24x256xf32> -> vector<24x256xf32>
    %90 = arith.addf %81, %89 : vector<24x256xf32>
    %c2_80 = arith.constant 2 : index
    %c0_81 = arith.constant 0 : index
    %c0_82 = arith.constant 0 : index
    %91 = vector.load %arg7[%c2_80, %c0_81, %c0_82] : memref<5x384x256xf32, #tpu.memory_space<vmem>>, vector<1x384x256xf32>
    %92 = vector.shape_cast %91 : vector<1x384x256xf32> to vector<384x256xf32>
    %cst_83 = arith.constant dense<0.000000e+00> : vector<24x256xf32>
    %93 = tpu.matmul %86, %92, %cst_83 {dimension_numbers = #tpu.dot_dimension_numbers<[1], [0], [0], [1], [0, 0, 1, 1], [], []>} : vector<24x384xf32>, vector<384x256xf32>, vector<24x256xf32> -> vector<24x256xf32>
    %94 = arith.addf %85, %93 : vector<24x256xf32>
    %c3_84 = arith.constant 3 : index
    %c0_85 = arith.constant 0 : index
    %95 = vector.load %arg10[%c3_84, %c0_85] : memref<32x384xf32, #tpu.memory_space<vmem>>, vector<24x384xf32>
    %c3_86 = arith.constant 3 : index
    %c0_87 = arith.constant 0 : index
    %c0_88 = arith.constant 0 : index
    %96 = vector.load %arg6[%c3_86, %c0_87, %c0_88] : memref<5x384x256xf32, #tpu.memory_space<vmem>>, vector<1x384x256xf32>
    %97 = vector.shape_cast %96 : vector<1x384x256xf32> to vector<384x256xf32>
    %cst_89 = arith.constant dense<0.000000e+00> : vector<24x256xf32>
    %98 = tpu.matmul %95, %97, %cst_89 {dimension_numbers = #tpu.dot_dimension_numbers<[1], [0], [0], [1], [0, 0, 1, 1], [], []>} : vector<24x384xf32>, vector<384x256xf32>, vector<24x256xf32> -> vector<24x256xf32>
    %99 = arith.addf %90, %98 : vector<24x256xf32>
    %c3_90 = arith.constant 3 : index
    %c0_91 = arith.constant 0 : index
    %c0_92 = arith.constant 0 : index
    %100 = vector.load %arg7[%c3_90, %c0_91, %c0_92] : memref<5x384x256xf32, #tpu.memory_space<vmem>>, vector<1x384x256xf32>
    %101 = vector.shape_cast %100 : vector<1x384x256xf32> to vector<384x256xf32>
    %cst_93 = arith.constant dense<0.000000e+00> : vector<24x256xf32>
    %102 = tpu.matmul %95, %101, %cst_93 {dimension_numbers = #tpu.dot_dimension_numbers<[1], [0], [0], [1], [0, 0, 1, 1], [], []>} : vector<24x384xf32>, vector<384x256xf32>, vector<24x256xf32> -> vector<24x256xf32>
    %103 = arith.addf %94, %102 : vector<24x256xf32>
    %c4_94 = arith.constant 4 : index
    %c0_95 = arith.constant 0 : index
    %104 = vector.load %arg10[%c4_94, %c0_95] : memref<32x384xf32, #tpu.memory_space<vmem>>, vector<24x384xf32>
    %c4_96 = arith.constant 4 : index
    %c0_97 = arith.constant 0 : index
    %c0_98 = arith.constant 0 : index
    %105 = vector.load %arg6[%c4_96, %c0_97, %c0_98] : memref<5x384x256xf32, #tpu.memory_space<vmem>>, vector<1x384x256xf32>
    %106 = vector.shape_cast %105 : vector<1x384x256xf32> to vector<384x256xf32>
    %cst_99 = arith.constant dense<0.000000e+00> : vector<24x256xf32>
    %107 = tpu.matmul %104, %106, %cst_99 {dimension_numbers = #tpu.dot_dimension_numbers<[1], [0], [0], [1], [0, 0, 1, 1], [], []>} : vector<24x384xf32>, vector<384x256xf32>, vector<24x256xf32> -> vector<24x256xf32>
    %108 = arith.addf %99, %107 : vector<24x256xf32>
    %c4_100 = arith.constant 4 : index
    %c0_101 = arith.constant 0 : index
    %c0_102 = arith.constant 0 : index
    %109 = vector.load %arg7[%c4_100, %c0_101, %c0_102] : memref<5x384x256xf32, #tpu.memory_space<vmem>>, vector<1x384x256xf32>
    %110 = vector.shape_cast %109 : vector<1x384x256xf32> to vector<384x256xf32>
    %cst_103 = arith.constant dense<0.000000e+00> : vector<24x256xf32>
    %111 = tpu.matmul %104, %110, %cst_103 {dimension_numbers = #tpu.dot_dimension_numbers<[1], [0], [0], [1], [0, 0, 1, 1], [], []>} : vector<24x384xf32>, vector<384x256xf32>, vector<24x256xf32> -> vector<24x256xf32>
    %112 = arith.addf %103, %111 : vector<24x256xf32>
    %113 = arith.maximumf %108, %112 : vector<24x256xf32>
    %c0_104 = arith.constant 0 : index
    %c0_105 = arith.constant 0 : index
    %114 = vector.load %arg8[%c0_104, %c0_105] : memref<1x256xf32, #tpu.memory_space<vmem>>, vector<1x256xf32>
    %115 = vector.broadcast %114 : vector<1x256xf32> to vector<24x256xf32>
    %116 = arith.addf %113, %115 : vector<24x256xf32>
    %cst_106 = arith.constant 0.000000e+00 : f32
    %117 = vector.broadcast %cst_106 : f32 to vector<24x256xf32>
    %118 = arith.maximumf %116, %117 : vector<24x256xf32>
    %c0_107 = arith.constant 0 : index
    %c0_108 = arith.constant 0 : index
    %119 = vector.load %arg9[%c0_107, %c0_108] : memref<24x256xf32, #tpu.memory_space<vmem>>, vector<24x256xf32>
    tpu.vector_store %arg9[%c0_107, %c0_108], %118 {strides = array<i32>} : memref<24x256xf32, #tpu.memory_space<vmem>>, vector<24x256xf32>,
    return
  }
  func.func @transform_0(%arg0: i32) -> (i32, i32) {
    %c0_i32 = arith.constant 0 : i32
    %c0_i32_0 = arith.constant 0 : i32
    return %arg0, %c0_i32 : i32, i32
  }
  func.func @transform_1(%arg0: i32) -> (i32, i32) {
    %c0_i32 = arith.constant 0 : i32
    %c0_i32_0 = arith.constant 0 : i32
    return %arg0, %c0_i32 : i32, i32
  }
  func.func @transform_2(%arg0: i32) -> (i32, i32) {
    %c0_i32 = arith.constant 0 : i32
    %c0_i32_0 = arith.constant 0 : i32
    return %arg0, %c0_i32 : i32, i32
  }
  func.func @transform_3(%arg0: i32) -> (i32, i32, i32) {
    %c0_i32 = arith.constant 0 : i32
    %c0_i32_0 = arith.constant 0 : i32
    %c0_i32_1 = arith.constant 0 : i32
    %c0_i32_2 = arith.constant 0 : i32
    return %c0_i32, %c0_i32_0, %c0_i32_1 : i32, i32, i32
  }
  func.func @transform_4(%arg0: i32) -> (i32, i32) {
    %c0_i32 = arith.constant 0 : i32
    %c0_i32_0 = arith.constant 0 : i32
    %c0_i32_1 = arith.constant 0 : i32
    return %c0_i32, %c0_i32_0 : i32, i32
  }
  func.func @transform_5(%arg0: i32) -> (i32, i32, i32) {
    %c0_i32 = arith.constant 0 : i32
    %c0_i32_0 = arith.constant 0 : i32
    %c0_i32_1 = arith.constant 0 : i32
    %c0_i32_2 = arith.constant 0 : i32
    return %c0_i32, %c0_i32_0, %c0_i32_1 : i32, i32, i32
  }
  func.func @transform_6(%arg0: i32) -> (i32, i32, i32) {
    %c0_i32 = arith.constant 0 : i32
    %c0_i32_0 = arith.constant 0 : i32
    %c0_i32_1 = arith.constant 0 : i32
    %c0_i32_2 = arith.constant 0 : i32
    return %c0_i32, %c0_i32_0, %c0_i32_1 : i32, i32, i32
  }
  func.func @transform_7(%arg0: i32) -> (i32, i32) {
    %c0_i32 = arith.constant 0 : i32
    %c0_i32_0 = arith.constant 0 : i32
    %c0_i32_1 = arith.constant 0 : i32
    return %c0_i32, %c0_i32_0 : i32, i32
  }
  func.func @transform_8(%arg0: i32) -> (i32, i32) {
    %c0_i32 = arith.constant 0 : i32
    %c0_i32_0 = arith.constant 0 : i32
    return %arg0, %c0_i32 : i32, i32
  }
}

module attributes {stable_mosaic.version = 11 : i64} {
  func.func @_mlp_kernel(%arg0: i32, %arg1: memref<2x1024xf32, #tpu.memory_space<vmem>>, %arg2: memref<1024x1024xf32, #tpu.memory_space<vmem>>, %arg3: memref<1x1024xf32, #tpu.memory_space<vmem>>, %arg4: memref<1024x128xf32, #tpu.memory_space<vmem>>, %arg5: memref<1x128xf32, #tpu.memory_space<vmem>>, %arg6: memref<2x128xf32, #tpu.memory_space<vmem>>) attributes {dimension_semantics = [#tpu.dimension_semantics<parallel>], iteration_bounds = array<i64: 1>, scalar_prefetch = 0 : i64, scratch_operands = 0 : i64, tpu.core_type = #tpu.core_type<tc>, window_params = [{transform_indices = @transform_0, window_bounds = array<i64: 2, 1024>}, {pipeline_mode = #tpu.pipeline_mode<synchronous>, transform_indices = @transform_1, window_bounds = array<i64: 1024, 1024>}, {pipeline_mode = #tpu.pipeline_mode<synchronous>, transform_indices = @transform_2, window_bounds = array<i64: 1, 1024>}, {pipeline_mode = #tpu.pipeline_mode<synchronous>, transform_indices = @transform_3, window_bounds = array<i64: 1024, 128>}, {pipeline_mode = #tpu.pipeline_mode<synchronous>, transform_indices = @transform_4, window_bounds = array<i64: 1, 128>}, {transform_indices = @transform_5, window_bounds = array<i64: 2, 128>}]} {
    %c0 = arith.constant 0 : index
    %c0_0 = arith.constant 0 : index
    %0 = vector.load %arg1[%c0, %c0_0] : memref<2x1024xf32, #tpu.memory_space<vmem>>, vector<2x1024xf32>
    %c0_1 = arith.constant 0 : index
    %c0_2 = arith.constant 0 : index
    %1 = vector.load %arg2[%c0_1, %c0_2] : memref<1024x1024xf32, #tpu.memory_space<vmem>>, vector<1024x1024xf32>
    %cst = arith.constant dense<0.000000e+00> : vector<2x1024xf32>
    %2 = tpu.matmul %0, %1, %cst {dimension_numbers = #tpu.dot_dimension_numbers<[1], [0], [0], [1], [0, 0, 1, 1], [], []>} : vector<2x1024xf32>, vector<1024x1024xf32>, vector<2x1024xf32> -> vector<2x1024xf32>
    %c0_3 = arith.constant 0 : index
    %c0_4 = arith.constant 0 : index
    %3 = vector.load %arg3[%c0_3, %c0_4] : memref<1x1024xf32, #tpu.memory_space<vmem>>, vector<1x1024xf32>
    %4 = vector.broadcast %3 : vector<1x1024xf32> to vector<2x1024xf32>
    %5 = arith.addf %2, %4 : vector<2x1024xf32>
    %cst_5 = arith.constant 0.000000e+00 : f32
    %6 = vector.broadcast %cst_5 : f32 to vector<2x1024xf32>
    %7 = arith.maximumf %5, %6 : vector<2x1024xf32>
    %c0_6 = arith.constant 0 : index
    %c0_7 = arith.constant 0 : index
    %8 = vector.load %arg4[%c0_6, %c0_7] : memref<1024x128xf32, #tpu.memory_space<vmem>>, vector<1024x128xf32>
    %cst_8 = arith.constant dense<0.000000e+00> : vector<2x128xf32>
    %9 = tpu.matmul %7, %8, %cst_8 {dimension_numbers = #tpu.dot_dimension_numbers<[1], [0], [0], [1], [0, 0, 1, 1], [], []>} : vector<2x1024xf32>, vector<1024x128xf32>, vector<2x128xf32> -> vector<2x128xf32>
    %c0_9 = arith.constant 0 : index
    %c0_10 = arith.constant 0 : index
    %10 = vector.load %arg5[%c0_9, %c0_10] : memref<1x128xf32, #tpu.memory_space<vmem>>, vector<1x128xf32>
    %11 = vector.broadcast %10 : vector<1x128xf32> to vector<2x128xf32>
    %12 = arith.addf %9, %11 : vector<2x128xf32>
    %c0_11 = arith.constant 0 : index
    %c0_12 = arith.constant 0 : index
    %13 = vector.load %arg6[%c0_11, %c0_12] : memref<2x128xf32, #tpu.memory_space<vmem>>, vector<2x128xf32>
    tpu.vector_store %arg6[%c0_11, %c0_12], %12 {strides = array<i32>} : memref<2x128xf32, #tpu.memory_space<vmem>>, vector<2x128xf32>,
    return
  }
  func.func @transform_0(%arg0: i32) -> (i32, i32) {
    %c0_i32 = arith.constant 0 : i32
    %c0_i32_0 = arith.constant 0 : i32
    return %arg0, %c0_i32 : i32, i32
  }
  func.func @transform_1(%arg0: i32) -> (i32, i32) {
    %c0_i32 = arith.constant 0 : i32
    %c0_i32_0 = arith.constant 0 : i32
    %c0_i32_1 = arith.constant 0 : i32
    return %c0_i32, %c0_i32_0 : i32, i32
  }
  func.func @transform_2(%arg0: i32) -> (i32, i32) {
    %c0_i32 = arith.constant 0 : i32
    %c0_i32_0 = arith.constant 0 : i32
    %c0_i32_1 = arith.constant 0 : i32
    return %c0_i32, %c0_i32_0 : i32, i32
  }
  func.func @transform_3(%arg0: i32) -> (i32, i32) {
    %c0_i32 = arith.constant 0 : i32
    %c0_i32_0 = arith.constant 0 : i32
    %c0_i32_1 = arith.constant 0 : i32
    return %c0_i32, %c0_i32_0 : i32, i32
  }
  func.func @transform_4(%arg0: i32) -> (i32, i32) {
    %c0_i32 = arith.constant 0 : i32
    %c0_i32_0 = arith.constant 0 : i32
    %c0_i32_1 = arith.constant 0 : i32
    return %c0_i32, %c0_i32_0 : i32, i32
  }
  func.func @transform_5(%arg0: i32) -> (i32, i32) {
    %c0_i32 = arith.constant 0 : i32
    %c0_i32_0 = arith.constant 0 : i32
    return %arg0, %c0_i32 : i32, i32
  }
}

</mosaic_0001>

<bundles_post_ra>
// kernel: cnn_forward.3
= control target key start
LH: loop header
LB: loop body
LE: loop exit
PB: predicated region body
PF: predicated region fallthrough
CT: control target
= control target key end

     0   :  { %10 = vsyncpa [#allocation3], 0  ;;  %s3195_s0 = inlined_call_operand.vmem [shape: f32[2,1024], index: 0, kind: input, shape index: {}]   ;;  %s3196_s1 = inlined_call_operand.hbm [shape: f32[1024,1024], index: 1, kind: input, shape index: {}]   ;;  %s3197_s2 = inlined_call_operand.hbm [shape: f32[1,1024], index: 2, kind: input, shape index: {}]   ;;  %s3198_s3 = inlined_call_operand.hbm [shape: f32[1024,128], index: 3, kind: input, shape index: {}]   ;;  %s3199_s4 = inlined_call_operand.hbm [shape: f32[1,128], index: 4, kind: input, shape index: {}]   ;;  %s3200_s5 = inlined_call_operand.hbm [shape: f32[2,128], index: 5, kind: output, shape index: {}]  }
   0x1   :  { %11 = vsyncpa [#allocation6], 0 }
   0x2   :  { %12 = vsyncpa [#allocation9], 0  ;;  %s34_s20 = sshll.u32 %s3197_s2, 4  ;;  %s35_s20 = int_to_ptr.hbm [resolvable:$true] %s34_s20 }
   0x3   :  { %13 = vsyncpa [#allocation4], 0  ;;  %s2907_s21 = smov [#allocation5]   ;;  %s20_s25 = sshll.u32 %s3196_s1, 4  ;;  %s21_s25 = int_to_ptr.hbm [resolvable:$true] %s20_s25 }
   0x4   :  { %s36_s22 = sshll.u32 %s2907_s21, 4  ;;  %s2908_s26 = smov [#allocation2]   ;;  %s37_s22 = int_to_ptr.vmem [resolvable:$true] %s36_s22 }
   0x5   :  { %39 = dma.hbm_to_vmem [thread:$0]  %s35_s20, 128, %s37_s22, [#allocation6]  }
   0x6   :  { %s22_s27 = sshll.u32 %s2908_s26, 4  ;;  %s2909_s28 = smov 1024   ;;  %s23_s27 = int_to_ptr.vmem [resolvable:$true] %s22_s27 }
   0x7   :  { %s2910_s29 = smov 64   ;;  %s44_s2 = sshll.u32 %s3198_s3, 4  ;;  %s45_s2 = int_to_ptr.hbm [resolvable:$true] %s44_s2 }
   0x8   :  { %28 = dma.hbm_to_vmem [thread:$0]  %s21_s25, 131072, %s23_s27, [#allocation3], %s2909_s28, %s2909_s28, %s2910_s29  }
   0x9   :  { %s2911_s7 = smov [#allocation7]   ;;  %s58_s1 = sshll.u32 %s3199_s4, 4  ;;  %s59_s1 = int_to_ptr.hbm [resolvable:$true] %s58_s1 }
   0xa   :  { %s46_s8 = sshll.u32 %s2911_s7, 4  ;;  %s2912_s11 = smov 128   ;;  %s47_s8 = int_to_ptr.vmem [resolvable:$true] %s46_s8 }
   0xb   :  { %s2913_s12 = smov 8   ;;  %s2914_s13 = smov [#allocation8]  }
   0xc   :  { %52 = dma.hbm_to_vmem [thread:$0]  %s45_s2, 16384, %s47_s8, [#allocation6], %s2912_s11, %s2912_s11, %s2913_s12  }
   0xd   :  { %s60_s14 = sshll.u32 %s2914_s13, 4  ;;  %s61_s14 = int_to_ptr.vmem [resolvable:$true] %s60_s14 }
   0xe   :  { %63 = dma.hbm_to_vmem [thread:$0]  %s59_s1, 16, %s61_s14, [#allocation9]  }
   0xf   :  { %2899 = dma.done.wait [#allocation3], 131072  }
  0x10   :  { %2900 = vsyncadd [#allocation3], 4294836224 }
  0x11   :  { %2901 = dma.done.wait [#allocation6], 16512  }
  0x12   :  { %2902 = vsyncadd [#allocation6], 4294950784 }
  0x13   :  { %2903 = dma.done.wait [#allocation9], 16  }
  0x14   :  { %2904 = vsyncadd [#allocation9], 4294967280  ;;  %v202_v0 = vld [vmem:[#allocation2 + $0x3c0] sm:$0xff]  ;;  %s2733_s20 = sshll.u32 %s3200_s5, 4  ;;  %s2734_s20 = int_to_ptr.hbm [resolvable:$true] %s2733_s20 }
  0x15   :  { %v330_v1 = vld [vmem:[#allocation2 + $0x7c0] sm:$0xff]  ;;  %1145 = vmatpush.msra.mxu0 %v202_v0 }
  0x16   :  { %v458_v2 = vld [vmem:[#allocation2 + $0xbc0] sm:$0xff]  ;;  %1165 = vmatpush.msra.mxu1 %v330_v1 }
  0x17   :  { %v586_v3 = vld [vmem:[#allocation2 + $0xfc0] sm:$0xff]  ;;  %1185 = vmatpush.msra.mxu2 %v458_v2 }
  0x18   :  { %v194_v4 = vld [vmem:[#allocation2 + $0x380] sm:$0xff]  ;;  %1205 = vmatpush.msra.mxu3 %v586_v3 }
  0x19   :  { %v322_v5 = vld [vmem:[#allocation2 + $0x780] sm:$0xff]  ;;  %1146 = vmatpush.msra.mxu0 %v194_v4 }
  0x1a   :  { %v450_v6 = vld [vmem:[#allocation2 + $0xb80] sm:$0xff]  ;;  %1166 = vmatpush.msra.mxu1 %v322_v5 }
  0x1b   :  { %v578_v7 = vld [vmem:[#allocation2 + $0xf80] sm:$0xff]  ;;  %1186 = vmatpush.msra.mxu2 %v450_v6 }
  0x1c   :  { %v186_v8 = vld [vmem:[#allocation2 + $0x340] sm:$0xff]  ;;  %1206 = vmatpush.msra.mxu3 %v578_v7 }
  0x1d   :  { %v314_v9 = vld [vmem:[#allocation2 + $0x740] sm:$0xff]  ;;  %1147 = vmatpush.msra.mxu0 %v186_v8 }
  0x1e   :  { %v442_v10 = vld [vmem:[#allocation2 + $0xb40] sm:$0xff]  ;;  %1167 = vmatpush.msra.mxu1 %v314_v9 }
  0x1f   :  { %v570_v11 = vld [vmem:[#allocation2 + $0xf40] sm:$0xff]  ;;  %1187 = vmatpush.msra.mxu2 %v442_v10 }
  0x20   :  { %v178_v12 = vld [vmem:[#allocation2 + $0x300] sm:$0xff]  ;;  %1207 = vmatpush.msra.mxu3 %v570_v11 }
  0x21   :  { %v306_v13 = vld [vmem:[#allocation2 + $0x700] sm:$0xff]  ;;  %1148 = vmatpush.msra.mxu0 %v178_v12 }
  0x22   :  { %v434_v14 = vld [vmem:[#allocation2 + $0xb00] sm:$0xff]  ;;  %1168 = vmatpush.msra.mxu1 %v306_v13 }
  0x23   :  { %v562_v15 = vld [vmem:[#allocation2 + $0xf00] sm:$0xff]  ;;  %1188 = vmatpush.msra.mxu2 %v434_v14 }
  0x24   :  { %v170_v16 = vld [vmem:[#allocation2 + $0x2c0] sm:$0xff]  ;;  %1208 = vmatpush.msra.mxu3 %v562_v15 }
  0x25   :  { %v298_v17 = vld [vmem:[#allocation2 + $0x6c0] sm:$0xff]  ;;  %1149 = vmatpush.msra.mxu0 %v170_v16 }
  0x26   :  { %v426_v18 = vld [vmem:[#allocation2 + $0xac0] sm:$0xff]  ;;  %1169 = vmatpush.msra.mxu1 %v298_v17 }
  0x27   :  { %v554_v19 = vld [vmem:[#allocation2 + $0xec0] sm:$0xff]  ;;  %1189 = vmatpush.msra.mxu2 %v426_v18 }
  0x28   :  { %v162_v20 = vld [vmem:[#allocation2 + $0x280] sm:$0xff]  ;;  %1209 = vmatpush.msra.mxu3 %v554_v19 }
  0x29   :  { %v290_v21 = vld [vmem:[#allocation2 + $0x680] sm:$0xff]  ;;  %1150 = vmatpush.msra.mxu0 %v162_v20 }
  0x2a   :  { %v418_v22 = vld [vmem:[#allocation2 + $0xa80] sm:$0xff]  ;;  %1170 = vmatpush.msra.mxu1 %v290_v21 }
  0x2b   :  { %v546_v23 = vld [vmem:[#allocation2 + $0xe80] sm:$0xff]  ;;  %1190 = vmatpush.msra.mxu2 %v418_v22 }
  0x2c   :  { %v154_v24 = vld [vmem:[#allocation2 + $0x240] sm:$0xff]  ;;  %1210 = vmatpush.msra.mxu3 %v546_v23 }
  0x2d   :  { %v282_v25 = vld [vmem:[#allocation2 + $0x640] sm:$0xff]  ;;  %1151 = vmatpush.msra.mxu0 %v154_v24 }
  0x2e   :  { %v410_v26 = vld [vmem:[#allocation2 + $0xa40] sm:$0xff]  ;;  %1171 = vmatpush.msra.mxu1 %v282_v25 }
  0x2f   :  { %v538_v27 = vld [vmem:[#allocation2 + $0xe40] sm:$0xff]  ;;  %1191 = vmatpush.msra.mxu2 %v410_v26  ;;  %v80_v26 = vld [vmem:[%s3195_s0] sm:$0xff] }
  0x30   :  { %v146_v28 = vld [vmem:[#allocation2 + $0x200] sm:$0xff]  ;;  %1211 = vmatpush.msra.mxu3 %v538_v27  ;;  %1126 = vst [vmem:[#allocation1] ss:$4 sm:$0xff] %v80_v26  ;;  %v555_v26 = vld [vmem:[#allocation2 + $0xec8] sm:$0xff] }
  0x31   :  { %v274_v29 = vld [vmem:[#allocation2 + $0x600] sm:$0xff]  ;;  %1152 = vmatpush.msra.mxu0 %v146_v28 }
  0x32   :  { %v402_v30 = vld [vmem:[#allocation2 + $0xa00] sm:$0xff]  ;;  %1172 = vmatpush.msra.mxu1 %v274_v29 }
  0x33   :  { %v530_v31 = vld [vmem:[#allocation2 + $0xe00] sm:$0xff]  ;;  %1192 = vmatpush.msra.mxu2 %v402_v30 }
  0x34   :  { %v138_v32 = vld [vmem:[#allocation2 + $0x1c0] sm:$0xff]  ;;  %1212 = vmatpush.msra.mxu3 %v530_v31 }
  0x35   :  { %v266_v33 = vld [vmem:[#allocation2 + $0x5c0] sm:$0xff]  ;;  %1153 = vmatpush.msra.mxu0 %v138_v32 }
  0x36   :  { %v394_v34 = vld [vmem:[#allocation2 + $0x9c0] sm:$0xff]  ;;  %1173 = vmatpush.msra.mxu1 %v266_v33 }
  0x37   :  { %v522_v35 = vld [vmem:[#allocation2 + $0xdc0] sm:$0xff]  ;;  %1193 = vmatpush.msra.mxu2 %v394_v34 }
  0x38   :  { %v130_v36 = vld [vmem:[#allocation2 + $0x180] sm:$0xff]  ;;  %1213 = vmatpush.msra.mxu3 %v522_v35 }
  0x39   :  { %v258_v37 = vld [vmem:[#allocation2 + $0x580] sm:$0xff]  ;;  %1154 = vmatpush.msra.mxu0 %v130_v36 }
  0x3a   :  { %v386_v38 = vld [vmem:[#allocation2 + $0x980] sm:$0xff]  ;;  %1174 = vmatpush.msra.mxu1 %v258_v37 }
  0x3b   :  { %v514_v39 = vld [vmem:[#allocation2 + $0xd80] sm:$0xff]  ;;  %1194 = vmatpush.msra.mxu2 %v386_v38 }
  0x3c   :  { %v122_v40 = vld [vmem:[#allocation2 + $0x140] sm:$0xff]  ;;  %1214 = vmatpush.msra.mxu3 %v514_v39 }
  0x3d   :  { %v250_v41 = vld [vmem:[#allocation2 + $0x540] sm:$0xff]  ;;  %1155 = vmatpush.msra.mxu0 %v122_v40 }
  0x3e   :  { %v378_v42 = vld [vmem:[#allocation2 + $0x940] sm:$0xff]  ;;  %1175 = vmatpush.msra.mxu1 %v250_v41 }
  0x3f   :  { %v506_v43 = vld [vmem:[#allocation2 + $0xd40] sm:$0xff]  ;;  %1195 = vmatpush.msra.mxu2 %v378_v42 }
  0x40   :  { %v114_v44 = vld [vmem:[#allocation2 + $0x100] sm:$0xff]  ;;  %1215 = vmatpush.msra.mxu3 %v506_v43 }
  0x41   :  { %v242_v45 = vld [vmem:[#allocation2 + $0x500] sm:$0xff]  ;;  %1156 = vmatpush.msra.mxu0 %v114_v44 }
  0x42   :  { %v370_v46 = vld [vmem:[#allocation2 + $0x900] sm:$0xff]  ;;  %1176 = vmatpush.msra.mxu1 %v242_v45 }
  0x43   :  { %v498_v47 = vld [vmem:[#allocation2 + $0xd00] sm:$0xff]  ;;  %1196 = vmatpush.msra.mxu2 %v370_v46 }
  0x44   :  { %v106_v48 = vld [vmem:[#allocation2 + $0xc0] sm:$0xff]  ;;  %1216 = vmatpush.msra.mxu3 %v498_v47 }
  0x45   :  { %v234_v49 = vld [vmem:[#allocation2 + $0x4c0] sm:$0xff]  ;;  %1157 = vmatpush.msra.mxu0 %v106_v48 }
  0x46   :  { %v362_v50 = vld [vmem:[#allocation2 + $0x8c0] sm:$0xff]  ;;  %1177 = vmatpush.msra.mxu1 %v234_v49 }
  0x47   :  { %v490_v51 = vld [vmem:[#allocation2 + $0xcc0] sm:$0xff]  ;;  %1197 = vmatpush.msra.mxu2 %v362_v50 }
  0x48   :  { %v98_v52 = vld [vmem:[#allocation2 + $0x80] sm:$0xff]  ;;  %1217 = vmatpush.msra.mxu3 %v490_v51 }
  0x49   :  { %v226_v53 = vld [vmem:[#allocation2 + $0x480] sm:$0xff]  ;;  %1158 = vmatpush.msra.mxu0 %v98_v52 }
  0x4a   :  { %v354_v54 = vld [vmem:[#allocation2 + $0x880] sm:$0xff]  ;;  %1178 = vmatpush.msra.mxu1 %v226_v53 }
  0x4b   :  { %v482_v55 = vld [vmem:[#allocation2 + $0xc80] sm:$0xff]  ;;  %1198 = vmatpush.msra.mxu2 %v354_v54 }
  0x4c   :  { %v90_v56 = vld [vmem:[#allocation2 + $0x40] sm:$0xff]  ;;  %1218 = vmatpush.msra.mxu3 %v482_v55 }
  0x4d   :  { %v218_v57 = vld [vmem:[#allocation2 + $0x440] sm:$0xff]  ;;  %1159 = vmatpush.msra.mxu0 %v90_v56 }
  0x4e   :  { %v346_v58 = vld [vmem:[#allocation2 + $0x840] sm:$0xff]  ;;  %1179 = vmatpush.msra.mxu1 %v218_v57 }
  0x4f   :  { %v474_v59 = vld [vmem:[#allocation2 + $0xc40] sm:$0xff]  ;;  %1199 = vmatpush.msra.mxu2 %v346_v58 }
  0x50   :  { %v82_v60 = vld [vmem:[#allocation2] sm:$0xff]  ;;  %1219 = vmatpush.msra.mxu3 %v474_v59 }
  0x51   :  { %v210_v61 = vld [vmem:[#allocation2 + $0x400] sm:$0xff]  ;;  %1160 = vmatpush.msra.mxu0 %v82_v60 }
  0x52   :  { %v338_v62 = vld [vmem:[#allocation2 + $0x800] sm:$0xff]  ;;  %1180 = vmatpush.msra.mxu1 %v210_v61 }
  0x53   :  { %v466_v63 = vld [vmem:[#allocation2 + $0xc00] sm:$0xff]  ;;  %1200 = vmatpush.msra.mxu2 %v338_v62 }
  0x54   :  { %v714_v0 = vld [vmem:[#allocation2 + $0x13c0] sm:$0xff]  ;;  %1220 = vmatpush.msra.mxu3 %v466_v63 }
  0x55   :  { %v842_v1 = vld [vmem:[#allocation2 + $0x17c0] sm:$0xff]  ;;  %1225 = vmatpush.msrb.mxu0 %v714_v0 }
  0x56   :  { %v970_v2 = vld [vmem:[#allocation2 + $0x1bc0] sm:$0xff]  ;;  %1245 = vmatpush.msrb.mxu1 %v842_v1 }
  0x57   :  { %v1098_v3 = vld [vmem:[#allocation2 + $0x1fc0] sm:$0xff]  ;;  %1265 = vmatpush.msrb.mxu2 %v970_v2  ;;  %v2964_v2 = vld.sshfl [vmem:[#allocation1] sm:$0xff pattern:$0x73625140] }
  0x58   :  { %v706_v4 = vld [vmem:[#allocation2 + $0x1380] sm:$0xff]  ;;  %1285 = vmatpush.msrb.mxu3 %v1098_v3  ;;  %1161 = vmatmul.f32.vlgmr.msra.gmra.mxu0 %v2964_v2 }
  0x59   :  { %v834_v5 = vld [vmem:[#allocation2 + $0x1780] sm:$0xff]  ;;  %1226 = vmatpush.msrb.mxu0 %v706_v4  ;;  %v2968_v4 = vld.sshfl [vmem:[#allocation1 + $0x10] sm:$0xff pattern:$0x73625140] }
  0x5a   :  { %v962_v6 = vld [vmem:[#allocation2 + $0x1b80] sm:$0xff]  ;;  %1246 = vmatpush.msrb.mxu1 %v834_v5  ;;  %v2970_v5 = vld.sshfl [vmem:[#allocation1 + $0x18] sm:$0xff pattern:$0x73625140]  ;;  %1201 = vmatmul.f32.vlgmr.msra.gmra.mxu2 %v2968_v4 }
  0x5b   :  { %v1090_v7 = vld [vmem:[#allocation2 + $0x1f80] sm:$0xff]  ;;  %1266 = vmatpush.msrb.mxu2 %v962_v6  ;;  %v203_v6 = vld [vmem:[#allocation2 + $0x3c8] sm:$0xff]  ;;  %1221 = vmatmul.f32.vlgmr.msra.gmra.mxu3 %v2970_v5 }
  0x5c   :  { %v698_v8 = vld [vmem:[#allocation2 + $0x1340] sm:$0xff]  ;;  %1286 = vmatpush.msrb.mxu3 %v1090_v7  ;;  %v331_v7 = vld [vmem:[#allocation2 + $0x7c8] sm:$0xff] }
  0x5d   :  { %v826_v9 = vld [vmem:[#allocation2 + $0x1740] sm:$0xff]  ;;  %1227 = vmatpush.msrb.mxu0 %v698_v8  ;;  %v459_v8 = vld [vmem:[#allocation2 + $0xbc8] sm:$0xff] }
  0x5e   :  { %v954_v10 = vld [vmem:[#allocation2 + $0x1b40] sm:$0xff]  ;;  %1247 = vmatpush.msrb.mxu1 %v826_v9  ;;  %v587_v9 = vld [vmem:[#allocation2 + $0xfc8] sm:$0xff] }
  0x5f   :  { %v1082_v11 = vld [vmem:[#allocation2 + $0x1f40] sm:$0xff]  ;;  %1267 = vmatpush.msrb.mxu2 %v954_v10  ;;  %v195_v10 = vld [vmem:[#allocation2 + $0x388] sm:$0xff] }
  0x60   :  { %v690_v12 = vld [vmem:[#allocation2 + $0x1300] sm:$0xff]  ;;  %1287 = vmatpush.msrb.mxu3 %v1082_v11  ;;  %v323_v11 = vld [vmem:[#allocation2 + $0x788] sm:$0xff] }
  0x61   :  { %v818_v13 = vld [vmem:[#allocation2 + $0x1700] sm:$0xff]  ;;  %1228 = vmatpush.msrb.mxu0 %v690_v12  ;;  %v451_v12 = vld [vmem:[#allocation2 + $0xb88] sm:$0xff] }
  0x62   :  { %v946_v14 = vld [vmem:[#allocation2 + $0x1b00] sm:$0xff]  ;;  %1248 = vmatpush.msrb.mxu1 %v818_v13  ;;  %v579_v13 = vld [vmem:[#allocation2 + $0xf88] sm:$0xff] }
  0x63   :  { %v1074_v15 = vld [vmem:[#allocation2 + $0x1f00] sm:$0xff]  ;;  %1268 = vmatpush.msrb.mxu2 %v946_v14  ;;  %v187_v14 = vld [vmem:[#allocation2 + $0x348] sm:$0xff] }
  0x64   :  { %v682_v16 = vld [vmem:[#allocation2 + $0x12c0] sm:$0xff]  ;;  %1288 = vmatpush.msrb.mxu3 %v1074_v15  ;;  %v315_v15 = vld [vmem:[#allocation2 + $0x748] sm:$0xff] }
  0x65   :  { %v810_v17 = vld [vmem:[#allocation2 + $0x16c0] sm:$0xff]  ;;  %1229 = vmatpush.msrb.mxu0 %v682_v16  ;;  %v443_v16 = vld [vmem:[#allocation2 + $0xb48] sm:$0xff] }
  0x66   :  { %v938_v18 = vld [vmem:[#allocation2 + $0x1ac0] sm:$0xff]  ;;  %1249 = vmatpush.msrb.mxu1 %v810_v17  ;;  %v571_v17 = vld [vmem:[#allocation2 + $0xf48] sm:$0xff] }
  0x67   :  { %v1066_v19 = vld [vmem:[#allocation2 + $0x1ec0] sm:$0xff]  ;;  %1269 = vmatpush.msrb.mxu2 %v938_v18  ;;  %v179_v18 = vld [vmem:[#allocation2 + $0x308] sm:$0xff] }
  0x68   :  { %v674_v20 = vld [vmem:[#allocation2 + $0x1280] sm:$0xff]  ;;  %1289 = vmatpush.msrb.mxu3 %v1066_v19  ;;  %v307_v19 = vld [vmem:[#allocation2 + $0x708] sm:$0xff] }
  0x69   :  { %v802_v21 = vld [vmem:[#allocation2 + $0x1680] sm:$0xff]  ;;  %1230 = vmatpush.msrb.mxu0 %v674_v20  ;;  %v435_v20 = vld [vmem:[#allocation2 + $0xb08] sm:$0xff] }
  0x6a   :  { %v930_v22 = vld [vmem:[#allocation2 + $0x1a80] sm:$0xff]  ;;  %1250 = vmatpush.msrb.mxu1 %v802_v21  ;;  %v563_v21 = vld [vmem:[#allocation2 + $0xf08] sm:$0xff] }
  0x6b   :  { %v1058_v23 = vld [vmem:[#allocation2 + $0x1e80] sm:$0xff]  ;;  %1270 = vmatpush.msrb.mxu2 %v930_v22 }
  0x6c   :  { %v666_v24 = vld [vmem:[#allocation2 + $0x1240] sm:$0xff]  ;;  %1290 = vmatpush.msrb.mxu3 %v1058_v23  ;;  %v171_v23 = vld [vmem:[#allocation2 + $0x2c8] sm:$0xff] }
  0x6d   :  { %v794_v25 = vld [vmem:[#allocation2 + $0x1640] sm:$0xff]  ;;  %1231 = vmatpush.msrb.mxu0 %v666_v24  ;;  %v299_v24 = vld [vmem:[#allocation2 + $0x6c8] sm:$0xff] }
  0x6e   :  { %v922_v27 = vld [vmem:[#allocation2 + $0x1a40] sm:$0xff]  ;;  %1251 = vmatpush.msrb.mxu1 %v794_v25  ;;  %v427_v25 = vld [vmem:[#allocation2 + $0xac8] sm:$0xff] }
  0x6f   :  { %v1050_v28 = vld [vmem:[#allocation2 + $0x1e40] sm:$0xff]  ;;  %1271 = vmatpush.msrb.mxu2 %v922_v27 }
  0x70   :  { %v658_v29 = vld [vmem:[#allocation2 + $0x1200] sm:$0xff]  ;;  %1291 = vmatpush.msrb.mxu3 %v1050_v28 }
  0x71   :  { %v786_v30 = vld [vmem:[#allocation2 + $0x1600] sm:$0xff]  ;;  %1232 = vmatpush.msrb.mxu0 %v658_v29  ;;  %v163_v29 = vld [vmem:[#allocation2 + $0x288] sm:$0xff] }
  0x72   :  { %v914_v31 = vld [vmem:[#allocation2 + $0x1a00] sm:$0xff]  ;;  %1252 = vmatpush.msrb.mxu1 %v786_v30  ;;  %v291_v30 = vld [vmem:[#allocation2 + $0x688] sm:$0xff] }
  0x73   :  { %v1042_v32 = vld [vmem:[#allocation2 + $0x1e00] sm:$0xff]  ;;  %1272 = vmatpush.msrb.mxu2 %v914_v31  ;;  %v419_v31 = vld [vmem:[#allocation2 + $0xa88] sm:$0xff] }
  0x74   :  { %v650_v33 = vld [vmem:[#allocation2 + $0x11c0] sm:$0xff]  ;;  %1292 = vmatpush.msrb.mxu3 %v1042_v32  ;;  %v547_v32 = vld [vmem:[#allocation2 + $0xe88] sm:$0xff] }
  0x75   :  { %v778_v34 = vld [vmem:[#allocation2 + $0x15c0] sm:$0xff]  ;;  %1233 = vmatpush.msrb.mxu0 %v650_v33 }
  0x76   :  { %v906_v35 = vld [vmem:[#allocation2 + $0x19c0] sm:$0xff]  ;;  %1253 = vmatpush.msrb.mxu1 %v778_v34  ;;  %v155_v34 = vld [vmem:[#allocation2 + $0x248] sm:$0xff] }
  0x77   :  { %v1034_v36 = vld [vmem:[#allocation2 + $0x1dc0] sm:$0xff]  ;;  %1273 = vmatpush.msrb.mxu2 %v906_v35  ;;  %v283_v35 = vld [vmem:[#allocation2 + $0x648] sm:$0xff] }
  0x78   :  { %v642_v37 = vld [vmem:[#allocation2 + $0x1180] sm:$0xff]  ;;  %1293 = vmatpush.msrb.mxu3 %v1034_v36  ;;  %v411_v36 = vld [vmem:[#allocation2 + $0xa48] sm:$0xff] }
  0x79   :  { %v770_v38 = vld [vmem:[#allocation2 + $0x1580] sm:$0xff]  ;;  %1234 = vmatpush.msrb.mxu0 %v642_v37  ;;  %v539_v37 = vld [vmem:[#allocation2 + $0xe48] sm:$0xff] }
  0x7a   :  { %v81_v39 = vld [vmem:[%s3195_s0 + $0x8] sm:$0xff]  ;;  %1254 = vmatpush.msrb.mxu1 %v770_v38  ;;  %v147_v38 = vld [vmem:[#allocation2 + $0x208] sm:$0xff]  ;;  %s2915_s0 = smov [#allocation10]  }
  0x7b   :  { %v898_v40 = vld [vmem:[#allocation2 + $0x1980] sm:$0xff]  ;;  %1128 = vst [vmem:[#allocation1 + $0x20] ss:$4 sm:$0xff] %v81_v39  ;;  %v275_v39 = vld [vmem:[#allocation2 + $0x608] sm:$0xff]  ;;  %s2731_s17 = sshll.u32 %s2915_s0, 4  ;;  %s2732_s17 = int_to_ptr.vmem [resolvable:$true] %s2731_s17 }
  0x7c   :  { %v1026_v41 = vld [vmem:[#allocation2 + $0x1d80] sm:$0xff]  ;;  %1274 = vmatpush.msrb.mxu2 %v898_v40  ;;  %v403_v40 = vld [vmem:[#allocation2 + $0xa08] sm:$0xff] }
  0x7d   :  { %v634_v42 = vld [vmem:[#allocation2 + $0x1140] sm:$0xff]  ;;  %1294 = vmatpush.msrb.mxu3 %v1026_v41  ;;  %v531_v41 = vld [vmem:[#allocation2 + $0xe08] sm:$0xff] }
  0x7e   :  { %v762_v43 = vld [vmem:[#allocation2 + $0x1540] sm:$0xff]  ;;  %1235 = vmatpush.msrb.mxu0 %v634_v42  ;;  %v139_v42 = vld [vmem:[#allocation2 + $0x1c8] sm:$0xff] }
  0x7f   :  { %v890_v44 = vld [vmem:[#allocation2 + $0x1940] sm:$0xff]  ;;  %1255 = vmatpush.msrb.mxu1 %v762_v43  ;;  %v267_v43 = vld [vmem:[#allocation2 + $0x5c8] sm:$0xff] }
  0x80   :  { %v1018_v45 = vld [vmem:[#allocation2 + $0x1d40] sm:$0xff]  ;;  %1275 = vmatpush.msrb.mxu2 %v890_v44  ;;  %v395_v44 = vld [vmem:[#allocation2 + $0x9c8] sm:$0xff] }
  0x81   :  { %v626_v46 = vld [vmem:[#allocation2 + $0x1100] sm:$0xff]  ;;  %1295 = vmatpush.msrb.mxu3 %v1018_v45  ;;  %v523_v45 = vld [vmem:[#allocation2 + $0xdc8] sm:$0xff] }
  0x82   :  { %v754_v47 = vld [vmem:[#allocation2 + $0x1500] sm:$0xff]  ;;  %1236 = vmatpush.msrb.mxu0 %v626_v46  ;;  %v2976_v22 = vld.sshfl [vmem:[#allocation1 + $0x30] sm:$0xff pattern:$0x73625140] }
  0x83   :  { %v882_v48 = vld [vmem:[#allocation2 + $0x1900] sm:$0xff]  ;;  %1256 = vmatpush.msrb.mxu1 %v754_v47  ;;  %v2978_v27 = vld.sshfl [vmem:[#allocation1 + $0x20] sm:$0xff pattern:$0x73625140]  ;;  %v131_v46 = vld [vmem:[#allocation2 + $0x188] sm:$0xff] }
  0x84   :  { %v1010_v49 = vld [vmem:[#allocation2 + $0x1d00] sm:$0xff]  ;;  %1276 = vmatpush.msrb.mxu2 %v882_v48  ;;  %v2981_v28 = vld.sshfl [vmem:[#allocation1 + $0x38] sm:$0xff pattern:$0x73625140]  ;;  %v259_v47 = vld [vmem:[#allocation2 + $0x588] sm:$0xff] }
  0x85   :  { %v618_v50 = vld [vmem:[#allocation2 + $0x10c0] sm:$0xff]  ;;  %1296 = vmatpush.msrb.mxu3 %v1010_v49  ;;  %v387_v48 = vld [vmem:[#allocation2 + $0x988] sm:$0xff] }
  0x86   :  { %v746_v51 = vld [vmem:[#allocation2 + $0x14c0] sm:$0xff]  ;;  %1237 = vmatpush.msrb.mxu0 %v618_v50  ;;  %v515_v49 = vld [vmem:[#allocation2 + $0xd88] sm:$0xff] }
  0x87   :  { %v874_v52 = vld [vmem:[#allocation2 + $0x18c0] sm:$0xff]  ;;  %1257 = vmatpush.msrb.mxu1 %v746_v51  ;;  %v123_v50 = vld [vmem:[#allocation2 + $0x148] sm:$0xff] }
  0x88   :  { %v1002_v53 = vld [vmem:[#allocation2 + $0x1cc0] sm:$0xff]  ;;  %1277 = vmatpush.msrb.mxu2 %v874_v52  ;;  %v251_v51 = vld [vmem:[#allocation2 + $0x548] sm:$0xff] }
  0x89   :  { %v610_v54 = vld [vmem:[#allocation2 + $0x1080] sm:$0xff]  ;;  %1297 = vmatpush.msrb.mxu3 %v1002_v53  ;;  %v379_v52 = vld [vmem:[#allocation2 + $0x948] sm:$0xff] }
  0x8a   :  { %v738_v55 = vld [vmem:[#allocation2 + $0x1480] sm:$0xff]  ;;  %1238 = vmatpush.msrb.mxu0 %v610_v54  ;;  %v507_v53 = vld [vmem:[#allocation2 + $0xd48] sm:$0xff] }
  0x8b   :  { %v866_v56 = vld [vmem:[#allocation2 + $0x1880] sm:$0xff]  ;;  %1258 = vmatpush.msrb.mxu1 %v738_v55  ;;  %v115_v54 = vld [vmem:[#allocation2 + $0x108] sm:$0xff] }
  0x8c   :  { %v994_v57 = vld [vmem:[#allocation2 + $0x1c80] sm:$0xff]  ;;  %1278 = vmatpush.msrb.mxu2 %v866_v56  ;;  %v243_v55 = vld [vmem:[#allocation2 + $0x508] sm:$0xff] }
  0x8d   :  { %v602_v58 = vld [vmem:[#allocation2 + $0x1040] sm:$0xff]  ;;  %1298 = vmatpush.msrb.mxu3 %v994_v57  ;;  %v371_v56 = vld [vmem:[#allocation2 + $0x908] sm:$0xff] }
  0x8e   :  { %v730_v59 = vld [vmem:[#allocation2 + $0x1440] sm:$0xff]  ;;  %1239 = vmatpush.msrb.mxu0 %v602_v58  ;;  %v499_v57 = vld [vmem:[#allocation2 + $0xd08] sm:$0xff] }
  0x8f   :  { %v858_v60 = vld [vmem:[#allocation2 + $0x1840] sm:$0xff]  ;;  %1259 = vmatpush.msrb.mxu1 %v730_v59  ;;  %v107_v58 = vld [vmem:[#allocation2 + $0xc8] sm:$0xff] }
  0x90   :  { %v986_v61 = vld [vmem:[#allocation2 + $0x1c40] sm:$0xff]  ;;  %1279 = vmatpush.msrb.mxu2 %v858_v60  ;;  %v235_v59 = vld [vmem:[#allocation2 + $0x4c8] sm:$0xff] }
  0x91   :  { %v594_v62 = vld [vmem:[#allocation2 + $0x1000] sm:$0xff]  ;;  %1299 = vmatpush.msrb.mxu3 %v986_v61  ;;  %v363_v60 = vld [vmem:[#allocation2 + $0x8c8] sm:$0xff] }
  0x92   :  { %v722_v63 = vld [vmem:[#allocation2 + $0x1400] sm:$0xff]  ;;  %1240 = vmatpush.msrb.mxu0 %v594_v62  ;;  %v491_v61 = vld [vmem:[#allocation2 + $0xcc8] sm:$0xff] }
  0x93   :  { %v850_v0 = vld [vmem:[#allocation2 + $0x1800] sm:$0xff]  ;;  %1260 = vmatpush.msrb.mxu1 %v722_v63  ;;  %1241 = vmatmul.f32.vlgmr.msrb.gmra.mxu0 %v2978_v27  ;;  %v99_v62 = vld [vmem:[#allocation2 + $0x88] sm:$0xff] }
  0x94   :  { %v978_v1 = vld [vmem:[#allocation2 + $0x1c00] sm:$0xff]  ;;  %1280 = vmatpush.msrb.mxu2 %v850_v0  ;;  %1305 = vmatpush.msra.mxu0 %v203_v6  ;;  %v227_v63 = vld [vmem:[#allocation2 + $0x488] sm:$0xff] }
  0x95   :  { %v2966_v3 = vld.sshfl [vmem:[#allocation1 + $0x8] sm:$0xff pattern:$0x73625140]  ;;  %1300 = vmatpush.msrb.mxu3 %v978_v1  ;;  %1281 = vmatmul.f32.vlgmr.msrb.gmra.mxu2 %v2976_v22  ;;  %v355_v0 = vld [vmem:[#allocation2 + $0x888] sm:$0xff] }
  0x96   :  { %1181 = vmatmul.f32.vlgmr.msra.gmra.mxu1 %v2966_v3  ;;  %1345 = vmatpush.msra.mxu2 %v459_v8  ;;  %v2984_v33 = vld.sshfl [vmem:[#allocation1 + $0x28] sm:$0xff pattern:$0x73625140]  ;;  %v483_v1 = vld [vmem:[#allocation2 + $0xc88] sm:$0xff] }
  0x97   :  { %1325 = vmatpush.msra.mxu1 %v331_v7  ;;  %1365 = vmatpush.msra.mxu3 %v587_v9  ;;  %v91_v6 = vld [vmem:[#allocation2 + $0x48] sm:$0xff] }
  0x98   :  { %1306 = vmatpush.msra.mxu0 %v195_v10  ;;  %1346 = vmatpush.msra.mxu2 %v451_v12  ;;  %v219_v7 = vld [vmem:[#allocation2 + $0x448] sm:$0xff] }
  0x99   :  { %1326 = vmatpush.msra.mxu1 %v323_v11  ;;  %1366 = vmatpush.msra.mxu3 %v579_v13  ;;  %v347_v8 = vld [vmem:[#allocation2 + $0x848] sm:$0xff] }
  0x9a   :  { %1307 = vmatpush.msra.mxu0 %v187_v14  ;;  %1347 = vmatpush.msra.mxu2 %v443_v16  ;;  %v475_v9 = vld [vmem:[#allocation2 + $0xc48] sm:$0xff] }
  0x9b   :  { %1327 = vmatpush.msra.mxu1 %v315_v15  ;;  %1367 = vmatpush.msra.mxu3 %v571_v17  ;;  %v83_v10 = vld [vmem:[#allocation2 + $0x8] sm:$0xff] }
  0x9c   :  { %1308 = vmatpush.msra.mxu0 %v179_v18  ;;  %1348 = vmatpush.msra.mxu2 %v435_v20  ;;  %v211_v11 = vld [vmem:[#allocation2 + $0x408] sm:$0xff] }
  0x9d   :  { %1328 = vmatpush.msra.mxu1 %v307_v19  ;;  %1368 = vmatpush.msra.mxu3 %v563_v21  ;;  %v339_v12 = vld [vmem:[#allocation2 + $0x808] sm:$0xff] }
  0x9e   :  { %1309 = vmatpush.msra.mxu0 %v171_v23  ;;  %1349 = vmatpush.msra.mxu2 %v427_v25  ;;  %v467_v13 = vld [vmem:[#allocation2 + $0xc08] sm:$0xff] }
  0x9f   :  { %1329 = vmatpush.msra.mxu1 %v299_v24  ;;  %1369 = vmatpush.msra.mxu3 %v555_v26  ;;  %v715_v14 = vld [vmem:[#allocation2 + $0x13c8] sm:$0xff] }
  0xa0   :  { %1301 = vmatmul.f32.vlgmr.msrb.gmra.mxu3 %v2981_v28  ;;  %1310 = vmatpush.msra.mxu0 %v163_v29  ;;  %v843_v15 = vld [vmem:[#allocation2 + $0x17c8] sm:$0xff] }
  0xa1   :  { %1330 = vmatpush.msra.mxu1 %v291_v30  ;;  %1350 = vmatpush.msra.mxu2 %v419_v31  ;;  %v971_v16 = vld [vmem:[#allocation2 + $0x1bc8] sm:$0xff] }
  0xa2   :  { %1370 = vmatpush.msra.mxu3 %v547_v32  ;;  %1261 = vmatmul.f32.vlgmr.msrb.gmra.mxu1 %v2984_v33  ;;  %v1099_v17 = vld [vmem:[#allocation2 + $0x1fc8] sm:$0xff] }
  0xa3   :  { %1311 = vmatpush.msra.mxu0 %v155_v34  ;;  %1331 = vmatpush.msra.mxu1 %v283_v35  ;;  %v707_v18 = vld [vmem:[#allocation2 + $0x1388] sm:$0xff] }
  0xa4   :  { %1351 = vmatpush.msra.mxu2 %v411_v36  ;;  %1371 = vmatpush.msra.mxu3 %v539_v37  ;;  %v835_v19 = vld [vmem:[#allocation2 + $0x1788] sm:$0xff] }
  0xa5   :  { %1312 = vmatpush.msra.mxu0 %v147_v38  ;;  %1332 = vmatpush.msra.mxu1 %v275_v39  ;;  %v963_v20 = vld [vmem:[#allocation2 + $0x1b88] sm:$0xff] }
  0xa6   :  { %1352 = vmatpush.msra.mxu2 %v403_v40  ;;  %1372 = vmatpush.msra.mxu3 %v531_v41  ;;  %v1091_v21 = vld [vmem:[#allocation2 + $0x1f88] sm:$0xff] }
  0xa7   :  { %1313 = vmatpush.msra.mxu0 %v139_v42  ;;  %1333 = vmatpush.msra.mxu1 %v267_v43  ;;  %v699_v23 = vld [vmem:[#allocation2 + $0x1348] sm:$0xff] }
  0xa8   :  { %1353 = vmatpush.msra.mxu2 %v395_v44  ;;  %1373 = vmatpush.msra.mxu3 %v523_v45  ;;  %v827_v24 = vld [vmem:[#allocation2 + $0x1748] sm:$0xff] }
  0xa9   :  { %1314 = vmatpush.msra.mxu0 %v131_v46  ;;  %1334 = vmatpush.msra.mxu1 %v259_v47  ;;  %v955_v25 = vld [vmem:[#allocation2 + $0x1b48] sm:$0xff] }
  0xaa   :  { %1354 = vmatpush.msra.mxu2 %v387_v48  ;;  %1374 = vmatpush.msra.mxu3 %v515_v49  ;;  %v1083_v26 = vld [vmem:[#allocation2 + $0x1f48] sm:$0xff] }
  0xab   :  { %1315 = vmatpush.msra.mxu0 %v123_v50  ;;  %1335 = vmatpush.msra.mxu1 %v251_v51  ;;  %v691_v29 = vld [vmem:[#allocation2 + $0x1308] sm:$0xff] }
  0xac   :  { %1355 = vmatpush.msra.mxu2 %v379_v52  ;;  %1375 = vmatpush.msra.mxu3 %v507_v53  ;;  %v819_v30 = vld [vmem:[#allocation2 + $0x1708] sm:$0xff] }
  0xad   :  { %1316 = vmatpush.msra.mxu0 %v115_v54  ;;  %1336 = vmatpush.msra.mxu1 %v243_v55  ;;  %v947_v31 = vld [vmem:[#allocation2 + $0x1b08] sm:$0xff] }
  0xae   :  { %1356 = vmatpush.msra.mxu2 %v371_v56  ;;  %1376 = vmatpush.msra.mxu3 %v499_v57  ;;  %v1075_v32 = vld [vmem:[#allocation2 + $0x1f08] sm:$0xff] }
  0xaf   :  { %1317 = vmatpush.msra.mxu0 %v107_v58  ;;  %1337 = vmatpush.msra.mxu1 %v235_v59  ;;  %v683_v34 = vld [vmem:[#allocation2 + $0x12c8] sm:$0xff] }
  0xb0   :  { %1357 = vmatpush.msra.mxu2 %v363_v60  ;;  %1377 = vmatpush.msra.mxu3 %v491_v61  ;;  %v811_v35 = vld [vmem:[#allocation2 + $0x16c8] sm:$0xff] }
  0xb1   :  { %1318 = vmatpush.msra.mxu0 %v99_v62  ;;  %1338 = vmatpush.msra.mxu1 %v227_v63  ;;  %v939_v36 = vld [vmem:[#allocation2 + $0x1ac8] sm:$0xff] }
  0xb2   :  { %1358 = vmatpush.msra.mxu2 %v355_v0  ;;  %1378 = vmatpush.msra.mxu3 %v483_v1  ;;  %v1067_v37 = vld [vmem:[#allocation2 + $0x1ec8] sm:$0xff] }
  0xb3   :  { %1319 = vmatpush.msra.mxu0 %v91_v6  ;;  %1339 = vmatpush.msra.mxu1 %v219_v7  ;;  %v675_v38 = vld [vmem:[#allocation2 + $0x1288] sm:$0xff] }
  0xb4   :  { %1359 = vmatpush.msra.mxu2 %v347_v8  ;;  %1379 = vmatpush.msra.mxu3 %v475_v9  ;;  %v803_v39 = vld [vmem:[#allocation2 + $0x1688] sm:$0xff] }
  0xb5   :  { %1320 = vmatpush.msra.mxu0 %v83_v10  ;;  %1340 = vmatpush.msra.mxu1 %v211_v11  ;;  %v931_v40 = vld [vmem:[#allocation2 + $0x1a88] sm:$0xff] }
  0xb6   :  { %1360 = vmatpush.msra.mxu2 %v339_v12  ;;  %1380 = vmatpush.msra.mxu3 %v467_v13  ;;  %v1059_v41 = vld [vmem:[#allocation2 + $0x1e88] sm:$0xff] }
  0xb7   :  { %1385 = vmatpush.msrb.mxu0 %v715_v14  ;;  %1405 = vmatpush.msrb.mxu1 %v843_v15  ;;  %v667_v42 = vld [vmem:[#allocation2 + $0x1248] sm:$0xff] }
  0xb8   :  { %1425 = vmatpush.msrb.mxu2 %v971_v16  ;;  %1445 = vmatpush.msrb.mxu3 %v1099_v17  ;;  %v795_v43 = vld [vmem:[#allocation2 + $0x1648] sm:$0xff] }
  0xb9   :  { %1386 = vmatpush.msrb.mxu0 %v707_v18  ;;  %1406 = vmatpush.msrb.mxu1 %v835_v19  ;;  %v923_v44 = vld [vmem:[#allocation2 + $0x1a48] sm:$0xff] }
  0xba   :  { %1426 = vmatpush.msrb.mxu2 %v963_v20  ;;  %1446 = vmatpush.msrb.mxu3 %v1091_v21  ;;  %v1051_v45 = vld [vmem:[#allocation2 + $0x1e48] sm:$0xff] }
  0xbb   :  { %1387 = vmatpush.msrb.mxu0 %v699_v23  ;;  %1407 = vmatpush.msrb.mxu1 %v827_v24  ;;  %v659_v46 = vld [vmem:[#allocation2 + $0x1208] sm:$0xff]  ;;  %v204_v23 = vld [vmem:[#allocation2 + $0x3d0] sm:$0xff] }
  0xbc   :  { %1427 = vmatpush.msrb.mxu2 %v955_v25  ;;  %1447 = vmatpush.msrb.mxu3 %v1083_v26  ;;  %v787_v47 = vld [vmem:[#allocation2 + $0x1608] sm:$0xff]  ;;  %v332_v24 = vld [vmem:[#allocation2 + $0x7d0] sm:$0xff] }
  0xbd   :  { %1388 = vmatpush.msrb.mxu0 %v691_v29  ;;  %1408 = vmatpush.msrb.mxu1 %v819_v30  ;;  %v915_v48 = vld [vmem:[#allocation2 + $0x1a08] sm:$0xff]  ;;  %v460_v25 = vld [vmem:[#allocation2 + $0xbd0] sm:$0xff] }
  0xbe   :  { %1428 = vmatpush.msrb.mxu2 %v947_v31  ;;  %1448 = vmatpush.msrb.mxu3 %v1075_v32  ;;  %v1043_v49 = vld [vmem:[#allocation2 + $0x1e08] sm:$0xff]  ;;  %v588_v26 = vld [vmem:[#allocation2 + $0xfd0] sm:$0xff] }
  0xbf   :  { %1389 = vmatpush.msrb.mxu0 %v683_v34  ;;  %1409 = vmatpush.msrb.mxu1 %v811_v35  ;;  %v651_v50 = vld [vmem:[#allocation2 + $0x11c8] sm:$0xff]  ;;  %v196_v29 = vld [vmem:[#allocation2 + $0x390] sm:$0xff] }
  0xc0   :  { %1429 = vmatpush.msrb.mxu2 %v939_v36  ;;  %1449 = vmatpush.msrb.mxu3 %v1067_v37  ;;  %v779_v51 = vld [vmem:[#allocation2 + $0x15c8] sm:$0xff]  ;;  %v324_v30 = vld [vmem:[#allocation2 + $0x790] sm:$0xff] }
  0xc1   :  { %1390 = vmatpush.msrb.mxu0 %v675_v38  ;;  %1410 = vmatpush.msrb.mxu1 %v803_v39  ;;  %v907_v52 = vld [vmem:[#allocation2 + $0x19c8] sm:$0xff]  ;;  %v452_v31 = vld [vmem:[#allocation2 + $0xb90] sm:$0xff] }
  0xc2   :  { %1430 = vmatpush.msrb.mxu2 %v931_v40  ;;  %1450 = vmatpush.msrb.mxu3 %v1059_v41  ;;  %v1035_v53 = vld [vmem:[#allocation2 + $0x1dc8] sm:$0xff]  ;;  %v580_v32 = vld [vmem:[#allocation2 + $0xf90] sm:$0xff] }
  0xc3   :  { %1391 = vmatpush.msrb.mxu0 %v667_v42  ;;  %1411 = vmatpush.msrb.mxu1 %v795_v43  ;;  %v643_v54 = vld [vmem:[#allocation2 + $0x1188] sm:$0xff]  ;;  %v188_v34 = vld [vmem:[#allocation2 + $0x350] sm:$0xff] }
  0xc4   :  { %1431 = vmatpush.msrb.mxu2 %v923_v44  ;;  %1451 = vmatpush.msrb.mxu3 %v1051_v45  ;;  %v771_v55 = vld [vmem:[#allocation2 + $0x1588] sm:$0xff]  ;;  %v316_v35 = vld [vmem:[#allocation2 + $0x750] sm:$0xff] }
  0xc5   :  { %1392 = vmatpush.msrb.mxu0 %v659_v46  ;;  %1412 = vmatpush.msrb.mxu1 %v787_v47  ;;  %v899_v56 = vld [vmem:[#allocation2 + $0x1988] sm:$0xff]  ;;  %v180_v36 = vld [vmem:[#allocation2 + $0x310] sm:$0xff] }
  0xc6   :  { %1432 = vmatpush.msrb.mxu2 %v915_v48  ;;  %1452 = vmatpush.msrb.mxu3 %v1043_v49  ;;  %v1027_v57 = vld [vmem:[#allocation2 + $0x1d88] sm:$0xff]  ;;  %v564_v37 = vld [vmem:[#allocation2 + $0xf10] sm:$0xff] }
  0xc7   :  { %1393 = vmatpush.msrb.mxu0 %v651_v50  ;;  %1413 = vmatpush.msrb.mxu1 %v779_v51  ;;  %v635_v58 = vld [vmem:[#allocation2 + $0x1148] sm:$0xff]  ;;  %v172_v38 = vld [vmem:[#allocation2 + $0x2d0] sm:$0xff] }
  0xc8   :  { %1433 = vmatpush.msrb.mxu2 %v907_v52  ;;  %1453 = vmatpush.msrb.mxu3 %v1035_v53  ;;  %v763_v59 = vld [vmem:[#allocation2 + $0x1548] sm:$0xff]  ;;  %v300_v39 = vld [vmem:[#allocation2 + $0x6d0] sm:$0xff] }
  0xc9   :  { %1394 = vmatpush.msrb.mxu0 %v643_v54  ;;  %1414 = vmatpush.msrb.mxu1 %v771_v55  ;;  %v891_v60 = vld [vmem:[#allocation2 + $0x1948] sm:$0xff]  ;;  %v428_v40 = vld [vmem:[#allocation2 + $0xad0] sm:$0xff] }
  0xca   :  { %v1019_v61 = vld [vmem:[#allocation2 + $0x1d48] sm:$0xff]  ;;  %1434 = vmatpush.msrb.mxu2 %v899_v56  ;;  %1454 = vmatpush.msrb.mxu3 %v1027_v57  ;;  %v556_v41 = vld [vmem:[#allocation2 + $0xed0] sm:$0xff] }
  0xcb   :  { %v627_v62 = vld [vmem:[#allocation2 + $0x1108] sm:$0xff]  ;;  %1395 = vmatpush.msrb.mxu0 %v635_v58  ;;  %1415 = vmatpush.msrb.mxu1 %v763_v59  ;;  %v164_v42 = vld [vmem:[#allocation2 + $0x290] sm:$0xff] }
  0xcc   :  { %v755_v63 = vld [vmem:[#allocation2 + $0x1508] sm:$0xff]  ;;  %1435 = vmatpush.msrb.mxu2 %v891_v60  ;;  %1455 = vmatpush.msrb.mxu3 %v1019_v61  ;;  %v292_v43 = vld [vmem:[#allocation2 + $0x690] sm:$0xff] }
  0xcd   :  { %v883_v0 = vld [vmem:[#allocation2 + $0x1908] sm:$0xff]  ;;  %1396 = vmatpush.msrb.mxu0 %v627_v62  ;;  %1416 = vmatpush.msrb.mxu1 %v755_v63  ;;  %v420_v44 = vld [vmem:[#allocation2 + $0xa90] sm:$0xff] }
  0xce   :  { %v1011_v1 = vld [vmem:[#allocation2 + $0x1d08] sm:$0xff]  ;;  %1436 = vmatpush.msrb.mxu2 %v883_v0  ;;  %1321 = vmatmul.f32.vlgmr.msra.gmra.mxu0 %v2964_v2  ;;  %v444_v2 = vld [vmem:[#allocation2 + $0xb50] sm:$0xff] }
  0xcf   :  { %v619_v6 = vld [vmem:[#allocation2 + $0x10c8] sm:$0xff]  ;;  %1456 = vmatpush.msrb.mxu3 %v1011_v1  ;;  %1341 = vmatmul.f32.vlgmr.msra.gmra.mxu1 %v2966_v3  ;;  %v572_v3 = vld [vmem:[#allocation2 + $0xf50] sm:$0xff] }
  0xd0   :  { %v747_v7 = vld [vmem:[#allocation2 + $0x14c8] sm:$0xff]  ;;  %1397 = vmatpush.msrb.mxu0 %v619_v6  ;;  %1361 = vmatmul.f32.vlgmr.msra.gmra.mxu2 %v2968_v4  ;;  %v308_v4 = vld [vmem:[#allocation2 + $0x710] sm:$0xff] }
  0xd1   :  { %v875_v8 = vld [vmem:[#allocation2 + $0x18c8] sm:$0xff]  ;;  %1417 = vmatpush.msrb.mxu1 %v747_v7  ;;  %1381 = vmatmul.f32.vlgmr.msra.gmra.mxu3 %v2970_v5  ;;  %v436_v5 = vld [vmem:[#allocation2 + $0xb10] sm:$0xff] }
  0xd2   :  { %v1003_v9 = vld [vmem:[#allocation2 + $0x1cc8] sm:$0xff]  ;;  %1437 = vmatpush.msrb.mxu2 %v875_v8  ;;  %v548_v45 = vld [vmem:[#allocation2 + $0xe90] sm:$0xff] }
  0xd3   :  { %v611_v10 = vld [vmem:[#allocation2 + $0x1088] sm:$0xff]  ;;  %1457 = vmatpush.msrb.mxu3 %v1003_v9  ;;  %v156_v46 = vld [vmem:[#allocation2 + $0x250] sm:$0xff] }
  0xd4   :  { %v739_v11 = vld [vmem:[#allocation2 + $0x1488] sm:$0xff]  ;;  %1398 = vmatpush.msrb.mxu0 %v611_v10  ;;  %v284_v47 = vld [vmem:[#allocation2 + $0x650] sm:$0xff] }
  0xd5   :  { %v867_v12 = vld [vmem:[#allocation2 + $0x1888] sm:$0xff]  ;;  %1418 = vmatpush.msrb.mxu1 %v739_v11  ;;  %v412_v48 = vld [vmem:[#allocation2 + $0xa50] sm:$0xff] }
  0xd6   :  { %v995_v13 = vld [vmem:[#allocation2 + $0x1c88] sm:$0xff]  ;;  %1438 = vmatpush.msrb.mxu2 %v867_v12  ;;  %v540_v49 = vld [vmem:[#allocation2 + $0xe50] sm:$0xff] }
  0xd7   :  { %v603_v14 = vld [vmem:[#allocation2 + $0x1048] sm:$0xff]  ;;  %1458 = vmatpush.msrb.mxu3 %v995_v13  ;;  %v276_v50 = vld [vmem:[#allocation2 + $0x610] sm:$0xff] }
  0xd8   :  { %v731_v15 = vld [vmem:[#allocation2 + $0x1448] sm:$0xff]  ;;  %1399 = vmatpush.msrb.mxu0 %v603_v14  ;;  %v404_v51 = vld [vmem:[#allocation2 + $0xa10] sm:$0xff] }
  0xd9   :  { %v859_v16 = vld [vmem:[#allocation2 + $0x1848] sm:$0xff]  ;;  %1419 = vmatpush.msrb.mxu1 %v731_v15  ;;  %v532_v52 = vld [vmem:[#allocation2 + $0xe10] sm:$0xff] }
  0xda   :  { %v987_v17 = vld [vmem:[#allocation2 + $0x1c48] sm:$0xff]  ;;  %1439 = vmatpush.msrb.mxu2 %v859_v16  ;;  %v396_v53 = vld [vmem:[#allocation2 + $0x9d0] sm:$0xff] }
  0xdb   :  { %v595_v18 = vld [vmem:[#allocation2 + $0x1008] sm:$0xff]  ;;  %1459 = vmatpush.msrb.mxu3 %v987_v17  ;;  %v524_v54 = vld [vmem:[#allocation2 + $0xdd0] sm:$0xff] }
  0xdc   :  { %v723_v19 = vld [vmem:[#allocation2 + $0x1408] sm:$0xff]  ;;  %1400 = vmatpush.msrb.mxu0 %v595_v18  ;;  %v132_v55 = vld [vmem:[#allocation2 + $0x190] sm:$0xff] }
  0xdd   :  { %v851_v20 = vld [vmem:[#allocation2 + $0x1808] sm:$0xff]  ;;  %1420 = vmatpush.msrb.mxu1 %v723_v19  ;;  %1401 = vmatmul.f32.vlgmr.msrb.gmra.mxu0 %v2978_v27  ;;  %v140_v27 = vld [vmem:[#allocation2 + $0x1d0] sm:$0xff] }
  0xde   :  { %v979_v21 = vld [vmem:[#allocation2 + $0x1c08] sm:$0xff]  ;;  %1440 = vmatpush.msrb.mxu2 %v851_v20  ;;  %1465 = vmatpush.msra.mxu0 %v204_v23  ;;  %v260_v56 = vld [vmem:[#allocation2 + $0x590] sm:$0xff] }
  0xdf   :  { %1460 = vmatpush.msrb.mxu3 %v979_v21  ;;  %1485 = vmatpush.msra.mxu1 %v332_v24  ;;  %v516_v57 = vld [vmem:[#allocation2 + $0xd90] sm:$0xff] }
  0xe0   :  { %1505 = vmatpush.msra.mxu2 %v460_v25  ;;  %1466 = vmatpush.msra.mxu0 %v196_v29  ;;  %v124_v58 = vld [vmem:[#allocation2 + $0x150] sm:$0xff] }
  0xe1   :  { %1525 = vmatpush.msra.mxu3 %v588_v26  ;;  %1486 = vmatpush.msra.mxu1 %v324_v30  ;;  %v252_v59 = vld [vmem:[#allocation2 + $0x550] sm:$0xff] }
  0xe2   :  { %1506 = vmatpush.msra.mxu2 %v452_v31  ;;  %1467 = vmatpush.msra.mxu0 %v188_v34  ;;  %v380_v60 = vld [vmem:[#allocation2 + $0x950] sm:$0xff] }
  0xe3   :  { %1526 = vmatpush.msra.mxu3 %v580_v32  ;;  %1487 = vmatpush.msra.mxu1 %v316_v35  ;;  %v508_v61 = vld [vmem:[#allocation2 + $0xd50] sm:$0xff] }
  0xe4   :  { %1507 = vmatpush.msra.mxu2 %v444_v2  ;;  %1468 = vmatpush.msra.mxu0 %v180_v36  ;;  %v116_v62 = vld [vmem:[#allocation2 + $0x110] sm:$0xff] }
  0xe5   :  { %1527 = vmatpush.msra.mxu3 %v572_v3  ;;  %1488 = vmatpush.msra.mxu1 %v308_v4  ;;  %v244_v63 = vld [vmem:[#allocation2 + $0x510] sm:$0xff] }
  0xe6   :  { %1508 = vmatpush.msra.mxu2 %v436_v5  ;;  %1469 = vmatpush.msra.mxu0 %v172_v38  ;;  %v372_v0 = vld [vmem:[#allocation2 + $0x910] sm:$0xff] }
  0xe7   :  { %1528 = vmatpush.msra.mxu3 %v564_v37  ;;  %1441 = vmatmul.f32.vlgmr.msrb.gmra.mxu2 %v2976_v22  ;;  %v148_v22 = vld [vmem:[#allocation2 + $0x210] sm:$0xff] }
  0xe8   :  { %1489 = vmatpush.msra.mxu1 %v300_v39  ;;  %1509 = vmatpush.msra.mxu2 %v428_v40  ;;  %v500_v1 = vld [vmem:[#allocation2 + $0xd10] sm:$0xff] }
  0xe9   :  { %1529 = vmatpush.msra.mxu3 %v556_v41  ;;  %1470 = vmatpush.msra.mxu0 %v164_v42  ;;  %v108_v6 = vld [vmem:[#allocation2 + $0xd0] sm:$0xff] }
  0xea   :  { %1461 = vmatmul.f32.vlgmr.msrb.gmra.mxu3 %v2981_v28  ;;  %1490 = vmatpush.msra.mxu1 %v292_v43  ;;  %v268_v28 = vld [vmem:[#allocation2 + $0x5d0] sm:$0xff] }
  0xeb   :  { %1510 = vmatpush.msra.mxu2 %v420_v44  ;;  %1530 = vmatpush.msra.mxu3 %v548_v45  ;;  %v236_v7 = vld [vmem:[#allocation2 + $0x4d0] sm:$0xff] }
  0xec   :  { %1421 = vmatmul.f32.vlgmr.msrb.gmra.mxu1 %v2984_v33  ;;  %1471 = vmatpush.msra.mxu0 %v156_v46  ;;  %v388_v33 = vld [vmem:[#allocation2 + $0x990] sm:$0xff] }
  0xed   :  { %1491 = vmatpush.msra.mxu1 %v284_v47  ;;  %1511 = vmatpush.msra.mxu2 %v412_v48  ;;  %v364_v8 = vld [vmem:[#allocation2 + $0x8d0] sm:$0xff] }
  0xee   :  { %1531 = vmatpush.msra.mxu3 %v540_v49  ;;  %1472 = vmatpush.msra.mxu0 %v148_v22  ;;  %v492_v9 = vld [vmem:[#allocation2 + $0xcd0] sm:$0xff] }
  0xef   :  { %1492 = vmatpush.msra.mxu1 %v276_v50  ;;  %1512 = vmatpush.msra.mxu2 %v404_v51  ;;  %v100_v10 = vld [vmem:[#allocation2 + $0x90] sm:$0xff] }
  0xf0   :  { %1532 = vmatpush.msra.mxu3 %v532_v52  ;;  %1473 = vmatpush.msra.mxu0 %v140_v27  ;;  %v228_v11 = vld [vmem:[#allocation2 + $0x490] sm:$0xff] }
  0xf1   :  { %1493 = vmatpush.msra.mxu1 %v268_v28  ;;  %1513 = vmatpush.msra.mxu2 %v396_v53  ;;  %v356_v12 = vld [vmem:[#allocation2 + $0x890] sm:$0xff] }
  0xf2   :  { %1533 = vmatpush.msra.mxu3 %v524_v54  ;;  %1474 = vmatpush.msra.mxu0 %v132_v55  ;;  %v484_v13 = vld [vmem:[#allocation2 + $0xc90] sm:$0xff] }
  0xf3   :  { %1494 = vmatpush.msra.mxu1 %v260_v56  ;;  %1514 = vmatpush.msra.mxu2 %v388_v33  ;;  %v92_v14 = vld [vmem:[#allocation2 + $0x50] sm:$0xff] }
  0xf4   :  { %1534 = vmatpush.msra.mxu3 %v516_v57  ;;  %1475 = vmatpush.msra.mxu0 %v124_v58  ;;  %v220_v15 = vld [vmem:[#allocation2 + $0x450] sm:$0xff] }
  0xf5   :  { %1495 = vmatpush.msra.mxu1 %v252_v59  ;;  %1515 = vmatpush.msra.mxu2 %v380_v60  ;;  %v348_v16 = vld [vmem:[#allocation2 + $0x850] sm:$0xff] }
  0xf6   :  { %1535 = vmatpush.msra.mxu3 %v508_v61  ;;  %1476 = vmatpush.msra.mxu0 %v116_v62  ;;  %v476_v17 = vld [vmem:[#allocation2 + $0xc50] sm:$0xff] }
  0xf7   :  { %1496 = vmatpush.msra.mxu1 %v244_v63  ;;  %1516 = vmatpush.msra.mxu2 %v372_v0  ;;  %v84_v18 = vld [vmem:[#allocation2 + $0x10] sm:$0xff] }
  0xf8   :  { %1536 = vmatpush.msra.mxu3 %v500_v1  ;;  %1477 = vmatpush.msra.mxu0 %v108_v6  ;;  %v212_v19 = vld [vmem:[#allocation2 + $0x410] sm:$0xff] }
  0xf9   :  { %1497 = vmatpush.msra.mxu1 %v236_v7  ;;  %1517 = vmatpush.msra.mxu2 %v364_v8  ;;  %v340_v20 = vld [vmem:[#allocation2 + $0x810] sm:$0xff] }
  0xfa   :  { %1537 = vmatpush.msra.mxu3 %v492_v9  ;;  %1478 = vmatpush.msra.mxu0 %v100_v10  ;;  %v468_v21 = vld [vmem:[#allocation2 + $0xc10] sm:$0xff] }
  0xfb   :  { %1498 = vmatpush.msra.mxu1 %v228_v11  ;;  %1518 = vmatpush.msra.mxu2 %v356_v12  ;;  %v716_v23 = vld [vmem:[#allocation2 + $0x13d0] sm:$0xff] }
  0xfc   :  { %1538 = vmatpush.msra.mxu3 %v484_v13  ;;  %1479 = vmatpush.msra.mxu0 %v92_v14  ;;  %v844_v24 = vld [vmem:[#allocation2 + $0x17d0] sm:$0xff] }
  0xfd   :  { %1499 = vmatpush.msra.mxu1 %v220_v15  ;;  %1519 = vmatpush.msra.mxu2 %v348_v16  ;;  %v972_v25 = vld [vmem:[#allocation2 + $0x1bd0] sm:$0xff] }
  0xfe   :  { %1539 = vmatpush.msra.mxu3 %v476_v17  ;;  %1480 = vmatpush.msra.mxu0 %v84_v18  ;;  %v1100_v26 = vld [vmem:[#allocation2 + $0x1fd0] sm:$0xff] }
  0xff   :  { %1500 = vmatpush.msra.mxu1 %v212_v19  ;;  %1520 = vmatpush.msra.mxu2 %v340_v20  ;;  %v708_v29 = vld [vmem:[#allocation2 + $0x1390] sm:$0xff] }
 0x100   :  { %1540 = vmatpush.msra.mxu3 %v468_v21  ;;  %v836_v30 = vld [vmem:[#allocation2 + $0x1790] sm:$0xff]  ;;  %1545 = vmatpush.msrb.mxu0 %v716_v23  ;;  %v205_v23 = vld [vmem:[#allocation2 + $0x3d8] sm:$0xff] }
 0x101   :  { %1565 = vmatpush.msrb.mxu1 %v844_v24  ;;  %v964_v31 = vld [vmem:[#allocation2 + $0x1b90] sm:$0xff]  ;;  %1585 = vmatpush.msrb.mxu2 %v972_v25  ;;  %v333_v24 = vld [vmem:[#allocation2 + $0x7d8] sm:$0xff] }
 0x102   :  { %v1092_v32 = vld [vmem:[#allocation2 + $0x1f90] sm:$0xff]  ;;  %1605 = vmatpush.msrb.mxu3 %v1100_v26  ;;  %1546 = vmatpush.msrb.mxu0 %v708_v29  ;;  %v2996_v25 = vld.sshfl [vmem:[#allocation1] sm:$0xff pattern:$0x73625140] }
 0x103   :  { %v700_v34 = vld [vmem:[#allocation2 + $0x1350] sm:$0xff]  ;;  %1566 = vmatpush.msrb.mxu1 %v836_v30  ;;  %1586 = vmatpush.msrb.mxu2 %v964_v31  ;;  %v2999_v26 = vld.sshfl [vmem:[#allocation1 + $0x8] sm:$0xff pattern:$0x73625140]  ;;  %v461_v29 = vld [vmem:[#allocation2 + $0xbd8] sm:$0xff] }
 0x104   :  { %v828_v35 = vld [vmem:[#allocation2 + $0x1750] sm:$0xff]  ;;  %1606 = vmatpush.msrb.mxu3 %v1092_v32  ;;  %1547 = vmatpush.msrb.mxu0 %v700_v34  ;;  %v589_v30 = vld [vmem:[#allocation2 + $0xfd8] sm:$0xff]  ;;  %v3002_v31 = vld.sshfl [vmem:[#allocation1 + $0x10] sm:$0xff pattern:$0x73625140] }
 0x105   :  { %v956_v2 = vld [vmem:[#allocation2 + $0x1b50] sm:$0xff]  ;;  %1567 = vmatpush.msrb.mxu1 %v828_v35  ;;  %1481 = vmatmul.f32.vlgmr.msra.gmra.mxu0 %v2996_v25  ;;  %v197_v34 = vld [vmem:[#allocation2 + $0x398] sm:$0xff] }
 0x106   :  { %v1084_v3 = vld [vmem:[#allocation2 + $0x1f50] sm:$0xff]  ;;  %1587 = vmatpush.msrb.mxu2 %v956_v2  ;;  %1501 = vmatmul.f32.vlgmr.msra.gmra.mxu1 %v2999_v26  ;;  %v325_v35 = vld [vmem:[#allocation2 + $0x798] sm:$0xff] }
 0x107   :  { %v692_v36 = vld [vmem:[#allocation2 + $0x1310] sm:$0xff]  ;;  %1607 = vmatpush.msrb.mxu3 %v1084_v3  ;;  %1521 = vmatmul.f32.vlgmr.msra.gmra.mxu2 %v3002_v31  ;;  %v453_v2 = vld [vmem:[#allocation2 + $0xb98] sm:$0xff] }
 0x108   :  { %v820_v4 = vld [vmem:[#allocation2 + $0x1710] sm:$0xff]  ;;  %1548 = vmatpush.msrb.mxu0 %v692_v36  ;;  %v581_v3 = vld [vmem:[#allocation2 + $0xf98] sm:$0xff] }
 0x109   :  { %v948_v5 = vld [vmem:[#allocation2 + $0x1b10] sm:$0xff]  ;;  %1568 = vmatpush.msrb.mxu1 %v820_v4  ;;  %v189_v36 = vld [vmem:[#allocation2 + $0x358] sm:$0xff] }
 0x10a   :  { %v1076_v37 = vld [vmem:[#allocation2 + $0x1f10] sm:$0xff]  ;;  %1588 = vmatpush.msrb.mxu2 %v948_v5  ;;  %v317_v4 = vld [vmem:[#allocation2 + $0x758] sm:$0xff] }
 0x10b   :  { %v684_v38 = vld [vmem:[#allocation2 + $0x12d0] sm:$0xff]  ;;  %1608 = vmatpush.msrb.mxu3 %v1076_v37  ;;  %v445_v5 = vld [vmem:[#allocation2 + $0xb58] sm:$0xff] }
 0x10c   :  { %v812_v39 = vld [vmem:[#allocation2 + $0x16d0] sm:$0xff]  ;;  %1549 = vmatpush.msrb.mxu0 %v684_v38  ;;  %v573_v37 = vld [vmem:[#allocation2 + $0xf58] sm:$0xff] }
 0x10d   :  { %v940_v40 = vld [vmem:[#allocation2 + $0x1ad0] sm:$0xff]  ;;  %1569 = vmatpush.msrb.mxu1 %v812_v39  ;;  %v181_v38 = vld [vmem:[#allocation2 + $0x318] sm:$0xff] }
 0x10e   :  { %v1068_v41 = vld [vmem:[#allocation2 + $0x1ed0] sm:$0xff]  ;;  %1589 = vmatpush.msrb.mxu2 %v940_v40  ;;  %v309_v39 = vld [vmem:[#allocation2 + $0x718] sm:$0xff] }
 0x10f   :  { %v676_v42 = vld [vmem:[#allocation2 + $0x1290] sm:$0xff]  ;;  %1609 = vmatpush.msrb.mxu3 %v1068_v41  ;;  %v437_v40 = vld [vmem:[#allocation2 + $0xb18] sm:$0xff] }
 0x110   :  { %v804_v43 = vld [vmem:[#allocation2 + $0x1690] sm:$0xff]  ;;  %1550 = vmatpush.msrb.mxu0 %v676_v42  ;;  %v565_v41 = vld [vmem:[#allocation2 + $0xf18] sm:$0xff] }
 0x111   :  { %v932_v44 = vld [vmem:[#allocation2 + $0x1a90] sm:$0xff]  ;;  %1570 = vmatpush.msrb.mxu1 %v804_v43  ;;  %v173_v42 = vld [vmem:[#allocation2 + $0x2d8] sm:$0xff] }
 0x112   :  { %v1060_v45 = vld [vmem:[#allocation2 + $0x1e90] sm:$0xff]  ;;  %1590 = vmatpush.msrb.mxu2 %v932_v44  ;;  %v301_v43 = vld [vmem:[#allocation2 + $0x6d8] sm:$0xff] }
 0x113   :  { %v668_v46 = vld [vmem:[#allocation2 + $0x1250] sm:$0xff]  ;;  %1610 = vmatpush.msrb.mxu3 %v1060_v45  ;;  %v429_v44 = vld [vmem:[#allocation2 + $0xad8] sm:$0xff] }
 0x114   :  { %v796_v47 = vld [vmem:[#allocation2 + $0x1650] sm:$0xff]  ;;  %1551 = vmatpush.msrb.mxu0 %v668_v46  ;;  %v557_v45 = vld [vmem:[#allocation2 + $0xed8] sm:$0xff]  ;;  %v3008_v46 = vld.sshfl [vmem:[#allocation1 + $0x30] sm:$0xff pattern:$0x73625140] }
 0x115   :  { %v924_v48 = vld [vmem:[#allocation2 + $0x1a50] sm:$0xff]  ;;  %1571 = vmatpush.msrb.mxu1 %v796_v47  ;;  %v165_v47 = vld [vmem:[#allocation2 + $0x298] sm:$0xff] }
 0x116   :  { %v1052_v49 = vld [vmem:[#allocation2 + $0x1e50] sm:$0xff]  ;;  %1591 = vmatpush.msrb.mxu2 %v924_v48  ;;  %v293_v48 = vld [vmem:[#allocation2 + $0x698] sm:$0xff] }
 0x117   :  { %v660_v22 = vld [vmem:[#allocation2 + $0x1210] sm:$0xff]  ;;  %1611 = vmatpush.msrb.mxu3 %v1052_v49  ;;  %v421_v49 = vld [vmem:[#allocation2 + $0xa98] sm:$0xff] }
 0x118   :  { %v788_v50 = vld [vmem:[#allocation2 + $0x1610] sm:$0xff]  ;;  %1552 = vmatpush.msrb.mxu0 %v660_v22  ;;  %v3011_v22 = vld.sshfl [vmem:[#allocation1 + $0x20] sm:$0xff pattern:$0x73625140] }
 0x119   :  { %v916_v51 = vld [vmem:[#allocation2 + $0x1a10] sm:$0xff]  ;;  %1572 = vmatpush.msrb.mxu1 %v788_v50  ;;  %v549_v50 = vld [vmem:[#allocation2 + $0xe98] sm:$0xff] }
 0x11a   :  { %v1044_v52 = vld [vmem:[#allocation2 + $0x1e10] sm:$0xff]  ;;  %1592 = vmatpush.msrb.mxu2 %v916_v51 }
 0x11b   :  { %v652_v27 = vld [vmem:[#allocation2 + $0x11d0] sm:$0xff]  ;;  %1612 = vmatpush.msrb.mxu3 %v1044_v52  ;;  %v157_v52 = vld [vmem:[#allocation2 + $0x258] sm:$0xff] }
 0x11c   :  { %v780_v28 = vld [vmem:[#allocation2 + $0x15d0] sm:$0xff]  ;;  %1553 = vmatpush.msrb.mxu0 %v652_v27  ;;  %v285_v27 = vld [vmem:[#allocation2 + $0x658] sm:$0xff] }
 0x11d   :  { %v908_v53 = vld [vmem:[#allocation2 + $0x19d0] sm:$0xff]  ;;  %1573 = vmatpush.msrb.mxu1 %v780_v28  ;;  %v413_v28 = vld [vmem:[#allocation2 + $0xa58] sm:$0xff] }
 0x11e   :  { %v1036_v54 = vld [vmem:[#allocation2 + $0x1dd0] sm:$0xff]  ;;  %1593 = vmatpush.msrb.mxu2 %v908_v53  ;;  %v541_v53 = vld [vmem:[#allocation2 + $0xe58] sm:$0xff] }
 0x11f   :  { %v644_v55 = vld [vmem:[#allocation2 + $0x1190] sm:$0xff]  ;;  %1613 = vmatpush.msrb.mxu3 %v1036_v54  ;;  %v3017_v54 = vld.sshfl [vmem:[#allocation1 + $0x28] sm:$0xff pattern:$0x73625140] }
 0x120   :  { %v772_v56 = vld [vmem:[#allocation2 + $0x1590] sm:$0xff]  ;;  %1554 = vmatpush.msrb.mxu0 %v644_v55  ;;  %v149_v55 = vld [vmem:[#allocation2 + $0x218] sm:$0xff] }
 0x121   :  { %v900_v33 = vld [vmem:[#allocation2 + $0x1990] sm:$0xff]  ;;  %1574 = vmatpush.msrb.mxu1 %v772_v56  ;;  %v277_v56 = vld [vmem:[#allocation2 + $0x618] sm:$0xff] }
 0x122   :  { %v1028_v57 = vld [vmem:[#allocation2 + $0x1d90] sm:$0xff]  ;;  %1594 = vmatpush.msrb.mxu2 %v900_v33  ;;  %v405_v33 = vld [vmem:[#allocation2 + $0xa18] sm:$0xff] }
 0x123   :  { %v636_v58 = vld [vmem:[#allocation2 + $0x1150] sm:$0xff]  ;;  %1614 = vmatpush.msrb.mxu3 %v1028_v57  ;;  %v533_v57 = vld [vmem:[#allocation2 + $0xe18] sm:$0xff] }
 0x124   :  { %v764_v59 = vld [vmem:[#allocation2 + $0x1550] sm:$0xff]  ;;  %1555 = vmatpush.msrb.mxu0 %v636_v58  ;;  %v141_v58 = vld [vmem:[#allocation2 + $0x1d8] sm:$0xff] }
 0x125   :  { %v892_v60 = vld [vmem:[#allocation2 + $0x1950] sm:$0xff]  ;;  %1575 = vmatpush.msrb.mxu1 %v764_v59  ;;  %v269_v59 = vld [vmem:[#allocation2 + $0x5d8] sm:$0xff] }
 0x126   :  { %v1020_v61 = vld [vmem:[#allocation2 + $0x1d50] sm:$0xff]  ;;  %1595 = vmatpush.msrb.mxu2 %v892_v60  ;;  %v397_v60 = vld [vmem:[#allocation2 + $0x9d8] sm:$0xff] }
 0x127   :  { %v628_v62 = vld [vmem:[#allocation2 + $0x1110] sm:$0xff]  ;;  %1615 = vmatpush.msrb.mxu3 %v1020_v61  ;;  %v525_v61 = vld [vmem:[#allocation2 + $0xdd8] sm:$0xff] }
 0x128   :  { %v756_v63 = vld [vmem:[#allocation2 + $0x1510] sm:$0xff]  ;;  %1556 = vmatpush.msrb.mxu0 %v628_v62  ;;  %v133_v62 = vld [vmem:[#allocation2 + $0x198] sm:$0xff] }
 0x129   :  { %v884_v0 = vld [vmem:[#allocation2 + $0x1910] sm:$0xff]  ;;  %1576 = vmatpush.msrb.mxu1 %v756_v63  ;;  %v261_v63 = vld [vmem:[#allocation2 + $0x598] sm:$0xff] }
 0x12a   :  { %v1012_v1 = vld [vmem:[#allocation2 + $0x1d10] sm:$0xff]  ;;  %1596 = vmatpush.msrb.mxu2 %v884_v0  ;;  %v389_v0 = vld [vmem:[#allocation2 + $0x998] sm:$0xff] }
 0x12b   :  { %v620_v6 = vld [vmem:[#allocation2 + $0x10d0] sm:$0xff]  ;;  %1616 = vmatpush.msrb.mxu3 %v1012_v1  ;;  %v517_v1 = vld [vmem:[#allocation2 + $0xd98] sm:$0xff] }
 0x12c   :  { %v748_v7 = vld [vmem:[#allocation2 + $0x14d0] sm:$0xff]  ;;  %1557 = vmatpush.msrb.mxu0 %v620_v6  ;;  %v125_v6 = vld [vmem:[#allocation2 + $0x158] sm:$0xff] }
 0x12d   :  { %v876_v8 = vld [vmem:[#allocation2 + $0x18d0] sm:$0xff]  ;;  %1577 = vmatpush.msrb.mxu1 %v748_v7  ;;  %v253_v7 = vld [vmem:[#allocation2 + $0x558] sm:$0xff] }
 0x12e   :  { %v1004_v9 = vld [vmem:[#allocation2 + $0x1cd0] sm:$0xff]  ;;  %1597 = vmatpush.msrb.mxu2 %v876_v8  ;;  %v381_v8 = vld [vmem:[#allocation2 + $0x958] sm:$0xff] }
 0x12f   :  { %v612_v10 = vld [vmem:[#allocation2 + $0x1090] sm:$0xff]  ;;  %1617 = vmatpush.msrb.mxu3 %v1004_v9  ;;  %v509_v9 = vld [vmem:[#allocation2 + $0xd58] sm:$0xff] }
 0x130   :  { %v740_v11 = vld [vmem:[#allocation2 + $0x1490] sm:$0xff]  ;;  %1558 = vmatpush.msrb.mxu0 %v612_v10  ;;  %v117_v10 = vld [vmem:[#allocation2 + $0x118] sm:$0xff] }
 0x131   :  { %v868_v12 = vld [vmem:[#allocation2 + $0x1890] sm:$0xff]  ;;  %1578 = vmatpush.msrb.mxu1 %v740_v11  ;;  %v245_v11 = vld [vmem:[#allocation2 + $0x518] sm:$0xff] }
 0x132   :  { %v996_v13 = vld [vmem:[#allocation2 + $0x1c90] sm:$0xff]  ;;  %1598 = vmatpush.msrb.mxu2 %v868_v12  ;;  %v373_v12 = vld [vmem:[#allocation2 + $0x918] sm:$0xff] }
 0x133   :  { %v604_v14 = vld [vmem:[#allocation2 + $0x1050] sm:$0xff]  ;;  %1618 = vmatpush.msrb.mxu3 %v996_v13  ;;  %v501_v13 = vld [vmem:[#allocation2 + $0xd18] sm:$0xff] }
 0x134   :  { %v732_v15 = vld [vmem:[#allocation2 + $0x1450] sm:$0xff]  ;;  %1559 = vmatpush.msrb.mxu0 %v604_v14  ;;  %v109_v14 = vld [vmem:[#allocation2 + $0xd8] sm:$0xff] }
 0x135   :  { %v860_v16 = vld [vmem:[#allocation2 + $0x1850] sm:$0xff]  ;;  %1579 = vmatpush.msrb.mxu1 %v732_v15  ;;  %v237_v15 = vld [vmem:[#allocation2 + $0x4d8] sm:$0xff] }
 0x136   :  { %v988_v17 = vld [vmem:[#allocation2 + $0x1c50] sm:$0xff]  ;;  %1599 = vmatpush.msrb.mxu2 %v860_v16  ;;  %v365_v16 = vld [vmem:[#allocation2 + $0x8d8] sm:$0xff] }
 0x137   :  { %v596_v18 = vld [vmem:[#allocation2 + $0x1010] sm:$0xff]  ;;  %1619 = vmatpush.msrb.mxu3 %v988_v17  ;;  %v493_v17 = vld [vmem:[#allocation2 + $0xcd8] sm:$0xff] }
 0x138   :  { %v724_v19 = vld [vmem:[#allocation2 + $0x1410] sm:$0xff]  ;;  %1560 = vmatpush.msrb.mxu0 %v596_v18  ;;  %v101_v18 = vld [vmem:[#allocation2 + $0x98] sm:$0xff] }
 0x139   :  { %v852_v20 = vld [vmem:[#allocation2 + $0x1810] sm:$0xff]  ;;  %1580 = vmatpush.msrb.mxu1 %v724_v19  ;;  %1561 = vmatmul.f32.vlgmr.msrb.gmra.mxu0 %v3011_v22  ;;  %v229_v19 = vld [vmem:[#allocation2 + $0x498] sm:$0xff] }
 0x13a   :  { %v980_v21 = vld [vmem:[#allocation2 + $0x1c10] sm:$0xff]  ;;  %1600 = vmatpush.msrb.mxu2 %v852_v20  ;;  %1625 = vmatpush.msra.mxu0 %v205_v23  ;;  %v357_v20 = vld [vmem:[#allocation2 + $0x898] sm:$0xff] }
 0x13b   :  { %1620 = vmatpush.msrb.mxu3 %v980_v21  ;;  %v3005_v32 = vld.sshfl [vmem:[#allocation1 + $0x18] sm:$0xff pattern:$0x73625140]  ;;  %1645 = vmatpush.msra.mxu1 %v333_v24  ;;  %v485_v21 = vld [vmem:[#allocation2 + $0xc98] sm:$0xff] }
 0x13c   :  { %1541 = vmatmul.f32.vlgmr.msra.gmra.mxu3 %v3005_v32  ;;  %1665 = vmatpush.msra.mxu2 %v461_v29  ;;  %v3014_v51 = vld.sshfl [vmem:[#allocation1 + $0x38] sm:$0xff pattern:$0x73625140]  ;;  %v93_v23 = vld [vmem:[#allocation2 + $0x58] sm:$0xff] }
 0x13d   :  { %1685 = vmatpush.msra.mxu3 %v589_v30  ;;  %1626 = vmatpush.msra.mxu0 %v197_v34  ;;  %v221_v24 = vld [vmem:[#allocation2 + $0x458] sm:$0xff] }
 0x13e   :  { %1646 = vmatpush.msra.mxu1 %v325_v35  ;;  %1666 = vmatpush.msra.mxu2 %v453_v2  ;;  %v349_v29 = vld [vmem:[#allocation2 + $0x858] sm:$0xff] }
 0x13f   :  { %1686 = vmatpush.msra.mxu3 %v581_v3  ;;  %1627 = vmatpush.msra.mxu0 %v189_v36  ;;  %v477_v30 = vld [vmem:[#allocation2 + $0xc58] sm:$0xff] }
 0x140   :  { %1647 = vmatpush.msra.mxu1 %v317_v4  ;;  %1667 = vmatpush.msra.mxu2 %v445_v5  ;;  %v85_v34 = vld [vmem:[#allocation2 + $0x18] sm:$0xff] }
 0x141   :  { %1687 = vmatpush.msra.mxu3 %v573_v37  ;;  %1628 = vmatpush.msra.mxu0 %v181_v38  ;;  %v213_v35 = vld [vmem:[#allocation2 + $0x418] sm:$0xff] }
 0x142   :  { %1648 = vmatpush.msra.mxu1 %v309_v39  ;;  %1668 = vmatpush.msra.mxu2 %v437_v40  ;;  %v341_v2 = vld [vmem:[#allocation2 + $0x818] sm:$0xff] }
 0x143   :  { %1688 = vmatpush.msra.mxu3 %v565_v41  ;;  %1601 = vmatmul.f32.vlgmr.msrb.gmra.mxu2 %v3008_v46  ;;  %v469_v3 = vld [vmem:[#allocation2 + $0xc18] sm:$0xff] }
 0x144   :  { %1629 = vmatpush.msra.mxu0 %v173_v42  ;;  %1649 = vmatpush.msra.mxu1 %v301_v43  ;;  %v717_v36 = vld [vmem:[#allocation2 + $0x13d8] sm:$0xff] }
 0x145   :  { %1669 = vmatpush.msra.mxu2 %v429_v44  ;;  %1689 = vmatpush.msra.mxu3 %v557_v45  ;;  %v845_v4 = vld [vmem:[#allocation2 + $0x17d8] sm:$0xff] }
 0x146   :  { %1621 = vmatmul.f32.vlgmr.msrb.gmra.mxu3 %v3014_v51  ;;  %1630 = vmatpush.msra.mxu0 %v165_v47  ;;  %v973_v5 = vld [vmem:[#allocation2 + $0x1bd8] sm:$0xff] }
 0x147   :  { %1650 = vmatpush.msra.mxu1 %v293_v48  ;;  %1670 = vmatpush.msra.mxu2 %v421_v49  ;;  %v1101_v37 = vld [vmem:[#allocation2 + $0x1fd8] sm:$0xff] }
 0x148   :  { %1690 = vmatpush.msra.mxu3 %v549_v50  ;;  %1581 = vmatmul.f32.vlgmr.msrb.gmra.mxu1 %v3017_v54  ;;  %v709_v38 = vld [vmem:[#allocation2 + $0x1398] sm:$0xff] }
 0x149   :  { %1631 = vmatpush.msra.mxu0 %v157_v52  ;;  %1651 = vmatpush.msra.mxu1 %v285_v27  ;;  %v837_v39 = vld [vmem:[#allocation2 + $0x1798] sm:$0xff] }
 0x14a   :  { %1671 = vmatpush.msra.mxu2 %v413_v28  ;;  %1691 = vmatpush.msra.mxu3 %v541_v53  ;;  %v965_v40 = vld [vmem:[#allocation2 + $0x1b98] sm:$0xff] }
 0x14b   :  { %1632 = vmatpush.msra.mxu0 %v149_v55  ;;  %1652 = vmatpush.msra.mxu1 %v277_v56  ;;  %v1093_v41 = vld [vmem:[#allocation2 + $0x1f98] sm:$0xff] }
 0x14c   :  { %1672 = vmatpush.msra.mxu2 %v405_v33  ;;  %1692 = vmatpush.msra.mxu3 %v533_v57  ;;  %v701_v42 = vld [vmem:[#allocation2 + $0x1358] sm:$0xff] }
 0x14d   :  { %1633 = vmatpush.msra.mxu0 %v141_v58  ;;  %1653 = vmatpush.msra.mxu1 %v269_v59  ;;  %v829_v43 = vld [vmem:[#allocation2 + $0x1758] sm:$0xff] }
 0x14e   :  { %1673 = vmatpush.msra.mxu2 %v397_v60  ;;  %1693 = vmatpush.msra.mxu3 %v525_v61  ;;  %v957_v44 = vld [vmem:[#allocation2 + $0x1b58] sm:$0xff] }
 0x14f   :  { %1634 = vmatpush.msra.mxu0 %v133_v62  ;;  %1654 = vmatpush.msra.mxu1 %v261_v63  ;;  %v1085_v45 = vld [vmem:[#allocation2 + $0x1f58] sm:$0xff] }
 0x150   :  { %1674 = vmatpush.msra.mxu2 %v389_v0  ;;  %1694 = vmatpush.msra.mxu3 %v517_v1  ;;  %v693_v47 = vld [vmem:[#allocation2 + $0x1318] sm:$0xff] }
 0x151   :  { %1635 = vmatpush.msra.mxu0 %v125_v6  ;;  %1655 = vmatpush.msra.mxu1 %v253_v7  ;;  %v821_v48 = vld [vmem:[#allocation2 + $0x1718] sm:$0xff] }
 0x152   :  { %1675 = vmatpush.msra.mxu2 %v381_v8  ;;  %1695 = vmatpush.msra.mxu3 %v509_v9  ;;  %v949_v49 = vld [vmem:[#allocation2 + $0x1b18] sm:$0xff] }
 0x153   :  { %1636 = vmatpush.msra.mxu0 %v117_v10  ;;  %1656 = vmatpush.msra.mxu1 %v245_v11  ;;  %v1077_v50 = vld [vmem:[#allocation2 + $0x1f18] sm:$0xff] }
 0x154   :  { %1676 = vmatpush.msra.mxu2 %v373_v12  ;;  %1696 = vmatpush.msra.mxu3 %v501_v13  ;;  %v685_v52 = vld [vmem:[#allocation2 + $0x12d8] sm:$0xff] }
 0x155   :  { %1637 = vmatpush.msra.mxu0 %v109_v14  ;;  %1657 = vmatpush.msra.mxu1 %v237_v15  ;;  %v813_v27 = vld [vmem:[#allocation2 + $0x16d8] sm:$0xff] }
 0x156   :  { %1677 = vmatpush.msra.mxu2 %v365_v16  ;;  %1697 = vmatpush.msra.mxu3 %v493_v17  ;;  %v941_v28 = vld [vmem:[#allocation2 + $0x1ad8] sm:$0xff] }
 0x157   :  { %1638 = vmatpush.msra.mxu0 %v101_v18  ;;  %1658 = vmatpush.msra.mxu1 %v229_v19  ;;  %v1069_v53 = vld [vmem:[#allocation2 + $0x1ed8] sm:$0xff] }
 0x158   :  { %1678 = vmatpush.msra.mxu2 %v357_v20  ;;  %1698 = vmatpush.msra.mxu3 %v485_v21  ;;  %v677_v55 = vld [vmem:[#allocation2 + $0x1298] sm:$0xff] }
 0x159   :  { %1639 = vmatpush.msra.mxu0 %v93_v23  ;;  %1659 = vmatpush.msra.mxu1 %v221_v24  ;;  %v805_v56 = vld [vmem:[#allocation2 + $0x1698] sm:$0xff] }
 0x15a   :  { %1679 = vmatpush.msra.mxu2 %v349_v29  ;;  %1699 = vmatpush.msra.mxu3 %v477_v30  ;;  %v933_v33 = vld [vmem:[#allocation2 + $0x1a98] sm:$0xff] }
 0x15b   :  { %1640 = vmatpush.msra.mxu0 %v85_v34  ;;  %1660 = vmatpush.msra.mxu1 %v213_v35  ;;  %v1061_v57 = vld [vmem:[#allocation2 + $0x1e98] sm:$0xff] }
 0x15c   :  { %1680 = vmatpush.msra.mxu2 %v341_v2  ;;  %1700 = vmatpush.msra.mxu3 %v469_v3  ;;  %v669_v58 = vld [vmem:[#allocation2 + $0x1258] sm:$0xff] }
 0x15d   :  { %1705 = vmatpush.msrb.mxu0 %v717_v36  ;;  %1725 = vmatpush.msrb.mxu1 %v845_v4  ;;  %v797_v59 = vld [vmem:[#allocation2 + $0x1658] sm:$0xff] }
 0x15e   :  { %1745 = vmatpush.msrb.mxu2 %v973_v5  ;;  %1765 = vmatpush.msrb.mxu3 %v1101_v37  ;;  %v925_v60 = vld [vmem:[#allocation2 + $0x1a58] sm:$0xff] }
 0x15f   :  { %1706 = vmatpush.msrb.mxu0 %v709_v38  ;;  %1726 = vmatpush.msrb.mxu1 %v837_v39  ;;  %v1053_v61 = vld [vmem:[#allocation2 + $0x1e58] sm:$0xff] }
 0x160   :  { %1746 = vmatpush.msrb.mxu2 %v965_v40  ;;  %1766 = vmatpush.msrb.mxu3 %v1093_v41  ;;  %v661_v62 = vld [vmem:[#allocation2 + $0x1218] sm:$0xff] }
 0x161   :  { %1707 = vmatpush.msrb.mxu0 %v701_v42  ;;  %1727 = vmatpush.msrb.mxu1 %v829_v43  ;;  %v789_v63 = vld [vmem:[#allocation2 + $0x1618] sm:$0xff]  ;;  %v206_v42 = vld [vmem:[#allocation2 + $0x3e0] sm:$0xff] }
 0x162   :  { %1747 = vmatpush.msrb.mxu2 %v957_v44  ;;  %1767 = vmatpush.msrb.mxu3 %v1085_v45  ;;  %v917_v0 = vld [vmem:[#allocation2 + $0x1a18] sm:$0xff]  ;;  %v334_v43 = vld [vmem:[#allocation2 + $0x7e0] sm:$0xff] }
 0x163   :  { %1708 = vmatpush.msrb.mxu0 %v693_v47  ;;  %1728 = vmatpush.msrb.mxu1 %v821_v48  ;;  %v1045_v1 = vld [vmem:[#allocation2 + $0x1e18] sm:$0xff]  ;;  %v462_v44 = vld [vmem:[#allocation2 + $0xbe0] sm:$0xff] }
 0x164   :  { %1748 = vmatpush.msrb.mxu2 %v949_v49  ;;  %1768 = vmatpush.msrb.mxu3 %v1077_v50  ;;  %v653_v6 = vld [vmem:[#allocation2 + $0x11d8] sm:$0xff]  ;;  %v590_v45 = vld [vmem:[#allocation2 + $0xfe0] sm:$0xff] }
 0x165   :  { %1709 = vmatpush.msrb.mxu0 %v685_v52  ;;  %1729 = vmatpush.msrb.mxu1 %v813_v27  ;;  %v781_v7 = vld [vmem:[#allocation2 + $0x15d8] sm:$0xff]  ;;  %v198_v47 = vld [vmem:[#allocation2 + $0x3a0] sm:$0xff] }
 0x166   :  { %1749 = vmatpush.msrb.mxu2 %v941_v28  ;;  %1769 = vmatpush.msrb.mxu3 %v1069_v53  ;;  %v909_v8 = vld [vmem:[#allocation2 + $0x19d8] sm:$0xff]  ;;  %v326_v48 = vld [vmem:[#allocation2 + $0x7a0] sm:$0xff] }
 0x167   :  { %1710 = vmatpush.msrb.mxu0 %v677_v55  ;;  %1730 = vmatpush.msrb.mxu1 %v805_v56  ;;  %v1037_v9 = vld [vmem:[#allocation2 + $0x1dd8] sm:$0xff]  ;;  %v454_v49 = vld [vmem:[#allocation2 + $0xba0] sm:$0xff] }
 0x168   :  { %1750 = vmatpush.msrb.mxu2 %v933_v33  ;;  %1770 = vmatpush.msrb.mxu3 %v1061_v57  ;;  %v645_v10 = vld [vmem:[#allocation2 + $0x1198] sm:$0xff]  ;;  %v582_v50 = vld [vmem:[#allocation2 + $0xfa0] sm:$0xff] }
 0x169   :  { %1711 = vmatpush.msrb.mxu0 %v669_v58  ;;  %1731 = vmatpush.msrb.mxu1 %v797_v59  ;;  %v773_v11 = vld [vmem:[#allocation2 + $0x1598] sm:$0xff]  ;;  %v190_v52 = vld [vmem:[#allocation2 + $0x360] sm:$0xff] }
 0x16a   :  { %1751 = vmatpush.msrb.mxu2 %v925_v60  ;;  %1771 = vmatpush.msrb.mxu3 %v1053_v61  ;;  %v901_v12 = vld [vmem:[#allocation2 + $0x1998] sm:$0xff]  ;;  %v318_v27 = vld [vmem:[#allocation2 + $0x760] sm:$0xff] }
 0x16b   :  { %1712 = vmatpush.msrb.mxu0 %v661_v62  ;;  %1732 = vmatpush.msrb.mxu1 %v789_v63  ;;  %v1029_v13 = vld [vmem:[#allocation2 + $0x1d98] sm:$0xff]  ;;  %v182_v28 = vld [vmem:[#allocation2 + $0x320] sm:$0xff] }
 0x16c   :  { %1752 = vmatpush.msrb.mxu2 %v917_v0  ;;  %1772 = vmatpush.msrb.mxu3 %v1045_v1  ;;  %v637_v14 = vld [vmem:[#allocation2 + $0x1158] sm:$0xff]  ;;  %v566_v53 = vld [vmem:[#allocation2 + $0xf20] sm:$0xff] }
 0x16d   :  { %1713 = vmatpush.msrb.mxu0 %v653_v6  ;;  %1733 = vmatpush.msrb.mxu1 %v781_v7  ;;  %v765_v15 = vld [vmem:[#allocation2 + $0x1558] sm:$0xff]  ;;  %v174_v55 = vld [vmem:[#allocation2 + $0x2e0] sm:$0xff] }
 0x16e   :  { %1753 = vmatpush.msrb.mxu2 %v909_v8  ;;  %1773 = vmatpush.msrb.mxu3 %v1037_v9  ;;  %v893_v16 = vld [vmem:[#allocation2 + $0x1958] sm:$0xff]  ;;  %v302_v56 = vld [vmem:[#allocation2 + $0x6e0] sm:$0xff] }
 0x16f   :  { %1714 = vmatpush.msrb.mxu0 %v645_v10  ;;  %1734 = vmatpush.msrb.mxu1 %v773_v11  ;;  %v1021_v17 = vld [vmem:[#allocation2 + $0x1d58] sm:$0xff]  ;;  %v430_v33 = vld [vmem:[#allocation2 + $0xae0] sm:$0xff] }
 0x170   :  { %1754 = vmatpush.msrb.mxu2 %v901_v12  ;;  %1774 = vmatpush.msrb.mxu3 %v1029_v13  ;;  %v629_v18 = vld [vmem:[#allocation2 + $0x1118] sm:$0xff]  ;;  %v558_v57 = vld [vmem:[#allocation2 + $0xee0] sm:$0xff] }
 0x171   :  { %v757_v19 = vld [vmem:[#allocation2 + $0x1518] sm:$0xff]  ;;  %1715 = vmatpush.msrb.mxu0 %v637_v14  ;;  %1735 = vmatpush.msrb.mxu1 %v765_v15  ;;  %v166_v58 = vld [vmem:[#allocation2 + $0x2a0] sm:$0xff] }
 0x172   :  { %v885_v20 = vld [vmem:[#allocation2 + $0x1918] sm:$0xff]  ;;  %1755 = vmatpush.msrb.mxu2 %v893_v16  ;;  %1775 = vmatpush.msrb.mxu3 %v1021_v17  ;;  %v294_v59 = vld [vmem:[#allocation2 + $0x6a0] sm:$0xff] }
 0x173   :  { %v1013_v21 = vld [vmem:[#allocation2 + $0x1d18] sm:$0xff]  ;;  %1716 = vmatpush.msrb.mxu0 %v629_v18  ;;  %1736 = vmatpush.msrb.mxu1 %v757_v19  ;;  %v422_v60 = vld [vmem:[#allocation2 + $0xaa0] sm:$0xff] }
 0x174   :  { %v621_v23 = vld [vmem:[#allocation2 + $0x10d8] sm:$0xff]  ;;  %1756 = vmatpush.msrb.mxu2 %v885_v20  ;;  %1776 = vmatpush.msrb.mxu3 %v1013_v21  ;;  %v550_v61 = vld [vmem:[#allocation2 + $0xea0] sm:$0xff] }
 0x175   :  { %v749_v24 = vld [vmem:[#allocation2 + $0x14d8] sm:$0xff]  ;;  %1717 = vmatpush.msrb.mxu0 %v621_v23  ;;  %1661 = vmatmul.f32.vlgmr.msra.gmra.mxu1 %v2999_v26  ;;  %v574_v26 = vld [vmem:[#allocation2 + $0xf60] sm:$0xff] }
 0x176   :  { %v877_v29 = vld [vmem:[#allocation2 + $0x18d8] sm:$0xff]  ;;  %1737 = vmatpush.msrb.mxu1 %v749_v24  ;;  %1641 = vmatmul.f32.vlgmr.msra.gmra.mxu0 %v2996_v25  ;;  %v446_v25 = vld [vmem:[#allocation2 + $0xb60] sm:$0xff] }
 0x177   :  { %v1005_v30 = vld [vmem:[#allocation2 + $0x1cd8] sm:$0xff]  ;;  %1757 = vmatpush.msrb.mxu2 %v877_v29  ;;  %1701 = vmatmul.f32.vlgmr.msra.gmra.mxu3 %v3005_v32  ;;  %v438_v32 = vld [vmem:[#allocation2 + $0xb20] sm:$0xff] }
 0x178   :  { %v613_v34 = vld [vmem:[#allocation2 + $0x1098] sm:$0xff]  ;;  %1777 = vmatpush.msrb.mxu3 %v1005_v30  ;;  %1681 = vmatmul.f32.vlgmr.msra.gmra.mxu2 %v3002_v31  ;;  %v310_v31 = vld [vmem:[#allocation2 + $0x720] sm:$0xff] }
 0x179   :  { %v741_v35 = vld [vmem:[#allocation2 + $0x1498] sm:$0xff]  ;;  %1718 = vmatpush.msrb.mxu0 %v613_v34  ;;  %v158_v62 = vld [vmem:[#allocation2 + $0x260] sm:$0xff] }
 0x17a   :  { %v869_v2 = vld [vmem:[#allocation2 + $0x1898] sm:$0xff]  ;;  %1738 = vmatpush.msrb.mxu1 %v741_v35  ;;  %v286_v63 = vld [vmem:[#allocation2 + $0x660] sm:$0xff] }
 0x17b   :  { %v997_v3 = vld [vmem:[#allocation2 + $0x1c98] sm:$0xff]  ;;  %1758 = vmatpush.msrb.mxu2 %v869_v2  ;;  %v414_v0 = vld [vmem:[#allocation2 + $0xa60] sm:$0xff] }
 0x17c   :  { %v605_v36 = vld [vmem:[#allocation2 + $0x1058] sm:$0xff]  ;;  %1778 = vmatpush.msrb.mxu3 %v997_v3  ;;  %v542_v1 = vld [vmem:[#allocation2 + $0xe60] sm:$0xff] }
 0x17d   :  { %v733_v4 = vld [vmem:[#allocation2 + $0x1458] sm:$0xff]  ;;  %1719 = vmatpush.msrb.mxu0 %v605_v36  ;;  %v278_v6 = vld [vmem:[#allocation2 + $0x620] sm:$0xff] }
 0x17e   :  { %v861_v5 = vld [vmem:[#allocation2 + $0x1858] sm:$0xff]  ;;  %1739 = vmatpush.msrb.mxu1 %v733_v4  ;;  %v406_v7 = vld [vmem:[#allocation2 + $0xa20] sm:$0xff] }
 0x17f   :  { %v989_v37 = vld [vmem:[#allocation2 + $0x1c58] sm:$0xff]  ;;  %1759 = vmatpush.msrb.mxu2 %v861_v5  ;;  %v534_v8 = vld [vmem:[#allocation2 + $0xe20] sm:$0xff] }
 0x180   :  { %v597_v38 = vld [vmem:[#allocation2 + $0x1018] sm:$0xff]  ;;  %1779 = vmatpush.msrb.mxu3 %v989_v37  ;;  %v398_v9 = vld [vmem:[#allocation2 + $0x9e0] sm:$0xff] }
 0x181   :  { %v725_v39 = vld [vmem:[#allocation2 + $0x1418] sm:$0xff]  ;;  %1720 = vmatpush.msrb.mxu0 %v597_v38  ;;  %v526_v10 = vld [vmem:[#allocation2 + $0xde0] sm:$0xff] }
 0x182   :  { %v853_v40 = vld [vmem:[#allocation2 + $0x1818] sm:$0xff]  ;;  %1740 = vmatpush.msrb.mxu1 %v725_v39  ;;  %1721 = vmatmul.f32.vlgmr.msrb.gmra.mxu0 %v3011_v22  ;;  %v142_v22 = vld [vmem:[#allocation2 + $0x1e0] sm:$0xff] }
 0x183   :  { %v981_v41 = vld [vmem:[#allocation2 + $0x1c18] sm:$0xff]  ;;  %1760 = vmatpush.msrb.mxu2 %v853_v40  ;;  %1785 = vmatpush.msra.mxu0 %v206_v42  ;;  %v134_v11 = vld [vmem:[#allocation2 + $0x1a0] sm:$0xff] }
 0x184   :  { %1780 = vmatpush.msrb.mxu3 %v981_v41  ;;  %1805 = vmatpush.msra.mxu1 %v334_v43  ;;  %v262_v12 = vld [vmem:[#allocation2 + $0x5a0] sm:$0xff] }
 0x185   :  { %1825 = vmatpush.msra.mxu2 %v462_v44  ;;  %1786 = vmatpush.msra.mxu0 %v198_v47  ;;  %v518_v13 = vld [vmem:[#allocation2 + $0xda0] sm:$0xff] }
 0x186   :  { %1845 = vmatpush.msra.mxu3 %v590_v45  ;;  %1806 = vmatpush.msra.mxu1 %v326_v48  ;;  %v126_v14 = vld [vmem:[#allocation2 + $0x160] sm:$0xff] }
 0x187   :  { %1826 = vmatpush.msra.mxu2 %v454_v49  ;;  %1787 = vmatpush.msra.mxu0 %v190_v52  ;;  %v254_v15 = vld [vmem:[#allocation2 + $0x560] sm:$0xff] }
 0x188   :  { %1846 = vmatpush.msra.mxu3 %v582_v50  ;;  %1807 = vmatpush.msra.mxu1 %v318_v27  ;;  %v382_v16 = vld [vmem:[#allocation2 + $0x960] sm:$0xff] }
 0x189   :  { %1827 = vmatpush.msra.mxu2 %v446_v25  ;;  %1788 = vmatpush.msra.mxu0 %v182_v28  ;;  %v510_v17 = vld [vmem:[#allocation2 + $0xd60] sm:$0xff] }
 0x18a   :  { %1847 = vmatpush.msra.mxu3 %v574_v26  ;;  %1808 = vmatpush.msra.mxu1 %v310_v31  ;;  %v118_v18 = vld [vmem:[#allocation2 + $0x120] sm:$0xff] }
 0x18b   :  { %1828 = vmatpush.msra.mxu2 %v438_v32  ;;  %1789 = vmatpush.msra.mxu0 %v174_v55  ;;  %v246_v19 = vld [vmem:[#allocation2 + $0x520] sm:$0xff] }
 0x18c   :  { %1848 = vmatpush.msra.mxu3 %v566_v53  ;;  %1761 = vmatmul.f32.vlgmr.msrb.gmra.mxu2 %v3008_v46  ;;  %v150_v46 = vld [vmem:[#allocation2 + $0x220] sm:$0xff] }
 0x18d   :  { %1809 = vmatpush.msra.mxu1 %v302_v56  ;;  %1829 = vmatpush.msra.mxu2 %v430_v33  ;;  %v374_v20 = vld [vmem:[#allocation2 + $0x920] sm:$0xff] }
 0x18e   :  { %1849 = vmatpush.msra.mxu3 %v558_v57  ;;  %1790 = vmatpush.msra.mxu0 %v166_v58  ;;  %v502_v21 = vld [vmem:[#allocation2 + $0xd20] sm:$0xff] }
 0x18f   :  { %1781 = vmatmul.f32.vlgmr.msrb.gmra.mxu3 %v3014_v51  ;;  %1810 = vmatpush.msra.mxu1 %v294_v59  ;;  %v270_v51 = vld [vmem:[#allocation2 + $0x5e0] sm:$0xff] }
 0x190   :  { %1830 = vmatpush.msra.mxu2 %v422_v60  ;;  %1850 = vmatpush.msra.mxu3 %v550_v61  ;;  %v110_v23 = vld [vmem:[#allocation2 + $0xe0] sm:$0xff] }
 0x191   :  { %1741 = vmatmul.f32.vlgmr.msrb.gmra.mxu1 %v3017_v54  ;;  %1791 = vmatpush.msra.mxu0 %v158_v62  ;;  %v390_v54 = vld [vmem:[#allocation2 + $0x9a0] sm:$0xff] }
 0x192   :  { %1811 = vmatpush.msra.mxu1 %v286_v63  ;;  %1831 = vmatpush.msra.mxu2 %v414_v0  ;;  %v238_v24 = vld [vmem:[#allocation2 + $0x4e0] sm:$0xff] }
 0x193   :  { %1851 = vmatpush.msra.mxu3 %v542_v1  ;;  %1792 = vmatpush.msra.mxu0 %v150_v46  ;;  %v366_v29 = vld [vmem:[#allocation2 + $0x8e0] sm:$0xff] }
 0x194   :  { %1812 = vmatpush.msra.mxu1 %v278_v6  ;;  %1832 = vmatpush.msra.mxu2 %v406_v7  ;;  %v494_v30 = vld [vmem:[#allocation2 + $0xce0] sm:$0xff] }
 0x195   :  { %1852 = vmatpush.msra.mxu3 %v534_v8  ;;  %1793 = vmatpush.msra.mxu0 %v142_v22  ;;  %v102_v34 = vld [vmem:[#allocation2 + $0xa0] sm:$0xff] }
 0x196   :  { %1813 = vmatpush.msra.mxu1 %v270_v51  ;;  %1833 = vmatpush.msra.mxu2 %v398_v9  ;;  %v230_v35 = vld [vmem:[#allocation2 + $0x4a0] sm:$0xff] }
 0x197   :  { %1853 = vmatpush.msra.mxu3 %v526_v10  ;;  %1794 = vmatpush.msra.mxu0 %v134_v11  ;;  %v358_v2 = vld [vmem:[#allocation2 + $0x8a0] sm:$0xff] }
 0x198   :  { %1814 = vmatpush.msra.mxu1 %v262_v12  ;;  %1834 = vmatpush.msra.mxu2 %v390_v54  ;;  %v486_v3 = vld [vmem:[#allocation2 + $0xca0] sm:$0xff] }
 0x199   :  { %1854 = vmatpush.msra.mxu3 %v518_v13  ;;  %1795 = vmatpush.msra.mxu0 %v126_v14  ;;  %v94_v36 = vld [vmem:[#allocation2 + $0x60] sm:$0xff] }
 0x19a   :  { %1815 = vmatpush.msra.mxu1 %v254_v15  ;;  %1835 = vmatpush.msra.mxu2 %v382_v16  ;;  %v222_v4 = vld [vmem:[#allocation2 + $0x460] sm:$0xff] }
 0x19b   :  { %1855 = vmatpush.msra.mxu3 %v510_v17  ;;  %1796 = vmatpush.msra.mxu0 %v118_v18  ;;  %v350_v5 = vld [vmem:[#allocation2 + $0x860] sm:$0xff] }
 0x19c   :  { %1816 = vmatpush.msra.mxu1 %v246_v19  ;;  %1836 = vmatpush.msra.mxu2 %v374_v20  ;;  %v478_v37 = vld [vmem:[#allocation2 + $0xc60] sm:$0xff] }
 0x19d   :  { %1856 = vmatpush.msra.mxu3 %v502_v21  ;;  %1797 = vmatpush.msra.mxu0 %v110_v23  ;;  %v86_v38 = vld [vmem:[#allocation2 + $0x20] sm:$0xff] }
 0x19e   :  { %1817 = vmatpush.msra.mxu1 %v238_v24  ;;  %1837 = vmatpush.msra.mxu2 %v366_v29  ;;  %v214_v39 = vld [vmem:[#allocation2 + $0x420] sm:$0xff] }
 0x19f   :  { %1857 = vmatpush.msra.mxu3 %v494_v30  ;;  %1798 = vmatpush.msra.mxu0 %v102_v34  ;;  %v342_v40 = vld [vmem:[#allocation2 + $0x820] sm:$0xff] }
 0x1a0   :  { %1818 = vmatpush.msra.mxu1 %v230_v35  ;;  %1838 = vmatpush.msra.mxu2 %v358_v2  ;;  %v470_v41 = vld [vmem:[#allocation2 + $0xc20] sm:$0xff] }
 0x1a1   :  { %1858 = vmatpush.msra.mxu3 %v486_v3  ;;  %1799 = vmatpush.msra.mxu0 %v94_v36  ;;  %v718_v42 = vld [vmem:[#allocation2 + $0x13e0] sm:$0xff] }
 0x1a2   :  { %1819 = vmatpush.msra.mxu1 %v222_v4  ;;  %1839 = vmatpush.msra.mxu2 %v350_v5  ;;  %v846_v43 = vld [vmem:[#allocation2 + $0x17e0] sm:$0xff] }
 0x1a3   :  { %1859 = vmatpush.msra.mxu3 %v478_v37  ;;  %1800 = vmatpush.msra.mxu0 %v86_v38  ;;  %v974_v44 = vld [vmem:[#allocation2 + $0x1be0] sm:$0xff] }
 0x1a4   :  { %1820 = vmatpush.msra.mxu1 %v214_v39  ;;  %v1102_v45 = vld [vmem:[#allocation2 + $0x1fe0] sm:$0xff]  ;;  %1840 = vmatpush.msra.mxu2 %v342_v40 }
 0x1a5   :  { %1860 = vmatpush.msra.mxu3 %v470_v41  ;;  %v710_v47 = vld [vmem:[#allocation2 + $0x13a0] sm:$0xff]  ;;  %1865 = vmatpush.msrb.mxu0 %v718_v42  ;;  %v207_v42 = vld [vmem:[#allocation2 + $0x3e8] sm:$0xff] }
 0x1a6   :  { %v838_v48 = vld [vmem:[#allocation2 + $0x17a0] sm:$0xff]  ;;  %1885 = vmatpush.msrb.mxu1 %v846_v43  ;;  %1905 = vmatpush.msrb.mxu2 %v974_v44  ;;  %v335_v43 = vld [vmem:[#allocation2 + $0x7e8] sm:$0xff]  ;;  %v3028_v44 = vld.sshfl [vmem:[#allocation1] sm:$0xff pattern:$0x73625140] }
 0x1a7   :  { %v966_v49 = vld [vmem:[#allocation2 + $0x1ba0] sm:$0xff]  ;;  %1925 = vmatpush.msrb.mxu3 %v1102_v45  ;;  %1866 = vmatpush.msrb.mxu0 %v710_v47  ;;  %v463_v47 = vld [vmem:[#allocation2 + $0xbe8] sm:$0xff] }
 0x1a8   :  { %v1094_v50 = vld [vmem:[#allocation2 + $0x1fa0] sm:$0xff]  ;;  %1886 = vmatpush.msrb.mxu1 %v838_v48  ;;  %1906 = vmatpush.msrb.mxu2 %v966_v49  ;;  %v591_v48 = vld [vmem:[#allocation2 + $0xfe8] sm:$0xff] }
 0x1a9   :  { %v702_v52 = vld [vmem:[#allocation2 + $0x1360] sm:$0xff]  ;;  %1926 = vmatpush.msrb.mxu3 %v1094_v50  ;;  %1801 = vmatmul.f32.vlgmr.msra.gmra.mxu0 %v3028_v44  ;;  %v3034_v49 = vld.sshfl [vmem:[#allocation1 + $0x10] sm:$0xff pattern:$0x73625140] }
 0x1aa   :  { %v830_v27 = vld [vmem:[#allocation2 + $0x1760] sm:$0xff]  ;;  %1867 = vmatpush.msrb.mxu0 %v702_v52  ;;  %1841 = vmatmul.f32.vlgmr.msra.gmra.mxu2 %v3034_v49  ;;  %v3037_v50 = vld.sshfl [vmem:[#allocation1 + $0x18] sm:$0xff pattern:$0x73625140]  ;;  %v199_v52 = vld [vmem:[#allocation2 + $0x3a8] sm:$0xff] }
 0x1ab   :  { %v958_v25 = vld [vmem:[#allocation2 + $0x1b60] sm:$0xff]  ;;  %1887 = vmatpush.msrb.mxu1 %v830_v27  ;;  %1861 = vmatmul.f32.vlgmr.msra.gmra.mxu3 %v3037_v50  ;;  %v327_v27 = vld [vmem:[#allocation2 + $0x7a8] sm:$0xff] }
 0x1ac   :  { %v1086_v26 = vld [vmem:[#allocation2 + $0x1f60] sm:$0xff]  ;;  %1907 = vmatpush.msrb.mxu2 %v958_v25  ;;  %v455_v25 = vld [vmem:[#allocation2 + $0xba8] sm:$0xff] }
 0x1ad   :  { %v694_v28 = vld [vmem:[#allocation2 + $0x1320] sm:$0xff]  ;;  %1927 = vmatpush.msrb.mxu3 %v1086_v26  ;;  %v583_v26 = vld [vmem:[#allocation2 + $0xfa8] sm:$0xff] }
 0x1ae   :  { %v822_v31 = vld [vmem:[#allocation2 + $0x1720] sm:$0xff]  ;;  %1868 = vmatpush.msrb.mxu0 %v694_v28  ;;  %v191_v28 = vld [vmem:[#allocation2 + $0x368] sm:$0xff] }
 0x1af   :  { %v950_v32 = vld [vmem:[#allocation2 + $0x1b20] sm:$0xff]  ;;  %1888 = vmatpush.msrb.mxu1 %v822_v31  ;;  %v319_v31 = vld [vmem:[#allocation2 + $0x768] sm:$0xff] }
 0x1b0   :  { %v1078_v53 = vld [vmem:[#allocation2 + $0x1f20] sm:$0xff]  ;;  %1908 = vmatpush.msrb.mxu2 %v950_v32  ;;  %v447_v32 = vld [vmem:[#allocation2 + $0xb68] sm:$0xff] }
 0x1b1   :  { %v686_v55 = vld [vmem:[#allocation2 + $0x12e0] sm:$0xff]  ;;  %1928 = vmatpush.msrb.mxu3 %v1078_v53  ;;  %v575_v53 = vld [vmem:[#allocation2 + $0xf68] sm:$0xff] }
 0x1b2   :  { %v814_v56 = vld [vmem:[#allocation2 + $0x16e0] sm:$0xff]  ;;  %1869 = vmatpush.msrb.mxu0 %v686_v55  ;;  %v183_v55 = vld [vmem:[#allocation2 + $0x328] sm:$0xff] }
 0x1b3   :  { %v942_v33 = vld [vmem:[#allocation2 + $0x1ae0] sm:$0xff]  ;;  %1889 = vmatpush.msrb.mxu1 %v814_v56  ;;  %v311_v56 = vld [vmem:[#allocation2 + $0x728] sm:$0xff] }
 0x1b4   :  { %v1070_v57 = vld [vmem:[#allocation2 + $0x1ee0] sm:$0xff]  ;;  %1909 = vmatpush.msrb.mxu2 %v942_v33  ;;  %v439_v33 = vld [vmem:[#allocation2 + $0xb28] sm:$0xff] }
 0x1b5   :  { %v678_v58 = vld [vmem:[#allocation2 + $0x12a0] sm:$0xff]  ;;  %1929 = vmatpush.msrb.mxu3 %v1070_v57  ;;  %v567_v57 = vld [vmem:[#allocation2 + $0xf28] sm:$0xff] }
 0x1b6   :  { %v806_v59 = vld [vmem:[#allocation2 + $0x16a0] sm:$0xff]  ;;  %1870 = vmatpush.msrb.mxu0 %v678_v58  ;;  %v175_v58 = vld [vmem:[#allocation2 + $0x2e8] sm:$0xff] }
 0x1b7   :  { %v934_v60 = vld [vmem:[#allocation2 + $0x1aa0] sm:$0xff]  ;;  %1890 = vmatpush.msrb.mxu1 %v806_v59  ;;  %v303_v59 = vld [vmem:[#allocation2 + $0x6e8] sm:$0xff] }
 0x1b8   :  { %v1062_v61 = vld [vmem:[#allocation2 + $0x1ea0] sm:$0xff]  ;;  %1910 = vmatpush.msrb.mxu2 %v934_v60  ;;  %v431_v60 = vld [vmem:[#allocation2 + $0xae8] sm:$0xff] }
 0x1b9   :  { %v670_v62 = vld [vmem:[#allocation2 + $0x1260] sm:$0xff]  ;;  %1930 = vmatpush.msrb.mxu3 %v1062_v61  ;;  %v559_v61 = vld [vmem:[#allocation2 + $0xee8] sm:$0xff] }
 0x1ba   :  { %v798_v63 = vld [vmem:[#allocation2 + $0x1660] sm:$0xff]  ;;  %1871 = vmatpush.msrb.mxu0 %v670_v62  ;;  %v3040_v62 = vld.sshfl [vmem:[#allocation1 + $0x30] sm:$0xff pattern:$0x73625140] }
 0x1bb   :  { %v926_v0 = vld [vmem:[#allocation2 + $0x1a60] sm:$0xff]  ;;  %1891 = vmatpush.msrb.mxu1 %v798_v63  ;;  %v167_v63 = vld [vmem:[#allocation2 + $0x2a8] sm:$0xff] }
 0x1bc   :  { %v1054_v1 = vld [vmem:[#allocation2 + $0x1e60] sm:$0xff]  ;;  %1911 = vmatpush.msrb.mxu2 %v926_v0  ;;  %v295_v0 = vld [vmem:[#allocation2 + $0x6a8] sm:$0xff] }
 0x1bd   :  { %v662_v46 = vld [vmem:[#allocation2 + $0x1220] sm:$0xff]  ;;  %1931 = vmatpush.msrb.mxu3 %v1054_v1  ;;  %v423_v1 = vld [vmem:[#allocation2 + $0xaa8] sm:$0xff] }
 0x1be   :  { %v790_v6 = vld [vmem:[#allocation2 + $0x1620] sm:$0xff]  ;;  %1872 = vmatpush.msrb.mxu0 %v662_v46  ;;  %v3043_v46 = vld.sshfl [vmem:[#allocation1 + $0x20] sm:$0xff pattern:$0x73625140] }
 0x1bf   :  { %v918_v7 = vld [vmem:[#allocation2 + $0x1a20] sm:$0xff]  ;;  %1892 = vmatpush.msrb.mxu1 %v790_v6  ;;  %v551_v6 = vld [vmem:[#allocation2 + $0xea8] sm:$0xff] }
 0x1c0   :  { %v1046_v8 = vld [vmem:[#allocation2 + $0x1e20] sm:$0xff]  ;;  %1912 = vmatpush.msrb.mxu2 %v918_v7  ;;  %v3046_v7 = vld.sshfl [vmem:[#allocation1 + $0x38] sm:$0xff pattern:$0x73625140] }
 0x1c1   :  { %v654_v22 = vld [vmem:[#allocation2 + $0x11e0] sm:$0xff]  ;;  %1932 = vmatpush.msrb.mxu3 %v1046_v8  ;;  %v159_v8 = vld [vmem:[#allocation2 + $0x268] sm:$0xff] }
 0x1c2   :  { %v782_v51 = vld [vmem:[#allocation2 + $0x15e0] sm:$0xff]  ;;  %1873 = vmatpush.msrb.mxu0 %v654_v22  ;;  %v287_v22 = vld [vmem:[#allocation2 + $0x668] sm:$0xff] }
 0x1c3   :  { %v910_v9 = vld [vmem:[#allocation2 + $0x19e0] sm:$0xff]  ;;  %1893 = vmatpush.msrb.mxu1 %v782_v51  ;;  %v415_v51 = vld [vmem:[#allocation2 + $0xa68] sm:$0xff] }
 0x1c4   :  { %v1038_v10 = vld [vmem:[#allocation2 + $0x1de0] sm:$0xff]  ;;  %1913 = vmatpush.msrb.mxu2 %v910_v9  ;;  %v543_v9 = vld [vmem:[#allocation2 + $0xe68] sm:$0xff] }
 0x1c5   :  { %v646_v11 = vld [vmem:[#allocation2 + $0x11a0] sm:$0xff]  ;;  %1933 = vmatpush.msrb.mxu3 %v1038_v10 }
 0x1c6   :  { %v774_v12 = vld [vmem:[#allocation2 + $0x15a0] sm:$0xff]  ;;  %1874 = vmatpush.msrb.mxu0 %v646_v11  ;;  %v151_v11 = vld [vmem:[#allocation2 + $0x228] sm:$0xff] }
 0x1c7   :  { %v902_v54 = vld [vmem:[#allocation2 + $0x19a0] sm:$0xff]  ;;  %1894 = vmatpush.msrb.mxu1 %v774_v12  ;;  %v279_v12 = vld [vmem:[#allocation2 + $0x628] sm:$0xff] }
 0x1c8   :  { %v1030_v13 = vld [vmem:[#allocation2 + $0x1da0] sm:$0xff]  ;;  %1914 = vmatpush.msrb.mxu2 %v902_v54  ;;  %v407_v54 = vld [vmem:[#allocation2 + $0xa28] sm:$0xff] }
 0x1c9   :  { %v638_v14 = vld [vmem:[#allocation2 + $0x1160] sm:$0xff]  ;;  %1934 = vmatpush.msrb.mxu3 %v1030_v13  ;;  %v535_v13 = vld [vmem:[#allocation2 + $0xe28] sm:$0xff] }
 0x1ca   :  { %v766_v15 = vld [vmem:[#allocation2 + $0x1560] sm:$0xff]  ;;  %1875 = vmatpush.msrb.mxu0 %v638_v14  ;;  %v143_v14 = vld [vmem:[#allocation2 + $0x1e8] sm:$0xff] }
 0x1cb   :  { %v894_v16 = vld [vmem:[#allocation2 + $0x1960] sm:$0xff]  ;;  %1895 = vmatpush.msrb.mxu1 %v766_v15  ;;  %v271_v15 = vld [vmem:[#allocation2 + $0x5e8] sm:$0xff] }
 0x1cc   :  { %v1022_v17 = vld [vmem:[#allocation2 + $0x1d60] sm:$0xff]  ;;  %1915 = vmatpush.msrb.mxu2 %v894_v16  ;;  %v399_v16 = vld [vmem:[#allocation2 + $0x9e8] sm:$0xff] }
 0x1cd   :  { %v630_v18 = vld [vmem:[#allocation2 + $0x1120] sm:$0xff]  ;;  %1935 = vmatpush.msrb.mxu3 %v1022_v17  ;;  %v527_v17 = vld [vmem:[#allocation2 + $0xde8] sm:$0xff] }
 0x1ce   :  { %v758_v19 = vld [vmem:[#allocation2 + $0x1520] sm:$0xff]  ;;  %1876 = vmatpush.msrb.mxu0 %v630_v18  ;;  %v135_v18 = vld [vmem:[#allocation2 + $0x1a8] sm:$0xff] }
 0x1cf   :  { %v886_v20 = vld [vmem:[#allocation2 + $0x1920] sm:$0xff]  ;;  %1896 = vmatpush.msrb.mxu1 %v758_v19  ;;  %v263_v19 = vld [vmem:[#allocation2 + $0x5a8] sm:$0xff] }
 0x1d0   :  { %v1014_v21 = vld [vmem:[#allocation2 + $0x1d20] sm:$0xff]  ;;  %1916 = vmatpush.msrb.mxu2 %v886_v20  ;;  %v391_v20 = vld [vmem:[#allocation2 + $0x9a8] sm:$0xff] }
 0x1d1   :  { %v622_v23 = vld [vmem:[#allocation2 + $0x10e0] sm:$0xff]  ;;  %1936 = vmatpush.msrb.mxu3 %v1014_v21  ;;  %v519_v21 = vld [vmem:[#allocation2 + $0xda8] sm:$0xff] }
 0x1d2   :  { %v750_v24 = vld [vmem:[#allocation2 + $0x14e0] sm:$0xff]  ;;  %1877 = vmatpush.msrb.mxu0 %v622_v23  ;;  %v127_v23 = vld [vmem:[#allocation2 + $0x168] sm:$0xff] }
 0x1d3   :  { %v878_v29 = vld [vmem:[#allocation2 + $0x18e0] sm:$0xff]  ;;  %1897 = vmatpush.msrb.mxu1 %v750_v24  ;;  %v255_v24 = vld [vmem:[#allocation2 + $0x568] sm:$0xff] }
 0x1d4   :  { %v1006_v30 = vld [vmem:[#allocation2 + $0x1ce0] sm:$0xff]  ;;  %1917 = vmatpush.msrb.mxu2 %v878_v29  ;;  %v383_v29 = vld [vmem:[#allocation2 + $0x968] sm:$0xff] }
 0x1d5   :  { %v614_v34 = vld [vmem:[#allocation2 + $0x10a0] sm:$0xff]  ;;  %1937 = vmatpush.msrb.mxu3 %v1006_v30  ;;  %v511_v30 = vld [vmem:[#allocation2 + $0xd68] sm:$0xff] }
 0x1d6   :  { %v742_v35 = vld [vmem:[#allocation2 + $0x14a0] sm:$0xff]  ;;  %1878 = vmatpush.msrb.mxu0 %v614_v34  ;;  %v119_v34 = vld [vmem:[#allocation2 + $0x128] sm:$0xff] }
 0x1d7   :  { %v870_v2 = vld [vmem:[#allocation2 + $0x18a0] sm:$0xff]  ;;  %1898 = vmatpush.msrb.mxu1 %v742_v35  ;;  %v247_v35 = vld [vmem:[#allocation2 + $0x528] sm:$0xff] }
 0x1d8   :  { %v998_v3 = vld [vmem:[#allocation2 + $0x1ca0] sm:$0xff]  ;;  %1918 = vmatpush.msrb.mxu2 %v870_v2  ;;  %v375_v2 = vld [vmem:[#allocation2 + $0x928] sm:$0xff] }
 0x1d9   :  { %v606_v36 = vld [vmem:[#allocation2 + $0x1060] sm:$0xff]  ;;  %1938 = vmatpush.msrb.mxu3 %v998_v3  ;;  %v503_v3 = vld [vmem:[#allocation2 + $0xd28] sm:$0xff] }
 0x1da   :  { %v734_v4 = vld [vmem:[#allocation2 + $0x1460] sm:$0xff]  ;;  %1879 = vmatpush.msrb.mxu0 %v606_v36  ;;  %v111_v36 = vld [vmem:[#allocation2 + $0xe8] sm:$0xff] }
 0x1db   :  { %v862_v5 = vld [vmem:[#allocation2 + $0x1860] sm:$0xff]  ;;  %1899 = vmatpush.msrb.mxu1 %v734_v4  ;;  %v239_v4 = vld [vmem:[#allocation2 + $0x4e8] sm:$0xff] }
 0x1dc   :  { %v990_v37 = vld [vmem:[#allocation2 + $0x1c60] sm:$0xff]  ;;  %1919 = vmatpush.msrb.mxu2 %v862_v5  ;;  %v367_v5 = vld [vmem:[#allocation2 + $0x8e8] sm:$0xff] }
 0x1dd   :  { %v598_v38 = vld [vmem:[#allocation2 + $0x1020] sm:$0xff]  ;;  %1939 = vmatpush.msrb.mxu3 %v990_v37  ;;  %v495_v37 = vld [vmem:[#allocation2 + $0xce8] sm:$0xff] }
 0x1de   :  { %v726_v39 = vld [vmem:[#allocation2 + $0x1420] sm:$0xff]  ;;  %1880 = vmatpush.msrb.mxu0 %v598_v38  ;;  %v103_v38 = vld [vmem:[#allocation2 + $0xa8] sm:$0xff] }
 0x1df   :  { %v854_v40 = vld [vmem:[#allocation2 + $0x1820] sm:$0xff]  ;;  %1900 = vmatpush.msrb.mxu1 %v726_v39  ;;  %1881 = vmatmul.f32.vlgmr.msrb.gmra.mxu0 %v3043_v46  ;;  %v231_v39 = vld [vmem:[#allocation2 + $0x4a8] sm:$0xff] }
 0x1e0   :  { %v982_v41 = vld [vmem:[#allocation2 + $0x1c20] sm:$0xff]  ;;  %1920 = vmatpush.msrb.mxu2 %v854_v40  ;;  %1945 = vmatpush.msra.mxu0 %v207_v42  ;;  %v359_v40 = vld [vmem:[#allocation2 + $0x8a8] sm:$0xff] }
 0x1e1   :  { %1940 = vmatpush.msrb.mxu3 %v982_v41  ;;  %v3031_v45 = vld.sshfl [vmem:[#allocation1 + $0x8] sm:$0xff pattern:$0x73625140]  ;;  %1921 = vmatmul.f32.vlgmr.msrb.gmra.mxu2 %v3040_v62  ;;  %v487_v41 = vld [vmem:[#allocation2 + $0xca8] sm:$0xff] }
 0x1e2   :  { %1821 = vmatmul.f32.vlgmr.msra.gmra.mxu1 %v3031_v45  ;;  %1985 = vmatpush.msra.mxu2 %v463_v47  ;;  %v3049_v10 = vld.sshfl [vmem:[#allocation1 + $0x28] sm:$0xff pattern:$0x73625140]  ;;  %v95_v42 = vld [vmem:[#allocation2 + $0x68] sm:$0xff] }
 0x1e3   :  { %1965 = vmatpush.msra.mxu1 %v335_v43  ;;  %2005 = vmatpush.msra.mxu3 %v591_v48  ;;  %v223_v43 = vld [vmem:[#allocation2 + $0x468] sm:$0xff] }
 0x1e4   :  { %1946 = vmatpush.msra.mxu0 %v199_v52  ;;  %1986 = vmatpush.msra.mxu2 %v455_v25  ;;  %v351_v47 = vld [vmem:[#allocation2 + $0x868] sm:$0xff] }
 0x1e5   :  { %1966 = vmatpush.msra.mxu1 %v327_v27  ;;  %2006 = vmatpush.msra.mxu3 %v583_v26  ;;  %v479_v48 = vld [vmem:[#allocation2 + $0xc68] sm:$0xff] }
 0x1e6   :  { %1947 = vmatpush.msra.mxu0 %v191_v28  ;;  %1987 = vmatpush.msra.mxu2 %v447_v32  ;;  %v87_v52 = vld [vmem:[#allocation2 + $0x28] sm:$0xff] }
 0x1e7   :  { %1967 = vmatpush.msra.mxu1 %v319_v31  ;;  %2007 = vmatpush.msra.mxu3 %v575_v53  ;;  %v215_v27 = vld [vmem:[#allocation2 + $0x428] sm:$0xff] }
 0x1e8   :  { %1948 = vmatpush.msra.mxu0 %v183_v55  ;;  %1988 = vmatpush.msra.mxu2 %v439_v33  ;;  %v343_v25 = vld [vmem:[#allocation2 + $0x828] sm:$0xff] }
 0x1e9   :  { %1968 = vmatpush.msra.mxu1 %v311_v56  ;;  %2008 = vmatpush.msra.mxu3 %v567_v57  ;;  %v471_v26 = vld [vmem:[#allocation2 + $0xc28] sm:$0xff] }
 0x1ea   :  { %1949 = vmatpush.msra.mxu0 %v175_v58  ;;  %1989 = vmatpush.msra.mxu2 %v431_v60  ;;  %v719_v28 = vld [vmem:[#allocation2 + $0x13e8] sm:$0xff] }
 0x1eb   :  { %1969 = vmatpush.msra.mxu1 %v303_v59  ;;  %2009 = vmatpush.msra.mxu3 %v559_v61  ;;  %v847_v31 = vld [vmem:[#allocation2 + $0x17e8] sm:$0xff] }
 0x1ec   :  { %1941 = vmatmul.f32.vlgmr.msrb.gmra.mxu3 %v3046_v7  ;;  %1950 = vmatpush.msra.mxu0 %v167_v63  ;;  %v975_v32 = vld [vmem:[#allocation2 + $0x1be8] sm:$0xff] }
 0x1ed   :  { %1970 = vmatpush.msra.mxu1 %v295_v0  ;;  %1990 = vmatpush.msra.mxu2 %v423_v1  ;;  %v1103_v53 = vld [vmem:[#allocation2 + $0x1fe8] sm:$0xff] }
 0x1ee   :  { %2010 = vmatpush.msra.mxu3 %v551_v6  ;;  %1901 = vmatmul.f32.vlgmr.msrb.gmra.mxu1 %v3049_v10  ;;  %v711_v55 = vld [vmem:[#allocation2 + $0x13a8] sm:$0xff] }
 0x1ef   :  { %1951 = vmatpush.msra.mxu0 %v159_v8  ;;  %1971 = vmatpush.msra.mxu1 %v287_v22  ;;  %v839_v56 = vld [vmem:[#allocation2 + $0x17a8] sm:$0xff] }
 0x1f0   :  { %1991 = vmatpush.msra.mxu2 %v415_v51  ;;  %2011 = vmatpush.msra.mxu3 %v543_v9  ;;  %v967_v33 = vld [vmem:[#allocation2 + $0x1ba8] sm:$0xff] }
 0x1f1   :  { %1952 = vmatpush.msra.mxu0 %v151_v11  ;;  %1972 = vmatpush.msra.mxu1 %v279_v12  ;;  %v1095_v57 = vld [vmem:[#allocation2 + $0x1fa8] sm:$0xff] }
 0x1f2   :  { %1992 = vmatpush.msra.mxu2 %v407_v54  ;;  %2012 = vmatpush.msra.mxu3 %v535_v13  ;;  %v703_v58 = vld [vmem:[#allocation2 + $0x1368] sm:$0xff] }
 0x1f3   :  { %1953 = vmatpush.msra.mxu0 %v143_v14  ;;  %1973 = vmatpush.msra.mxu1 %v271_v15  ;;  %v831_v59 = vld [vmem:[#allocation2 + $0x1768] sm:$0xff] }
 0x1f4   :  { %1993 = vmatpush.msra.mxu2 %v399_v16  ;;  %2013 = vmatpush.msra.mxu3 %v527_v17  ;;  %v959_v60 = vld [vmem:[#allocation2 + $0x1b68] sm:$0xff] }
 0x1f5   :  { %1954 = vmatpush.msra.mxu0 %v135_v18  ;;  %1974 = vmatpush.msra.mxu1 %v263_v19  ;;  %v1087_v61 = vld [vmem:[#allocation2 + $0x1f68] sm:$0xff] }
 0x1f6   :  { %1994 = vmatpush.msra.mxu2 %v391_v20  ;;  %2014 = vmatpush.msra.mxu3 %v519_v21  ;;  %v695_v63 = vld [vmem:[#allocation2 + $0x1328] sm:$0xff] }
 0x1f7   :  { %1955 = vmatpush.msra.mxu0 %v127_v23  ;;  %1975 = vmatpush.msra.mxu1 %v255_v24  ;;  %v823_v0 = vld [vmem:[#allocation2 + $0x1728] sm:$0xff] }
 0x1f8   :  { %1995 = vmatpush.msra.mxu2 %v383_v29  ;;  %2015 = vmatpush.msra.mxu3 %v511_v30  ;;  %v951_v1 = vld [vmem:[#allocation2 + $0x1b28] sm:$0xff] }
 0x1f9   :  { %1956 = vmatpush.msra.mxu0 %v119_v34  ;;  %1976 = vmatpush.msra.mxu1 %v247_v35  ;;  %v1079_v6 = vld [vmem:[#allocation2 + $0x1f28] sm:$0xff] }
 0x1fa   :  { %1996 = vmatpush.msra.mxu2 %v375_v2  ;;  %2016 = vmatpush.msra.mxu3 %v503_v3  ;;  %v687_v8 = vld [vmem:[#allocation2 + $0x12e8] sm:$0xff] }
 0x1fb   :  { %1957 = vmatpush.msra.mxu0 %v111_v36  ;;  %1977 = vmatpush.msra.mxu1 %v239_v4  ;;  %v815_v22 = vld [vmem:[#allocation2 + $0x16e8] sm:$0xff] }
 0x1fc   :  { %1997 = vmatpush.msra.mxu2 %v367_v5  ;;  %2017 = vmatpush.msra.mxu3 %v495_v37  ;;  %v943_v51 = vld [vmem:[#allocation2 + $0x1ae8] sm:$0xff] }
 0x1fd   :  { %1958 = vmatpush.msra.mxu0 %v103_v38  ;;  %1978 = vmatpush.msra.mxu1 %v231_v39  ;;  %v1071_v9 = vld [vmem:[#allocation2 + $0x1ee8] sm:$0xff] }
 0x1fe   :  { %1998 = vmatpush.msra.mxu2 %v359_v40  ;;  %2018 = vmatpush.msra.mxu3 %v487_v41  ;;  %v679_v11 = vld [vmem:[#allocation2 + $0x12a8] sm:$0xff] }
 0x1ff   :  { %1959 = vmatpush.msra.mxu0 %v95_v42  ;;  %1979 = vmatpush.msra.mxu1 %v223_v43  ;;  %v807_v12 = vld [vmem:[#allocation2 + $0x16a8] sm:$0xff] }
 0x200   :  { %1999 = vmatpush.msra.mxu2 %v351_v47  ;;  %2019 = vmatpush.msra.mxu3 %v479_v48  ;;  %v935_v54 = vld [vmem:[#allocation2 + $0x1aa8] sm:$0xff] }
 0x201   :  { %1960 = vmatpush.msra.mxu0 %v87_v52  ;;  %1980 = vmatpush.msra.mxu1 %v215_v27  ;;  %v1063_v13 = vld [vmem:[#allocation2 + $0x1ea8] sm:$0xff] }
 0x202   :  { %2000 = vmatpush.msra.mxu2 %v343_v25  ;;  %2020 = vmatpush.msra.mxu3 %v471_v26  ;;  %v671_v14 = vld [vmem:[#allocation2 + $0x1268] sm:$0xff] }
 0x203   :  { %2025 = vmatpush.msrb.mxu0 %v719_v28  ;;  %2045 = vmatpush.msrb.mxu1 %v847_v31  ;;  %v799_v15 = vld [vmem:[#allocation2 + $0x1668] sm:$0xff] }
 0x204   :  { %2065 = vmatpush.msrb.mxu2 %v975_v32  ;;  %2085 = vmatpush.msrb.mxu3 %v1103_v53  ;;  %v927_v16 = vld [vmem:[#allocation2 + $0x1a68] sm:$0xff] }
 0x205   :  { %2026 = vmatpush.msrb.mxu0 %v711_v55  ;;  %2046 = vmatpush.msrb.mxu1 %v839_v56  ;;  %v1055_v17 = vld [vmem:[#allocation2 + $0x1e68] sm:$0xff] }
 0x206   :  { %2066 = vmatpush.msrb.mxu2 %v967_v33  ;;  %2086 = vmatpush.msrb.mxu3 %v1095_v57  ;;  %v663_v18 = vld [vmem:[#allocation2 + $0x1228] sm:$0xff] }
 0x207   :  { %2027 = vmatpush.msrb.mxu0 %v703_v58  ;;  %2047 = vmatpush.msrb.mxu1 %v831_v59  ;;  %v791_v19 = vld [vmem:[#allocation2 + $0x1628] sm:$0xff]  ;;  %v208_v58 = vld [vmem:[#allocation2 + $0x3f0] sm:$0xff] }
 0x208   :  { %2067 = vmatpush.msrb.mxu2 %v959_v60  ;;  %2087 = vmatpush.msrb.mxu3 %v1087_v61  ;;  %v919_v20 = vld [vmem:[#allocation2 + $0x1a28] sm:$0xff]  ;;  %v336_v59 = vld [vmem:[#allocation2 + $0x7f0] sm:$0xff] }
 0x209   :  { %2028 = vmatpush.msrb.mxu0 %v695_v63  ;;  %2048 = vmatpush.msrb.mxu1 %v823_v0  ;;  %v1047_v21 = vld [vmem:[#allocation2 + $0x1e28] sm:$0xff]  ;;  %v464_v60 = vld [vmem:[#allocation2 + $0xbf0] sm:$0xff] }
 0x20a   :  { %2068 = vmatpush.msrb.mxu2 %v951_v1  ;;  %2088 = vmatpush.msrb.mxu3 %v1079_v6  ;;  %v655_v23 = vld [vmem:[#allocation2 + $0x11e8] sm:$0xff]  ;;  %v592_v61 = vld [vmem:[#allocation2 + $0xff0] sm:$0xff] }
 0x20b   :  { %2029 = vmatpush.msrb.mxu0 %v687_v8  ;;  %2049 = vmatpush.msrb.mxu1 %v815_v22  ;;  %v783_v24 = vld [vmem:[#allocation2 + $0x15e8] sm:$0xff]  ;;  %v200_v63 = vld [vmem:[#allocation2 + $0x3b0] sm:$0xff] }
 0x20c   :  { %2069 = vmatpush.msrb.mxu2 %v943_v51  ;;  %2089 = vmatpush.msrb.mxu3 %v1071_v9  ;;  %v911_v29 = vld [vmem:[#allocation2 + $0x19e8] sm:$0xff]  ;;  %v328_v0 = vld [vmem:[#allocation2 + $0x7b0] sm:$0xff] }
 0x20d   :  { %2030 = vmatpush.msrb.mxu0 %v679_v11  ;;  %2050 = vmatpush.msrb.mxu1 %v807_v12  ;;  %v1039_v30 = vld [vmem:[#allocation2 + $0x1de8] sm:$0xff]  ;;  %v456_v1 = vld [vmem:[#allocation2 + $0xbb0] sm:$0xff] }
 0x20e   :  { %2070 = vmatpush.msrb.mxu2 %v935_v54  ;;  %2090 = vmatpush.msrb.mxu3 %v1063_v13  ;;  %v647_v34 = vld [vmem:[#allocation2 + $0x11a8] sm:$0xff]  ;;  %v584_v6 = vld [vmem:[#allocation2 + $0xfb0] sm:$0xff] }
 0x20f   :  { %2031 = vmatpush.msrb.mxu0 %v671_v14  ;;  %2051 = vmatpush.msrb.mxu1 %v799_v15  ;;  %v775_v35 = vld [vmem:[#allocation2 + $0x15a8] sm:$0xff]  ;;  %v192_v8 = vld [vmem:[#allocation2 + $0x370] sm:$0xff] }
 0x210   :  { %2071 = vmatpush.msrb.mxu2 %v927_v16  ;;  %2091 = vmatpush.msrb.mxu3 %v1055_v17  ;;  %v903_v2 = vld [vmem:[#allocation2 + $0x19a8] sm:$0xff]  ;;  %v320_v22 = vld [vmem:[#allocation2 + $0x770] sm:$0xff] }
 0x211   :  { %2032 = vmatpush.msrb.mxu0 %v663_v18  ;;  %2052 = vmatpush.msrb.mxu1 %v791_v19  ;;  %v1031_v3 = vld [vmem:[#allocation2 + $0x1da8] sm:$0xff]  ;;  %v448_v51 = vld [vmem:[#allocation2 + $0xb70] sm:$0xff] }
 0x212   :  { %2072 = vmatpush.msrb.mxu2 %v919_v20  ;;  %2092 = vmatpush.msrb.mxu3 %v1047_v21  ;;  %v639_v36 = vld [vmem:[#allocation2 + $0x1168] sm:$0xff]  ;;  %v184_v9 = vld [vmem:[#allocation2 + $0x330] sm:$0xff] }
 0x213   :  { %2033 = vmatpush.msrb.mxu0 %v655_v23  ;;  %2053 = vmatpush.msrb.mxu1 %v783_v24  ;;  %v767_v4 = vld [vmem:[#allocation2 + $0x1568] sm:$0xff]  ;;  %v312_v11 = vld [vmem:[#allocation2 + $0x730] sm:$0xff] }
 0x214   :  { %2073 = vmatpush.msrb.mxu2 %v911_v29  ;;  %2093 = vmatpush.msrb.mxu3 %v1039_v30  ;;  %v895_v5 = vld [vmem:[#allocation2 + $0x1968] sm:$0xff]  ;;  %v440_v12 = vld [vmem:[#allocation2 + $0xb30] sm:$0xff] }
 0x215   :  { %2034 = vmatpush.msrb.mxu0 %v647_v34  ;;  %2054 = vmatpush.msrb.mxu1 %v775_v35  ;;  %v1023_v37 = vld [vmem:[#allocation2 + $0x1d68] sm:$0xff]  ;;  %v568_v54 = vld [vmem:[#allocation2 + $0xf30] sm:$0xff] }
 0x216   :  { %2074 = vmatpush.msrb.mxu2 %v903_v2  ;;  %2094 = vmatpush.msrb.mxu3 %v1031_v3  ;;  %v631_v38 = vld [vmem:[#allocation2 + $0x1128] sm:$0xff]  ;;  %v176_v13 = vld [vmem:[#allocation2 + $0x2f0] sm:$0xff] }
 0x217   :  { %v759_v39 = vld [vmem:[#allocation2 + $0x1528] sm:$0xff]  ;;  %2035 = vmatpush.msrb.mxu0 %v639_v36  ;;  %2055 = vmatpush.msrb.mxu1 %v767_v4  ;;  %v304_v14 = vld [vmem:[#allocation2 + $0x6f0] sm:$0xff] }
 0x218   :  { %v887_v40 = vld [vmem:[#allocation2 + $0x1928] sm:$0xff]  ;;  %2075 = vmatpush.msrb.mxu2 %v895_v5  ;;  %2095 = vmatpush.msrb.mxu3 %v1023_v37  ;;  %v432_v15 = vld [vmem:[#allocation2 + $0xaf0] sm:$0xff] }
 0x219   :  { %v1015_v41 = vld [vmem:[#allocation2 + $0x1d28] sm:$0xff]  ;;  %2036 = vmatpush.msrb.mxu0 %v631_v38  ;;  %2056 = vmatpush.msrb.mxu1 %v759_v39  ;;  %v560_v16 = vld [vmem:[#allocation2 + $0xef0] sm:$0xff] }
 0x21a   :  { %v623_v42 = vld [vmem:[#allocation2 + $0x10e8] sm:$0xff]  ;;  %2076 = vmatpush.msrb.mxu2 %v887_v40  ;;  %2096 = vmatpush.msrb.mxu3 %v1015_v41  ;;  %v168_v17 = vld [vmem:[#allocation2 + $0x2b0] sm:$0xff] }
 0x21b   :  { %v751_v43 = vld [vmem:[#allocation2 + $0x14e8] sm:$0xff]  ;;  %2037 = vmatpush.msrb.mxu0 %v623_v42  ;;  %1981 = vmatmul.f32.vlgmr.msra.gmra.mxu1 %v3031_v45  ;;  %v576_v45 = vld [vmem:[#allocation2 + $0xf70] sm:$0xff] }
 0x21c   :  { %v879_v47 = vld [vmem:[#allocation2 + $0x18e8] sm:$0xff]  ;;  %2057 = vmatpush.msrb.mxu1 %v751_v43  ;;  %1961 = vmatmul.f32.vlgmr.msra.gmra.mxu0 %v3028_v44  ;;  %v296_v18 = vld [vmem:[#allocation2 + $0x6b0] sm:$0xff] }
 0x21d   :  { %v1007_v48 = vld [vmem:[#allocation2 + $0x1ce8] sm:$0xff]  ;;  %2077 = vmatpush.msrb.mxu2 %v879_v47  ;;  %2021 = vmatmul.f32.vlgmr.msra.gmra.mxu3 %v3037_v50  ;;  %v424_v19 = vld [vmem:[#allocation2 + $0xab0] sm:$0xff] }
 0x21e   :  { %v615_v52 = vld [vmem:[#allocation2 + $0x10a8] sm:$0xff]  ;;  %2097 = vmatpush.msrb.mxu3 %v1007_v48  ;;  %2001 = vmatmul.f32.vlgmr.msra.gmra.mxu2 %v3034_v49  ;;  %v552_v20 = vld [vmem:[#allocation2 + $0xeb0] sm:$0xff] }
 0x21f   :  { %v743_v27 = vld [vmem:[#allocation2 + $0x14a8] sm:$0xff]  ;;  %2038 = vmatpush.msrb.mxu0 %v615_v52  ;;  %v160_v21 = vld [vmem:[#allocation2 + $0x270] sm:$0xff] }
 0x220   :  { %v871_v25 = vld [vmem:[#allocation2 + $0x18a8] sm:$0xff]  ;;  %2058 = vmatpush.msrb.mxu1 %v743_v27  ;;  %v288_v23 = vld [vmem:[#allocation2 + $0x670] sm:$0xff] }
 0x221   :  { %v999_v26 = vld [vmem:[#allocation2 + $0x1ca8] sm:$0xff]  ;;  %2078 = vmatpush.msrb.mxu2 %v871_v25  ;;  %v416_v24 = vld [vmem:[#allocation2 + $0xa70] sm:$0xff] }
 0x222   :  { %v607_v28 = vld [vmem:[#allocation2 + $0x1068] sm:$0xff]  ;;  %2098 = vmatpush.msrb.mxu3 %v999_v26  ;;  %v544_v29 = vld [vmem:[#allocation2 + $0xe70] sm:$0xff] }
 0x223   :  { %v735_v31 = vld [vmem:[#allocation2 + $0x1468] sm:$0xff]  ;;  %2039 = vmatpush.msrb.mxu0 %v607_v28  ;;  %v152_v30 = vld [vmem:[#allocation2 + $0x230] sm:$0xff] }
 0x224   :  { %v863_v32 = vld [vmem:[#allocation2 + $0x1868] sm:$0xff]  ;;  %2059 = vmatpush.msrb.mxu1 %v735_v31  ;;  %v280_v34 = vld [vmem:[#allocation2 + $0x630] sm:$0xff] }
 0x225   :  { %v991_v53 = vld [vmem:[#allocation2 + $0x1c68] sm:$0xff]  ;;  %2079 = vmatpush.msrb.mxu2 %v863_v32  ;;  %v408_v35 = vld [vmem:[#allocation2 + $0xa30] sm:$0xff] }
 0x226   :  { %v599_v55 = vld [vmem:[#allocation2 + $0x1028] sm:$0xff]  ;;  %2099 = vmatpush.msrb.mxu3 %v991_v53  ;;  %v536_v2 = vld [vmem:[#allocation2 + $0xe30] sm:$0xff] }
 0x227   :  { %v727_v56 = vld [vmem:[#allocation2 + $0x1428] sm:$0xff]  ;;  %2040 = vmatpush.msrb.mxu0 %v599_v55  ;;  %v144_v3 = vld [vmem:[#allocation2 + $0x1f0] sm:$0xff] }
 0x228   :  { %v855_v33 = vld [vmem:[#allocation2 + $0x1828] sm:$0xff]  ;;  %2060 = vmatpush.msrb.mxu1 %v727_v56  ;;  %2041 = vmatmul.f32.vlgmr.msrb.gmra.mxu0 %v3043_v46  ;;  %v272_v36 = vld [vmem:[#allocation2 + $0x5f0] sm:$0xff] }
 0x229   :  { %v983_v57 = vld [vmem:[#allocation2 + $0x1c28] sm:$0xff]  ;;  %2080 = vmatpush.msrb.mxu2 %v855_v33  ;;  %2105 = vmatpush.msra.mxu0 %v208_v58  ;;  %v400_v4 = vld [vmem:[#allocation2 + $0x9f0] sm:$0xff] }
 0x22a   :  { %2100 = vmatpush.msrb.mxu3 %v983_v57  ;;  %2125 = vmatpush.msra.mxu1 %v336_v59  ;;  %v528_v5 = vld [vmem:[#allocation2 + $0xdf0] sm:$0xff] }
 0x22b   :  { %2145 = vmatpush.msra.mxu2 %v464_v60  ;;  %2106 = vmatpush.msra.mxu0 %v200_v63  ;;  %v136_v37 = vld [vmem:[#allocation2 + $0x1b0] sm:$0xff] }
 0x22c   :  { %2165 = vmatpush.msra.mxu3 %v592_v61  ;;  %2126 = vmatpush.msra.mxu1 %v328_v0  ;;  %v264_v38 = vld [vmem:[#allocation2 + $0x5b0] sm:$0xff] }
 0x22d   :  { %2146 = vmatpush.msra.mxu2 %v456_v1  ;;  %2107 = vmatpush.msra.mxu0 %v192_v8  ;;  %v392_v39 = vld [vmem:[#allocation2 + $0x9b0] sm:$0xff] }
 0x22e   :  { %2166 = vmatpush.msra.mxu3 %v584_v6  ;;  %2127 = vmatpush.msra.mxu1 %v320_v22  ;;  %v520_v40 = vld [vmem:[#allocation2 + $0xdb0] sm:$0xff] }
 0x22f   :  { %2147 = vmatpush.msra.mxu2 %v448_v51  ;;  %2108 = vmatpush.msra.mxu0 %v184_v9  ;;  %v128_v41 = vld [vmem:[#allocation2 + $0x170] sm:$0xff] }
 0x230   :  { %2167 = vmatpush.msra.mxu3 %v576_v45  ;;  %2128 = vmatpush.msra.mxu1 %v312_v11  ;;  %v256_v42 = vld [vmem:[#allocation2 + $0x570] sm:$0xff] }
 0x231   :  { %2148 = vmatpush.msra.mxu2 %v440_v12  ;;  %2109 = vmatpush.msra.mxu0 %v176_v13  ;;  %v384_v43 = vld [vmem:[#allocation2 + $0x970] sm:$0xff] }
 0x232   :  { %2168 = vmatpush.msra.mxu3 %v568_v54  ;;  %2081 = vmatmul.f32.vlgmr.msrb.gmra.mxu2 %v3040_v62  ;;  %v512_v47 = vld [vmem:[#allocation2 + $0xd70] sm:$0xff] }
 0x233   :  { %2129 = vmatpush.msra.mxu1 %v304_v14  ;;  %2149 = vmatpush.msra.mxu2 %v432_v15  ;;  %v120_v48 = vld [vmem:[#allocation2 + $0x130] sm:$0xff] }
 0x234   :  { %2169 = vmatpush.msra.mxu3 %v560_v16  ;;  %2110 = vmatpush.msra.mxu0 %v168_v17  ;;  %v248_v52 = vld [vmem:[#allocation2 + $0x530] sm:$0xff] }
 0x235   :  { %2101 = vmatmul.f32.vlgmr.msrb.gmra.mxu3 %v3046_v7  ;;  %2130 = vmatpush.msra.mxu1 %v296_v18  ;;  %v376_v27 = vld [vmem:[#allocation2 + $0x930] sm:$0xff] }
 0x236   :  { %2150 = vmatpush.msra.mxu2 %v424_v19  ;;  %2170 = vmatpush.msra.mxu3 %v552_v20  ;;  %v504_v25 = vld [vmem:[#allocation2 + $0xd30] sm:$0xff] }
 0x237   :  { %2061 = vmatmul.f32.vlgmr.msrb.gmra.mxu1 %v3049_v10  ;;  %2111 = vmatpush.msra.mxu0 %v160_v21  ;;  %v112_v26 = vld [vmem:[#allocation2 + $0xf0] sm:$0xff] }
 0x238   :  { %2131 = vmatpush.msra.mxu1 %v288_v23  ;;  %2151 = vmatpush.msra.mxu2 %v416_v24  ;;  %v240_v28 = vld [vmem:[#allocation2 + $0x4f0] sm:$0xff] }
 0x239   :  { %2171 = vmatpush.msra.mxu3 %v544_v29  ;;  %2112 = vmatpush.msra.mxu0 %v152_v30  ;;  %v368_v31 = vld [vmem:[#allocation2 + $0x8f0] sm:$0xff] }
 0x23a   :  { %2132 = vmatpush.msra.mxu1 %v280_v34  ;;  %2152 = vmatpush.msra.mxu2 %v408_v35  ;;  %v496_v32 = vld [vmem:[#allocation2 + $0xcf0] sm:$0xff] }
 0x23b   :  { %2172 = vmatpush.msra.mxu3 %v536_v2  ;;  %2113 = vmatpush.msra.mxu0 %v144_v3  ;;  %v104_v53 = vld [vmem:[#allocation2 + $0xb0] sm:$0xff] }
 0x23c   :  { %2133 = vmatpush.msra.mxu1 %v272_v36  ;;  %2153 = vmatpush.msra.mxu2 %v400_v4  ;;  %v232_v55 = vld [vmem:[#allocation2 + $0x4b0] sm:$0xff] }
 0x23d   :  { %2173 = vmatpush.msra.mxu3 %v528_v5  ;;  %2114 = vmatpush.msra.mxu0 %v136_v37  ;;  %v360_v56 = vld [vmem:[#allocation2 + $0x8b0] sm:$0xff] }
 0x23e   :  { %2134 = vmatpush.msra.mxu1 %v264_v38  ;;  %2154 = vmatpush.msra.mxu2 %v392_v39  ;;  %v488_v33 = vld [vmem:[#allocation2 + $0xcb0] sm:$0xff] }
 0x23f   :  { %2174 = vmatpush.msra.mxu3 %v520_v40  ;;  %2115 = vmatpush.msra.mxu0 %v128_v41  ;;  %v96_v57 = vld [vmem:[#allocation2 + $0x70] sm:$0xff] }
 0x240   :  { %2135 = vmatpush.msra.mxu1 %v256_v42  ;;  %2155 = vmatpush.msra.mxu2 %v384_v43  ;;  %v224_v58 = vld [vmem:[#allocation2 + $0x470] sm:$0xff] }
 0x241   :  { %2175 = vmatpush.msra.mxu3 %v512_v47  ;;  %2116 = vmatpush.msra.mxu0 %v120_v48  ;;  %v352_v59 = vld [vmem:[#allocation2 + $0x870] sm:$0xff] }
 0x242   :  { %2136 = vmatpush.msra.mxu1 %v248_v52  ;;  %2156 = vmatpush.msra.mxu2 %v376_v27  ;;  %v480_v60 = vld [vmem:[#allocation2 + $0xc70] sm:$0xff] }
 0x243   :  { %2176 = vmatpush.msra.mxu3 %v504_v25  ;;  %2117 = vmatpush.msra.mxu0 %v112_v26  ;;  %v88_v61 = vld [vmem:[#allocation2 + $0x30] sm:$0xff] }
 0x244   :  { %2137 = vmatpush.msra.mxu1 %v240_v28  ;;  %2157 = vmatpush.msra.mxu2 %v368_v31  ;;  %v216_v63 = vld [vmem:[#allocation2 + $0x430] sm:$0xff] }
 0x245   :  { %2177 = vmatpush.msra.mxu3 %v496_v32  ;;  %2118 = vmatpush.msra.mxu0 %v104_v53  ;;  %v344_v0 = vld [vmem:[#allocation2 + $0x830] sm:$0xff] }
 0x246   :  { %2138 = vmatpush.msra.mxu1 %v232_v55  ;;  %2158 = vmatpush.msra.mxu2 %v360_v56  ;;  %v472_v1 = vld [vmem:[#allocation2 + $0xc30] sm:$0xff] }
 0x247   :  { %2178 = vmatpush.msra.mxu3 %v488_v33  ;;  %2119 = vmatpush.msra.mxu0 %v96_v57  ;;  %v720_v6 = vld [vmem:[#allocation2 + $0x13f0] sm:$0xff] }
 0x248   :  { %2139 = vmatpush.msra.mxu1 %v224_v58  ;;  %2159 = vmatpush.msra.mxu2 %v352_v59  ;;  %v848_v8 = vld [vmem:[#allocation2 + $0x17f0] sm:$0xff] }
 0x249   :  { %2179 = vmatpush.msra.mxu3 %v480_v60  ;;  %2120 = vmatpush.msra.mxu0 %v88_v61  ;;  %v976_v22 = vld [vmem:[#allocation2 + $0x1bf0] sm:$0xff] }
 0x24a   :  { %2140 = vmatpush.msra.mxu1 %v216_v63  ;;  %v1104_v51 = vld [vmem:[#allocation2 + $0x1ff0] sm:$0xff]  ;;  %2160 = vmatpush.msra.mxu2 %v344_v0 }
 0x24b   :  { %2180 = vmatpush.msra.mxu3 %v472_v1  ;;  %v712_v45 = vld [vmem:[#allocation2 + $0x13b0] sm:$0xff]  ;;  %2185 = vmatpush.msrb.mxu0 %v720_v6 }
 0x24c   :  { %v840_v9 = vld [vmem:[#allocation2 + $0x17b0] sm:$0xff]  ;;  %2205 = vmatpush.msrb.mxu1 %v848_v8  ;;  %2225 = vmatpush.msrb.mxu2 %v976_v22 }
 0x24d   :  { %v968_v11 = vld [vmem:[#allocation2 + $0x1bb0] sm:$0xff]  ;;  %2245 = vmatpush.msrb.mxu3 %v1104_v51  ;;  %2186 = vmatpush.msrb.mxu0 %v712_v45 }
 0x24e   :  { %v1096_v12 = vld [vmem:[#allocation2 + $0x1fb0] sm:$0xff]  ;;  %2206 = vmatpush.msrb.mxu1 %v840_v9  ;;  %2226 = vmatpush.msrb.mxu2 %v968_v11  ;;  %v337_v11 = vld [vmem:[#allocation2 + $0x7f8] sm:$0xff] }
 0x24f   :  { %v704_v54 = vld [vmem:[#allocation2 + $0x1370] sm:$0xff]  ;;  %2246 = vmatpush.msrb.mxu3 %v1096_v12  ;;  %2161 = vmatmul.f32.vlgmr.msra.gmra.mxu2 %v3034_v49  ;;  %v3063_v49 = vld.sshfl [vmem:[#allocation1 + $0x8] sm:$0xff pattern:$0x73625140]  ;;  %v465_v12 = vld [vmem:[#allocation2 + $0xbf8] sm:$0xff] }
 0x250   :  { %v832_v13 = vld [vmem:[#allocation2 + $0x1770] sm:$0xff]  ;;  %2187 = vmatpush.msrb.mxu0 %v704_v54  ;;  %2181 = vmatmul.f32.vlgmr.msra.gmra.mxu3 %v3037_v50  ;;  %v209_v50 = vld [vmem:[#allocation2 + $0x3f8] sm:$0xff] }
 0x251   :  { %v960_v14 = vld [vmem:[#allocation2 + $0x1b70] sm:$0xff]  ;;  %2207 = vmatpush.msrb.mxu1 %v832_v13  ;;  %2121 = vmatmul.f32.vlgmr.msra.gmra.mxu0 %v3028_v44  ;;  %v593_v54 = vld [vmem:[#allocation2 + $0xff8] sm:$0xff] }
 0x252   :  { %v1088_v15 = vld [vmem:[#allocation2 + $0x1f70] sm:$0xff]  ;;  %2227 = vmatpush.msrb.mxu2 %v960_v14  ;;  %2141 = vmatmul.f32.vlgmr.msra.gmra.mxu1 %v3063_v49  ;;  %v201_v13 = vld [vmem:[#allocation2 + $0x3b8] sm:$0xff] }
 0x253   :  { %v696_v16 = vld [vmem:[#allocation2 + $0x1330] sm:$0xff]  ;;  %2247 = vmatpush.msrb.mxu3 %v1088_v15  ;;  %v329_v14 = vld [vmem:[#allocation2 + $0x7b8] sm:$0xff] }
 0x254   :  { %v824_v17 = vld [vmem:[#allocation2 + $0x1730] sm:$0xff]  ;;  %2188 = vmatpush.msrb.mxu0 %v696_v16  ;;  %v457_v15 = vld [vmem:[#allocation2 + $0xbb8] sm:$0xff] }
 0x255   :  { %v952_v18 = vld [vmem:[#allocation2 + $0x1b30] sm:$0xff]  ;;  %2208 = vmatpush.msrb.mxu1 %v824_v17  ;;  %v585_v16 = vld [vmem:[#allocation2 + $0xfb8] sm:$0xff] }
 0x256   :  { %v1080_v19 = vld [vmem:[#allocation2 + $0x1f30] sm:$0xff]  ;;  %2228 = vmatpush.msrb.mxu2 %v952_v18  ;;  %v193_v17 = vld [vmem:[#allocation2 + $0x378] sm:$0xff] }
 0x257   :  { %v688_v20 = vld [vmem:[#allocation2 + $0x12f0] sm:$0xff]  ;;  %2248 = vmatpush.msrb.mxu3 %v1080_v19  ;;  %v321_v18 = vld [vmem:[#allocation2 + $0x778] sm:$0xff] }
 0x258   :  { %v816_v21 = vld [vmem:[#allocation2 + $0x16f0] sm:$0xff]  ;;  %2189 = vmatpush.msrb.mxu0 %v688_v20  ;;  %v449_v19 = vld [vmem:[#allocation2 + $0xb78] sm:$0xff] }
 0x259   :  { %v944_v23 = vld [vmem:[#allocation2 + $0x1af0] sm:$0xff]  ;;  %2209 = vmatpush.msrb.mxu1 %v816_v21  ;;  %v577_v20 = vld [vmem:[#allocation2 + $0xf78] sm:$0xff] }
 0x25a   :  { %v1072_v24 = vld [vmem:[#allocation2 + $0x1ef0] sm:$0xff]  ;;  %2229 = vmatpush.msrb.mxu2 %v944_v23  ;;  %v313_v21 = vld [vmem:[#allocation2 + $0x738] sm:$0xff] }
 0x25b   :  { %v680_v29 = vld [vmem:[#allocation2 + $0x12b0] sm:$0xff]  ;;  %2249 = vmatpush.msrb.mxu3 %v1072_v24  ;;  %v441_v23 = vld [vmem:[#allocation2 + $0xb38] sm:$0xff] }
 0x25c   :  { %v808_v30 = vld [vmem:[#allocation2 + $0x16b0] sm:$0xff]  ;;  %2190 = vmatpush.msrb.mxu0 %v680_v29  ;;  %v569_v24 = vld [vmem:[#allocation2 + $0xf38] sm:$0xff]  ;;  %v3070_v29 = vpop.f32.mrf.mxu0 }
 0x25d   :  { %v936_v34 = vld [vmem:[#allocation2 + $0x1ab0] sm:$0xff]  ;;  %2210 = vmatpush.msrb.mxu1 %v808_v30  ;;  %v433_v30 = vld [vmem:[#allocation2 + $0xaf8] sm:$0xff] }
 0x25e   :  { %v1064_v35 = vld [vmem:[#allocation2 + $0x1eb0] sm:$0xff]  ;;  %2230 = vmatpush.msrb.mxu2 %v936_v34  ;;  %v561_v34 = vld [vmem:[#allocation2 + $0xef8] sm:$0xff] }
 0x25f   :  { %v672_v2 = vld [vmem:[#allocation2 + $0x1270] sm:$0xff]  ;;  %2250 = vmatpush.msrb.mxu3 %v1064_v35  ;;  %v169_v35 = vld [vmem:[#allocation2 + $0x2b8] sm:$0xff] }
 0x260   :  { %v800_v3 = vld [vmem:[#allocation2 + $0x1670] sm:$0xff]  ;;  %2191 = vmatpush.msrb.mxu0 %v672_v2  ;;  %v425_v2 = vld [vmem:[#allocation2 + $0xab8] sm:$0xff] }
 0x261   :  { %v928_v36 = vld [vmem:[#allocation2 + $0x1a70] sm:$0xff]  ;;  %2211 = vmatpush.msrb.mxu1 %v800_v3  ;;  %v553_v3 = vld [vmem:[#allocation2 + $0xeb8] sm:$0xff] }
 0x262   :  { %v1056_v4 = vld [vmem:[#allocation2 + $0x1e70] sm:$0xff]  ;;  %2231 = vmatpush.msrb.mxu2 %v928_v36  ;;  %v161_v36 = vld [vmem:[#allocation2 + $0x278] sm:$0xff] }
 0x263   :  { %v664_v5 = vld [vmem:[#allocation2 + $0x1230] sm:$0xff]  ;;  %2251 = vmatpush.msrb.mxu3 %v1056_v4  ;;  %v289_v4 = vld [vmem:[#allocation2 + $0x678] sm:$0xff] }
 0x264   :  { %v792_v37 = vld [vmem:[#allocation2 + $0x1630] sm:$0xff]  ;;  %2192 = vmatpush.msrb.mxu0 %v664_v5  ;;  %v3072_v5 = vpop.f32.mrf.mxu1 }
 0x265   :  { %v920_v38 = vld [vmem:[#allocation2 + $0x1a30] sm:$0xff]  ;;  %2212 = vmatpush.msrb.mxu1 %v792_v37  ;;  %v417_v37 = vld [vmem:[#allocation2 + $0xa78] sm:$0xff] }
 0x266   :  { %v1048_v39 = vld [vmem:[#allocation2 + $0x1e30] sm:$0xff]  ;;  %2232 = vmatpush.msrb.mxu2 %v920_v38  ;;  %v545_v38 = vld [vmem:[#allocation2 + $0xe78] sm:$0xff] }
 0x267   :  { %v656_v40 = vld [vmem:[#allocation2 + $0x11f0] sm:$0xff]  ;;  %2252 = vmatpush.msrb.mxu3 %v1048_v39  ;;  %v3074_v39 = vpop.f32.mrf.mxu2 }
 0x268   :  { %v784_v41 = vld [vmem:[#allocation2 + $0x15f0] sm:$0xff]  ;;  %2193 = vmatpush.msrb.mxu0 %v656_v40  ;;  %v153_v40 = vld [vmem:[#allocation2 + $0x238] sm:$0xff] }
 0x269   :  { %v912_v42 = vld [vmem:[#allocation2 + $0x19f0] sm:$0xff]  ;;  %2213 = vmatpush.msrb.mxu1 %v784_v41  ;;  %v281_v41 = vld [vmem:[#allocation2 + $0x638] sm:$0xff] }
 0x26a   :  { %v1040_v43 = vld [vmem:[#allocation2 + $0x1df0] sm:$0xff]  ;;  %2233 = vmatpush.msrb.mxu2 %v912_v42  ;;  %v409_v42 = vld [vmem:[#allocation2 + $0xa38] sm:$0xff] }
 0x26b   :  { %v648_v47 = vld [vmem:[#allocation2 + $0x11b0] sm:$0xff]  ;;  %2253 = vmatpush.msrb.mxu3 %v1040_v43  ;;  %v537_v43 = vld [vmem:[#allocation2 + $0xe38] sm:$0xff] }
 0x26c   :  { %v776_v48 = vld [vmem:[#allocation2 + $0x15b0] sm:$0xff]  ;;  %2194 = vmatpush.msrb.mxu0 %v648_v47  ;;  %v145_v47 = vld [vmem:[#allocation2 + $0x1f8] sm:$0xff] }
 0x26d   :  { %v904_v52 = vld [vmem:[#allocation2 + $0x19b0] sm:$0xff]  ;;  %2214 = vmatpush.msrb.mxu1 %v776_v48  ;;  %v273_v48 = vld [vmem:[#allocation2 + $0x5f8] sm:$0xff] }
 0x26e   :  { %v1032_v27 = vld [vmem:[#allocation2 + $0x1db0] sm:$0xff]  ;;  %2234 = vmatpush.msrb.mxu2 %v904_v52  ;;  %v3076_v52 = vpop.f32.mrf.mxu3 }
 0x26f   :  { %v640_v25 = vld [vmem:[#allocation2 + $0x1170] sm:$0xff]  ;;  %2254 = vmatpush.msrb.mxu3 %v1032_v27  ;;  %v401_v27 = vld [vmem:[#allocation2 + $0x9f8] sm:$0xff] }
 0x270   :  { %v768_v26 = vld [vmem:[#allocation2 + $0x1570] sm:$0xff]  ;;  %2195 = vmatpush.msrb.mxu0 %v640_v25  ;;  %v529_v25 = vld [vmem:[#allocation2 + $0xdf8] sm:$0xff] }
 0x271   :  { %v896_v28 = vld [vmem:[#allocation2 + $0x1970] sm:$0xff]  ;;  %2215 = vmatpush.msrb.mxu1 %v768_v26  ;;  %v137_v26 = vld [vmem:[#allocation2 + $0x1b8] sm:$0xff] }
 0x272   :  { %v1024_v31 = vld [vmem:[#allocation2 + $0x1d70] sm:$0xff]  ;;  %2235 = vmatpush.msrb.mxu2 %v896_v28  ;;  %v265_v28 = vld [vmem:[#allocation2 + $0x5b8] sm:$0xff] }
 0x273   :  { %v632_v32 = vld [vmem:[#allocation2 + $0x1130] sm:$0xff]  ;;  %2255 = vmatpush.msrb.mxu3 %v1024_v31  ;;  %v3078_v31 = vpop.f32.mrf.mxu0 }
 0x274   :  { %v760_v53 = vld [vmem:[#allocation2 + $0x1530] sm:$0xff]  ;;  %2196 = vmatpush.msrb.mxu0 %v632_v32  ;;  %v393_v32 = vld [vmem:[#allocation2 + $0x9b8] sm:$0xff] }
 0x275   :  { %v888_v55 = vld [vmem:[#allocation2 + $0x1930] sm:$0xff]  ;;  %2216 = vmatpush.msrb.mxu1 %v760_v53  ;;  %v521_v53 = vld [vmem:[#allocation2 + $0xdb8] sm:$0xff] }
 0x276   :  { %v1016_v56 = vld [vmem:[#allocation2 + $0x1d30] sm:$0xff]  ;;  %2236 = vmatpush.msrb.mxu2 %v888_v55  ;;  %v129_v55 = vld [vmem:[#allocation2 + $0x178] sm:$0xff] }
 0x277   :  { %v624_v33 = vld [vmem:[#allocation2 + $0x10f0] sm:$0xff]  ;;  %2256 = vmatpush.msrb.mxu3 %v1016_v56  ;;  %v257_v56 = vld [vmem:[#allocation2 + $0x578] sm:$0xff] }
 0x278   :  { %v752_v57 = vld [vmem:[#allocation2 + $0x14f0] sm:$0xff]  ;;  %2197 = vmatpush.msrb.mxu0 %v624_v33  ;;  %v385_v33 = vld [vmem:[#allocation2 + $0x978] sm:$0xff] }
 0x279   :  { %v880_v58 = vld [vmem:[#allocation2 + $0x18f0] sm:$0xff]  ;;  %2217 = vmatpush.msrb.mxu1 %v752_v57  ;;  %v513_v57 = vld [vmem:[#allocation2 + $0xd78] sm:$0xff] }
 0x27a   :  { %v1008_v59 = vld [vmem:[#allocation2 + $0x1cf0] sm:$0xff]  ;;  %2237 = vmatpush.msrb.mxu2 %v880_v58  ;;  %v121_v58 = vld [vmem:[#allocation2 + $0x138] sm:$0xff] }
 0x27b   :  { %v616_v60 = vld [vmem:[#allocation2 + $0x10b0] sm:$0xff]  ;;  %2257 = vmatpush.msrb.mxu3 %v1008_v59  ;;  %v249_v59 = vld [vmem:[#allocation2 + $0x538] sm:$0xff] }
 0x27c   :  { %v744_v61 = vld [vmem:[#allocation2 + $0x14b0] sm:$0xff]  ;;  %2198 = vmatpush.msrb.mxu0 %v616_v60  ;;  %v3080_v60 = vpop.f32.mrf.mxu1 }
 0x27d   :  { %v872_v63 = vld [vmem:[#allocation2 + $0x18b0] sm:$0xff]  ;;  %2218 = vmatpush.msrb.mxu1 %v744_v61  ;;  %v377_v61 = vld [vmem:[#allocation2 + $0x938] sm:$0xff] }
 0x27e   :  { %v1000_v0 = vld [vmem:[#allocation2 + $0x1cb0] sm:$0xff]  ;;  %2238 = vmatpush.msrb.mxu2 %v872_v63  ;;  %v505_v63 = vld [vmem:[#allocation2 + $0xd38] sm:$0xff] }
 0x27f   :  { %v608_v1 = vld [vmem:[#allocation2 + $0x1070] sm:$0xff]  ;;  %2258 = vmatpush.msrb.mxu3 %v1000_v0  ;;  %v3082_v0 = vpop.f32.mrf.mxu2 }
 0x280   :  { %v736_v6 = vld [vmem:[#allocation2 + $0x1470] sm:$0xff]  ;;  %2199 = vmatpush.msrb.mxu0 %v608_v1  ;;  %v113_v1 = vld [vmem:[#allocation2 + $0xf8] sm:$0xff] }
 0x281   :  { %v864_v8 = vld [vmem:[#allocation2 + $0x1870] sm:$0xff]  ;;  %2219 = vmatpush.msrb.mxu1 %v736_v6  ;;  %v241_v6 = vld [vmem:[#allocation2 + $0x4f8] sm:$0xff] }
 0x282   :  { %v992_v22 = vld [vmem:[#allocation2 + $0x1c70] sm:$0xff]  ;;  %2239 = vmatpush.msrb.mxu2 %v864_v8  ;;  %v369_v8 = vld [vmem:[#allocation2 + $0x8f8] sm:$0xff] }
 0x283   :  { %v600_v51 = vld [vmem:[#allocation2 + $0x1030] sm:$0xff]  ;;  %2259 = vmatpush.msrb.mxu3 %v992_v22  ;;  %v497_v22 = vld [vmem:[#allocation2 + $0xcf8] sm:$0xff] }
 0x284   :  { %v728_v45 = vld [vmem:[#allocation2 + $0x1430] sm:$0xff]  ;;  %2200 = vmatpush.msrb.mxu0 %v600_v51  ;;  %v105_v51 = vld [vmem:[#allocation2 + $0xb8] sm:$0xff] }
 0x285   :  { %v856_v44 = vld [vmem:[#allocation2 + $0x1830] sm:$0xff]  ;;  %2220 = vmatpush.msrb.mxu1 %v728_v45  ;;  %2201 = vmatmul.f32.vlgmr.msrb.gmra.mxu0 %v3043_v46  ;;  %v177_v46 = vld [vmem:[#allocation2 + $0x2f8] sm:$0xff] }
 0x286   :  { %v984_v9 = vld [vmem:[#allocation2 + $0x1c30] sm:$0xff]  ;;  %2240 = vmatpush.msrb.mxu2 %v856_v44  ;;  %2265 = vmatpush.msra.mxu0 %v209_v50  ;;  %v233_v45 = vld [vmem:[#allocation2 + $0x4b8] sm:$0xff]  ;;  %v3084_v44 = vpop.f32.mrf.mxu3 }
 0x287   :  { %2260 = vmatpush.msrb.mxu3 %v984_v9  ;;  %2241 = vmatmul.f32.vlgmr.msrb.gmra.mxu2 %v3040_v62  ;;  %v185_v62 = vld [vmem:[#allocation2 + $0x338] sm:$0xff]  ;;  %v3086_v9 = vpop.f32.mrf.mxu0 }
 0x288   :  { %2285 = vmatpush.msra.mxu1 %v337_v11  ;;  %2305 = vmatpush.msra.mxu2 %v465_v12  ;;  %v361_v50 = vld [vmem:[#allocation2 + $0x8b8] sm:$0xff] }
 0x289   :  { %2325 = vmatpush.msra.mxu3 %v593_v54  ;;  %2266 = vmatpush.msra.mxu0 %v201_v13  ;;  %v489_v11 = vld [vmem:[#allocation2 + $0xcb8] sm:$0xff] }
 0x28a   :  { %2261 = vmatmul.f32.vlgmr.msrb.gmra.mxu3 %v3046_v7  ;;  %2286 = vmatpush.msra.mxu1 %v329_v14  ;;  %v305_v7 = vld [vmem:[#allocation2 + $0x6f8] sm:$0xff] }
 0x28b   :  { %2306 = vmatpush.msra.mxu2 %v457_v15  ;;  %2326 = vmatpush.msra.mxu3 %v585_v16  ;;  %v97_v12 = vld [vmem:[#allocation2 + $0x78] sm:$0xff] }
 0x28c   :  { %2221 = vmatmul.f32.vlgmr.msrb.gmra.mxu1 %v3049_v10  ;;  %2267 = vmatpush.msra.mxu0 %v193_v17  ;;  %v297_v10 = vld [vmem:[#allocation2 + $0x6b8] sm:$0xff]  ;;  %v3088_v17 = vpop.f32.mrf.mxu1 }
 0x28d   :  { %2287 = vmatpush.msra.mxu1 %v321_v18  ;;  %2307 = vmatpush.msra.mxu2 %v449_v19  ;;  %v225_v54 = vld [vmem:[#allocation2 + $0x478] sm:$0xff] }
 0x28e   :  { %2327 = vmatpush.msra.mxu3 %v577_v20  ;;  %2268 = vmatpush.msra.mxu0 %v185_v62  ;;  %v353_v13 = vld [vmem:[#allocation2 + $0x878] sm:$0xff]  ;;  %v3090_v20 = vpop.f32.mrf.mxu2 }
 0x28f   :  { %2288 = vmatpush.msra.mxu1 %v313_v21  ;;  %2308 = vmatpush.msra.mxu2 %v441_v23  ;;  %v481_v14 = vld [vmem:[#allocation2 + $0xc78] sm:$0xff] }
 0x290   :  { %2328 = vmatpush.msra.mxu3 %v569_v24  ;;  %2269 = vmatpush.msra.mxu0 %v177_v46  ;;  %v89_v15 = vld [vmem:[#allocation2 + $0x38] sm:$0xff] }
 0x291   :  { %2289 = vmatpush.msra.mxu1 %v305_v7  ;;  %2309 = vmatpush.msra.mxu2 %v433_v30  ;;  %v217_v16 = vld [vmem:[#allocation2 + $0x438] sm:$0xff]  ;;  %v3092_v30 = vpop.f32.mrf.mxu3 }
 0x292   :  { %2329 = vmatpush.msra.mxu3 %v561_v34  ;;  %2270 = vmatpush.msra.mxu0 %v169_v35  ;;  %v345_v18 = vld [vmem:[#allocation2 + $0x838] sm:$0xff] }
 0x293   :  { %2290 = vmatpush.msra.mxu1 %v297_v10  ;;  %2310 = vmatpush.msra.mxu2 %v425_v2  ;;  %v473_v19 = vld [vmem:[#allocation2 + $0xc38] sm:$0xff] }
 0x294   :  { %2330 = vmatpush.msra.mxu3 %v553_v3  ;;  %2271 = vmatpush.msra.mxu0 %v161_v36  ;;  %v721_v62 = vld [vmem:[#allocation2 + $0x13f8] sm:$0xff]  ;;  %v3094_v3 = vpop.f32.mrf.mxu0 }
 0x295   :  { %2291 = vmatpush.msra.mxu1 %v289_v4  ;;  %2311 = vmatpush.msra.mxu2 %v417_v37  ;;  %v849_v21 = vld [vmem:[#allocation2 + $0x17f8] sm:$0xff] }
 0x296   :  { %2331 = vmatpush.msra.mxu3 %v545_v38  ;;  %2272 = vmatpush.msra.mxu0 %v153_v40  ;;  %v977_v23 = vld [vmem:[#allocation2 + $0x1bf8] sm:$0xff] }
 0x297   :  { %2292 = vmatpush.msra.mxu1 %v281_v41  ;;  %2312 = vmatpush.msra.mxu2 %v409_v42  ;;  %v1105_v24 = vld [vmem:[#allocation2 + $0x1ff8] sm:$0xff] }
 0x298   :  { %2332 = vmatpush.msra.mxu3 %v537_v43  ;;  %2273 = vmatpush.msra.mxu0 %v145_v47  ;;  %v713_v46 = vld [vmem:[#allocation2 + $0x13b8] sm:$0xff]  ;;  %v3096_v47 = vpop.f32.mrf.mxu1 }
 0x299   :  { %2293 = vmatpush.msra.mxu1 %v273_v48  ;;  %2313 = vmatpush.msra.mxu2 %v401_v27  ;;  %v841_v7 = vld [vmem:[#allocation2 + $0x17b8] sm:$0xff] }
 0x29a   :  { %2333 = vmatpush.msra.mxu3 %v529_v25  ;;  %2274 = vmatpush.msra.mxu0 %v137_v26  ;;  %v969_v34 = vld [vmem:[#allocation2 + $0x1bb8] sm:$0xff]  ;;  %v3098_v25 = vpop.f32.mrf.mxu2 }
 0x29b   :  { %2294 = vmatpush.msra.mxu1 %v265_v28  ;;  %2314 = vmatpush.msra.mxu2 %v393_v32  ;;  %v1097_v35 = vld [vmem:[#allocation2 + $0x1fb8] sm:$0xff] }
 0x29c   :  { %2334 = vmatpush.msra.mxu3 %v521_v53  ;;  %2275 = vmatpush.msra.mxu0 %v129_v55  ;;  %v705_v10 = vld [vmem:[#allocation2 + $0x1378] sm:$0xff] }
 0x29d   :  { %2295 = vmatpush.msra.mxu1 %v257_v56  ;;  %2315 = vmatpush.msra.mxu2 %v385_v33  ;;  %v833_v2 = vld [vmem:[#allocation2 + $0x1778] sm:$0xff]  ;;  %v3100_v33 = vpop.f32.mrf.mxu3 }
 0x29e   :  { %2335 = vmatpush.msra.mxu3 %v513_v57  ;;  %2276 = vmatpush.msra.mxu0 %v121_v58  ;;  %v961_v36 = vld [vmem:[#allocation2 + $0x1b78] sm:$0xff]  ;;  %v3102_v57 = vpop.f32.mrf.mxu0 }
 0x29f   :  { %2296 = vmatpush.msra.mxu1 %v249_v59  ;;  %2316 = vmatpush.msra.mxu2 %v377_v61  ;;  %v1089_v4 = vld [vmem:[#allocation2 + $0x1f78] sm:$0xff] }
 0x2a0   :  { %2336 = vmatpush.msra.mxu3 %v505_v63  ;;  %2277 = vmatpush.msra.mxu0 %v113_v1  ;;  %v697_v37 = vld [vmem:[#allocation2 + $0x1338] sm:$0xff] }
 0x2a1   :  { %2297 = vmatpush.msra.mxu1 %v241_v6  ;;  %2317 = vmatpush.msra.mxu2 %v369_v8  ;;  %v825_v38 = vld [vmem:[#allocation2 + $0x1738] sm:$0xff] }
 0x2a2   :  { %2337 = vmatpush.msra.mxu3 %v497_v22  ;;  %2278 = vmatpush.msra.mxu0 %v105_v51  ;;  %v953_v40 = vld [vmem:[#allocation2 + $0x1b38] sm:$0xff]  ;;  %v3104_v51 = vpop.f32.mrf.mxu1 }
 0x2a3   :  { %2298 = vmatpush.msra.mxu1 %v233_v45  ;;  %2318 = vmatpush.msra.mxu2 %v361_v50  ;;  %v1081_v41 = vld [vmem:[#allocation2 + $0x1f38] sm:$0xff] }
 0x2a4   :  { %2338 = vmatpush.msra.mxu3 %v489_v11  ;;  %2279 = vmatpush.msra.mxu0 %v97_v12  ;;  %v689_v42 = vld [vmem:[#allocation2 + $0x12f8] sm:$0xff]  ;;  %v3106_v11 = vpop.f32.mrf.mxu2 }
 0x2a5   :  { %2299 = vmatpush.msra.mxu1 %v225_v54  ;;  %2319 = vmatpush.msra.mxu2 %v353_v13  ;;  %v817_v43 = vld [vmem:[#allocation2 + $0x16f8] sm:$0xff] }
 0x2a6   :  { %2339 = vmatpush.msra.mxu3 %v481_v14  ;;  %2280 = vmatpush.msra.mxu0 %v89_v15  ;;  %v945_v48 = vld [vmem:[#allocation2 + $0x1af8] sm:$0xff] }
 0x2a7   :  { %2300 = vmatpush.msra.mxu1 %v217_v16  ;;  %2320 = vmatpush.msra.mxu2 %v345_v18  ;;  %v1073_v27 = vld [vmem:[#allocation2 + $0x1ef8] sm:$0xff]  ;;  %v3108_v18 = vpop.f32.mrf.mxu3 }
 0x2a8   :  { %2340 = vmatpush.msra.mxu3 %v473_v19  ;;  %2345 = vmatpush.msrb.mxu0 %v721_v62  ;;  %v681_v26 = vld [vmem:[#allocation2 + $0x12b8] sm:$0xff] }
 0x2a9   :  { %2365 = vmatpush.msrb.mxu1 %v849_v21  ;;  %2385 = vmatpush.msrb.mxu2 %v977_v23  ;;  %v809_v28 = vld [vmem:[#allocation2 + $0x16b8] sm:$0xff] }
 0x2aa   :  { %2405 = vmatpush.msrb.mxu3 %v1105_v24  ;;  %2346 = vmatpush.msrb.mxu0 %v713_v46  ;;  %v937_v32 = vld [vmem:[#allocation2 + $0x1ab8] sm:$0xff]  ;;  %v3110_v24 = vpop.f32.mrf.mxu0 }
 0x2ab   :  { %2366 = vmatpush.msrb.mxu1 %v841_v7  ;;  %2386 = vmatpush.msrb.mxu2 %v969_v34  ;;  %v1065_v53 = vld [vmem:[#allocation2 + $0x1eb8] sm:$0xff] }
 0x2ac   :  { %2406 = vmatpush.msrb.mxu3 %v1097_v35  ;;  %2347 = vmatpush.msrb.mxu0 %v705_v10  ;;  %v673_v55 = vld [vmem:[#allocation2 + $0x1278] sm:$0xff] }
 0x2ad   :  { %2367 = vmatpush.msrb.mxu1 %v833_v2  ;;  %2387 = vmatpush.msrb.mxu2 %v961_v36  ;;  %v801_v56 = vld [vmem:[#allocation2 + $0x1678] sm:$0xff]  ;;  %v3112_v36 = vpop.f32.mrf.mxu1 }
 0x2ae   :  { %2407 = vmatpush.msrb.mxu3 %v1089_v4  ;;  %2348 = vmatpush.msrb.mxu0 %v697_v37  ;;  %v929_v58 = vld [vmem:[#allocation2 + $0x1a78] sm:$0xff]  ;;  %v2772_v4 = vld.sshfl [vmem:[#allocation1 + $0x10] sm:$0xff pattern:$0x73625140] }
 0x2af   :  { %2368 = vmatpush.msrb.mxu1 %v825_v38  ;;  %2388 = vmatpush.msrb.mxu2 %v953_v40  ;;  %v1057_v59 = vld [vmem:[#allocation2 + $0x1e78] sm:$0xff]  ;;  %v3114_v38 = vpop.f32.mrf.mxu2 }
 0x2b0   :  { %2408 = vmatpush.msrb.mxu3 %v1081_v41  ;;  %2349 = vmatpush.msrb.mxu0 %v689_v42  ;;  %v665_v61 = vld [vmem:[#allocation2 + $0x1238] sm:$0xff] }
 0x2b1   :  { %2369 = vmatpush.msrb.mxu1 %v817_v43  ;;  %2389 = vmatpush.msrb.mxu2 %v945_v48  ;;  %v793_v63 = vld [vmem:[#allocation2 + $0x1638] sm:$0xff]  ;;  %v3116_v48 = vld [vmem:[#allocation5] sm:$0xff] }
 0x2b2   :  { %2409 = vmatpush.msrb.mxu3 %v1073_v27  ;;  %2350 = vmatpush.msrb.mxu0 %v681_v26  ;;  %v921_v1 = vld [vmem:[#allocation2 + $0x1a38] sm:$0xff]  ;;  %v2774_v27 = vld.sshfl [vmem:[#allocation1 + $0x18] sm:$0xff pattern:$0x73625140] }
 0x2b3   :  { %2370 = vmatpush.msrb.mxu1 %v809_v28  ;;  %2390 = vmatpush.msrb.mxu2 %v937_v32  ;;  %v1049_v6 = vld [vmem:[#allocation2 + $0x1e38] sm:$0xff]  ;;  %v3118_v32 = vpop.f32.mrf.mxu3 }
 0x2b4   :  { %2410 = vmatpush.msrb.mxu3 %v1065_v53  ;;  %2351 = vmatpush.msrb.mxu0 %v673_v55  ;;  %v657_v8 = vld [vmem:[#allocation2 + $0x11f8] sm:$0xff]  ;;  %v1642_v53 = vpop.f32.mrf.mxu0 }
 0x2b5   :  { %2371 = vmatpush.msrb.mxu1 %v801_v56  ;;  %2391 = vmatpush.msrb.mxu2 %v929_v58  ;;  %v785_v22 = vld [vmem:[#allocation2 + $0x15f8] sm:$0xff] }
 0x2b6   :  { %2411 = vmatpush.msrb.mxu3 %v1057_v59  ;;  %2352 = vmatpush.msrb.mxu0 %v665_v61  ;;  %v913_v45 = vld [vmem:[#allocation2 + $0x19f8] sm:$0xff]  ;;  %v1108_v61 = vperm.slane %v3116_v48, 0 }
 0x2b7   :  { %2372 = vmatpush.msrb.mxu1 %v793_v63  ;;  %v1041_v50 = vld [vmem:[#allocation2 + $0x1df8] sm:$0xff]  ;;  %2392 = vmatpush.msrb.mxu2 %v921_v1  ;;  %v1109_v63 = vperm.slane %v3116_v48, 1 }
 0x2b8   :  { %2412 = vmatpush.msrb.mxu3 %v1049_v6  ;;  %v649_v12 = vld [vmem:[#allocation2 + $0x11b8] sm:$0xff]  ;;  %2353 = vmatpush.msrb.mxu0 %v657_v8  ;;  %v1110_v8 = vperm.slane %v3116_v48, 2 }
 0x2b9   :  { %v777_v54 = vld [vmem:[#allocation2 + $0x15b8] sm:$0xff]  ;;  %2373 = vmatpush.msrb.mxu1 %v785_v22  ;;  %2393 = vmatpush.msrb.mxu2 %v913_v45  ;;  %v1111_v22 = vperm.slane %v3116_v48, 3  ;;  %v2448_v45 = vld [vmem:[#allocation7 + $0x78] sm:$0xff] }
 0x2ba   :  { %v905_v13 = vld [vmem:[#allocation2 + $0x19b8] sm:$0xff]  ;;  %2413 = vmatpush.msrb.mxu3 %v1041_v50  ;;  %2354 = vmatpush.msrb.mxu0 %v649_v12  ;;  %v1662_v50 = vpop.f32.mrf.mxu1  ;;  %v2480_v12 = vld [vmem:[#allocation7 + $0x178] sm:$0xff] }
 0x2bb   :  { %v1033_v14 = vld [vmem:[#allocation2 + $0x1db8] sm:$0xff]  ;;  %2374 = vmatpush.msrb.mxu1 %v777_v54  ;;  %2394 = vmatpush.msrb.mxu2 %v905_v13  ;;  %v1682_v54 = vpop.f32.mrf.mxu2  ;;  %v2496_v13 = vld [vmem:[#allocation7 + $0x1f8] sm:$0xff] }
 0x2bc   :  { %v641_v15 = vld [vmem:[#allocation2 + $0x1178] sm:$0xff]  ;;  %2414 = vmatpush.msrb.mxu3 %v1033_v14  ;;  %2321 = vmatmul.f32.vlgmr.msra.gmra.mxu2 %v2772_v4  ;;  %v1163_v14 = vadd.f32 %v3070_v29, %v1108_v61  ;;  %v2777_v29 = vld.sshfl [vmem:[#allocation1 + $0x38] sm:$0xff pattern:$0x73625140]  ;;  %v3132_v4 = vpop.f32.mrf.mxu0 }
 0x2bd   :  { %v769_v16 = vld [vmem:[#allocation2 + $0x1578] sm:$0xff]  ;;  %2355 = vmatpush.msrb.mxu0 %v641_v15  ;;  %2341 = vmatmul.f32.vlgmr.msra.gmra.mxu3 %v2774_v27  ;;  %v1323_v15 = vadd.f32 %v3086_v9, %v1109_v63  ;;  %v2446_v9 = vld [vmem:[#allocation7 + $0x68] sm:$0xff]  ;;  %v2445_v27 = vld [vmem:[#allocation7 + $0x60] sm:$0xff] }
 0x2be   :  { %v897_v19 = vld [vmem:[#allocation2 + $0x1978] sm:$0xff]  ;;  %2375 = vmatpush.msrb.mxu1 %v769_v16  ;;  %v2775_v16 = vld.sshfl [vmem:[#allocation1 + $0x30] sm:$0xff pattern:$0x73625140] }
 0x2bf   :  { %v1025_v62 = vld [vmem:[#allocation2 + $0x1d78] sm:$0xff]  ;;  %2395 = vmatpush.msrb.mxu2 %v897_v19  ;;  %2301 = vmatmul.f32.vlgmr.msra.gmra.mxu1 %v3063_v49  ;;  %v2464_v49 = vld [vmem:[#allocation7 + $0xf8] sm:$0xff] }
 0x2c0   :  { %v633_v21 = vld [vmem:[#allocation2 + $0x1138] sm:$0xff]  ;;  %2415 = vmatpush.msrb.mxu3 %v1025_v62  ;;  %v1483_v62 = vadd.f32 %v3102_v57, %v1110_v8  ;;  %v1343_v57 = vadd.f32 %v3088_v17, %v1323_v15  ;;  %v2444_v17 = vld [vmem:[#allocation7 + $0x58] sm:$0xff] }
 0x2c1   :  { %v761_v23 = vld [vmem:[#allocation2 + $0x1538] sm:$0xff]  ;;  %2356 = vmatpush.msrb.mxu0 %v633_v21  ;;  %v1643_v21 = vadd.f32 %v1642_v53, %v1111_v22  ;;  %v2460_v53 = vld [vmem:[#allocation7 + $0xd8] sm:$0xff] }
 0x2c2   :  { %v889_v46 = vld [vmem:[#allocation2 + $0x1938] sm:$0xff]  ;;  %2376 = vmatpush.msrb.mxu1 %v761_v23 }
 0x2c3   :  { %v1017_v7 = vld [vmem:[#allocation2 + $0x1d38] sm:$0xff]  ;;  %2396 = vmatpush.msrb.mxu2 %v889_v46 }
 0x2c4   :  { %v625_v34 = vld [vmem:[#allocation2 + $0x10f8] sm:$0xff]  ;;  %2416 = vmatpush.msrb.mxu3 %v1017_v7  ;;  %v3128_v7 = vpop.f32.mrf.mxu3 }
 0x2c5   :  { %v753_v35 = vld [vmem:[#allocation2 + $0x14f8] sm:$0xff]  ;;  %2357 = vmatpush.msrb.mxu0 %v625_v34 }
 0x2c6   :  { %v881_v10 = vld [vmem:[#allocation2 + $0x18f8] sm:$0xff]  ;;  %2377 = vmatpush.msrb.mxu1 %v753_v35 }
 0x2c7   :  { %v1009_v2 = vld [vmem:[#allocation2 + $0x1cf8] sm:$0xff]  ;;  %2397 = vmatpush.msrb.mxu2 %v881_v10  ;;  %v2462_v10 = vld [vmem:[#allocation7 + $0xe8] sm:$0xff] }
 0x2c8   :  { %v617_v37 = vld [vmem:[#allocation2 + $0x10b8] sm:$0xff]  ;;  %2417 = vmatpush.msrb.mxu3 %v1009_v2  ;;  %v1183_v2 = vadd.f32 %v3072_v5, %v1163_v14  ;;  %v2493_v5 = vld [vmem:[#allocation7 + $0x1e0] sm:$0xff] }
 0x2c9   :  { %v745_v40 = vld [vmem:[#allocation2 + $0x14b8] sm:$0xff]  ;;  %2358 = vmatpush.msrb.mxu0 %v617_v37  ;;  %v2478_v37 = vld [vmem:[#allocation7 + $0x168] sm:$0xff] }
 0x2ca   :  { %v873_v41 = vld [vmem:[#allocation2 + $0x18b8] sm:$0xff]  ;;  %2378 = vmatpush.msrb.mxu1 %v745_v40  ;;  %v2494_v40 = vld [vmem:[#allocation7 + $0x1e8] sm:$0xff] }
 0x2cb   :  { %v2773_v42 = vld.sshfl [vmem:[#allocation1] sm:$0xff pattern:$0x73625140]  ;;  %2398 = vmatpush.msrb.mxu2 %v873_v41  ;;  %v1503_v41 = vadd.f32 %v3104_v51, %v1483_v62  ;;  %v2476_v51 = vld [vmem:[#allocation7 + $0x158] sm:$0xff] }
 0x2cc   :  { %2281 = vmatmul.f32.vlgmr.msra.gmra.mxu0 %v2773_v42  ;;  %v1001_v43 = vld [vmem:[#allocation2 + $0x1cb8] sm:$0xff]  ;;  %v1663_v42 = vadd.f32 %v1662_v50, %v1643_v21  ;;  %v2440_v62 = vld [vmem:[#allocation7 + $0x38] sm:$0xff] }
 0x2cd   :  { %v609_v26 = vld [vmem:[#allocation2 + $0x1078] sm:$0xff]  ;;  %2418 = vmatpush.msrb.mxu3 %v1001_v43  ;;  %v2778_v43 = vld.sshfl [vmem:[#allocation1 + $0x28] sm:$0xff pattern:$0x73625140]  ;;  %v1523_v61 = vadd.f32 %v3106_v11, %v1503_v41  ;;  %v3144_v11 = vpop.f32.mrf.mxu3 }
 0x2ce   :  { %v737_v28 = vld [vmem:[#allocation2 + $0x1478] sm:$0xff]  ;;  %2359 = vmatpush.msrb.mxu0 %v609_v26  ;;  %v2461_v26 = vld [vmem:[#allocation7 + $0xe0] sm:$0xff]  ;;  %v1683_v63 = vadd.f32 %v1682_v54, %v1663_v42  ;;  %v2474_v54 = vld [vmem:[#allocation7 + $0x148] sm:$0xff] }
 0x2cf   :  { %v865_v55 = vld [vmem:[#allocation2 + $0x1878] sm:$0xff]  ;;  %2379 = vmatpush.msrb.mxu1 %v737_v28  ;;  %v2477_v28 = vld [vmem:[#allocation7 + $0x160] sm:$0xff]  ;;  %v1543_v14 = vadd.f32 %v3108_v18, %v1523_v61  ;;  %v2456_v21 = vld [vmem:[#allocation7 + $0xb8] sm:$0xff] }
 0x2d0   :  { %v993_v56 = vld [vmem:[#allocation2 + $0x1c78] sm:$0xff]  ;;  %2399 = vmatpush.msrb.mxu2 %v865_v55  ;;  %v1203_v55 = vadd.f32 %v3074_v39, %v1183_v2  ;;  %v1703_v15 = vadd.f32 %v3128_v7, %v1683_v63  ;;  %v2472_v18 = vld [vmem:[#allocation7 + $0x138] sm:$0xff]  ;;  %v2486_v42 = vld [vmem:[#allocation7 + $0x1a8] sm:$0xff] }
 0x2d1   :  { %v601_v58 = vld [vmem:[#allocation2 + $0x1038] sm:$0xff]  ;;  %2419 = vmatpush.msrb.mxu3 %v993_v56  ;;  %v1363_v56 = vadd.f32 %v3090_v20, %v1343_v57  ;;  %v2442_v20 = vld [vmem:[#allocation7 + $0x48] sm:$0xff]  ;;  %v2488_v7 = vld [vmem:[#allocation7 + $0x1b8] sm:$0xff] }
 0x2d2   :  { %v729_v59 = vld [vmem:[#allocation2 + $0x1438] sm:$0xff]  ;;  %2360 = vmatpush.msrb.mxu0 %v601_v58  ;;  %v3137_v58 = vpop.f32.mrf.mxu1  ;;  %v1223_v50 = vadd.f32 %v3076_v52, %v1203_v55  ;;  %v2473_v52 = vld [vmem:[#allocation7 + $0x140] sm:$0xff]  ;;  %v2438_v57 = vld [vmem:[#allocation7 + $0x28] sm:$0xff] }
 0x2d3   :  { %v857_v1 = vld [vmem:[#allocation2 + $0x1838] sm:$0xff]  ;;  %2380 = vmatpush.msrb.mxu1 %v729_v59  ;;  %v2492_v59 = vld [vmem:[#allocation7 + $0x1d8] sm:$0xff] }
 0x2d4   :  { %v985_v6 = vld [vmem:[#allocation2 + $0x1c38] sm:$0xff]  ;;  %2400 = vmatpush.msrb.mxu2 %v857_v1  ;;  %2565 = vmatpush.msra.mxu0 %v2448_v45  ;;  %v3140_v1 = vpop.f32.mrf.mxu2  ;;  %v2458_v45 = vld [vmem:[#allocation7 + $0xc8] sm:$0xff] }
 0x2d5   :  { %2420 = vmatpush.msrb.mxu3 %v985_v6  ;;  %2401 = vmatmul.f32.vlgmr.msrb.gmra.mxu2 %v2775_v16  ;;  %v2447_v19 = vld [vmem:[#allocation7 + $0x70] sm:$0xff]  ;;  %v2441_v16 = vld [vmem:[#allocation7 + $0x40] sm:$0xff]  ;;  %v3160_v41 = vpop.f32.mrf.mxu3 }
 0x2d6   :  { %2585 = vmatpush.msra.mxu1 %v2464_v49  ;;  %2605 = vmatpush.msra.mxu2 %v2480_v12  ;;  %v2463_v23 = vld [vmem:[#allocation7 + $0xf0] sm:$0xff]  ;;  %v1383_v49 = vadd.f32 %v3092_v30, %v1363_v56  ;;  %v3146_v12 = vpop.f32.mrf.mxu0  ;;  %v2489_v30 = vld [vmem:[#allocation7 + $0x1c0] sm:$0xff]  ;;  %v2468_v56 = vld [vmem:[#allocation7 + $0x118] sm:$0xff] }
 0x2d7   :  { %v2479_v46 = vld [vmem:[#allocation7 + $0x170] sm:$0xff]  ;;  %2625 = vmatpush.msra.mxu3 %v2496_v13  ;;  %2566 = vmatpush.msra.mxu0 %v2447_v19  ;;  %v2490_v13 = vld [vmem:[#allocation7 + $0x1c8] sm:$0xff]  ;;  %v2457_v19 = vld [vmem:[#allocation7 + $0xc0] sm:$0xff] }
 0x2d8   :  { %v2776_v34 = vld.sshfl [vmem:[#allocation1 + $0x20] sm:$0xff pattern:$0x73625140]  ;;  %2421 = vmatmul.f32.vlgmr.msrb.gmra.mxu3 %v2777_v29  ;;  %2586 = vmatpush.msra.mxu1 %v2463_v23  ;;  %v1243_v23 = vadd.f32 %v3078_v31, %v1223_v50  ;;  %v1723_v29 = vadd.f32 %v3132_v4, %v1703_v15  ;;  %v2470_v4 = vld [vmem:[#allocation7 + $0x128] sm:$0xff]  ;;  %v2449_v15 = vld [vmem:[#allocation7 + $0x80] sm:$0xff] }
 0x2d9   :  { %2361 = vmatmul.f32.vlgmr.msrb.gmra.mxu0 %v2776_v34  ;;  %v2495_v35 = vld [vmem:[#allocation7 + $0x1f0] sm:$0xff]  ;;  %2606 = vmatpush.msra.mxu2 %v2479_v46  ;;  %v1403_v46 = vadd.f32 %v3094_v3, %v1383_v49 }
 0x2da   :  { %2626 = vmatpush.msra.mxu3 %v2495_v35  ;;  %2381 = vmatmul.f32.vlgmr.msrb.gmra.mxu1 %v2778_v43  ;;  %v2443_v6 = vld [vmem:[#allocation7 + $0x50] sm:$0xff]  ;;  %v3152_v34 = vpop.f32.mrf.mxu1  ;;  %v1563_v35 = vadd.f32 %v3110_v24, %v1543_v14  ;;  %v2433_v14 = vld [vmem:[#allocation7] sm:$0xff] }
 0x2db   :  { %2567 = vmatpush.msra.mxu0 %v2446_v9  ;;  %2587 = vmatpush.msra.mxu1 %v2462_v10  ;;  %v2459_v8 = vld [vmem:[#allocation7 + $0xd0] sm:$0xff]  ;;  %v1423_v24 = vadd.f32 %v3096_v47, %v1403_v46  ;;  %v2485_v47 = vld [vmem:[#allocation7 + $0x1a0] sm:$0xff]  ;;  %v2528_v46 = vld [vmem:[#allocation7 + $0x2f8] sm:$0xff] }
 0x2dc   :  { %2607 = vmatpush.msra.mxu2 %v2478_v37  ;;  %2627 = vmatpush.msra.mxu3 %v2494_v40  ;;  %v2475_v39 = vld [vmem:[#allocation7 + $0x150] sm:$0xff]  ;;  %v3156_v9 = vpop.f32.mrf.mxu2  ;;  %v2454_v37 = vld [vmem:[#allocation7 + $0xa8] sm:$0xff]  ;;  %v1263_v40 = vadd.f32 %v3080_v60, %v1243_v23  ;;  %v1583_v43 = vadd.f32 %v3112_v36, %v1563_v35  ;;  %v2469_v60 = vld [vmem:[#allocation7 + $0x120] sm:$0xff] }
 0x2dd   :  { %2568 = vmatpush.msra.mxu0 %v2445_v27  ;;  %2588 = vmatpush.msra.mxu1 %v2461_v26  ;;  %v2491_v22 = vld [vmem:[#allocation7 + $0x1d0] sm:$0xff]  ;;  %v1743_v27 = vadd.f32 %v3137_v58, %v1723_v29  ;;  %v2437_v26 = vld [vmem:[#allocation7 + $0x20] sm:$0xff]  ;;  %v1443_v36 = vadd.f32 %v3098_v25, %v1423_v24  ;;  %v2484_v58 = vld [vmem:[#allocation7 + $0x198] sm:$0xff] }
 0x2de   :  { %2608 = vmatpush.msra.mxu2 %v2477_v28  ;;  %2628 = vmatpush.msra.mxu3 %v2493_v5  ;;  %v2439_v10 = vld [vmem:[#allocation7 + $0x30] sm:$0xff]  ;;  %v2453_v28 = vld [vmem:[#allocation7 + $0xa0] sm:$0xff]  ;;  %v3164_v5 = vpop.f32.mrf.mxu0  ;;  %v1283_v55 = vadd.f32 %v3082_v0, %v1263_v40  ;;  %v2434_v25 = vld [vmem:[#allocation7 + $0x8] sm:$0xff] }
 0x2df   :  { %2569 = vmatpush.msra.mxu0 %v2444_v17  ;;  %2589 = vmatpush.msra.mxu1 %v2460_v53  ;;  %v2455_v2 = vld [vmem:[#allocation7 + $0xb0] sm:$0xff]  ;;  %v2436_v17 = vld [vmem:[#allocation7 + $0x18] sm:$0xff]  ;;  %v2542_v40 = vld [vmem:[#allocation7 + $0x368] sm:$0xff] }
 0x2e0   :  { %2609 = vmatpush.msra.mxu2 %v2476_v51  ;;  %2629 = vmatpush.msra.mxu3 %v2492_v59  ;;  %v2471_v31 = vld [vmem:[#allocation7 + $0x130] sm:$0xff]  ;;  %v2452_v53 = vld [vmem:[#allocation7 + $0x98] sm:$0xff]  ;;  %v1603_v51 = vadd.f32 %v3114_v38, %v1583_v43  ;;  %v1763_v59 = vadd.f32 %v3140_v1, %v1743_v27  ;;  %v1303_v38 = vadd.f32 %v3084_v44, %v1283_v55  ;;  %v2509_v24 = vld [vmem:[#allocation7 + $0x260] sm:$0xff] }
 0x2e1   :  { %2570 = vmatpush.msra.mxu0 %v2443_v6  ;;  %2590 = vmatpush.msra.mxu1 %v2459_v8  ;;  %v2487_v3 = vld [vmem:[#allocation7 + $0x1b0] sm:$0xff]  ;;  %v1463_v1 = vadd.f32 %v3100_v33, %v1443_v36  ;;  %v2465_v33 = vld [vmem:[#allocation7 + $0x100] sm:$0xff]  ;;  %v2512_v23 = vld [vmem:[#allocation7 + $0x278] sm:$0xff] }
 0x2e2   :  { %2610 = vmatpush.msra.mxu2 %v2475_v39  ;;  %2630 = vmatpush.msra.mxu3 %v2491_v22  ;;  %v2435_v61 = vld [vmem:[#allocation7 + $0x10] sm:$0xff]  ;;  %v3170_v6 = vpop.f32.mrf.mxu1  ;;  %v2450_v22 = vld [vmem:[#allocation7 + $0x88] sm:$0xff]  ;;  %v1623_v50 = vadd.f32 %v3118_v32, %v1603_v51  ;;  %v1783_v49 = vadd.f32 %v3144_v11, %v1763_v59  ;;  %v2425_v32 = vmax.f32 %v1303_v38, 0.0  ;;  %v2541_v43 = vld [vmem:[#allocation7 + $0x360] sm:$0xff] }
 0x2e3   :  { %2571 = vmatpush.msra.mxu0 %v2442_v20  ;;  %2591 = vmatpush.msra.mxu1 %v2458_v45  ;;  %v2451_v63 = vld [vmem:[#allocation7 + $0x90] sm:$0xff]  ;;  %v2466_v20 = vld [vmem:[#allocation7 + $0x108] sm:$0xff]  ;;  %v2557_v51 = vld [vmem:[#allocation7 + $0x3e0] sm:$0xff] }
 0x2e4   :  { %2611 = vmatpush.msra.mxu2 %v2474_v54  ;;  %2631 = vmatpush.msra.mxu3 %v2490_v13  ;;  %v2467_v8 = vld [vmem:[#allocation7 + $0x110] sm:$0xff]  ;;  %v3172_v39 = vpop.f32.mrf.mxu2  ;;  %v2482_v45 = vld [vmem:[#allocation7 + $0x188] sm:$0xff]  ;;  %v1112_v54 = vperm.slane %v3116_v48, 4  ;;  %v1113_v13 = vperm.slane %v3116_v48, 5  ;;  %v2427_v11 = vmax.f32 %v1623_v50, 0.0  ;;  %v2505_v38 = vld [vmem:[#allocation7 + $0x240] sm:$0xff] }
 0x2e5   :  { %2572 = vmatpush.msra.mxu0 %v2441_v16  ;;  %2592 = vmatpush.msra.mxu1 %v2457_v19  ;;  %v2483_v0 = vld [vmem:[#allocation7 + $0x190] sm:$0xff]  ;;  %v3180_v16 = vpop.f32.mrf.mxu3  ;;  %v2481_v19 = vld [vmem:[#allocation7 + $0x180] sm:$0xff] }
 0x2e6   :  { %2612 = vmatpush.msra.mxu2 %v2473_v52  ;;  %2632 = vmatpush.msra.mxu3 %v2489_v30  ;;  %v1962_v44 = vpop.f32.mrf.mxu0  ;;  %v2426_v52 = vmax.f32 %v1463_v1, 0.0  ;;  %v2428_v30 = vmax.f32 %v1783_v49, 0.0  ;;  %v2511_v29 = vld [vmem:[#allocation7 + $0x270] sm:$0xff]  ;;  %v2521_v1 = vld [vmem:[#allocation7 + $0x2c0] sm:$0xff] }
 0x2e7   :  { %2573 = vmatpush.msra.mxu0 %v2440_v62  ;;  %2593 = vmatpush.msra.mxu1 %v2456_v21  ;;  %v1803_v62 = vadd.f32 %v3146_v12, %v1112_v54  ;;  %v1963_v21 = vadd.f32 %v1962_v44, %v1113_v13  ;;  %v2559_v27 = vld [vmem:[#allocation7 + $0x3f0] sm:$0xff]  ;;  %v2504_v54 = vld [vmem:[#allocation7 + $0x238] sm:$0xff] }
 0x2e8   :  { %2613 = vmatpush.msra.mxu2 %v2472_v18  ;;  %2633 = vmatpush.msra.mxu3 %v2488_v7  ;;  %v2544_v7 = vld [vmem:[#allocation7 + $0x378] sm:$0xff]  ;;  %v2507_v55 = vld [vmem:[#allocation7 + $0x250] sm:$0xff] }
 0x2e9   :  { %2574 = vmatpush.msra.mxu0 %v2439_v10  ;;  %2594 = vmatpush.msra.mxu1 %v2455_v2  ;;  %v2527_v10 = vld [vmem:[#allocation7 + $0x2f0] sm:$0xff]  ;;  %v2520_v13 = vld [vmem:[#allocation7 + $0x2b8] sm:$0xff] }
 0x2ea   :  { %2614 = vmatpush.msra.mxu2 %v2471_v31  ;;  %2634 = vmatpush.msra.mxu3 %v2487_v3  ;;  %v1982_v18 = vpop.f32.mrf.mxu1  ;;  %v2543_v2 = vld [vmem:[#allocation7 + $0x370] sm:$0xff]  ;;  %v1823_v31 = vadd.f32 %v3152_v34, %v1803_v62  ;;  %v2510_v3 = vld [vmem:[#allocation7 + $0x268] sm:$0xff]  ;;  %v2536_v44 = vld [vmem:[#allocation7 + $0x338] sm:$0xff] }
 0x2eb   :  { %2575 = vmatpush.msra.mxu0 %v2438_v57  ;;  %2595 = vmatpush.msra.mxu1 %v2454_v37  ;;  %v1983_v12 = vadd.f32 %v1982_v18, %v1963_v21  ;;  %v2526_v57 = vld [vmem:[#allocation7 + $0x2e8] sm:$0xff]  ;;  %v2523_v36 = vld [vmem:[#allocation7 + $0x2d0] sm:$0xff]  ;;  %v2501_v18 = vld [vmem:[#allocation7 + $0x220] sm:$0xff] }
 0x2ec   :  { %2615 = vmatpush.msra.mxu2 %v2470_v4  ;;  %2635 = vmatpush.msra.mxu3 %v2486_v42  ;;  %v2002_v35 = vpop.f32.mrf.mxu2  ;;  %v2525_v4 = vld [vmem:[#allocation7 + $0x2e0] sm:$0xff]  ;;  %v2560_v42 = vld [vmem:[#allocation7 + $0x3f8] sm:$0xff]  ;;  %v2518_v62 = vld [vmem:[#allocation7 + $0x2a8] sm:$0xff] }
 0x2ed   :  { %2576 = vmatpush.msra.mxu0 %v2437_v26  ;;  %2596 = vmatpush.msra.mxu1 %v2453_v28  ;;  %v2022_v37 = vpop.f32.mrf.mxu3  ;;  %v1843_v26 = vadd.f32 %v3156_v9, %v1823_v31  ;;  %v2003_v28 = vadd.f32 %v2002_v35, %v1983_v12  ;;  %v2500_v31 = vld [vmem:[#allocation7 + $0x218] sm:$0xff] }
 0x2ee   :  { %2616 = vmatpush.msra.mxu2 %v2469_v60  ;;  %2636 = vmatpush.msra.mxu3 %v2485_v47  ;;  %v2042_v34 = vpop.f32.mrf.mxu0  ;;  %v2508_v60 = vld [vmem:[#allocation7 + $0x258] sm:$0xff] }
 0x2ef   :  { %2577 = vmatpush.msra.mxu0 %v2436_v17  ;;  %2597 = vmatpush.msra.mxu1 %v2452_v53  ;;  %v2524_v47 = vld [vmem:[#allocation7 + $0x2d8] sm:$0xff]  ;;  %v2558_v53 = vld [vmem:[#allocation7 + $0x3e8] sm:$0xff]  ;;  %v1863_v9 = vadd.f32 %v3160_v41, %v1843_v26  ;;  %v2023_v59 = vadd.f32 %v2022_v37, %v2003_v28  ;;  %v2537_v41 = vld [vmem:[#allocation7 + $0x340] sm:$0xff] }
 0x2f0   :  { %2617 = vmatpush.msra.mxu2 %v2468_v56  ;;  %2637 = vmatpush.msra.mxu3 %v2484_v58  ;;  %v2540_v17 = vld [vmem:[#allocation7 + $0x358] sm:$0xff]  ;;  %v2539_v58 = vld [vmem:[#allocation7 + $0x350] sm:$0xff]  ;;  %v2514_v26 = vld [vmem:[#allocation7 + $0x288] sm:$0xff] }
 0x2f1   :  { %2578 = vmatpush.msra.mxu0 %v2435_v61  ;;  %2598 = vmatpush.msra.mxu1 %v2451_v63  ;;  %v2506_v63 = vld [vmem:[#allocation7 + $0x248] sm:$0xff]  ;;  %v1883_v50 = vadd.f32 %v3164_v5, %v1863_v9  ;;  %v2043_v49 = vadd.f32 %v2042_v34, %v2023_v59  ;;  %v2516_v12 = vld [vmem:[#allocation7 + $0x298] sm:$0xff]  ;;  %v2499_v37 = vld [vmem:[#allocation7 + $0x210] sm:$0xff] }
 0x2f2   :  { %2618 = vmatpush.msra.mxu2 %v2467_v8  ;;  %2638 = vmatpush.msra.mxu3 %v2483_v0  ;;  %v2062_v56 = vpop.f32.mrf.mxu1  ;;  %v2522_v8 = vld [vmem:[#allocation7 + $0x2c8] sm:$0xff]  ;;  %v1114_v0 = vperm.slane %v3116_v48, 6 }
 0x2f3   :  { %2579 = vmatpush.msra.mxu0 %v2434_v25  ;;  %2599 = vmatpush.msra.mxu1 %v2450_v22  ;;  %v2538_v25 = vld [vmem:[#allocation7 + $0x348] sm:$0xff]  ;;  %v2556_v22 = vld [vmem:[#allocation7 + $0x3d8] sm:$0xff]  ;;  %v1903_v5 = vadd.f32 %v3170_v6, %v1883_v50 }
 0x2f4   :  { %2619 = vmatpush.msra.mxu2 %v2466_v20  ;;  %2639 = vmatpush.msra.mxu3 %v2482_v45  ;;  %v2082_v61 = vpop.f32.mrf.mxu2  ;;  %v2555_v45 = vld [vmem:[#allocation7 + $0x3d0] sm:$0xff]  ;;  %v2530_v34 = vld [vmem:[#allocation7 + $0x308] sm:$0xff] }
 0x2f5   :  { %2580 = vmatpush.msra.mxu0 %v2433_v14  ;;  %2600 = vmatpush.msra.mxu1 %v2449_v15  ;;  %v2102_v20 = vpop.f32.mrf.mxu3  ;;  %v2554_v59 = vld [vmem:[#allocation7 + $0x3c8] sm:$0xff] }
 0x2f6   :  { %2620 = vmatpush.msra.mxu2 %v2465_v33  ;;  %2640 = vmatpush.msra.mxu3 %v2481_v19  ;;  %v2122_v14 = vpop.f32.mrf.mxu0  ;;  %v2503_v33 = vld [vmem:[#allocation7 + $0x230] sm:$0xff] }
 0x2f7   :  { %2581 = vmatmul.f32.vlgmr.msra.gmra.mxu0 %v2425_v32  ;;  %2601 = vmatmul.f32.vlgmr.msra.gmra.mxu1 %v2426_v52  ;;  %v2123_v15 = vadd.f32 %v2122_v14, %v1114_v0  ;;  %v2519_v19 = vld [vmem:[#allocation7 + $0x2b0] sm:$0xff]  ;;  %v2550_v0 = vld [vmem:[#allocation7 + $0x3a8] sm:$0xff] }
 0x2f8   :  { %2621 = vmatmul.f32.vlgmr.msra.gmra.mxu2 %v2427_v11  ;;  %2641 = vmatmul.f32.vlgmr.msra.gmra.mxu3 %v2428_v30  ;;  %v2535_v52 = vld [vmem:[#allocation7 + $0x330] sm:$0xff]  ;;  %v2063_v11 = vadd.f32 %v2062_v56, %v2043_v49  ;;  %v2502_v30 = vld [vmem:[#allocation7 + $0x228] sm:$0xff] }
 0x2f9   :  { %2645 = vmatpush.msrb.mxu0 %v2512_v23  ;;  %2665 = vmatpush.msrb.mxu1 %v2528_v46  ;;  %v2534_v46 = vld [vmem:[#allocation7 + $0x328] sm:$0xff] }
 0x2fa   :  { %2685 = vmatpush.msrb.mxu2 %v2544_v7  ;;  %2705 = vmatpush.msrb.mxu3 %v2560_v42  ;;  %v2142_v32 = vpop.f32.mrf.mxu1  ;;  %v2517_v7 = vld [vmem:[#allocation7 + $0x2a0] sm:$0xff]  ;;  %v2083_v6 = vadd.f32 %v2082_v61, %v2063_v11  ;;  %v2531_v42 = vld [vmem:[#allocation7 + $0x310] sm:$0xff] }
 0x2fb   :  { %2646 = vmatpush.msrb.mxu0 %v2511_v29  ;;  %2666 = vmatpush.msrb.mxu1 %v2527_v10  ;;  %v2143_v21 = vadd.f32 %v2142_v32, %v2123_v15  ;;  %v2533_v10 = vld [vmem:[#allocation7 + $0x320] sm:$0xff] }
 0x2fc   :  { %2686 = vmatpush.msrb.mxu2 %v2543_v2  ;;  %2706 = vmatpush.msrb.mxu3 %v2559_v27  ;;  %v2162_v23 = vpop.f32.mrf.mxu2  ;;  %v1923_v2 = vadd.f32 %v3172_v39, %v1903_v5  ;;  %v2103_v27 = vadd.f32 %v2102_v20, %v2083_v6  ;;  %v2498_v39 = vld [vmem:[#allocation7 + $0x208] sm:$0xff]  ;;  %v2553_v61 = vld [vmem:[#allocation7 + $0x3c0] sm:$0xff] }
 0x2fd   :  { %2647 = vmatpush.msrb.mxu0 %v2510_v3  ;;  %2667 = vmatpush.msrb.mxu1 %v2526_v57  ;;  %v2163_v35 = vadd.f32 %v2162_v23, %v2143_v21  ;;  %v2182_v29 = vpop.f32.mrf.mxu3  ;;  %v2532_v57 = vld [vmem:[#allocation7 + $0x318] sm:$0xff]  ;;  %v2545_v20 = vld [vmem:[#allocation7 + $0x380] sm:$0xff] }
 0x2fe   :  { %2687 = vmatpush.msrb.mxu2 %v2542_v40  ;;  %2707 = vmatpush.msrb.mxu3 %v2558_v53  ;;  %v2515_v40 = vld [vmem:[#allocation7 + $0x290] sm:$0xff]  ;;  %v2754_v23 = vld [vmem:[#allocation8] ss:$0 sm:$0xff] }
 0x2ff   :  { %2648 = vmatpush.msrb.mxu0 %v2509_v24  ;;  %2668 = vmatpush.msrb.mxu1 %v2525_v4  ;;  %v2183_v3 = vadd.f32 %v2182_v29, %v2163_v35 }
 0x300   :  { %2688 = vmatpush.msrb.mxu2 %v2541_v43  ;;  %2708 = vmatpush.msrb.mxu3 %v2557_v51  ;;  %v1943_v43 = vadd.f32 %v3180_v16, %v1923_v2  ;;  %v2529_v16 = vld [vmem:[#allocation7 + $0x300] sm:$0xff] }
 0x301   :  { %2649 = vmatpush.msrb.mxu0 %v2508_v60  ;;  %2669 = vmatpush.msrb.mxu1 %v2524_v47  ;;  %v2497_v60 = vld [vmem:[#allocation7 + $0x200] sm:$0xff] }
 0x302   :  { %2689 = vmatpush.msrb.mxu2 %v2540_v17  ;;  %2709 = vmatpush.msrb.mxu3 %v2556_v22  ;;  %v2202_v24 = vpop.f32.mrf.mxu0  ;;  %v2513_v47 = vld [vmem:[#allocation7 + $0x280] sm:$0xff]  ;;  %v2548_v22 = vld [vmem:[#allocation7 + $0x398] sm:$0xff] }
 0x303   :  { %2650 = vmatpush.msrb.mxu0 %v2507_v55  ;;  %2670 = vmatpush.msrb.mxu1 %v2523_v36  ;;  %v2203_v4 = vadd.f32 %v2202_v24, %v2183_v3  ;;  %v2429_v55 = vmax.f32 %v1943_v43, 0.0  ;;  %v2430_v36 = vmax.f32 %v2103_v27, 0.0 }
 0x304   :  { %2690 = vmatpush.msrb.mxu2 %v2539_v58  ;;  %2710 = vmatpush.msrb.mxu3 %v2555_v45 }
 0x305   :  { %2651 = vmatpush.msrb.mxu0 %v2506_v63  ;;  %2671 = vmatpush.msrb.mxu1 %v2522_v8  ;;  %v2552_v63 = vld [vmem:[#allocation7 + $0x3b8] sm:$0xff]  ;;  %v2551_v8 = vld [vmem:[#allocation7 + $0x3b0] sm:$0xff] }
 0x306   :  { %2691 = vmatpush.msrb.mxu2 %v2538_v25  ;;  %2711 = vmatpush.msrb.mxu3 %v2554_v59  ;;  %v2549_v25 = vld [vmem:[#allocation7 + $0x3a0] sm:$0xff] }
 0x307   :  { %2652 = vmatpush.msrb.mxu0 %v2505_v38  ;;  %2672 = vmatpush.msrb.mxu1 %v2521_v1  ;;  %v2547_v38 = vld [vmem:[#allocation7 + $0x390] sm:$0xff]  ;;  %v2546_v1 = vld [vmem:[#allocation7 + $0x388] sm:$0xff] }
 0x308   :  { %2692 = vmatpush.msrb.mxu2 %v2537_v41  ;;  %2712 = vmatpush.msrb.mxu3 %v2553_v61  ;;  %v1115_v41 = vperm.slane %v3116_v48, 7 }
 0x309   :  { %2653 = vmatpush.msrb.mxu0 %v2504_v54  ;;  %2673 = vmatpush.msrb.mxu1 %v2520_v13  ;;  %v2222_v28 = vpop.f32.mrf.mxu1 }
 0x30a   :  { %2693 = vmatpush.msrb.mxu2 %v2536_v44  ;;  %v2223_v17 = vadd.f32 %v2222_v28, %v2203_v4  ;;  %v2242_v53 = vpop.f32.mrf.mxu2  ;;  %2713 = vmatpush.msrb.mxu3 %v2552_v63 }
 0x30b   :  { %2654 = vmatpush.msrb.mxu0 %v2503_v33  ;;  %2674 = vmatpush.msrb.mxu1 %v2519_v19 }
 0x30c   :  { %2694 = vmatpush.msrb.mxu2 %v2535_v52  ;;  %v2243_v56 = vadd.f32 %v2242_v53, %v2223_v17  ;;  %2714 = vmatpush.msrb.mxu3 %v2551_v8 }
 0x30d   :  { %2655 = vmatpush.msrb.mxu0 %v2502_v30  ;;  %2675 = vmatpush.msrb.mxu1 %v2518_v62  ;;  %v2262_v58 = vpop.f32.mrf.mxu3 }
 0x30e   :  { %2695 = vmatpush.msrb.mxu2 %v2534_v46  ;;  %v2263_v51 = vadd.f32 %v2262_v58, %v2243_v56  ;;  %2715 = vmatpush.msrb.mxu3 %v2550_v0 }
 0x30f   :  { %2656 = vmatpush.msrb.mxu0 %v2501_v18  ;;  %2676 = vmatpush.msrb.mxu1 %v2517_v7 }
 0x310   :  { %2696 = vmatpush.msrb.mxu2 %v2533_v10  ;;  %v2431_v9 = vmax.f32 %v2263_v51, 0.0  ;;  %2716 = vmatpush.msrb.mxu3 %v2549_v25 }
 0x311   :  { %2657 = vmatpush.msrb.mxu0 %v2500_v31  ;;  %2677 = vmatpush.msrb.mxu1 %v2516_v12 }
 0x312   :  { %2697 = vmatpush.msrb.mxu2 %v2532_v57  ;;  %2717 = vmatpush.msrb.mxu3 %v2548_v22 }
 0x313   :  { %2658 = vmatpush.msrb.mxu0 %v2499_v37  ;;  %2678 = vmatpush.msrb.mxu1 %v2515_v40 }
 0x314   :  { %2698 = vmatpush.msrb.mxu2 %v2531_v42  ;;  %2718 = vmatpush.msrb.mxu3 %v2547_v38 }
 0x315   :  { %2659 = vmatpush.msrb.mxu0 %v2498_v39  ;;  %2679 = vmatpush.msrb.mxu1 %v2514_v26 }
 0x316   :  { %2699 = vmatpush.msrb.mxu2 %v2530_v34  ;;  %2719 = vmatpush.msrb.mxu3 %v2546_v1 }
 0x317   :  { %2660 = vmatpush.msrb.mxu0 %v2497_v60  ;;  %2680 = vmatpush.msrb.mxu1 %v2513_v47 }
 0x318   :  { %2661 = vmatmul.f32.vlgmr.msrb.gmra.mxu0 %v2429_v55  ;;  %2681 = vmatmul.f32.vlgmr.msrb.gmra.mxu1 %v2430_v36 }
 0x319   :  { %2700 = vmatpush.msrb.mxu2 %v2529_v16  ;;  %2720 = vmatpush.msrb.mxu3 %v2545_v20 }
 0x31a   :  { %2701 = vmatmul.f32.vlgmr.msrb.gmra.mxu2 %v2431_v9 }
 0x33c   :  { %v2302_v49 = vpop.f32.mrf.mxu1 }
 0x33f   :  { %v2322_v13 = vpop.f32.mrf.mxu2 }
 0x340   :  { %v2342_v15 = vpop.f32.mrf.mxu3 }
 0x349   :  { %v2282_v45 = vpop.f32.mrf.mxu0 }
 0x34a   :  { %v2283_v50 = vadd.f32 %v2282_v45, %v1115_v41 }
 0x34c   :  { %v2303_v54 = vadd.f32 %v2302_v49, %v2283_v50 }
 0x34e   :  { %v2323_v14 = vadd.f32 %v2322_v13, %v2303_v54 }
 0x350   :  { %v2343_v44 = vadd.f32 %v2342_v15, %v2323_v14 }
 0x356   :  { %v2362_v33 = vpop.f32.mrf.mxu0 }
 0x357   :  { %v2363_v19 = vadd.f32 %v2362_v33, %v2343_v44  ;;  %v2382_v32 = vpop.f32.mrf.mxu1 }
 0x358   :  { %v2402_v5 = vpop.f32.mrf.mxu2 }
 0x359   :  { %v2383_v52 = vadd.f32 %v2382_v32, %v2363_v19 }
 0x35b   :  { %v2403_v11 = vadd.f32 %v2402_v5, %v2383_v52  ;;  %v2422_v30 = vpop.f32.mrf.mxu3 }
 0x35d   :  { %v2423_v62 = vadd.f32 %v2422_v30, %v2403_v11 }
 0x35f   :  { %v2432_v21 = vmax.f32 %v2423_v62, 0.0 }
 0x361   :  { %2721 = vmatmul.f32.vlgmr.msrb.gmra.mxu3 %v2432_v21 }
 0x374   :  { %v2582_v48 = vpop.f32.mrf.mxu0  ;;  %v2602_v18 = vpop.f32.mrf.mxu1 }
 0x375   :  { %v2583_v46 = vadd.f32 %v2754_v23, %v2582_v48 }
 0x377   :  { %v2603_v35 = vadd.f32 %v2602_v18, %v2583_v46 }
 0x37b   :  { %v2622_v7 = vpop.f32.mrf.mxu2  ;;  %v2642_v10 = vpop.f32.mrf.mxu3 }
 0x37c   :  { %v2623_v29 = vadd.f32 %v2622_v7, %v2603_v35 }
 0x37e   :  { %v2643_v6 = vadd.f32 %v2642_v10, %v2623_v29 }
 0x395   :  { %v2662_v2 = vpop.f32.mrf.mxu0  ;;  %v2682_v12 = vpop.f32.mrf.mxu1 }
 0x396   :  { %v2663_v31 = vadd.f32 %v2662_v2, %v2643_v6 }
 0x398   :  { %v2683_v57 = vadd.f32 %v2682_v12, %v2663_v31 }
 0x39d   :  { %v2702_v3 = vpop.f32.mrf.mxu2 }
 0x39e   :  { %v2703_v37 = vadd.f32 %v2702_v3, %v2683_v57 }
 0x3e4   :  { %v2722_v40 = vpop.f32.mrf.mxu3 }
 0x3e5   :  { %v2723_v24 = vadd.f32 %v2722_v40, %v2703_v37 }
 0x3e7   :  { %2725 = vst [vmem:[#allocation10] sm:$0x3] %v2723_v24 }
 0x3e8   :  { %2736 = dma.vmem_to_hbm [thread:$0]  %s2732_s17, 32, %s2734_s20, [#allocation4]  }
 0x3e9   :  { %2905 = dma.done.wait [#allocation4], 32  }
 0x3ea   :  { %2906 = vsyncadd [#allocation4], 4294967264 }
 0x3eb   :  { %2741 = vsyncpa [#allocation3], 1 }
 0x3ec   :  { %2742 = vsyncpa [#allocation6], 1 }
 0x3ed   :  { %2743 = vsyncpa [#allocation9], 1 }
 0x3ee   :  { %2744 = vsyncpa [#allocation4], 1 }

// kernel: cnn_forward.2
= control target key start
LH: loop header
LB: loop body
LE: loop exit
PB: predicated region body
PF: predicated region fallthrough
CT: control target
= control target key end

     0   :  { %13 = vsyncpa [#allocation4], 0  ;;  %s5967_s0 = inlined_call_operand.vmem [shape: f32[24,56], index: 0, kind: input, shape index: {}]   ;;  %s5968_s1 = inlined_call_operand.vmem [shape: f32[24,56], index: 1, kind: input, shape index: {}]   ;;  %s5969_s2 = inlined_call_operand.vmem [shape: f32[24,56], index: 2, kind: input, shape index: {}]   ;;  %s5970_s3 = inlined_call_operand.hbm [shape: f32[12,56,384], index: 3, kind: input, shape index: {}]   ;;  %s5971_s4 = inlined_call_operand.hbm [shape: f32[1,384], index: 4, kind: input, shape index: {}]   ;;  %s5972_s5 = inlined_call_operand.hbm [shape: f32[5,384,256], index: 5, kind: input, shape index: {}]   ;;  %s5973_s6 = inlined_call_operand.hbm [shape: f32[5,384,256], index: 6, kind: input, shape index: {}]   ;;  %s5974_s7 = inlined_call_operand.hbm [shape: f32[1,256], index: 7, kind: input, shape index: {}]   ;;  %s5975_s8 = inlined_call_operand.vmem [shape: f32[24,256], index: 8, kind: output, shape index: {}]  }
   0x1   :  { %14 = vsyncpa [#allocation6], 0  ;;  %s40_s29 = sshll.u32 %s5971_s4, 4  ;;  %s41_s29 = int_to_ptr.hbm [resolvable:$true] %s40_s29 }
   0x2   :  { %15 = vsyncpa [#allocation9], 0  ;;  %s4499_s30 = smov [#allocation5]   ;;  %s63_s12 = sshll.u32 %s5973_s6, 4  ;;  %s64_s12 = int_to_ptr.hbm [resolvable:$true] %s63_s12 }
   0x3   :  { %s42_s9 = sshll.u32 %s4499_s30, 4  ;;  %s4500_s13 = smov [#allocation8]   ;;  %s43_s9 = int_to_ptr.vmem [resolvable:$true] %s42_s9 }
   0x4   :  { %45 = dma.hbm_to_vmem [thread:$0]  %s41_s29, 48, %s43_s9, [#allocation6]  }
   0x5   :  { %s65_s14 = sshll.u32 %s4500_s13, 4  ;;  %s26_s17 = sshll.u32 %s5970_s3, 4  ;;  %s66_s14 = int_to_ptr.vmem [resolvable:$true] %s65_s14  ;;  %s27_s17 = int_to_ptr.hbm [resolvable:$true] %s26_s17 }
   0x6   :  { %s4501_s4 = smov 256   ;;  %s4502_s18 = smov 16  }
   0x7   :  { %71 = dma.hbm_to_vmem [thread:$0]  %s64_s12, 61440, %s66_s14, [#allocation9], %s4501_s4, %s4501_s4, %s4502_s18  }
   0x8   :  { %s4503_s19 = smov [#allocation3]   ;;  %s50_s23 = sshll.u32 %s5972_s5, 4  ;;  %s51_s23 = int_to_ptr.hbm [resolvable:$true] %s50_s23 }
   0x9   :  { %s28_s20 = sshll.u32 %s4503_s19, 4  ;;  %s4504_s6 = smov 384   ;;  %s29_s20 = int_to_ptr.vmem [resolvable:$true] %s28_s20 }
   0xa   :  { %s4505_s24 = smov 24   ;;  %s4506_s25 = smov [#allocation7]  }
   0xb   :  { %34 = dma.hbm_to_vmem [thread:$0]  %s27_s17, 32256, %s29_s20, [#allocation4], %s4504_s6, %s4504_s6, %s4505_s24  }
   0xc   :  { %s52_s26 = sshll.u32 %s4506_s25, 4  ;;  %s77_s28 = sshll.u32 %s5974_s7, 4  ;;  %s53_s26 = int_to_ptr.vmem [resolvable:$true] %s52_s26  ;;  %s78_s28 = int_to_ptr.hbm [resolvable:$true] %s77_s28 }
   0xd   :  { %58 = dma.hbm_to_vmem [thread:$0]  %s51_s23, 61440, %s53_s26, [#allocation6], %s4501_s4, %s4501_s4, %s4502_s18  }
   0xe   :  { %s4507_s29 = smov [#allocation10]  }
   0xf   :  { %s79_s30 = sshll.u32 %s4507_s29, 4  ;;  %s80_s30 = int_to_ptr.vmem [resolvable:$true] %s79_s30 }
  0x10   :  { %82 = dma.hbm_to_vmem [thread:$0]  %s78_s28, 32, %s80_s30, [#allocation9]  }
  0x11   :  { %4493 = dma.done.wait [#allocation4], 32256  }
  0x12   :  { %4494 = vsyncadd [#allocation4], 4294935040 }
  0x13   :  { %4495 = dma.done.wait [#allocation6], 61488  }
  0x14   :  { %4496 = vsyncadd [#allocation6], 4294905808 }
  0x15   :  { %4497 = dma.done.wait [#allocation9], 61472  }
  0x16   :  { %4498 = vsyncadd [#allocation9], 4294905824  ;;  %v152_v0 = vld [vmem:[#allocation3 + $0x330] sm:$0xff]  ;;  %v153_v1 = vld [vmem:[#allocation3 + $0x338] sm:$0xff]  ;;  %vm155_vm0 = vcmask 457728   ;;  %vm1762_vm1 = vcmask 1046528  }
  0x17   :  { %v154_v2 = vld [vmem:[#allocation3 + $0x340] sm:$0xff]  ;;  %174 = vmatpush.msra.mxu0 %v152_v0  ;;  %200 = vmatpush.msra.mxu1 %v153_v1  ;;  %v130_v3 = vld [vmem:[#allocation3 + $0x90] sm:$0xff]  ;;  %v149_v4 = vld [vmem:[#allocation3 + $0x318] sm:$0xff]  ;;  %vm2623_vm2 = vcmask 1045504   ;;  %vm3184_vm3 = vcmask 1044480   ;;  %vm3745_vm4 = vcmask 1043456  }
  0x18   :  { %v150_v5 = vld [vmem:[#allocation3 + $0x320] sm:$0xff]  ;;  %226 = vmatpush.msra.mxu2 %v154_v2  ;;  %261 = vmatpush.msra.mxu3 %v130_v3  ;;  %v151_v6 = vld [vmem:[#allocation3 + $0x328] sm:$0xff]  ;;  %v127_v7 = vld [vmem:[#allocation3 + $0x78] sm:$0xff] }
  0x19   :  { %v146_v8 = vld [vmem:[#allocation3 + $0x300] sm:$0xff]  ;;  %175 = vmatpush.msra.mxu0 %v149_v4  ;;  %201 = vmatpush.msra.mxu1 %v150_v5  ;;  %v147_v9 = vld [vmem:[#allocation3 + $0x308] sm:$0xff]  ;;  %v148_v10 = vld [vmem:[#allocation3 + $0x310] sm:$0xff] }
  0x1a   :  { %v124_v11 = vld [vmem:[#allocation3 + $0x60] sm:$0xff]  ;;  %227 = vmatpush.msra.mxu2 %v151_v6  ;;  %262 = vmatpush.msra.mxu3 %v127_v7  ;;  %v143_v12 = vld [vmem:[#allocation3 + $0x2e8] sm:$0xff]  ;;  %v144_v13 = vld [vmem:[#allocation3 + $0x2f0] sm:$0xff] }
  0x1b   :  { %176 = vmatpush.msra.mxu0 %v146_v8  ;;  %202 = vmatpush.msra.mxu1 %v147_v9  ;;  %v145_v14 = vld [vmem:[#allocation3 + $0x2f8] sm:$0xff]  ;;  %v121_v15 = vld [vmem:[#allocation3 + $0x48] sm:$0xff]  ;;  %v140_v16 = vld [vmem:[#allocation3 + $0x2d0] sm:$0xff] }
  0x1c   :  { %228 = vmatpush.msra.mxu2 %v148_v10  ;;  %263 = vmatpush.msra.mxu3 %v124_v11  ;;  %v141_v17 = vld [vmem:[#allocation3 + $0x2d8] sm:$0xff]  ;;  %v142_v18 = vld [vmem:[#allocation3 + $0x2e0] sm:$0xff]  ;;  %v118_v19 = vld [vmem:[#allocation3 + $0x30] sm:$0xff] }
  0x1d   :  { %177 = vmatpush.msra.mxu0 %v143_v12  ;;  %203 = vmatpush.msra.mxu1 %v144_v13  ;;  %v137_v20 = vld [vmem:[#allocation3 + $0x2b8] sm:$0xff]  ;;  %v138_v21 = vld [vmem:[#allocation3 + $0x2c0] sm:$0xff]  ;;  %v139_v22 = vld [vmem:[#allocation3 + $0x2c8] sm:$0xff] }
  0x1e   :  { %229 = vmatpush.msra.mxu2 %v145_v14  ;;  %264 = vmatpush.msra.mxu3 %v121_v15  ;;  %v115_v23 = vld [vmem:[#allocation3 + $0x18] sm:$0xff]  ;;  %v134_v24 = vld [vmem:[#allocation3 + $0x2a0] sm:$0xff]  ;;  %v135_v25 = vld [vmem:[#allocation3 + $0x2a8] sm:$0xff] }
  0x1f   :  { %178 = vmatpush.msra.mxu0 %v140_v16  ;;  %204 = vmatpush.msra.mxu1 %v141_v17  ;;  %v136_v26 = vld [vmem:[#allocation3 + $0x2b0] sm:$0xff]  ;;  %v112_v27 = vld [vmem:[#allocation3] sm:$0xff]  ;;  %v131_v30 = vld [vmem:[#allocation3 + $0x98] sm:$0xff] }
  0x20   :  { %230 = vmatpush.msra.mxu2 %v142_v18  ;;  %265 = vmatpush.msra.mxu3 %v118_v19  ;;  %v4572_v28 = vld [vmem:[%s5968_s1] sm:$0xff]  ;;  %v349_v32 = vld [vmem:[#allocation3 + $0x5d0] sm:$0xff]  ;;  %v350_v33 = vld [vmem:[#allocation3 + $0x5d8] sm:$0xff] }
  0x21   :  { %179 = vmatpush.msra.mxu0 %v137_v20  ;;  %205 = vmatpush.msra.mxu1 %v138_v21  ;;  %v4577_v29 = vld [vmem:[%s5967_s0] sm:$0xff]  ;;  %v129_v35 = vld [vmem:[#allocation3 + $0x88] sm:$0xff]  ;;  %v346_v36 = vld [vmem:[#allocation3 + $0x5b8] sm:$0xff] }
  0x22   :  { %231 = vmatpush.msra.mxu2 %v139_v22  ;;  %266 = vmatpush.msra.mxu3 %v115_v23  ;;  %v132_v31 = vld [vmem:[#allocation3 + $0xa0] sm:$0xff]  ;;  %v125_v38 = vld [vmem:[#allocation3 + $0x68] sm:$0xff]  ;;  %v126_v39 = vld [vmem:[#allocation3 + $0x70] sm:$0xff] }
  0x23   :  { %180 = vmatpush.msra.mxu0 %v134_v24  ;;  %206 = vmatpush.msra.mxu1 %v135_v25  ;;  %v128_v34 = vld [vmem:[#allocation3 + $0x80] sm:$0xff]  ;;  %v344_v41 = vld [vmem:[#allocation3 + $0x5a8] sm:$0xff]  ;;  %v122_v44 = vld [vmem:[#allocation3 + $0x50] sm:$0xff] }
  0x24   :  { %232 = vmatpush.msra.mxu2 %v136_v26  ;;  %267 = vmatpush.msra.mxu3 %v112_v27  ;;  %v347_v37 = vld [vmem:[#allocation3 + $0x5c0] sm:$0xff]  ;;  %v4590_v42 = vld [vmem:[%s5968_s1 + $0x8] sm:$0xff]  ;;  %v123_v45 = vld [vmem:[#allocation3 + $0x58] sm:$0xff] }
  0x25   :  { %4234 = vmatmul.msk.f32.vlgmr.msra.gmra.mxu0 %vm155_vm0, %v4572_v28  ;;  %4237 = vmatmul.msk.f32.vlgmr.msra.gmra.mxu1 %vm155_vm0, %v4572_v28  ;;  %v343_v40 = vld [vmem:[#allocation3 + $0x5a0] sm:$0xff]  ;;  %v4595_v43 = vld [vmem:[%s5967_s0 + $0x8] sm:$0xff]  ;;  %v341_v47 = vld [vmem:[#allocation3 + $0x590] sm:$0xff] }
  0x26   :  { %4240 = vmatmul.msk.f32.vlgmr.msra.gmra.mxu2 %vm155_vm0, %v4572_v28  ;;  %4243 = vmatmul.msk.f32.vlgmr.msra.gmra.mxu3 %vm155_vm0, %v4577_v29  ;;  %v340_v46 = vld [vmem:[#allocation3 + $0x588] sm:$0xff]  ;;  %v119_v48 = vld [vmem:[#allocation3 + $0x38] sm:$0xff]  ;;  %v120_v49 = vld [vmem:[#allocation3 + $0x40] sm:$0xff] }
  0x27   :  { %287 = vmatpush.msrb.mxu0 %v131_v30  ;;  %313 = vmatpush.msrb.mxu1 %v132_v31  ;;  %v337_v50 = vld [vmem:[#allocation3 + $0x570] sm:$0xff]  ;;  %v338_v51 = vld [vmem:[#allocation3 + $0x578] sm:$0xff]  ;;  %v116_v52 = vld [vmem:[#allocation3 + $0x20] sm:$0xff] }
  0x28   :  { %370 = vmatpush.msrb.mxu2 %v349_v32  ;;  %396 = vmatpush.msrb.mxu3 %v350_v33  ;;  %v117_v53 = vld [vmem:[#allocation3 + $0x28] sm:$0xff]  ;;  %v334_v54 = vld [vmem:[#allocation3 + $0x558] sm:$0xff]  ;;  %v335_v55 = vld [vmem:[#allocation3 + $0x560] sm:$0xff] }
  0x29   :  { %288 = vmatpush.msrb.mxu0 %v128_v34  ;;  %314 = vmatpush.msrb.mxu1 %v129_v35  ;;  %v4608_v56 = vld [vmem:[%s5968_s1 + $0x10] sm:$0xff]  ;;  %v113_v58 = vld [vmem:[#allocation3 + $0x8] sm:$0xff]  ;;  %v331_v60 = vld [vmem:[#allocation3 + $0x540] sm:$0xff] }
  0x2a   :  { %371 = vmatpush.msrb.mxu2 %v346_v36  ;;  %397 = vmatpush.msrb.mxu3 %v347_v37  ;;  %v4613_v57 = vld [vmem:[%s5967_s0 + $0x10] sm:$0xff]  ;;  %v332_v61 = vld [vmem:[#allocation3 + $0x548] sm:$0xff]  ;;  %v351_v62 = vld [vmem:[#allocation3 + $0x5e0] sm:$0xff] }
  0x2b   :  { %289 = vmatpush.msrb.mxu0 %v125_v38  ;;  %315 = vmatpush.msrb.mxu1 %v126_v39  ;;  %v114_v59 = vld [vmem:[#allocation3 + $0x10] sm:$0xff]  ;;  %v489_v63 = vld [vmem:[#allocation3 + $0x3d8] sm:$0xff]  ;;  %v490_v0 = vld [vmem:[#allocation3 + $0x3e0] sm:$0xff] }
  0x2c   :  { %372 = vmatpush.msrb.mxu2 %v343_v40  ;;  %398 = vmatpush.msrb.mxu3 %v344_v41  ;;  %v491_v1 = vld [vmem:[#allocation3 + $0x3e8] sm:$0xff]  ;;  %v486_v3 = vld [vmem:[#allocation3 + $0x3c0] sm:$0xff]  ;;  %v488_v5 = vld [vmem:[#allocation3 + $0x3d0] sm:$0xff] }
  0x2d   :  { %4235 = vmatmul.msk.f32.gmra.mxu0 %vm155_vm0, %v4590_v42  ;;  %4238 = vmatmul.msk.f32.gmra.mxu1 %vm155_vm0, %v4590_v42  ;;  %v348_v2 = vld [vmem:[#allocation3 + $0x5c8] sm:$0xff]  ;;  %v4626_v6 = vld [vmem:[%s5969_s2] sm:$0xff]  ;;  %v345_v7 = vld [vmem:[#allocation3 + $0x5b0] sm:$0xff] }
  0x2e   :  { %4241 = vmatmul.msk.f32.gmra.mxu2 %vm155_vm0, %v4590_v42  ;;  %4244 = vmatmul.msk.f32.gmra.mxu3 %vm155_vm0, %v4595_v43  ;;  %v487_v4 = vld [vmem:[#allocation3 + $0x3c8] sm:$0xff]  ;;  %v484_v9 = vld [vmem:[#allocation3 + $0x3b0] sm:$0xff]  ;;  %v485_v10 = vld [vmem:[#allocation3 + $0x3b8] sm:$0xff] }
  0x2f   :  { %290 = vmatpush.msrb.mxu0 %v122_v44  ;;  %316 = vmatpush.msrb.mxu1 %v123_v45  ;;  %v483_v8 = vld [vmem:[#allocation3 + $0x3a8] sm:$0xff]  ;;  %v342_v11 = vld [vmem:[#allocation3 + $0x598] sm:$0xff]  ;;  %v480_v12 = vld [vmem:[#allocation3 + $0x390] sm:$0xff] }
  0x30   :  { %373 = vmatpush.msrb.mxu2 %v340_v46  ;;  %399 = vmatpush.msrb.mxu3 %v341_v47  ;;  %v481_v13 = vld [vmem:[#allocation3 + $0x398] sm:$0xff]  ;;  %v482_v14 = vld [vmem:[#allocation3 + $0x3a0] sm:$0xff]  ;;  %v479_v18 = vld [vmem:[#allocation3 + $0x388] sm:$0xff] }
  0x31   :  { %291 = vmatpush.msrb.mxu0 %v119_v48  ;;  %317 = vmatpush.msrb.mxu1 %v120_v49  ;;  %v339_v15 = vld [vmem:[#allocation3 + $0x580] sm:$0xff]  ;;  %v477_v16 = vld [vmem:[#allocation3 + $0x378] sm:$0xff]  ;;  %v4639_v19 = vld [vmem:[%s5969_s2 + $0x8] sm:$0xff] }
  0x32   :  { %374 = vmatpush.msrb.mxu2 %v337_v50  ;;  %400 = vmatpush.msrb.mxu3 %v338_v51  ;;  %v478_v17 = vld [vmem:[#allocation3 + $0x380] sm:$0xff]  ;;  %v336_v20 = vld [vmem:[#allocation3 + $0x568] sm:$0xff]  ;;  %v476_v23 = vld [vmem:[#allocation3 + $0x370] sm:$0xff] }
  0x33   :  { %292 = vmatpush.msrb.mxu0 %v116_v52  ;;  %318 = vmatpush.msrb.mxu1 %v117_v53  ;;  %v474_v21 = vld [vmem:[#allocation3 + $0x360] sm:$0xff]  ;;  %v475_v22 = vld [vmem:[#allocation3 + $0x368] sm:$0xff]  ;;  %v333_v24 = vld [vmem:[#allocation3 + $0x550] sm:$0xff] }
  0x34   :  { %375 = vmatpush.msrb.mxu2 %v334_v54  ;;  %401 = vmatpush.msrb.mxu3 %v335_v55  ;;  %v471_v25 = vld [vmem:[#allocation3 + $0x348] sm:$0xff]  ;;  %v472_v26 = vld [vmem:[#allocation3 + $0x350] sm:$0xff]  ;;  %v473_v27 = vld [vmem:[#allocation3 + $0x358] sm:$0xff] }
  0x35   :  { %4236 = vmatmul.msk.f32.gmra.mxu0 %vm155_vm0, %v4608_v56  ;;  %4239 = vmatmul.msk.f32.gmra.mxu1 %vm155_vm0, %v4608_v56  ;;  %v467_v30 = vld [vmem:[#allocation3 + $0x138] sm:$0xff]  ;;  %v468_v31 = vld [vmem:[#allocation3 + $0x140] sm:$0xff]  ;;  %v469_v32 = vld [vmem:[#allocation3 + $0x148] sm:$0xff] }
  0x36   :  { %4242 = vmatmul.msk.f32.gmra.mxu2 %vm155_vm0, %v4608_v56  ;;  %4245 = vmatmul.msk.f32.gmra.mxu3 %vm155_vm0, %v4613_v57  ;;  %v667_v33 = vld [vmem:[#allocation3 + $0x678] sm:$0xff]  ;;  %v4652_v34 = vld [vmem:[%s5969_s2 + $0x10] sm:$0xff]  ;;  %v464_v35 = vld [vmem:[#allocation3 + $0x120] sm:$0xff] }
  0x37   :  { %293 = vmatpush.msrb.mxu0 %v113_v58  ;;  %319 = vmatpush.msrb.mxu1 %v114_v59  ;;  %v465_v36 = vld [vmem:[#allocation3 + $0x128] sm:$0xff]  ;;  %v466_v37 = vld [vmem:[#allocation3 + $0x130] sm:$0xff]  ;;  %v664_v38 = vld [vmem:[#allocation3 + $0x660] sm:$0xff] }
  0x38   :  { %376 = vmatpush.msrb.mxu2 %v331_v60  ;;  %402 = vmatpush.msrb.mxu3 %v332_v61  ;;  %v461_v39 = vld [vmem:[#allocation3 + $0x108] sm:$0xff]  ;;  %v462_v40 = vld [vmem:[#allocation3 + $0x110] sm:$0xff]  ;;  %v463_v41 = vld [vmem:[#allocation3 + $0x118] sm:$0xff] }
  0x39   :  { %422 = vmatpush.msra.mxu0 %v351_v62  ;;  %501 = vmatpush.msra.mxu1 %v489_v63  ;;  %v661_v44 = vld [vmem:[#allocation3 + $0x648] sm:$0xff]  ;;  %v458_v45 = vld [vmem:[#allocation3 + $0xf0] sm:$0xff]  ;;  %v459_v46 = vld [vmem:[#allocation3 + $0xf8] sm:$0xff] }
  0x3a   :  { %527 = vmatpush.msra.mxu2 %v490_v0  ;;  %553 = vmatpush.msra.mxu3 %v491_v1  ;;  %v460_v47 = vld [vmem:[#allocation3 + $0x100] sm:$0xff]  ;;  %v658_v48 = vld [vmem:[#allocation3 + $0x630] sm:$0xff]  ;;  %v455_v49 = vld [vmem:[#allocation3 + $0xd8] sm:$0xff] }
  0x3b   :  { %423 = vmatpush.msra.mxu0 %v348_v2  ;;  %502 = vmatpush.msra.mxu1 %v486_v3  ;;  %v456_v50 = vld [vmem:[#allocation3 + $0xe0] sm:$0xff]  ;;  %v457_v51 = vld [vmem:[#allocation3 + $0xe8] sm:$0xff]  ;;  %v655_v52 = vld [vmem:[#allocation3 + $0x618] sm:$0xff] }
  0x3c   :  { %528 = vmatpush.msra.mxu2 %v487_v4  ;;  %554 = vmatpush.msra.mxu3 %v488_v5  ;;  %v452_v53 = vld [vmem:[#allocation3 + $0xc0] sm:$0xff]  ;;  %v453_v54 = vld [vmem:[#allocation3 + $0xc8] sm:$0xff]  ;;  %v454_v55 = vld [vmem:[#allocation3 + $0xd0] sm:$0xff] }
  0x3d   :  { %4246 = vmatmul.msk.f32.vlgmr.msrb.gmra.mxu0 %vm155_vm0, %v4577_v29  ;;  %4249 = vmatmul.msk.f32.vlgmr.msrb.gmra.mxu1 %vm155_vm0, %v4577_v29  ;;  %v652_v58 = vld [vmem:[#allocation3 + $0x600] sm:$0xff]  ;;  %v449_v59 = vld [vmem:[#allocation3 + $0xa8] sm:$0xff]  ;;  %v450_v60 = vld [vmem:[#allocation3 + $0xb0] sm:$0xff] }
  0x3e   :  { %4252 = vmatmul.msk.f32.vlgmr.msrb.gmra.mxu2 %vm155_vm0, %v4626_v6  ;;  %4255 = vmatmul.msk.f32.vlgmr.msrb.gmra.mxu3 %vm155_vm0, %v4626_v6  ;;  %v451_v61 = vld [vmem:[#allocation3 + $0xb8] sm:$0xff]  ;;  %v649_v62 = vld [vmem:[#allocation3 + $0x5e8] sm:$0xff]  ;;  %v668_v63 = vld [vmem:[#allocation3 + $0x680] sm:$0xff] }
  0x3f   :  { %424 = vmatpush.msra.mxu0 %v345_v7  ;;  %503 = vmatpush.msra.mxu1 %v483_v8  ;;  %v669_v0 = vld [vmem:[#allocation3 + $0x688] sm:$0xff]  ;;  %v807_v1 = vld [vmem:[#allocation3 + $0x480] sm:$0xff]  ;;  %v666_v4 = vld [vmem:[#allocation3 + $0x670] sm:$0xff] }
  0x40   :  { %529 = vmatpush.msra.mxu2 %v484_v9  ;;  %555 = vmatpush.msra.mxu3 %v485_v10  ;;  %v808_v2 = vld [vmem:[#allocation3 + $0x488] sm:$0xff]  ;;  %v805_v7 = vld [vmem:[#allocation3 + $0x470] sm:$0xff]  ;;  %v663_v9 = vld [vmem:[#allocation3 + $0x658] sm:$0xff] }
  0x41   :  { %425 = vmatpush.msra.mxu0 %v342_v11  ;;  %504 = vmatpush.msra.mxu1 %v480_v12  ;;  %v665_v3 = vld [vmem:[#allocation3 + $0x668] sm:$0xff]  ;;  %v662_v8 = vld [vmem:[#allocation3 + $0x650] sm:$0xff]  ;;  %v802_v11 = vld [vmem:[#allocation3 + $0x458] sm:$0xff] }
  0x42   :  { %530 = vmatpush.msra.mxu2 %v481_v13  ;;  %556 = vmatpush.msra.mxu3 %v482_v14  ;;  %v804_v5 = vld [vmem:[#allocation3 + $0x468] sm:$0xff]  ;;  %v801_v10 = vld [vmem:[#allocation3 + $0x450] sm:$0xff]  ;;  %v659_v12 = vld [vmem:[#allocation3 + $0x638] sm:$0xff] }
  0x43   :  { %426 = vmatpush.msra.mxu0 %v339_v15  ;;  %505 = vmatpush.msra.mxu1 %v477_v16  ;;  %v660_v13 = vld [vmem:[#allocation3 + $0x640] sm:$0xff]  ;;  %v798_v14 = vld [vmem:[#allocation3 + $0x438] sm:$0xff] }
  0x44   :  { %531 = vmatpush.msra.mxu2 %v478_v17  ;;  %557 = vmatpush.msra.mxu3 %v479_v18  ;;  %v799_v15 = vld [vmem:[#allocation3 + $0x440] sm:$0xff]  ;;  %v657_v17 = vld [vmem:[#allocation3 + $0x628] sm:$0xff] }
  0x45   :  { %4247 = vmatmul.msk.f32.gmra.mxu0 %vm155_vm0, %v4595_v43  ;;  %4250 = vmatmul.msk.f32.gmra.mxu1 %vm155_vm0, %v4595_v43  ;;  %v656_v16 = vld [vmem:[#allocation3 + $0x620] sm:$0xff] }
  0x46   :  { %4253 = vmatmul.msk.f32.gmra.mxu2 %vm155_vm0, %v4639_v19  ;;  %4256 = vmatmul.msk.f32.gmra.mxu3 %vm155_vm0, %v4639_v19  ;;  %v795_v18 = vld [vmem:[#allocation3 + $0x420] sm:$0xff] }
  0x47   :  { %427 = vmatpush.msra.mxu0 %v336_v20  ;;  %506 = vmatpush.msra.mxu1 %v474_v21  ;;  %v796_v20 = vld [vmem:[#allocation3 + $0x428] sm:$0xff] }
  0x48   :  { %532 = vmatpush.msra.mxu2 %v475_v22  ;;  %558 = vmatpush.msra.mxu3 %v476_v23  ;;  %v653_v21 = vld [vmem:[#allocation3 + $0x608] sm:$0xff]  ;;  %v654_v22 = vld [vmem:[#allocation3 + $0x610] sm:$0xff] }
  0x49   :  { %428 = vmatpush.msra.mxu0 %v333_v24  ;;  %507 = vmatpush.msra.mxu1 %v471_v25  ;;  %v792_v23 = vld [vmem:[#allocation3 + $0x408] sm:$0xff]  ;;  %v793_v24 = vld [vmem:[#allocation3 + $0x410] sm:$0xff] }
  0x4a   :  { %533 = vmatpush.msra.mxu2 %v472_v26  ;;  %559 = vmatpush.msra.mxu3 %v473_v27  ;;  %v650_v25 = vld [vmem:[#allocation3 + $0x5f0] sm:$0xff]  ;;  %v651_v26 = vld [vmem:[#allocation3 + $0x5f8] sm:$0xff] }
  0x4b   :  { %579 = vmatpush.msrb.mxu0 %v467_v30  ;;  %605 = vmatpush.msrb.mxu1 %v468_v31  ;;  %v789_v27 = vld [vmem:[#allocation3 + $0x3f0] sm:$0xff]  ;;  %v790_v30 = vld [vmem:[#allocation3 + $0x3f8] sm:$0xff] }
  0x4c   :  { %631 = vmatpush.msrb.mxu2 %v469_v32  ;;  %679 = vmatpush.msrb.mxu3 %v667_v33  ;;  %v809_v31 = vld [vmem:[#allocation3 + $0x490] sm:$0xff]  ;;  %v785_v32 = vld [vmem:[#allocation3 + $0x1e0] sm:$0xff]  ;;  %v786_v33 = vld [vmem:[#allocation3 + $0x1e8] sm:$0xff] }
  0x4d   :  { %4248 = vmatmul.msk.f32.gmra.mxu0 %vm155_vm0, %v4613_v57  ;;  %4251 = vmatmul.msk.f32.gmra.mxu1 %vm155_vm0, %v4613_v57 }
  0x4e   :  { %4254 = vmatmul.msk.f32.gmra.mxu2 %vm155_vm0, %v4652_v34  ;;  %4257 = vmatmul.msk.f32.gmra.mxu3 %vm155_vm0, %v4652_v34 }
  0x4f   :  { %580 = vmatpush.msrb.mxu0 %v464_v35  ;;  %606 = vmatpush.msrb.mxu1 %v465_v36  ;;  %v787_v35 = vld [vmem:[#allocation3 + $0x1f0] sm:$0xff]  ;;  %v806_v36 = vld [vmem:[#allocation3 + $0x478] sm:$0xff] }
  0x50   :  { %632 = vmatpush.msrb.mxu2 %v466_v37  ;;  %680 = vmatpush.msrb.mxu3 %v664_v38  ;;  %v782_v37 = vld [vmem:[#allocation3 + $0x1c8] sm:$0xff]  ;;  %v783_v38 = vld [vmem:[#allocation3 + $0x1d0] sm:$0xff] }
  0x51   :  { %581 = vmatpush.msrb.mxu0 %v461_v39  ;;  %607 = vmatpush.msrb.mxu1 %v462_v40  ;;  %v784_v39 = vld [vmem:[#allocation3 + $0x1d8] sm:$0xff]  ;;  %v803_v40 = vld [vmem:[#allocation3 + $0x460] sm:$0xff] }
  0x52   :  { %633 = vmatpush.msrb.mxu2 %v463_v41  ;;  %681 = vmatpush.msrb.mxu3 %v661_v44  ;;  %v779_v41 = vld [vmem:[#allocation3 + $0x1b0] sm:$0xff]  ;;  %v780_v44 = vld [vmem:[#allocation3 + $0x1b8] sm:$0xff] }
  0x53   :  { %582 = vmatpush.msrb.mxu0 %v458_v45  ;;  %608 = vmatpush.msrb.mxu1 %v459_v46  ;;  %v781_v45 = vld [vmem:[#allocation3 + $0x1c0] sm:$0xff]  ;;  %v800_v46 = vld [vmem:[#allocation3 + $0x448] sm:$0xff] }
  0x54   :  { %634 = vmatpush.msrb.mxu2 %v460_v47  ;;  %682 = vmatpush.msrb.mxu3 %v658_v48  ;;  %v776_v47 = vld [vmem:[#allocation3 + $0x198] sm:$0xff]  ;;  %v777_v48 = vld [vmem:[#allocation3 + $0x1a0] sm:$0xff] }
  0x55   :  { %4258 = vmatmul.msk.f32.vlgmr.msra.gmra.mxu0 %vm155_vm0, %v4626_v6  ;;  %4261 = vmatmul.msk.f32.vlgmr.msra.gmra.mxu1 %vm155_vm0, %v4572_v28 }
  0x56   :  { %4264 = vmatmul.msk.f32.vlgmr.msra.gmra.mxu2 %vm155_vm0, %v4572_v28  ;;  %4267 = vmatmul.msk.f32.vlgmr.msra.gmra.mxu3 %vm155_vm0, %v4572_v28 }
  0x57   :  { %583 = vmatpush.msrb.mxu0 %v455_v49  ;;  %609 = vmatpush.msrb.mxu1 %v456_v50  ;;  %v778_v49 = vld [vmem:[#allocation3 + $0x1a8] sm:$0xff]  ;;  %v797_v50 = vld [vmem:[#allocation3 + $0x430] sm:$0xff] }
  0x58   :  { %635 = vmatpush.msrb.mxu2 %v457_v51  ;;  %683 = vmatpush.msrb.mxu3 %v655_v52  ;;  %v773_v51 = vld [vmem:[#allocation3 + $0x180] sm:$0xff]  ;;  %v774_v52 = vld [vmem:[#allocation3 + $0x188] sm:$0xff] }
  0x59   :  { %584 = vmatpush.msrb.mxu0 %v452_v53  ;;  %610 = vmatpush.msrb.mxu1 %v453_v54  ;;  %v775_v53 = vld [vmem:[#allocation3 + $0x190] sm:$0xff]  ;;  %v794_v54 = vld [vmem:[#allocation3 + $0x418] sm:$0xff] }
  0x5a   :  { %636 = vmatpush.msrb.mxu2 %v454_v55  ;;  %684 = vmatpush.msrb.mxu3 %v652_v58  ;;  %v770_v55 = vld [vmem:[#allocation3 + $0x168] sm:$0xff]  ;;  %v771_v58 = vld [vmem:[#allocation3 + $0x170] sm:$0xff] }
  0x5b   :  { %585 = vmatpush.msrb.mxu0 %v449_v59  ;;  %611 = vmatpush.msrb.mxu1 %v450_v60  ;;  %v772_v59 = vld [vmem:[#allocation3 + $0x178] sm:$0xff]  ;;  %v791_v60 = vld [vmem:[#allocation3 + $0x400] sm:$0xff] }
  0x5c   :  { %637 = vmatpush.msrb.mxu2 %v451_v61  ;;  %685 = vmatpush.msrb.mxu3 %v649_v62  ;;  %v767_v61 = vld [vmem:[#allocation3 + $0x150] sm:$0xff]  ;;  %v768_v62 = vld [vmem:[#allocation3 + $0x158] sm:$0xff] }
  0x5d   :  { %4259 = vmatmul.msk.f32.gmra.mxu0 %vm155_vm0, %v4639_v19  ;;  %4262 = vmatmul.msk.f32.gmra.mxu1 %vm155_vm0, %v4590_v42 }
  0x5e   :  { %4265 = vmatmul.msk.f32.gmra.mxu2 %vm155_vm0, %v4590_v42  ;;  %4268 = vmatmul.msk.f32.gmra.mxu3 %vm155_vm0, %v4590_v42 }
  0x5f   :  { %705 = vmatpush.msra.mxu0 %v668_v63  ;;  %731 = vmatpush.msra.mxu1 %v669_v0  ;;  %v769_v63 = vld [vmem:[#allocation3 + $0x160] sm:$0xff] }
  0x60   :  { %819 = vmatpush.msra.mxu2 %v807_v1  ;;  %845 = vmatpush.msra.mxu3 %v808_v2  ;;  %v985_v0 = vld [vmem:[#allocation3 + $0x720] sm:$0xff]  ;;  %v986_v1 = vld [vmem:[#allocation3 + $0x728] sm:$0xff]  ;;  %v987_v2 = vld [vmem:[#allocation3 + $0x730] sm:$0xff] }
  0x61   :  { %706 = vmatpush.msra.mxu0 %v665_v3  ;;  %732 = vmatpush.msra.mxu1 %v666_v4  ;;  %v1125_v3 = vld [vmem:[#allocation3 + $0x528] sm:$0xff] }
  0x62   :  { %820 = vmatpush.msra.mxu2 %v804_v5  ;;  %846 = vmatpush.msra.mxu3 %v805_v7  ;;  %v982_v4 = vld [vmem:[#allocation3 + $0x708] sm:$0xff]  ;;  %v983_v5 = vld [vmem:[#allocation3 + $0x710] sm:$0xff]  ;;  %v984_v7 = vld [vmem:[#allocation3 + $0x718] sm:$0xff] }
  0x63   :  { %707 = vmatpush.msra.mxu0 %v662_v8  ;;  %733 = vmatpush.msra.mxu1 %v663_v9  ;;  %v1122_v8 = vld [vmem:[#allocation3 + $0x510] sm:$0xff] }
  0x64   :  { %821 = vmatpush.msra.mxu2 %v801_v10  ;;  %847 = vmatpush.msra.mxu3 %v802_v11  ;;  %v979_v9 = vld [vmem:[#allocation3 + $0x6f0] sm:$0xff]  ;;  %v980_v10 = vld [vmem:[#allocation3 + $0x6f8] sm:$0xff]  ;;  %v981_v11 = vld [vmem:[#allocation3 + $0x700] sm:$0xff] }
  0x65   :  { %4260 = vmatmul.msk.f32.gmra.mxu0 %vm155_vm0, %v4652_v34  ;;  %4263 = vmatmul.msk.f32.gmra.mxu1 %vm155_vm0, %v4608_v56 }
  0x66   :  { %4266 = vmatmul.msk.f32.gmra.mxu2 %vm155_vm0, %v4608_v56  ;;  %4269 = vmatmul.msk.f32.gmra.mxu3 %vm155_vm0, %v4608_v56 }
  0x67   :  { %708 = vmatpush.msra.mxu0 %v659_v12  ;;  %734 = vmatpush.msra.mxu1 %v660_v13  ;;  %v1119_v12 = vld [vmem:[#allocation3 + $0x4f8] sm:$0xff] }
  0x68   :  { %822 = vmatpush.msra.mxu2 %v798_v14  ;;  %848 = vmatpush.msra.mxu3 %v799_v15  ;;  %v976_v13 = vld [vmem:[#allocation3 + $0x6d8] sm:$0xff]  ;;  %v977_v14 = vld [vmem:[#allocation3 + $0x6e0] sm:$0xff]  ;;  %v978_v15 = vld [vmem:[#allocation3 + $0x6e8] sm:$0xff] }
  0x69   :  { %709 = vmatpush.msra.mxu0 %v656_v16  ;;  %735 = vmatpush.msra.mxu1 %v657_v17  ;;  %v1116_v16 = vld [vmem:[#allocation3 + $0x4e0] sm:$0xff] }
  0x6a   :  { %823 = vmatpush.msra.mxu2 %v795_v18  ;;  %849 = vmatpush.msra.mxu3 %v796_v20  ;;  %v973_v17 = vld [vmem:[#allocation3 + $0x6c0] sm:$0xff]  ;;  %v974_v18 = vld [vmem:[#allocation3 + $0x6c8] sm:$0xff]  ;;  %v975_v20 = vld [vmem:[#allocation3 + $0x6d0] sm:$0xff] }
  0x6b   :  { %710 = vmatpush.msra.mxu0 %v653_v21  ;;  %736 = vmatpush.msra.mxu1 %v654_v22  ;;  %v1113_v21 = vld [vmem:[#allocation3 + $0x4c8] sm:$0xff] }
  0x6c   :  { %824 = vmatpush.msra.mxu2 %v792_v23  ;;  %850 = vmatpush.msra.mxu3 %v793_v24  ;;  %v970_v22 = vld [vmem:[#allocation3 + $0x6a8] sm:$0xff]  ;;  %v971_v23 = vld [vmem:[#allocation3 + $0x6b0] sm:$0xff]  ;;  %v972_v24 = vld [vmem:[#allocation3 + $0x6b8] sm:$0xff] }
  0x6d   :  { %4270 = vmatmul.msk.f32.vlgmr.msrb.gmra.mxu0 %vm155_vm0, %v4577_v29  ;;  %4273 = vmatmul.msk.f32.vlgmr.msrb.gmra.mxu1 %vm155_vm0, %v4577_v29 }
  0x6e   :  { %4276 = vmatmul.msk.f32.vlgmr.msrb.gmra.mxu2 %vm155_vm0, %v4577_v29  ;;  %4279 = vmatmul.msk.f32.vlgmr.msrb.gmra.mxu3 %vm155_vm0, %v4626_v6 }
  0x6f   :  { %711 = vmatpush.msra.mxu0 %v650_v25  ;;  %737 = vmatpush.msra.mxu1 %v651_v26  ;;  %v1110_v25 = vld [vmem:[#allocation3 + $0x4b0] sm:$0xff] }
  0x70   :  { %825 = vmatpush.msra.mxu2 %v789_v27  ;;  %851 = vmatpush.msra.mxu3 %v790_v30  ;;  %v967_v26 = vld [vmem:[#allocation3 + $0x690] sm:$0xff]  ;;  %v968_v27 = vld [vmem:[#allocation3 + $0x698] sm:$0xff]  ;;  %v969_v30 = vld [vmem:[#allocation3 + $0x6a0] sm:$0xff] }
  0x71   :  { %871 = vmatpush.msrb.mxu0 %v809_v31  ;;  %897 = vmatpush.msrb.mxu1 %v785_v32  ;;  %v1107_v31 = vld [vmem:[#allocation3 + $0x498] sm:$0xff]  ;;  %v1126_v32 = vld [vmem:[#allocation3 + $0x530] sm:$0xff] }
  0x72   :  { %923 = vmatpush.msrb.mxu2 %v786_v33  ;;  %949 = vmatpush.msrb.mxu3 %v787_v35  ;;  %v1127_v33 = vld [vmem:[#allocation3 + $0x538] sm:$0xff]  ;;  %v1103_v35 = vld [vmem:[#allocation3 + $0x288] sm:$0xff] }
  0x73   :  { %872 = vmatpush.msrb.mxu0 %v806_v36  ;;  %898 = vmatpush.msrb.mxu1 %v782_v37  ;;  %v1104_v36 = vld [vmem:[#allocation3 + $0x290] sm:$0xff] }
  0x74   :  { %924 = vmatpush.msrb.mxu2 %v783_v38  ;;  %950 = vmatpush.msrb.mxu3 %v784_v39  ;;  %v1123_v39 = vld [vmem:[#allocation3 + $0x518] sm:$0xff] }
  0x75   :  { %4271 = vmatmul.msk.f32.gmra.mxu0 %vm155_vm0, %v4595_v43  ;;  %4274 = vmatmul.msk.f32.gmra.mxu1 %vm155_vm0, %v4595_v43 }
  0x76   :  { %4277 = vmatmul.msk.f32.gmra.mxu2 %vm155_vm0, %v4595_v43  ;;  %4280 = vmatmul.msk.f32.gmra.mxu3 %vm155_vm0, %v4639_v19 }
  0x77   :  { %873 = vmatpush.msrb.mxu0 %v803_v40  ;;  %899 = vmatpush.msrb.mxu1 %v779_v41  ;;  %v1124_v40 = vld [vmem:[#allocation3 + $0x520] sm:$0xff]  ;;  %v1100_v41 = vld [vmem:[#allocation3 + $0x270] sm:$0xff] }
  0x78   :  { %925 = vmatpush.msrb.mxu2 %v780_v44  ;;  %951 = vmatpush.msrb.mxu3 %v781_v45  ;;  %v1101_v44 = vld [vmem:[#allocation3 + $0x278] sm:$0xff]  ;;  %v1121_v45 = vld [vmem:[#allocation3 + $0x508] sm:$0xff] }
  0x79   :  { %874 = vmatpush.msrb.mxu0 %v800_v46  ;;  %900 = vmatpush.msrb.mxu1 %v776_v47  ;;  %v1097_v46 = vld [vmem:[#allocation3 + $0x258] sm:$0xff]  ;;  %v1098_v47 = vld [vmem:[#allocation3 + $0x260] sm:$0xff] }
  0x7a   :  { %926 = vmatpush.msrb.mxu2 %v777_v48  ;;  %952 = vmatpush.msrb.mxu3 %v778_v49  ;;  %v1117_v48 = vld [vmem:[#allocation3 + $0x4e8] sm:$0xff]  ;;  %v1118_v49 = vld [vmem:[#allocation3 + $0x4f0] sm:$0xff] }
  0x7b   :  { %875 = vmatpush.msrb.mxu0 %v797_v50  ;;  %901 = vmatpush.msrb.mxu1 %v773_v51  ;;  %v1094_v50 = vld [vmem:[#allocation3 + $0x240] sm:$0xff]  ;;  %v1095_v51 = vld [vmem:[#allocation3 + $0x248] sm:$0xff] }
  0x7c   :  { %927 = vmatpush.msrb.mxu2 %v774_v52  ;;  %953 = vmatpush.msrb.mxu3 %v775_v53  ;;  %v1114_v52 = vld [vmem:[#allocation3 + $0x4d0] sm:$0xff]  ;;  %v1115_v53 = vld [vmem:[#allocation3 + $0x4d8] sm:$0xff] }
  0x7d   :  { %4272 = vmatmul.msk.f32.gmra.mxu0 %vm155_vm0, %v4613_v57  ;;  %4275 = vmatmul.msk.f32.gmra.mxu1 %vm155_vm0, %v4613_v57 }
  0x7e   :  { %4278 = vmatmul.msk.f32.gmra.mxu2 %vm155_vm0, %v4613_v57  ;;  %4281 = vmatmul.msk.f32.gmra.mxu3 %vm155_vm0, %v4652_v34 }
  0x7f   :  { %876 = vmatpush.msrb.mxu0 %v794_v54  ;;  %902 = vmatpush.msrb.mxu1 %v770_v55 }
  0x80   :  { %928 = vmatpush.msrb.mxu2 %v771_v58  ;;  %954 = vmatpush.msrb.mxu3 %v772_v59  ;;  %v1091_v58 = vld [vmem:[#allocation3 + $0x228] sm:$0xff]  ;;  %v1092_v59 = vld [vmem:[#allocation3 + $0x230] sm:$0xff] }
  0x81   :  { %877 = vmatpush.msrb.mxu0 %v791_v60  ;;  %903 = vmatpush.msrb.mxu1 %v767_v61 }
  0x82   :  { %929 = vmatpush.msrb.mxu2 %v768_v62  ;;  %955 = vmatpush.msrb.mxu3 %v769_v63  ;;  %v1111_v62 = vld [vmem:[#allocation3 + $0x4b8] sm:$0xff]  ;;  %v1112_v63 = vld [vmem:[#allocation3 + $0x4c0] sm:$0xff] }
  0x85   :  { %4282 = vmatmul.msk.f32.vlgmr.msra.gmra.mxu0 %vm155_vm0, %v4626_v6  ;;  %4285 = vmatmul.msk.f32.vlgmr.msra.gmra.mxu1 %vm155_vm0, %v4626_v6 }
  0x86   :  { %4288 = vmatmul.msk.f32.vlgmr.msra.gmra.mxu2 %vm155_vm0, %v4572_v28  ;;  %4291 = vmatmul.msk.f32.vlgmr.msra.gmra.mxu3 %vm155_vm0, %v4572_v28 }
  0x87   :  { %997 = vmatpush.msra.mxu0 %v985_v0  ;;  %1023 = vmatpush.msra.mxu1 %v986_v1  ;;  %v1088_v0 = vld [vmem:[#allocation3 + $0x210] sm:$0xff]  ;;  %v1089_v1 = vld [vmem:[#allocation3 + $0x218] sm:$0xff] }
  0x88   :  { %1049 = vmatpush.msra.mxu2 %v987_v2  ;;  %1137 = vmatpush.msra.mxu3 %v1125_v3  ;;  %v1108_v2 = vld [vmem:[#allocation3 + $0x4a0] sm:$0xff]  ;;  %v1109_v3 = vld [vmem:[#allocation3 + $0x4a8] sm:$0xff] }
  0x89   :  { %998 = vmatpush.msra.mxu0 %v982_v4  ;;  %1024 = vmatpush.msra.mxu1 %v983_v5  ;;  %v1085_v4 = vld [vmem:[#allocation3 + $0x1f8] sm:$0xff]  ;;  %v1086_v5 = vld [vmem:[#allocation3 + $0x200] sm:$0xff] }
  0x8a   :  { %1050 = vmatpush.msra.mxu2 %v984_v7  ;;  %1138 = vmatpush.msra.mxu3 %v1122_v8 }
  0x8b   :  { %999 = vmatpush.msra.mxu0 %v979_v9  ;;  %1025 = vmatpush.msra.mxu1 %v980_v10 }
  0x8c   :  { %1051 = vmatpush.msra.mxu2 %v981_v11  ;;  %1139 = vmatpush.msra.mxu3 %v1119_v12  ;;  %v1303_v12 = vld [vmem:[#allocation3 + $0x7c8] sm:$0xff] }
  0x8d   :  { %4283 = vmatmul.msk.f32.gmra.mxu0 %vm155_vm0, %v4639_v19  ;;  %4286 = vmatmul.msk.f32.gmra.mxu1 %vm155_vm0, %v4639_v19 }
  0x8e   :  { %4289 = vmatmul.msk.f32.gmra.mxu2 %vm155_vm0, %v4590_v42  ;;  %4292 = vmatmul.msk.f32.gmra.mxu3 %vm155_vm0, %v4590_v42 }
  0x8f   :  { %1000 = vmatpush.msra.mxu0 %v976_v13  ;;  %1026 = vmatpush.msra.mxu1 %v977_v14  ;;  %v1304_v13 = vld [vmem:[#allocation3 + $0x7d0] sm:$0xff] }
  0x90   :  { %1052 = vmatpush.msra.mxu2 %v978_v15  ;;  %1140 = vmatpush.msra.mxu3 %v1116_v16  ;;  %v1305_v16 = vld [vmem:[#allocation3 + $0x7d8] sm:$0xff] }
  0x91   :  { %1001 = vmatpush.msra.mxu0 %v973_v17  ;;  %1027 = vmatpush.msra.mxu1 %v974_v18 }
  0x92   :  { %1053 = vmatpush.msra.mxu2 %v975_v20  ;;  %1141 = vmatpush.msra.mxu3 %v1113_v21  ;;  %v1102_v21 = vld [vmem:[#allocation3 + $0x280] sm:$0xff] }
  0x93   :  { %1002 = vmatpush.msra.mxu0 %v970_v22  ;;  %1028 = vmatpush.msra.mxu1 %v971_v23  ;;  %v1300_v22 = vld [vmem:[#allocation3 + $0x7b0] sm:$0xff]  ;;  %v1302_v23 = vld [vmem:[#allocation3 + $0x7c0] sm:$0xff] }
  0x94   :  { %1054 = vmatpush.msra.mxu2 %v972_v24  ;;  %1142 = vmatpush.msra.mxu3 %v1110_v25  ;;  %v1099_v24 = vld [vmem:[#allocation3 + $0x268] sm:$0xff]  ;;  %v1297_v25 = vld [vmem:[#allocation3 + $0x798] sm:$0xff] }
  0x95   :  { %4284 = vmatmul.msk.f32.gmra.mxu0 %vm155_vm0, %v4652_v34  ;;  %4287 = vmatmul.msk.f32.gmra.mxu1 %vm155_vm0, %v4652_v34 }
  0x96   :  { %4290 = vmatmul.msk.f32.gmra.mxu2 %vm155_vm0, %v4608_v56  ;;  %4293 = vmatmul.msk.f32.gmra.mxu3 %vm155_vm0, %v4608_v56 }
  0x97   :  { %1003 = vmatpush.msra.mxu0 %v967_v26  ;;  %1029 = vmatpush.msra.mxu1 %v968_v27  ;;  %v1298_v26 = vld [vmem:[#allocation3 + $0x7a0] sm:$0xff]  ;;  %v1299_v27 = vld [vmem:[#allocation3 + $0x7a8] sm:$0xff] }
  0x98   :  { %1055 = vmatpush.msra.mxu2 %v969_v30  ;;  %1143 = vmatpush.msra.mxu3 %v1107_v31  ;;  %v1096_v30 = vld [vmem:[#allocation3 + $0x250] sm:$0xff]  ;;  %v1294_v31 = vld [vmem:[#allocation3 + $0x780] sm:$0xff] }
  0x9d   :  { %4294 = vmatmul.msk.f32.vlgmr.msrb.gmra.mxu0 %vm155_vm0, %v4572_v28  ;;  %4297 = vmatmul.msk.f32.vlgmr.msrb.gmra.mxu1 %vm155_vm0, %v4577_v29 }
  0x9e   :  { %4300 = vmatmul.msk.f32.vlgmr.msrb.gmra.mxu2 %vm155_vm0, %v4577_v29  ;;  %4303 = vmatmul.msk.f32.vlgmr.msrb.gmra.mxu3 %vm155_vm0, %v4577_v29  ;;  %v1120_v29 = vld [vmem:[#allocation3 + $0x500] sm:$0xff] }
  0x9f   :  { %1163 = vmatpush.msrb.mxu0 %v1126_v32  ;;  %1189 = vmatpush.msrb.mxu1 %v1127_v33  ;;  %v1295_v32 = vld [vmem:[#allocation3 + $0x788] sm:$0xff]  ;;  %v1296_v33 = vld [vmem:[#allocation3 + $0x790] sm:$0xff] }
  0xa0   :  { %1215 = vmatpush.msrb.mxu2 %v1103_v35  ;;  %1241 = vmatpush.msrb.mxu3 %v1104_v36  ;;  %v1093_v35 = vld [vmem:[#allocation3 + $0x238] sm:$0xff]  ;;  %v1291_v36 = vld [vmem:[#allocation3 + $0x768] sm:$0xff] }
  0xa1   :  { %1164 = vmatpush.msrb.mxu0 %v1123_v39  ;;  %1190 = vmatpush.msrb.mxu1 %v1124_v40  ;;  %v1292_v40 = vld [vmem:[#allocation3 + $0x770] sm:$0xff] }
  0xa2   :  { %v182_v37 = vpop.f32.mrf.mxu0  ;;  %v4742_v38 = vpop.f32.mrf.mxu1  ;;  %1216 = vmatpush.msrb.mxu2 %v1100_v41  ;;  %1242 = vmatpush.msrb.mxu3 %v1101_v44  ;;  %v1293_v41 = vld [vmem:[#allocation3 + $0x778] sm:$0xff] }
  0xa3   :  { %1165 = vmatpush.msrb.mxu0 %v1120_v29  ;;  %1191 = vmatpush.msrb.mxu1 %v1121_v45  ;;  %v1090_v29 = vld [vmem:[#allocation3 + $0x220] sm:$0xff]  ;;  %v1288_v45 = vld [vmem:[#allocation3 + $0x750] sm:$0xff] }
  0xa4   :  { %1217 = vmatpush.msrb.mxu2 %v1097_v46  ;;  %1243 = vmatpush.msrb.mxu3 %v1098_v47  ;;  %v1289_v46 = vld [vmem:[#allocation3 + $0x758] sm:$0xff]  ;;  %v1290_v47 = vld [vmem:[#allocation3 + $0x760] sm:$0xff] }
  0xa5   :  { %4295 = vmatmul.msk.f32.gmra.mxu0 %vm155_vm0, %v4590_v42  ;;  %4298 = vmatmul.msk.f32.gmra.mxu1 %vm155_vm0, %v4595_v43 }
  0xa6   :  { %4301 = vmatmul.msk.f32.gmra.mxu2 %vm155_vm0, %v4595_v43  ;;  %4304 = vmatmul.msk.f32.gmra.mxu3 %vm155_vm0, %v4595_v43 }
  0xa7   :  { %1166 = vmatpush.msrb.mxu0 %v1117_v48  ;;  %1192 = vmatpush.msrb.mxu1 %v1118_v49  ;;  %v1087_v48 = vld [vmem:[#allocation3 + $0x208] sm:$0xff]  ;;  %v1285_v49 = vld [vmem:[#allocation3 + $0x738] sm:$0xff] }
  0xa8   :  { %1218 = vmatpush.msrb.mxu2 %v1094_v50  ;;  %1244 = vmatpush.msrb.mxu3 %v1095_v51  ;;  %v1286_v50 = vld [vmem:[#allocation3 + $0x740] sm:$0xff]  ;;  %v1287_v51 = vld [vmem:[#allocation3 + $0x748] sm:$0xff] }
  0xa9   :  { %v4752_v54 = vpop.f32.mrf.mxu2  ;;  %v269_v55 = vpop.f32.mrf.mxu3  ;;  %1167 = vmatpush.msrb.mxu0 %v1114_v52  ;;  %1193 = vmatpush.msrb.mxu1 %v1115_v53 }
  0xaa   :  { %v4754_v60 = vadd.f32 %v269_v55, %v182_v37  ;;  %v185_v43 = vpop.f32.mrf.mxu0  ;;  %v4756_v61 = vpop.f32.mrf.mxu1  ;;  %1219 = vmatpush.msrb.mxu2 %v1091_v58  ;;  %1245 = vmatpush.msrb.mxu3 %v1092_v59  ;;  %v4353_v59 = vld [vmem:[%s5967_s0] sm:$0xff] }
  0xab   :  { %1168 = vmatpush.msrb.mxu0 %v1111_v62  ;;  %1194 = vmatpush.msrb.mxu1 %v1112_v63 }
  0xac   :  { %1220 = vmatpush.msrb.mxu2 %v1088_v0  ;;  %1246 = vmatpush.msrb.mxu3 %v1089_v1  ;;  %v4354_v1 = vld [vmem:[%s5968_s1 + $0x8] sm:$0xff] }
  0xad   :  { %4296 = vmatmul.msk.f32.gmra.mxu0 %vm155_vm0, %v4608_v56  ;;  %4299 = vmatmul.msk.f32.gmra.mxu1 %vm155_vm0, %v4613_v57 }
  0xae   :  { %4302 = vmatmul.msk.f32.gmra.mxu2 %vm155_vm0, %v4613_v57  ;;  %4305 = vmatmul.msk.f32.gmra.mxu3 %vm155_vm0, %v4613_v57  ;;  %v1105_v57 = vld [vmem:[#allocation3 + $0x298] sm:$0xff] }
  0xaf   :  { %1169 = vmatpush.msrb.mxu0 %v1108_v2  ;;  %1195 = vmatpush.msrb.mxu1 %v1109_v3  ;;  %v4355_v2 = vld [vmem:[%s5967_s0 + $0x8] sm:$0xff] }
  0xb0   :  { %1221 = vmatpush.msrb.mxu2 %v1085_v4  ;;  %1247 = vmatpush.msrb.mxu3 %v1086_v5 }
  0xb1   :  { %v4766_v7 = vpop.f32.mrf.mxu2  ;;  %v272_v8 = vpop.f32.mrf.mxu3 }
  0xb2   :  { %v4768_v9 = vadd.f32 %v272_v8, %v185_v43  ;;  %v188_v10 = vpop.f32.mrf.mxu0  ;;  %v4770_v11 = vpop.f32.mrf.mxu1 }
  0xb5   :  { %4306 = vmatmul.msk.f32.vlgmr.msra.gmra.mxu0 %vm155_vm0, %v4626_v6  ;;  %4309 = vmatmul.msk.f32.vlgmr.msra.gmra.mxu1 %vm155_vm0, %v4626_v6 }
  0xb6   :  { %4312 = vmatmul.msk.f32.vlgmr.msra.gmra.mxu2 %vm155_vm0, %v4626_v6  ;;  %4315 = vmatmul.msk.f32.vlgmr.msra.gmra.mxu3 %vm155_vm0, %v4572_v28  ;;  %v1301_v28 = vld [vmem:[#allocation3 + $0x7b8] sm:$0xff] }
  0xb7   :  { %1267 = vmatpush.msra.mxu0 %v1105_v57  ;;  %1315 = vmatpush.msra.mxu1 %v1303_v12  ;;  %v4357_v57 = vld [vmem:[%s5967_s0 + $0x10] sm:$0xff] }
  0xb8   :  { %1341 = vmatpush.msra.mxu2 %v1304_v13  ;;  %1367 = vmatpush.msra.mxu3 %v1305_v16 }
  0xb9   :  { %v4780_v14 = vpop.f32.mrf.mxu2  ;;  %v275_v15 = vpop.f32.mrf.mxu3  ;;  %1268 = vmatpush.msra.mxu0 %v1102_v21  ;;  %1316 = vmatpush.msra.mxu1 %v1300_v22 }
  0xba   :  { %v4782_v17 = vadd.f32 %v275_v15, %v188_v10  ;;  %v4784_v18 = vpop.f32.mrf.mxu0  ;;  %v4786_v20 = vpop.f32.mrf.mxu1  ;;  %1342 = vmatpush.msra.mxu2 %v1301_v28  ;;  %1368 = vmatpush.msra.mxu3 %v1302_v23  ;;  %v4356_v10 = vld [vmem:[%s5968_s1 + $0x10] sm:$0xff] }
  0xbb   :  { %1269 = vmatpush.msra.mxu0 %v1099_v24  ;;  %1317 = vmatpush.msra.mxu1 %v1297_v25 }
  0xbc   :  { %1343 = vmatpush.msra.mxu2 %v1298_v26  ;;  %1369 = vmatpush.msra.mxu3 %v1299_v27 }
  0xbd   :  { %4307 = vmatmul.msk.f32.gmra.mxu0 %vm155_vm0, %v4639_v19  ;;  %4310 = vmatmul.msk.f32.gmra.mxu1 %vm155_vm0, %v4639_v19 }
  0xbe   :  { %4313 = vmatmul.msk.f32.gmra.mxu2 %vm155_vm0, %v4639_v19  ;;  %4316 = vmatmul.msk.f32.gmra.mxu3 %vm155_vm0, %v4590_v42 }
  0xbf   :  { %1270 = vmatpush.msra.mxu0 %v1096_v30  ;;  %1318 = vmatpush.msra.mxu1 %v1294_v31 }
  0xc0   :  { %1344 = vmatpush.msra.mxu2 %v1295_v32  ;;  %1370 = vmatpush.msra.mxu3 %v1296_v33 }
  0xc1   :  { %v4796_v37 = vpop.f32.mrf.mxu2  ;;  %v4798_v39 = vpop.f32.mrf.mxu3  ;;  %1271 = vmatpush.msra.mxu0 %v1093_v35  ;;  %1319 = vmatpush.msra.mxu1 %v1291_v36 }
  0xc2   :  { %v4800_v44 = vpop.f32.mrf.mxu0  ;;  %v4802_v42 = vpop.f32.mrf.mxu1  ;;  %1345 = vmatpush.msra.mxu2 %v1292_v40  ;;  %1371 = vmatpush.msra.mxu3 %v1293_v41 }
  0xc3   :  { %1272 = vmatpush.msra.mxu0 %v1090_v29  ;;  %1320 = vmatpush.msra.mxu1 %v1288_v45 }
  0xc4   :  { %1346 = vmatpush.msra.mxu2 %v1289_v46  ;;  %1372 = vmatpush.msra.mxu3 %v1290_v47 }
  0xc5   :  { %4308 = vmatmul.msk.f32.gmra.mxu0 %vm155_vm0, %v4652_v34  ;;  %4311 = vmatmul.msk.f32.gmra.mxu1 %vm155_vm0, %v4652_v34 }
  0xc6   :  { %4314 = vmatmul.msk.f32.gmra.mxu2 %vm155_vm0, %v4652_v34  ;;  %4317 = vmatmul.msk.f32.gmra.mxu3 %vm155_vm0, %v4608_v56  ;;  %v4352_v56 = vld [vmem:[%s5968_s1] sm:$0xff] }
  0xc7   :  { %1273 = vmatpush.msra.mxu0 %v1087_v48  ;;  %1321 = vmatpush.msra.mxu1 %v1285_v49  ;;  %v1684_v49 = vld [vmem:[#allocation7 + $0x3f0] sm:$0xff] }
  0xc8   :  { %1347 = vmatpush.msra.mxu2 %v1286_v50  ;;  %1373 = vmatpush.msra.mxu3 %v1287_v51  ;;  %v1685_v50 = vld [vmem:[#allocation7 + $0x3f8] sm:$0xff] }
  0xc9   :  { %v4812_v52 = vpop.f32.mrf.mxu2  ;;  %v4814_v53 = vpop.f32.mrf.mxu3 }
  0xca   :  { %v4816_v55 = vpop.f32.mrf.mxu0  ;;  %v4818_v58 = vpop.f32.mrf.mxu1 }
  0xcd   :  { %4318 = vmatmul.msk.f32.vlgmr.msrb.gmra.mxu0 %vm155_vm0, %v4352_v56  ;;  %4321 = vmatmul.msk.f32.vlgmr.msrb.gmra.mxu1 %vm155_vm0, %v4352_v56 }
  0xce   :  { %4324 = vmatmul.msk.f32.vlgmr.msrb.gmra.mxu2 %vm155_vm0, %v4353_v59  ;;  %4327 = vmatmul.msk.f32.vlgmr.msrb.gmra.mxu3 %vm155_vm0, %v4353_v59 }
  0xcf   :  { %1793 = vmatpush.msrb.mxu0 %v1684_v49  ;;  %1871 = vmatpush.msrb.mxu3 %v1685_v50  ;;  %v1676_v49 = vld [vmem:[#allocation7 + $0x3b0] sm:$0xff]  ;;  %v1714_v50 = vld [vmem:[#allocation7 + $0x4e0] sm:$0xff] }
  0xd1   :  { %v4830_v43 = vpop.f32.mrf.mxu2  ;;  %v4832_v62 = vpop.f32.mrf.mxu3 }
  0xd2   :  { %5983 = vst [vmem:[#allocation14_spill] sm:$0xff] %v4832_v62  ;;  %v4834_v63 = vpop.f32.mrf.mxu0  ;;  %v4836_v0 = vpop.f32.mrf.mxu1  ;;  %v1678_v62 = vld [vmem:[#allocation7 + $0x3c0] sm:$0xff] }
  0xd5   :  { %4319 = vmatmul.msk.f32.gmra.mxu0 %vm155_vm0, %v4354_v1  ;;  %4322 = vmatmul.msk.f32.gmra.mxu1 %vm155_vm0, %v4354_v1 }
  0xd6   :  { %4325 = vmatmul.msk.f32.gmra.mxu2 %vm155_vm0, %v4355_v2  ;;  %4328 = vmatmul.msk.f32.gmra.mxu3 %vm155_vm0, %v4355_v2 }
  0xd9   :  { %v4848_v3 = vpop.f32.mrf.mxu2  ;;  %v4850_v4 = vpop.f32.mrf.mxu3 }
  0xda   :  { %v4852_v5 = vpop.f32.mrf.mxu0  ;;  %v4854_v8 = vpop.f32.mrf.mxu1 }
  0xdd   :  { %4320 = vmatmul.msk.f32.gmra.mxu0 %vm155_vm0, %v4356_v10  ;;  %4323 = vmatmul.msk.f32.gmra.mxu1 %vm155_vm0, %v4356_v10  ;;  %v1683_v10 = vld [vmem:[#allocation7 + $0x3e8] sm:$0xff] }
  0xde   :  { %4326 = vmatmul.msk.f32.gmra.mxu2 %vm155_vm0, %v4357_v57  ;;  %4329 = vmatmul.msk.f32.gmra.mxu3 %vm155_vm0, %v4357_v57 }
  0xdf   :  { %1872 = vmatpush.msrb.mxu3 %v1683_v10 }
  0xe1   :  { %v4866_v12 = vpop.f32.mrf.mxu2  ;;  %v4868_v13 = vpop.f32.mrf.mxu3 }
  0xe2   :  { %v4870_v15 = vpop.f32.mrf.mxu0  ;;  %v4872_v16 = vpop.f32.mrf.mxu1 }
  0xe3   :  { %5984 = vst [vmem:[#allocation15_spill] sm:$0xff] %v4870_v15  ;;  %v1681_v15 = vld [vmem:[#allocation7 + $0x3d8] sm:$0xff] }
  0xe4   :  { %1873 = vmatpush.msrb.mxu3 %v1681_v15 }
  0xe5   :  { %4330 = vmatmul.msk.f32.vlgmr.msra.gmra.mxu0 %vm155_vm0, %v4353_v59  ;;  %4333 = vmatmul.msk.f32.vlgmr.msra.gmra.mxu1 %vm155_vm0, %v4626_v6 }
  0xe6   :  { %4336 = vmatmul.msk.f32.vlgmr.msra.gmra.mxu2 %vm155_vm0, %v4626_v6  ;;  %4339 = vmatmul.msk.f32.vlgmr.msra.gmra.mxu3 %vm155_vm0, %v4626_v6 }
  0xe9   :  { %v4881_v21 = vpop.f32.mrf.mxu2  ;;  %v4883_v22 = vpop.f32.mrf.mxu3 }
  0xea   :  { %5985 = vst [vmem:[#allocation16_spill] sm:$0xff] %v4881_v21  ;;  %v4885_v28 = vpop.f32.mrf.mxu0  ;;  %v4887_v23 = vpop.f32.mrf.mxu1 }
  0xeb   :  { %5986 = vst [vmem:[#allocation17_spill] sm:$0xff] %v4883_v22  ;;  %v1692_v22 = vld [vmem:[#allocation7 + $0x430] sm:$0xff] }
  0xed   :  { %4331 = vmatmul.msk.f32.gmra.mxu0 %vm155_vm0, %v4355_v2  ;;  %4334 = vmatmul.msk.f32.gmra.mxu1 %vm155_vm0, %v4639_v19  ;;  %v1682_v2 = vld [vmem:[#allocation7 + $0x3e0] sm:$0xff] }
  0xee   :  { %4337 = vmatmul.msk.f32.gmra.mxu2 %vm155_vm0, %v4639_v19  ;;  %4340 = vmatmul.msk.f32.gmra.mxu3 %vm155_vm0, %v4639_v19 }
  0xef   :  { %1794 = vmatpush.msrb.mxu0 %v1682_v2  ;;  %v1677_v2 = vld [vmem:[#allocation7 + $0x3b8] sm:$0xff] }
  0xf1   :  { %v4896_v6 = vpop.f32.mrf.mxu2  ;;  %v4898_v24 = vpop.f32.mrf.mxu3 }
  0xf2   :  { %v4900_v25 = vpop.f32.mrf.mxu0  ;;  %v4902_v26 = vpop.f32.mrf.mxu1 }
  0xf5   :  { %4332 = vmatmul.msk.f32.gmra.mxu0 %vm155_vm0, %v4357_v57  ;;  %4335 = vmatmul.msk.f32.gmra.mxu1 %vm155_vm0, %v4652_v34  ;;  %v1680_v57 = vld [vmem:[#allocation7 + $0x3d0] sm:$0xff] }
  0xf6   :  { %4338 = vmatmul.msk.f32.gmra.mxu2 %vm155_vm0, %v4652_v34  ;;  %4341 = vmatmul.msk.f32.gmra.mxu3 %vm155_vm0, %v4652_v34 }
  0xf7   :  { %1795 = vmatpush.msrb.mxu0 %v1680_v57  ;;  %v1672_v57 = vld [vmem:[#allocation7 + $0x390] sm:$0xff] }
  0xf9   :  { %v4911_v19 = vpop.f32.mrf.mxu2  ;;  %v4913_v27 = vpop.f32.mrf.mxu3  ;;  %1796 = vmatpush.msrb.mxu0 %v1678_v62  ;;  %v1674_v62 = vld [vmem:[#allocation7 + $0x3a0] sm:$0xff] }
  0xfa   :  { %v4915_v30 = vpop.f32.mrf.mxu0  ;;  %v4917_v31 = vpop.f32.mrf.mxu1 }
  0xfb   :  { %5987 = vst [vmem:[#allocation18_spill] sm:$0xff] %v4917_v31  ;;  %1797 = vmatpush.msrb.mxu0 %v1676_v49  ;;  %v1673_v49 = vld [vmem:[#allocation7 + $0x398] sm:$0xff] }
  0xfc   :  { %v1717_v31 = vld [vmem:[#allocation7 + $0x4f8] sm:$0xff] }
  0xfd   :  { %1798 = vmatpush.msrb.mxu0 %v1674_v62  ;;  %v1668_v62 = vld [vmem:[#allocation7 + $0x370] sm:$0xff] }
  0xff   :  { %1799 = vmatpush.msrb.mxu0 %v1672_v57 }
 0x101   :  { %v4919_v32 = vpop.f32.mrf.mxu2  ;;  %v4921_v33 = vpop.f32.mrf.mxu3 }
 0x102   :  { %5988 = vst [vmem:[#allocation19_spill] sm:$0xff] %v4919_v32  ;;  %v4923_v35 = vpop.f32.mrf.mxu0  ;;  %v4925_v36 = vpop.f32.mrf.mxu1 }
 0x103   :  { %5989 = vst [vmem:[#allocation20_spill] sm:$0xff] %v4921_v33  ;;  %v1742_v33 = vld [vmem:[#allocation7 + $0x5c0] sm:$0xff] }
 0x109   :  { %v4927_v40 = vpop.f32.mrf.mxu2  ;;  %v4929_v41 = vpop.f32.mrf.mxu3 }
 0x10a   :  { %v4931_v34 = vpop.f32.mrf.mxu0  ;;  %v4933_v29 = vpop.f32.mrf.mxu1 }
 0x10b   :  { %5990 = vst [vmem:[#allocation21_spill] sm:$0xff] %v4931_v34  ;;  %v1710_v34 = vld [vmem:[#allocation7 + $0x4c0] sm:$0xff] }
 0x10c   :  { %5991 = vst [vmem:[#allocation22_spill] sm:$0xff] %v4933_v29 }
 0x111   :  { %v4935_v45 = vpop.f32.mrf.mxu2  ;;  %v4937_v46 = vpop.f32.mrf.mxu3 }
 0x112   :  { %5992 = vst [vmem:[#allocation23_spill] sm:$0xff] %v4937_v46  ;;  %v4939_v47 = vpop.f32.mrf.mxu0  ;;  %v4941_v48 = vpop.f32.mrf.mxu1 }
 0x113   :  { %5993 = vst [vmem:[#allocation24_spill] sm:$0xff] %v4939_v47  ;;  %v1748_v47 = vld [vmem:[#allocation7 + $0x5f0] sm:$0xff] }
 0x114   :  { %5994 = vst [vmem:[#allocation25_spill] sm:$0xff] %v4941_v48  ;;  %v1716_v48 = vld [vmem:[#allocation7 + $0x4f0] sm:$0xff]  ;;  %1845 = vmatpush.msrb.mxu2 %v1748_v47 }
 0x115   :  { %1819 = vmatpush.msrb.mxu1 %v1716_v48  ;;  %v1712_v48 = vld [vmem:[#allocation7 + $0x4d0] sm:$0xff] }
 0x116   :  { %v1744_v47 = vld [vmem:[#allocation7 + $0x5d0] sm:$0xff] }
 0x117   :  { %1820 = vmatpush.msrb.mxu1 %v1714_v50  ;;  %v1670_v50 = vld [vmem:[#allocation7 + $0x380] sm:$0xff] }
 0x118   :  { %1800 = vmatpush.msrb.mxu0 %v1670_v50  ;;  %v1736_v50 = vld [vmem:[#allocation7 + $0x590] sm:$0xff] }
 0x119   :  { %v4943_v51 = vpop.f32.mrf.mxu2  ;;  %v4945_v56 = vpop.f32.mrf.mxu3  ;;  %1821 = vmatpush.msrb.mxu1 %v1712_v48  ;;  %v1706_v48 = vld [vmem:[#allocation7 + $0x4a0] sm:$0xff] }
 0x11a   :  { %5995 = vst [vmem:[#allocation26_spill] sm:$0xff] %v4943_v51  ;;  %v4947_v59 = vpop.f32.mrf.mxu0  ;;  %v4949_v1 = vpop.f32.mrf.mxu1  ;;  %v1746_v51 = vld [vmem:[#allocation7 + $0x5e0] sm:$0xff]  ;;  %1801 = vmatpush.msrb.mxu0 %v1668_v62  ;;  %v1665_v62 = vld [vmem:[#allocation7 + $0x358] sm:$0xff] }
 0x11b   :  { %5996 = vst [vmem:[#allocation27_spill] sm:$0xff] %v4945_v56  ;;  %v1679_v56 = vld [vmem:[#allocation7 + $0x3c8] sm:$0xff]  ;;  %1846 = vmatpush.msrb.mxu2 %v1746_v51  ;;  %1822 = vmatpush.msrb.mxu1 %v1710_v34  ;;  %v1740_v51 = vld [vmem:[#allocation7 + $0x5b0] sm:$0xff]  ;;  %v1669_v34 = vld [vmem:[#allocation7 + $0x378] sm:$0xff] }
 0x11c   :  { %1874 = vmatpush.msrb.mxu3 %v1679_v56  ;;  %v1675_v56 = vld [vmem:[#allocation7 + $0x3a8] sm:$0xff] }
 0x11d   :  { %1847 = vmatpush.msrb.mxu2 %v1744_v47  ;;  %v1738_v47 = vld [vmem:[#allocation7 + $0x5a0] sm:$0xff] }
 0x11e   :  { %1875 = vmatpush.msrb.mxu3 %v1677_v2  ;;  %v1671_v2 = vld [vmem:[#allocation7 + $0x388] sm:$0xff] }
 0x11f   :  { %1848 = vmatpush.msrb.mxu2 %v1742_v33 }
 0x120   :  { %1876 = vmatpush.msrb.mxu3 %v1675_v56 }
 0x121   :  { %v4951_v46 = vpop.f32.mrf.mxu2  ;;  %v4953_v29 = vpop.f32.mrf.mxu3  ;;  %1849 = vmatpush.msrb.mxu2 %v1740_v51  ;;  %v1667_v51 = vld [vmem:[#allocation7 + $0x368] sm:$0xff] }
 0x122   :  { %v4955_v10 = vpop.f32.mrf.mxu0  ;;  %v4957_v15 = vpop.f32.mrf.mxu1  ;;  %1877 = vmatpush.msrb.mxu3 %v1673_v49  ;;  %v1704_v49 = vld [vmem:[#allocation7 + $0x490] sm:$0xff] }
 0x123   :  { %5997 = vst [vmem:[#allocation28_spill] sm:$0xff] %v4955_v10  ;;  %v1708_v10 = vld [vmem:[#allocation7 + $0x4b0] sm:$0xff]  ;;  %1850 = vmatpush.msrb.mxu2 %v1738_v47 }
 0x124   :  { %5998 = vst [vmem:[#allocation29_spill] sm:$0xff] %v4957_v15  ;;  %1823 = vmatpush.msrb.mxu1 %v1708_v10  ;;  %1878 = vmatpush.msrb.mxu3 %v1671_v2  ;;  %v1666_v10 = vld [vmem:[#allocation7 + $0x360] sm:$0xff]  ;;  %v1664_v2 = vld [vmem:[#allocation7 + $0x350] sm:$0xff] }
 0x125   :  { %1802 = vmatpush.msrb.mxu0 %v1666_v10  ;;  %1851 = vmatpush.msrb.mxu2 %v1736_v50  ;;  %v1732_v47 = vld [vmem:[#allocation7 + $0x570] sm:$0xff]  ;;  %v1730_v50 = vld [vmem:[#allocation7 + $0x560] sm:$0xff] }
 0x126   :  { %1824 = vmatpush.msrb.mxu1 %v1706_v48  ;;  %1879 = vmatpush.msrb.mxu3 %v1669_v34  ;;  %v1662_v48 = vld [vmem:[#allocation7 + $0x340] sm:$0xff]  ;;  %v1663_v34 = vld [vmem:[#allocation7 + $0x348] sm:$0xff]  ;;  %v1660_v10 = vld [vmem:[#allocation7 + $0x330] sm:$0xff] }
 0x127   :  { %1803 = vmatpush.msrb.mxu0 %v1664_v2  ;;  %v1479_v15 = vld [vmem:[#allocation7 + $0xf0] sm:$0xff] }
 0x128   :  { %1825 = vmatpush.msrb.mxu1 %v1704_v49  ;;  %1880 = vmatpush.msrb.mxu3 %v1667_v51  ;;  %v1698_v49 = vld [vmem:[#allocation7 + $0x460] sm:$0xff] }
 0x129   :  { %v4959_v56 = vpop.f32.mrf.mxu2  ;;  %v4961_v32 = vpop.f32.mrf.mxu3  ;;  %1804 = vmatpush.msrb.mxu0 %v1662_v48  ;;  %v1728_v48 = vld [vmem:[#allocation7 + $0x550] sm:$0xff] }
 0x12a   :  { %5999 = vst [vmem:[#allocation30_spill] sm:$0xff] %v4959_v56  ;;  %v4963_v33 = vpop.f32.mrf.mxu0  ;;  %v4965_v57 = vpop.f32.mrf.mxu1  ;;  %v1702_v56 = vld [vmem:[#allocation7 + $0x480] sm:$0xff]  ;;  %1881 = vmatpush.msrb.mxu3 %v1665_v62  ;;  %v1696_v62 = vld [vmem:[#allocation7 + $0x450] sm:$0xff] }
 0x12b   :  { %6000 = vst [vmem:[#allocation31_spill] sm:$0xff] %v4961_v32  ;;  %v1734_v32 = vld [vmem:[#allocation7 + $0x580] sm:$0xff]  ;;  %1826 = vmatpush.msrb.mxu1 %v1702_v56  ;;  %1805 = vmatpush.msrb.mxu0 %v1660_v10  ;;  %v1661_v56 = vld [vmem:[#allocation7 + $0x338] sm:$0xff] }
 0x12c   :  { %6001 = vst [vmem:[#allocation32_spill] sm:$0xff] %v4963_v33  ;;  %1852 = vmatpush.msrb.mxu2 %v1734_v32  ;;  %v1700_v33 = vld [vmem:[#allocation7 + $0x470] sm:$0xff]  ;;  %1882 = vmatpush.msrb.mxu3 %v1663_v34  ;;  %v1657_v10 = vld [vmem:[#allocation7 + $0x318] sm:$0xff] }
 0x12d   :  { %6002 = vst [vmem:[#allocation33_spill] sm:$0xff] %v4965_v57  ;;  %1827 = vmatpush.msrb.mxu1 %v1700_v33  ;;  %v1658_v33 = vld [vmem:[#allocation7 + $0x320] sm:$0xff]  ;;  %v1656_v34 = vld [vmem:[#allocation7 + $0x310] sm:$0xff] }
 0x12e   :  { %1853 = vmatpush.msrb.mxu2 %v1732_v47  ;;  %1883 = vmatpush.msrb.mxu3 %v1661_v56  ;;  %v1659_v47 = vld [vmem:[#allocation7 + $0x328] sm:$0xff] }
 0x12f   :  { %1828 = vmatpush.msrb.mxu1 %v1698_v49  ;;  %1806 = vmatpush.msrb.mxu0 %v1658_v33  ;;  %v1654_v49 = vld [vmem:[#allocation7 + $0x300] sm:$0xff]  ;;  %v1655_v56 = vld [vmem:[#allocation7 + $0x308] sm:$0xff]  ;;  %v1511_v33 = vld [vmem:[#allocation7 + $0x1f0] sm:$0xff] }
 0x130   :  { %1854 = vmatpush.msrb.mxu2 %v1730_v50  ;;  %1884 = vmatpush.msrb.mxu3 %v1659_v47  ;;  %v1724_v50 = vld [vmem:[#allocation7 + $0x530] sm:$0xff] }
 0x131   :  { %v4967_v51 = vpop.f32.mrf.mxu2  ;;  %v4969_v57 = vpop.f32.mrf.mxu3  ;;  %1829 = vmatpush.msrb.mxu1 %v1696_v62  ;;  %1807 = vmatpush.msrb.mxu0 %v1656_v34  ;;  %v1690_v62 = vld [vmem:[#allocation7 + $0x420] sm:$0xff] }
 0x132   :  { %6003 = vst [vmem:[#allocation34_spill] sm:$0xff] %v4967_v51  ;;  %v4971_v32 = vpop.f32.mrf.mxu0  ;;  %v4973_v2 = vpop.f32.mrf.mxu1  ;;  %1855 = vmatpush.msrb.mxu2 %v1728_v48  ;;  %v1694_v51 = vld [vmem:[#allocation7 + $0x440] sm:$0xff]  ;;  %1885 = vmatpush.msrb.mxu3 %v1657_v10 }
 0x133   :  { %6004 = vst [vmem:[#allocation35_spill] sm:$0xff] %v4969_v57  ;;  %v1726_v57 = vld [vmem:[#allocation7 + $0x540] sm:$0xff]  ;;  %1830 = vmatpush.msrb.mxu1 %v1694_v51  ;;  %1808 = vmatpush.msrb.mxu0 %v1654_v49  ;;  %v1720_v49 = vld [vmem:[#allocation7 + $0x510] sm:$0xff] }
 0x134   :  { %6005 = vst [vmem:[#allocation36_spill] sm:$0xff] %v4973_v2  ;;  %1856 = vmatpush.msrb.mxu2 %v1726_v57  ;;  %1886 = vmatpush.msrb.mxu3 %v1655_v56  ;;  %v1722_v48 = vld [vmem:[#allocation7 + $0x520] sm:$0xff]  ;;  %v1715_v57 = vld [vmem:[#allocation7 + $0x4e8] sm:$0xff]  ;;  %v1507_v56 = vld [vmem:[#allocation7 + $0x1d0] sm:$0xff] }
 0x135   :  { %1831 = vmatpush.msrb.mxu1 %v1692_v22  ;;  %1897 = vmatpush.msra.mxu0 %v1717_v31  ;;  %v1509_v51 = vld [vmem:[#allocation7 + $0x1e0] sm:$0xff]  ;;  %v1688_v22 = vld [vmem:[#allocation7 + $0x410] sm:$0xff]  ;;  %v1711_v31 = vld [vmem:[#allocation7 + $0x4c8] sm:$0xff] }
 0x136   :  { %1857 = vmatpush.msrb.mxu2 %v1724_v50  ;;  %1975 = vmatpush.msra.mxu3 %v1511_v33  ;;  %v1713_v50 = vld [vmem:[#allocation7 + $0x4d8] sm:$0xff]  ;;  %v1718_v2 = vld [vmem:[#allocation7 + $0x500] sm:$0xff] }
 0x137   :  { %1832 = vmatpush.msrb.mxu1 %v1690_v62  ;;  %1898 = vmatpush.msra.mxu0 %v1715_v57  ;;  %v1749_v33 = vld [vmem:[#allocation7 + $0x5f8] sm:$0xff]  ;;  %v1477_v57 = vld [vmem:[#allocation7 + $0xe0] sm:$0xff] }
 0x138   :  { %1858 = vmatpush.msrb.mxu2 %v1722_v48  ;;  %1976 = vmatpush.msra.mxu3 %v1509_v51  ;;  %v1709_v62 = vld [vmem:[#allocation7 + $0x4b8] sm:$0xff]  ;;  %v1747_v48 = vld [vmem:[#allocation7 + $0x5e8] sm:$0xff]  ;;  %v1503_v51 = vld [vmem:[#allocation7 + $0x1b0] sm:$0xff] }
 0x139   :  { %v4975_v47 = vpop.f32.mrf.mxu2  ;;  %v4977_v21 = vpop.f32.mrf.mxu3  ;;  %1833 = vmatpush.msrb.mxu1 %v1688_v22  ;;  %1899 = vmatpush.msra.mxu0 %v1713_v50 }
 0x13a   :  { %6006 = vst [vmem:[#allocation37_spill] sm:$0xff] %v4975_v47  ;;  %v4979_v34 = vpop.f32.mrf.mxu0  ;;  %v4981_v10 = vpop.f32.mrf.mxu1  ;;  %1859 = vmatpush.msrb.mxu2 %v1720_v49  ;;  %v1686_v47 = vld [vmem:[#allocation7 + $0x400] sm:$0xff]  ;;  %1977 = vmatpush.msra.mxu3 %v1507_v56 }
 0x13b   :  { %6007 = vst [vmem:[#allocation38_spill] sm:$0xff] %v4981_v10  ;;  %1834 = vmatpush.msrb.mxu1 %v1686_v47  ;;  %v1505_v10 = vld [vmem:[#allocation7 + $0x1c0] sm:$0xff]  ;;  %1900 = vmatpush.msra.mxu0 %v1711_v31  ;;  %v1745_v47 = vld [vmem:[#allocation7 + $0x5d8] sm:$0xff]  ;;  %v1475_v31 = vld [vmem:[#allocation7 + $0xd0] sm:$0xff] }
 0x13c   :  { %1860 = vmatpush.msrb.mxu2 %v1718_v2  ;;  %1978 = vmatpush.msra.mxu3 %v1505_v10  ;;  %v1707_v2 = vld [vmem:[#allocation7 + $0x4a8] sm:$0xff]  ;;  %v1705_v10 = vld [vmem:[#allocation7 + $0x498] sm:$0xff] }
 0x13d   :  { %1923 = vmatpush.msra.mxu1 %v1749_v33  ;;  %1901 = vmatpush.msra.mxu0 %v1709_v62  ;;  %v1743_v33 = vld [vmem:[#allocation7 + $0x5c8] sm:$0xff]  ;;  %v1499_v62 = vld [vmem:[#allocation7 + $0x190] sm:$0xff] }
 0x13e   :  { %1949 = vmatpush.msra.mxu2 %v1479_v15  ;;  %1979 = vmatpush.msra.mxu3 %v1503_v51  ;;  %v1501_v15 = vld [vmem:[#allocation7 + $0x1a0] sm:$0xff] }
 0x13f   :  { %1924 = vmatpush.msra.mxu1 %v1747_v48  ;;  %1902 = vmatpush.msra.mxu0 %v1707_v2  ;;  %v1703_v48 = vld [vmem:[#allocation7 + $0x488] sm:$0xff]  ;;  %v1497_v51 = vld [vmem:[#allocation7 + $0x180] sm:$0xff]  ;;  %v1701_v2 = vld [vmem:[#allocation7 + $0x478] sm:$0xff] }
 0x140   :  { %1950 = vmatpush.msra.mxu2 %v1477_v57  ;;  %1980 = vmatpush.msra.mxu3 %v1501_v15  ;;  %v1471_v57 = vld [vmem:[#allocation7 + $0xb0] sm:$0xff] }
 0x141   :  { %v4983_v22 = vpop.f32.mrf.mxu2  ;;  %v4985_v49 = vpop.f32.mrf.mxu3  ;;  %1925 = vmatpush.msra.mxu1 %v1745_v47  ;;  %1903 = vmatpush.msra.mxu0 %v1705_v10  ;;  %v1739_v47 = vld [vmem:[#allocation7 + $0x5a8] sm:$0xff]  ;;  %v1495_v10 = vld [vmem:[#allocation7 + $0x170] sm:$0xff] }
 0x142   :  { %6008 = vst [vmem:[#allocation39_spill] sm:$0xff] %v4983_v22  ;;  %v4987_v50 = vpop.f32.mrf.mxu0  ;;  %v4989_v56 = vpop.f32.mrf.mxu1  ;;  %1951 = vmatpush.msra.mxu2 %v1475_v31  ;;  %v1473_v22 = vld [vmem:[#allocation7 + $0xc0] sm:$0xff]  ;;  %1981 = vmatpush.msra.mxu3 %v1499_v62  ;;  %v1737_v62 = vld [vmem:[#allocation7 + $0x598] sm:$0xff] }
 0x143   :  { %6009 = vst [vmem:[#allocation40_spill] sm:$0xff] %v4985_v49  ;;  %1926 = vmatpush.msra.mxu1 %v1743_v33  ;;  %1904 = vmatpush.msra.mxu0 %v1703_v48  ;;  %v1469_v31 = vld [vmem:[#allocation7 + $0xa0] sm:$0xff]  ;;  %v1467_v48 = vld [vmem:[#allocation7 + $0x90] sm:$0xff]  ;;  %v1733_v49 = vld [vmem:[#allocation7 + $0x578] sm:$0xff] }
 0x144   :  { %6010 = vst [vmem:[#allocation41_spill] sm:$0xff] %v4987_v50  ;;  %1952 = vmatpush.msra.mxu2 %v1473_v22  ;;  %1982 = vmatpush.msra.mxu3 %v1497_v51  ;;  %v1697_v51 = vld [vmem:[#allocation7 + $0x458] sm:$0xff] }
 0x145   :  { %6011 = vst [vmem:[#allocation42_spill] sm:$0xff] %v4989_v56  ;;  %v1741_v56 = vld [vmem:[#allocation7 + $0x5b8] sm:$0xff]  ;;  %1905 = vmatpush.msra.mxu0 %v1701_v2  ;;  %v1491_v2 = vld [vmem:[#allocation7 + $0x150] sm:$0xff] }
 0x146   :  { %1927 = vmatpush.msra.mxu1 %v1741_v56  ;;  %1953 = vmatpush.msra.mxu2 %v1471_v57  ;;  %v1699_v56 = vld [vmem:[#allocation7 + $0x468] sm:$0xff]  ;;  %v1493_v57 = vld [vmem:[#allocation7 + $0x160] sm:$0xff] }
 0x147   :  { %1983 = vmatpush.msra.mxu3 %v1495_v10  ;;  %1906 = vmatpush.msra.mxu0 %v1699_v56  ;;  %v1489_v10 = vld [vmem:[#allocation7 + $0x140] sm:$0xff]  ;;  %v1693_v56 = vld [vmem:[#allocation7 + $0x438] sm:$0xff] }
 0x148   :  { %1928 = vmatpush.msra.mxu1 %v1739_v47  ;;  %1954 = vmatpush.msra.mxu2 %v1469_v31  ;;  %v1695_v47 = vld [vmem:[#allocation7 + $0x448] sm:$0xff]  ;;  %v1463_v31 = vld [vmem:[#allocation7 + $0x70] sm:$0xff] }
 0x149   :  { %v4991_v15 = vpop.f32.mrf.mxu2  ;;  %v4993_v50 = vpop.f32.mrf.mxu3  ;;  %1984 = vmatpush.msra.mxu3 %v1493_v57  ;;  %1907 = vmatpush.msra.mxu0 %v1697_v51 }
 0x14a   :  { %6012 = vst [vmem:[#allocation43_spill] sm:$0xff] %v4991_v15  ;;  %v4995_v22 = vpop.f32.mrf.mxu0  ;;  %v4997_v33 = vpop.f32.mrf.mxu1  ;;  %1929 = vmatpush.msra.mxu1 %v1737_v62  ;;  %1955 = vmatpush.msra.mxu2 %v1467_v48  ;;  %v1735_v15 = vld [vmem:[#allocation7 + $0x588] sm:$0xff]  ;;  %v1461_v48 = vld [vmem:[#allocation7 + $0x60] sm:$0xff] }
 0x14b   :  { %6013 = vst [vmem:[#allocation44_spill] sm:$0xff] %v4993_v50  ;;  %v1465_v50 = vld [vmem:[#allocation7 + $0x80] sm:$0xff]  ;;  %1985 = vmatpush.msra.mxu3 %v1491_v2  ;;  %1908 = vmatpush.msra.mxu0 %v1695_v47  ;;  %v1731_v62 = vld [vmem:[#allocation7 + $0x568] sm:$0xff]  ;;  %v1729_v2 = vld [vmem:[#allocation7 + $0x558] sm:$0xff] }
 0x14c   :  { %6014 = vst [vmem:[#allocation45_spill] sm:$0xff] %v4995_v22  ;;  %1930 = vmatpush.msra.mxu1 %v1735_v15  ;;  %1956 = vmatpush.msra.mxu2 %v1465_v50  ;;  %v1487_v15 = vld [vmem:[#allocation7 + $0x130] sm:$0xff]  ;;  %v1727_v22 = vld [vmem:[#allocation7 + $0x548] sm:$0xff] }
 0x14d   :  { %6015 = vst [vmem:[#allocation46_spill] sm:$0xff] %v4997_v33  ;;  %1986 = vmatpush.msra.mxu3 %v1489_v10  ;;  %1909 = vmatpush.msra.mxu0 %v1693_v56  ;;  %v1459_v47 = vld [vmem:[#allocation7 + $0x50] sm:$0xff]  ;;  %v1689_v10 = vld [vmem:[#allocation7 + $0x418] sm:$0xff] }
 0x14e   :  { %1931 = vmatpush.msra.mxu1 %v1733_v49  ;;  %1957 = vmatpush.msra.mxu2 %v1463_v31  ;;  %v1691_v49 = vld [vmem:[#allocation7 + $0x428] sm:$0xff]  ;;  %v1485_v31 = vld [vmem:[#allocation7 + $0x120] sm:$0xff]  ;;  %v1483_v56 = vld [vmem:[#allocation7 + $0x110] sm:$0xff] }
 0x14f   :  { %1987 = vmatpush.msra.mxu3 %v1487_v15  ;;  %1910 = vmatpush.msra.mxu0 %v1691_v49  ;;  %v1481_v15 = vld [vmem:[#allocation7 + $0x100] sm:$0xff]  ;;  %v1723_v49 = vld [vmem:[#allocation7 + $0x528] sm:$0xff] }
 0x150   :  { %1932 = vmatpush.msra.mxu1 %v1731_v62  ;;  %1958 = vmatpush.msra.mxu2 %v1461_v48  ;;  %v1687_v62 = vld [vmem:[#allocation7 + $0x408] sm:$0xff]  ;;  %v1455_v48 = vld [vmem:[#allocation7 + $0x30] sm:$0xff] }
 0x151   :  { %v4999_v57 = vpop.f32.mrf.mxu2  ;;  %v5001_v33 = vpop.f32.mrf.mxu3  ;;  %1988 = vmatpush.msra.mxu3 %v1485_v31  ;;  %1911 = vmatpush.msra.mxu0 %v1689_v10  ;;  %v1721_v10 = vld [vmem:[#allocation7 + $0x518] sm:$0xff] }
 0x152   :  { %6016 = vst [vmem:[#allocation47_spill] sm:$0xff] %v5001_v33  ;;  %v5003_v50 = vpop.f32.mrf.mxu0  ;;  %v5005_v51 = vpop.f32.mrf.mxu1  ;;  %1933 = vmatpush.msra.mxu1 %v1729_v2  ;;  %1959 = vmatpush.msra.mxu2 %v1459_v47  ;;  %v1457_v33 = vld [vmem:[#allocation7 + $0x40] sm:$0xff]  ;;  %v4508_v47 = vmov 0.0  }
 0x153   :  { %6017 = vst [vmem:[#allocation48_spill] sm:$0xff] %v5003_v50  ;;  %1989 = vmatpush.msra.mxu3 %v1483_v56  ;;  %1912 = vmatpush.msra.mxu0 %v1687_v62  ;;  %v1453_v2 = vld [vmem:[#allocation7 + $0x20] sm:$0xff]  ;;  %v588_v56 = vadd.f32 %v4885_v28, %v4836_v0  ;;  %v296_v62 = vadd.f32 %v4784_v18, %v4742_v38 }
 0x154   :  { %6018 = vst [vmem:[#allocation49_spill] sm:$0xff] %v5005_v51  ;;  %1934 = vmatpush.msra.mxu1 %v1727_v22  ;;  %1960 = vmatpush.msra.mxu2 %v1457_v33  ;;  %v1725_v51 = vld [vmem:[#allocation7 + $0x538] sm:$0xff]  ;;  %v439_v0 = vadd.f32 %v4796_v37, %v4754_v60  ;;  %v325_v18 = vadd.f32 %v4802_v42, %v4766_v7 }
 0x155   :  { %1990 = vmatpush.msra.mxu3 %v1481_v15  ;;  %1437 = vst [vmem:[#allocation2 + $0x48] sm:$0xff] %v4508_v47  ;;  %v1449_v15 = vld [vmem:[#allocation7] sm:$0xff]  ;;  %v440_v38 = vadd.f32 %v4798_v39, %v296_v62  ;;  %v5038_v28 = vadd.f32 %v4816_v55, %v4770_v11  ;;  %v5043_v60 = vadd.f32 %v4818_v58, %v4780_v14  ;;  %v1402_v37 = vld [vmem:[#allocation5] sm:$0x7] }
 0x156   :  { %1935 = vmatpush.msra.mxu1 %v1725_v51  ;;  %1961 = vmatpush.msra.mxu2 %v1455_v48  ;;  %1438 = vst [vmem:[#allocation2 + $0x10] sm:$0xff] %v4508_v47  ;;  %v1451_v51 = vld [vmem:[#allocation7 + $0x10] sm:$0xff]  ;;  %v1719_v48 = vld [vmem:[#allocation7 + $0x508] sm:$0xff]  ;;  %v614_v7 = vadd.f32 %v4887_v23, %v4848_v3  ;;  %v5053_v11 = vadd.f32 %v4830_v43, %v4782_v17  ;;  %v5069_v23 = vperm.slane %v1402_v37, 0 }
 0x157   :  { %1439 = vst [vmem:[#allocation2 + $0x40] sm:$0xff] %v4508_v47  ;;  %v322_v47 = vadd.f32 %v4786_v20, %v4752_v54  ;;  %v640_v20 = vadd.f32 %v4896_v6, %v4850_v4  ;;  %v1224_v14 = vadd.f32 %v4999_v57, %v4977_v21  ;;  %v932_v17 = vadd.f32 %v4951_v46, %v4929_v41  ;;  %v6029_v62 = vld [vmem:[#allocation22_spill] sm:$0xff] }
 0x158   :  { %1936 = vmatpush.msra.mxu1 %v1723_v49  ;;  %1962 = vmatpush.msra.mxu2 %v1453_v2  ;;  %v299_v49 = vadd.f32 %v4800_v44, %v4756_v61  ;;  %v906_v2 = vadd.f32 %v4949_v1, %v4927_v40  ;;  %v442_v61 = vadd.f32 %v4812_v52, %v4768_v9  ;;  %v6021_v40 = vld [vmem:[#allocation36_spill] sm:$0xff] }
 0x159   :  { %v5007_v31 = vpop.f32.mrf.mxu2  ;;  %v5009_v50 = vpop.f32.mrf.mxu3  ;;  %v591_v9 = vadd.f32 %v4900_v25, %v4854_v8  ;;  %v441_v39 = vadd.f32 %v4834_v63, %v322_v47  ;;  %v749_v58 = vadd.f32 %v4923_v35, %v614_v7  ;;  %v750_v3 = vadd.f32 %v4925_v36, %v640_v20  ;;  %v6020_v35 = vld [vmem:[#allocation29_spill] sm:$0xff]  ;;  %v6032_v47 = vld [vmem:[#allocation46_spill] sm:$0xff] }
 0x15a   :  { %v5011_v22 = vpop.f32.mrf.mxu0  ;;  %v5013_v33 = vpop.f32.mrf.mxu1  ;;  %1937 = vmatpush.msra.mxu1 %v1721_v10  ;;  %1963 = vmatpush.msra.mxu2 %v1451_v51  ;;  %v5034_v44 = vadd.f32 %v4814_v53, %v299_v49  ;;  %v1066_v54 = vadd.f32 %v4971_v32, %v906_v2  ;;  %v958_v63 = vadd.f32 %v4953_v29, %v4947_v59  ;;  %v6022_v29 = vld [vmem:[#allocation37_spill] sm:$0xff]  ;;  %v6024_v32 = vld [vmem:[#allocation18_spill] sm:$0xff]  ;;  %v6027_v10 = vld [vmem:[#allocation20_spill] sm:$0xff] }
 0x15b   :  { %6019 = vst [vmem:[#allocation50_spill] sm:$0xff] %v5011_v22  ;;  %v748_v22 = vadd.f32 %v4898_v24, %v588_v56  ;;  %v751_v55 = vadd.f32 %v4913_v27, %v591_v9  ;;  %v5072_v6 = vadd.f32 %v4852_v5, %v325_v18  ;;  %v617_v24 = vadd.f32 %v4902_v26, %v4866_v12  ;;  %v6023_v5 = vld [vmem:[#allocation16_spill] sm:$0xff]  ;;  %v6026_v12 = vld [vmem:[#allocation19_spill] sm:$0xff] }
 0x15c   :  { %1938 = vmatpush.msra.mxu1 %v1719_v48  ;;  %1964 = vmatpush.msra.mxu2 %v1449_v15  ;;  %v643_v25 = vadd.f32 %v4911_v19, %v4868_v13  ;;  %v594_v27 = vadd.f32 %v4915_v30, %v4872_v16  ;;  %v909_v36 = vadd.f32 %v6020_v35, %v4935_v45  ;;  %v6028_v45 = vld [vmem:[#allocation21_spill] sm:$0xff]  ;;  %v6031_v49 = vld [vmem:[#allocation47_spill] sm:$0xff] }
 0x15d   :  { %v757_v42 = vmax.f32 %v439_v0, %v748_v22  ;;  %v1067_v41 = vadd.f32 %v6021_v40, %v932_v17  ;;  %v1068_v46 = vadd.f32 %v6022_v29, %v958_v63  ;;  %v760_v1 = vmax.f32 %v442_v61, %v751_v55  ;;  %v6025_v22 = vld [vmem:[#allocation17_spill] sm:$0xff]  ;;  %v6035_v17 = vld [vmem:[#allocation30_spill] sm:$0xff] }
 0x15e   :  { %v620_v57 = vadd.f32 %v6024_v32, %v6023_v5  ;;  %v646_v26 = vadd.f32 %v6026_v12, %v6025_v22  ;;  %v754_v13 = vadd.f32 %v6027_v10, %v594_v27  ;;  %v758_v19 = vmax.f32 %v440_v38, %v749_v58  ;;  %v6030_v15 = vld [vmem:[#allocation45_spill] sm:$0xff]  ;;  %v6042_v5 = vld [vmem:[#allocation39_spill] sm:$0xff] }
 0x15f   :  { %v1075_v8 = vmax.f32 %v757_v42, %v1066_v54  ;;  %v759_v51 = vmax.f32 %v441_v39, %v750_v3  ;;  %v1069_v16 = vadd.f32 %v4979_v34, %v909_v36  ;;  %v752_v56 = vadd.f32 %v6028_v45, %v617_v24  ;;  %v6033_v54 = vld [vmem:[#allocation40_spill] sm:$0xff]  ;;  %v6034_v3 = vld [vmem:[#allocation23_spill] sm:$0xff]  ;;  %v6038_v36 = vld [vmem:[#allocation26_spill] sm:$0xff] }
 0x160   :  { %v753_v48 = vadd.f32 %v6029_v62, %v643_v25  ;;  %v1250_v2 = vadd.f32 %v6031_v49, %v6030_v15  ;;  %v1076_v18 = vmax.f32 %v758_v19, %v1067_v41  ;;  %v1227_v7 = vadd.f32 %v5007_v31, %v6033_v54  ;;  %v6037_v24 = vld [vmem:[#allocation31_spill] sm:$0xff]  ;;  %v6039_v40 = vld [vmem:[#allocation33_spill] sm:$0xff]  ;;  %v6040_v41 = vld [vmem:[#allocation38_spill] sm:$0xff] }
 0x161   :  { %v5058_v52 = vpop.f32.mrf.mxu2  ;;  %v5060_v53 = vpop.f32.mrf.mxu3  ;;  %v1077_v61 = vmax.f32 %v759_v51, %v1068_v46  ;;  %v5100_v39 = vperm.slane %v1402_v37, 1  ;;  %v763_v58 = vmax.f32 %v5053_v11, %v754_v13  ;;  %v912_v11 = vadd.f32 %v6039_v40, %v6038_v36  ;;  %v6043_v12 = vld [vmem:[#allocation25_spill] sm:$0xff]  ;;  %v6044_v13 = vld [vmem:[#allocation27_spill] sm:$0xff]  ;;  %v6045_v19 = vld [vmem:[#allocation34_spill] sm:$0xff] }
 0x162   :  { %v1275_v43 = vpop.f32.mrf.mxu0  ;;  %v1323_v4 = vpop.f32.mrf.mxu1  ;;  %v756_v10 = vadd.f32 %v6043_v12, %v646_v26  ;;  %v938_v51 = vadd.f32 %v6045_v19, %v6044_v13  ;;  %v6047_v45 = vld [vmem:[#allocation48_spill] sm:$0xff] }
 0x163   :  { %v1384_v21 = vadd.f32 %v1323_v4, %v1224_v14  ;;  %v1276_v0 = vadd.f32 %v1275_v43, %v6032_v47  ;;  %v5102_v14 = vperm.slane %v1402_v37, 2  ;;  %v935_v43 = vadd.f32 %v6035_v17, %v6034_v3  ;;  %v6049_v49 = vld [vmem:[#allocation32_spill] sm:$0xff] }
 0x164   :  { %v1078_v4 = vmax.f32 %v760_v1, %v1069_v16  ;;  %v762_v37 = vmax.f32 %v5072_v6, %v753_v48  ;;  %v6046_v6 = vld [vmem:[#allocation41_spill] sm:$0xff]  ;;  %v1539_v19 = vld [vmem:[#allocation7 + $0x2d0] sm:$0xff] }
 0x165   :  { %v1393_v59 = vmax.f32 %v1075_v8, %v1384_v21  ;;  %v761_v8 = vmax.f32 %v5034_v44, %v752_v56  ;;  %v6036_v21 = vld [vmem:[#allocation28_spill] sm:$0xff]  ;;  %v1070_v29 = vadd.f32 %v6040_v41, %v935_v43  ;;  %v1072_v16 = vadd.f32 %v6046_v6, %v912_v11  ;;  %v6048_v48 = vld [vmem:[#allocation49_spill] sm:$0xff] }
 0x166   :  { %v961_v25 = vadd.f32 %v6037_v24, %v6036_v21  ;;  %v1253_v56 = vadd.f32 %v5009_v50, %v6047_v45  ;;  %v1543_v24 = vld [vmem:[#allocation7 + $0x2f0] sm:$0xff] }
 0x167   :  { %v1410_v30 = vadd.f32 %v5069_v23, %v1393_v59  ;;  %v6041_v59 = vld [vmem:[#allocation24_spill] sm:$0xff]  ;;  %v1079_v26 = vmax.f32 %v761_v8, %v1070_v29  ;;  %v1542_v29 = vld [vmem:[#allocation7 + $0x2e8] sm:$0xff] }
 0x168   :  { %v755_v1 = vadd.f32 %v6041_v59, %v620_v57  ;;  %v1071_v32 = vadd.f32 %v6042_v5, %v961_v25  ;;  %v1544_v25 = vld [vmem:[#allocation7 + $0x2f8] sm:$0xff] }
 0x169   :  { %v5098_v38 = vmax.f32 %v1410_v30, 0.0  ;;  %v1349_v20 = vpop.f32.mrf.mxu2  ;;  %v1375_v34 = vpop.f32.mrf.mxu3 }
 0x16a   :  { %v1385_v9 = vadd.f32 %v1349_v20, %v1250_v2  ;;  %v1386_v42 = vadd.f32 %v1375_v34, %v1276_v0  ;;  %v1326_v55 = vpop.f32.mrf.mxu1  ;;  %v1278_v31 = vpop.f32.mrf.mxu0  ;;  %v6050_v2 = vld [vmem:[#allocation35_spill] sm:$0xff]  ;;  %v6051_v0 = vld [vmem:[#allocation44_spill] sm:$0xff]  ;;  %v1080_v20 = vmax.f32 %v762_v37, %v1071_v32  ;;  %v6056_v32 = vld [vmem:[#allocation50_spill] sm:$0xff] }
 0x16b   :  { %1428 = vst [vmem:[#allocation2 + $0x30] sm:$0xff] %v5098_v38  ;;  %v1387_v63 = vadd.f32 %v1326_v55, %v1227_v7  ;;  %v1279_v15 = vadd.f32 %v1278_v31, %v6048_v48  ;;  %v964_v47 = vadd.f32 %v6050_v2, %v6049_v49  ;;  %v1081_v55 = vmax.f32 %v763_v58, %v1072_v16  ;;  %v6053_v31 = vld [vmem:[#allocation15_spill] sm:$0xff] }
 0x16c   :  { %v1394_v27 = vmax.f32 %v1076_v18, %v1385_v9  ;;  %v1395_v35 = vmax.f32 %v1077_v61, %v1386_v42  ;;  %v1230_v18 = vadd.f32 %v5058_v52, %v6051_v0  ;;  %v6052_v52 = vld [vmem:[#allocation14_spill] sm:$0xff] }
 0x16d   :  { %v1396_v46 = vmax.f32 %v1078_v4, %v1387_v63  ;;  %v446_v4 = vadd.f32 %v6052_v52, %v5038_v28  ;;  %v447_v63 = vadd.f32 %v6053_v31, %v5043_v60  ;;  %v1541_v60 = vld [vmem:[#allocation7 + $0x2e0] sm:$0xff]  ;;  %v1536_v52 = vld [vmem:[#allocation7 + $0x2b8] sm:$0xff] }
 0x16e   :  { %v1411_v22 = vadd.f32 %v5100_v39, %v1394_v27  ;;  %v1412_v44 = vadd.f32 %v5102_v14, %v1395_v35  ;;  %v6054_v27 = vld [vmem:[#allocation42_spill] sm:$0xff]  ;;  %v6055_v35 = vld [vmem:[#allocation43_spill] sm:$0xff] }
 0x16f   :  { %v1413_v30 = vadd.f32 %v5069_v23, %v1396_v46  ;;  %v1073_v58 = vadd.f32 %v6054_v27, %v938_v51  ;;  %v1074_v37 = vadd.f32 %v6055_v35, %v964_v47  ;;  %v764_v46 = vmax.f32 %v446_v4, %v755_v1  ;;  %v1540_v51 = vld [vmem:[#allocation7 + $0x2d8] sm:$0xff] }
 0x170   :  { %v5126_v62 = vmax.f32 %v1411_v22, 0.0  ;;  %v5128_v57 = vmax.f32 %v1412_v44, 0.0  ;;  %v765_v59 = vmax.f32 %v447_v63, %v756_v10  ;;  %v1256_v22 = vadd.f32 %v5060_v53, %v6056_v32  ;;  %v1480_v47 = vld [vmem:[#allocation7 + $0xf8] sm:$0xff]  ;;  %v1534_v63 = vld [vmem:[#allocation7 + $0x2a8] sm:$0xff] }
 0x171   :  { %v5135_v61 = vmax.f32 %v1413_v30, 0.0  ;;  %v1352_v54 = vpop.f32.mrf.mxu2  ;;  %v1378_v7 = vpop.f32.mrf.mxu3  ;;  %v1082_v6 = vmax.f32 %v764_v46, %v1073_v58  ;;  %v1506_v58 = vld [vmem:[#allocation7 + $0x1c8] sm:$0xff]  ;;  %v1532_v35 = vld [vmem:[#allocation7 + $0x298] sm:$0xff]  ;;  %v1527_v46 = vld [vmem:[#allocation7 + $0x270] sm:$0xff] }
 0x172   :  { %1429 = vst [vmem:[#allocation2] sm:$0xff] %v5126_v62  ;;  %v1388_v50 = vadd.f32 %v1352_v54, %v1253_v56  ;;  %v1389_v34 = vadd.f32 %v1378_v7, %v1279_v15  ;;  %v1329_v9 = vpop.f32.mrf.mxu1  ;;  %v1641_v42 = vld [vmem:[#allocation2 + $0x30] sm:$0xfe]  ;;  %v1281_v36 = vpop.f32.mrf.mxu0  ;;  %v1083_v16 = vmax.f32 %v765_v59, %v1074_v37  ;;  %v1512_v7 = vld [vmem:[#allocation7 + $0x1f8] sm:$0xff] }
 0x173   :  { %1430 = vst [vmem:[#allocation2 + $0x58] sm:$0xff] %v5128_v57  ;;  %v1390_v3 = vadd.f32 %v1329_v9, %v1230_v18  ;;  %v1763_v17 = vrot.slane %v1641_v42, 1  ;;  %v1764_v43 = vrot.slane %v5135_v61, 1  ;;  %v1282_v13 = vadd.f32 %v1281_v36, %v5013_v33  ;;  %v1537_v33 = vld [vmem:[#allocation7 + $0x2c0] sm:$0xff]  ;;  %v1470_v59 = vld [vmem:[#allocation7 + $0xa8] sm:$0xff] }
 0x174   :  { %1431 = vst [vmem:[#allocation2 + $0x18] sm:$0xff] %v5135_v61  ;;  %v1397_v8 = vmax.f32 %v1079_v26, %v1388_v50  ;;  %v1398_v21 = vmax.f32 %v1080_v20, %v1389_v34  ;;  %v1538_v20 = vld [vmem:[#allocation7 + $0x2c8] sm:$0xff] }
 0x175   :  { %v1399_v40 = vmax.f32 %v1081_v55, %v1390_v3  ;;  %v5148_v11 = vsel %vm1762_vm1, %v1763_v17, %v1764_v43  ;;  %v1535_v55 = vld [vmem:[#allocation7 + $0x2b0] sm:$0xff]  ;;  %v1478_v3 = vld [vmem:[#allocation7 + $0xe8] sm:$0xff] }
 0x176   :  { %v1414_v28 = vadd.f32 %v5100_v39, %v1397_v8  ;;  %v1415_v41 = vadd.f32 %v5102_v14, %v1398_v21  ;;  %1809 = vmatmul.f32.vlgmr.msrb.gmra.mxu0 %v5148_v11  ;;  %1887 = vmatmul.f32.vlgmr.msrb.gmra.mxu3 %v5148_v11  ;;  %v1510_v17 = vld [vmem:[#allocation7 + $0x1e8] sm:$0xff]  ;;  %v1650_v8 = vld [vmem:[#allocation2 + $0x48] sm:$0x1]  ;;  %v1531_v21 = vld [vmem:[#allocation7 + $0x290] sm:$0xff] }
 0x177   :  { %v1416_v5 = vadd.f32 %v5069_v23, %v1399_v40  ;;  %2001 = vmatpush.msrb.mxu0 %v1543_v24  ;;  %2079 = vmatpush.msrb.mxu3 %v1544_v25  ;;  %v1474_v24 = vld [vmem:[#allocation7 + $0xc8] sm:$0xff]  ;;  %v1529_v40 = vld [vmem:[#allocation7 + $0x280] sm:$0xff] }
 0x178   :  { %v5157_v44 = vmax.f32 %v1414_v28, 0.0  ;;  %v5159_v12 = vmax.f32 %v1415_v41, 0.0  ;;  %v1472_v28 = vld [vmem:[#allocation7 + $0xb8] sm:$0xff]  ;;  %v1778_v41 = vrot.slane %v1650_v8, 1 }
 0x179   :  { %v5162_v30 = vmax.f32 %v1416_v5, 0.0  ;;  %v1355_v1 = vpop.f32.mrf.mxu2  ;;  %v1381_v10 = vpop.f32.mrf.mxu3  ;;  %2002 = vmatpush.msrb.mxu0 %v1541_v60  ;;  %2080 = vmatpush.msrb.mxu3 %v1542_v29  ;;  %v1642_v23 = vld [vmem:[#allocation2] sm:$0xfe]  ;;  %v1530_v29 = vld [vmem:[#allocation7 + $0x288] sm:$0xff] }
 0x17a   :  { %1432 = vst [vmem:[#allocation2 + $0x50] sm:$0xff] %v5157_v44  ;;  %v1391_v53 = vadd.f32 %v1355_v1, %v1256_v22  ;;  %v1392_v45 = vadd.f32 %v1381_v10, %v1282_v13  ;;  %v1766_v56 = vrot.slane %v1642_v23, 1  ;;  %v1767_v48 = vrot.slane %v5157_v44, 1  ;;  %v1643_v15 = vld [vmem:[#allocation2 + $0x58] sm:$0xfe]  ;;  %v1502_v22 = vld [vmem:[#allocation7 + $0x1a8] sm:$0xff] }
 0x17b   :  { %1433 = vst [vmem:[#allocation2 + $0x20] sm:$0xff] %v5159_v12  ;;  %2003 = vmatpush.msrb.mxu0 %v1539_v19  ;;  %2081 = vmatpush.msrb.mxu3 %v1540_v51  ;;  %v1769_v49 = vrot.slane %v1643_v15, 1  ;;  %v1770_v2 = vrot.slane %v5159_v12, 1  ;;  %v1772_v26 = vrot.slane %v5162_v30, 1  ;;  %v1504_v60 = vld [vmem:[#allocation7 + $0x1b8] sm:$0xff]  ;;  %v1525_v51 = vld [vmem:[#allocation7 + $0x260] sm:$0xff] }
 0x17c   :  { %1434 = vst [vmem:[#allocation2 + $0x8] sm:$0xff] %v5162_v30  ;;  %v1400_v0 = vmax.f32 %v1082_v6, %v1391_v53  ;;  %v1401_v18 = vmax.f32 %v1083_v16, %v1392_v45  ;;  %v5171_v54 = vsel %vm1762_vm1, %v1766_v56, %v1767_v48  ;;  %v1651_v5 = vld [vmem:[#allocation2 + $0x10] sm:$0x1]  ;;  %v1528_v13 = vld [vmem:[#allocation7 + $0x278] sm:$0xff]  ;;  %v1523_v10 = vld [vmem:[#allocation7 + $0x250] sm:$0xff] }
 0x17d   :  { %1835 = vmatmul.f32.vlgmr.msrb.gmra.mxu1 %v5171_v54  ;;  %v5175_v50 = vsel %vm1762_vm1, %v1769_v49, %v1770_v2  ;;  %2004 = vmatpush.msrb.mxu0 %v1537_v33  ;;  %v5180_v34 = vsel %vm1762_vm1, %v1764_v43, %v1772_v26  ;;  %v1476_v43 = vld [vmem:[#allocation7 + $0xd8] sm:$0xff]  ;;  %v5206_v32 = vsel %vm1762_vm1, %v1772_v26, %v1778_v41  ;;  %v1526_v1 = vld [vmem:[#allocation7 + $0x268] sm:$0xff]  ;;  %v1780_v53 = vrot.slane %v1651_v5, 1  ;;  %v1521_v15 = vld [vmem:[#allocation7 + $0x240] sm:$0xff] }
 0x17e   :  { %v1417_v9 = vadd.f32 %v5100_v39, %v1400_v0  ;;  %v1418_v42 = vadd.f32 %v5102_v14, %v1401_v18  ;;  %1861 = vmatmul.f32.vlgmr.msrb.gmra.mxu2 %v5175_v50  ;;  %2027 = vmatpush.msrb.mxu1 %v1480_v47  ;;  %v1533_v39 = vld [vmem:[#allocation7 + $0x2a0] sm:$0xff]  ;;  %v1508_v14 = vld [vmem:[#allocation7 + $0x1d8] sm:$0xff]  ;;  %v1466_v23 = vld [vmem:[#allocation7 + $0x88] sm:$0xff] }
 0x17f   :  { %2053 = vmatpush.msrb.mxu2 %v1512_v7  ;;  %2082 = vmatpush.msrb.mxu3 %v1538_v20  ;;  %v1652_v19 = vld [vmem:[#allocation2 + $0x40] sm:$0x1]  ;;  %v1498_v56 = vld [vmem:[#allocation7 + $0x188] sm:$0xff]  ;;  %v1519_v0 = vld [vmem:[#allocation7 + $0x230] sm:$0xff] }
 0x180   :  { %v5185_v4 = vmax.f32 %v1417_v9, 0.0  ;;  %v5187_v31 = vmax.f32 %v1418_v42, 0.0  ;;  %1812 = vmatmul.f32.gmra.mxu0 %v5180_v34  ;;  %1890 = vmatmul.f32.gmra.mxu3 %v5180_v34  ;;  %v1468_v6 = vld [vmem:[#allocation7 + $0x98] sm:$0xff]  ;;  %v1782_v45 = vrot.slane %v1652_v19, 1  ;;  %v1522_v26 = vld [vmem:[#allocation7 + $0x248] sm:$0xff]  ;;  %v1517_v9 = vld [vmem:[#allocation7 + $0x220] sm:$0xff] }
 0x181   :  { %2005 = vmatpush.msrb.mxu0 %v1535_v55  ;;  %2028 = vmatpush.msrb.mxu1 %v1478_v3  ;;  %v1500_v16 = vld [vmem:[#allocation7 + $0x198] sm:$0xff]  ;;  %v1462_v18 = vld [vmem:[#allocation7 + $0x68] sm:$0xff]  ;;  %v2130_v5 = vld [vmem:[#allocation8 + $0x3c0] sm:$0xff] }
 0x182   :  { %1435 = vst [vmem:[#allocation2 + $0x38] sm:$0xff] %v5185_v4  ;;  %2054 = vmatpush.msrb.mxu2 %v1510_v17  ;;  %2083 = vmatpush.msrb.mxu3 %v1536_v52  ;;  %v1774_v25 = vrot.slane %v5185_v4, 1  ;;  %v1776_v27 = vrot.slane %v5187_v31, 1  ;;  %v1464_v33 = vld [vmem:[#allocation7 + $0x78] sm:$0xff]  ;;  %v1494_v7 = vld [vmem:[#allocation7 + $0x168] sm:$0xff]  ;;  %v1515_v17 = vld [vmem:[#allocation7 + $0x210] sm:$0xff] }
 0x183   :  { %1436 = vst [vmem:[#allocation2 + $0x28] sm:$0xff] %v5187_v31  ;;  %2006 = vmatpush.msrb.mxu0 %v1533_v39  ;;  %2029 = vmatpush.msrb.mxu1 %v1476_v43  ;;  %v1496_v47 = vld [vmem:[#allocation7 + $0x178] sm:$0xff]  ;;  %v1518_v3 = vld [vmem:[#allocation7 + $0x228] sm:$0xff] }
 0x184   :  { %2055 = vmatpush.msrb.mxu2 %v1508_v14  ;;  %2084 = vmatpush.msrb.mxu3 %v1534_v63  ;;  %v5196_v37 = vsel %vm1762_vm1, %v1767_v48, %v1774_v25  ;;  %v5199_v36 = vsel %vm1762_vm1, %v1770_v2, %v1776_v27  ;;  %v1524_v48 = vld [vmem:[#allocation7 + $0x258] sm:$0xff]  ;;  %v5211_v49 = vsel %vm1762_vm1, %v1774_v25, %v1780_v53  ;;  %v1458_v52 = vld [vmem:[#allocation7 + $0x48] sm:$0xff]  ;;  %v1513_v14 = vld [vmem:[#allocation7 + $0x200] sm:$0xff] }
 0x185   :  { %2007 = vmatpush.msrb.mxu0 %v1531_v21  ;;  %2030 = vmatpush.msrb.mxu1 %v1474_v24  ;;  %v5214_v2 = vsel %vm1762_vm1, %v1776_v27, %v1782_v45  ;;  %v1520_v20 = vld [vmem:[#allocation7 + $0x238] sm:$0xff]  ;;  %v1490_v39 = vld [vmem:[#allocation7 + $0x148] sm:$0xff]  ;;  %v2136_v24 = vld [vmem:[#allocation8 + $0x3f0] sm:$0xff] }
 0x186   :  { %2056 = vmatpush.msrb.mxu2 %v1506_v58  ;;  %2085 = vmatpush.msrb.mxu3 %v1532_v35  ;;  %v1460_v42 = vld [vmem:[#allocation7 + $0x58] sm:$0xff]  ;;  %v1514_v21 = vld [vmem:[#allocation7 + $0x208] sm:$0xff]  ;;  %v2134_v35 = vld [vmem:[#allocation8 + $0x3e0] sm:$0xff] }
 0x187   :  { %1838 = vmatmul.f32.gmra.mxu1 %v5196_v37  ;;  %1864 = vmatmul.f32.gmra.mxu2 %v5199_v36  ;;  %v1492_v55 = vld [vmem:[#allocation7 + $0x158] sm:$0xff]  ;;  %v1454_v27 = vld [vmem:[#allocation7 + $0x28] sm:$0xff]  ;;  %v2196_v53 = vld [vmem:[#allocation8 + $0x5d0] sm:$0xff] }
 0x188   :  { %2008 = vmatpush.msrb.mxu0 %v1529_v40  ;;  %2031 = vmatpush.msrb.mxu1 %v1472_v28  ;;  %v1516_v43 = vld [vmem:[#allocation7 + $0x218] sm:$0xff]  ;;  %v1486_v58 = vld [vmem:[#allocation7 + $0x128] sm:$0xff] }
 0x189   :  { %2057 = vmatpush.msrb.mxu2 %v1504_v60  ;;  %2086 = vmatpush.msrb.mxu3 %v1530_v29  ;;  %v1456_v63 = vld [vmem:[#allocation7 + $0x38] sm:$0xff]  ;;  %v2135_v40 = vld [vmem:[#allocation8 + $0x3e8] sm:$0xff]  ;;  %v2132_v60 = vld [vmem:[#allocation8 + $0x3d0] sm:$0xff] }
 0x18a   :  { %1815 = vmatmul.f32.gmra.mxu0 %v5206_v32  ;;  %1893 = vmatmul.f32.gmra.mxu3 %v5206_v32  ;;  %v1488_v8 = vld [vmem:[#allocation7 + $0x138] sm:$0xff]  ;;  %v2131_v19 = vld [vmem:[#allocation8 + $0x3c8] sm:$0xff] }
 0x18b   :  { %2009 = vmatpush.msrb.mxu0 %v1527_v46  ;;  %2032 = vmatpush.msrb.mxu1 %v1470_v59  ;;  %v2137_v25 = vld [vmem:[#allocation8 + $0x3f8] sm:$0xff]  ;;  %v1450_v46 = vld [vmem:[#allocation7 + $0x8] sm:$0xff] }
 0x18c   :  { %2058 = vmatpush.msrb.mxu2 %v1502_v22  ;;  %2087 = vmatpush.msrb.mxu3 %v1528_v13  ;;  %v1452_v28 = vld [vmem:[#allocation7 + $0x18] sm:$0xff]  ;;  %v1482_v59 = vld [vmem:[#allocation7 + $0x108] sm:$0xff]  ;;  %v2168_v22 = vld [vmem:[#allocation8 + $0x4f0] sm:$0xff] }
 0x18d   :  { %2010 = vmatpush.msrb.mxu0 %v1525_v51  ;;  %2033 = vmatpush.msrb.mxu1 %v1468_v6  ;;  %v1484_v41 = vld [vmem:[#allocation7 + $0x118] sm:$0xff]  ;;  %v2200_v13 = vld [vmem:[#allocation8 + $0x5f0] sm:$0xff]  ;;  %v2166_v6 = vld [vmem:[#allocation8 + $0x4e0] sm:$0xff] }
 0x18e   :  { %2059 = vmatpush.msrb.mxu2 %v1500_v16  ;;  %2088 = vmatpush.msrb.mxu3 %v1526_v1  ;;  %v2133_v29 = vld [vmem:[#allocation8 + $0x3d8] sm:$0xff]  ;;  %v2128_v51 = vld [vmem:[#allocation8 + $0x3b0] sm:$0xff]  ;;  %v2198_v16 = vld [vmem:[#allocation8 + $0x5e0] sm:$0xff] }
 0x18f   :  { %2011 = vmatpush.msrb.mxu0 %v1523_v10  ;;  %2034 = vmatpush.msrb.mxu1 %v1466_v23  ;;  %v2129_v1 = vld [vmem:[#allocation8 + $0x3b8] sm:$0xff]  ;;  %v2126_v10 = vld [vmem:[#allocation8 + $0x3a0] sm:$0xff]  ;;  %v2164_v23 = vld [vmem:[#allocation8 + $0x4d0] sm:$0xff] }
 0x190   :  { %2060 = vmatpush.msrb.mxu2 %v1498_v56  ;;  %2089 = vmatpush.msrb.mxu3 %v1524_v48  ;;  %v2127_v45 = vld [vmem:[#allocation8 + $0x3a8] sm:$0xff]  ;;  %v2124_v56 = vld [vmem:[#allocation8 + $0x390] sm:$0xff]  ;;  %v2162_v48 = vld [vmem:[#allocation8 + $0x4c0] sm:$0xff] }
 0x191   :  { %1841 = vmatmul.f32.gmra.mxu1 %v5211_v49  ;;  %1867 = vmatmul.f32.gmra.mxu2 %v5214_v2 }
 0x192   :  { %2012 = vmatpush.msrb.mxu0 %v1521_v15  ;;  %2035 = vmatpush.msrb.mxu1 %v1464_v33  ;;  %v2194_v15 = vld [vmem:[#allocation8 + $0x5c0] sm:$0xff]  ;;  %v2125_v33 = vld [vmem:[#allocation8 + $0x398] sm:$0xff] }
 0x193   :  { %2061 = vmatpush.msrb.mxu2 %v1496_v47  ;;  %2090 = vmatpush.msrb.mxu3 %v1522_v26  ;;  %v2122_v47 = vld [vmem:[#allocation8 + $0x380] sm:$0xff]  ;;  %v2160_v26 = vld [vmem:[#allocation8 + $0x4b0] sm:$0xff] }
 0x194   :  { %1913 = vmatmul.f32.vlgmr.msra.gmra.mxu0 %v5171_v54  ;;  %1991 = vmatmul.f32.vlgmr.msra.gmra.mxu3 %v5126_v62 }
 0x195   :  { %2013 = vmatpush.msrb.mxu0 %v1519_v0  ;;  %2036 = vmatpush.msrb.mxu1 %v1462_v18  ;;  %v2192_v0 = vld [vmem:[#allocation8 + $0x5b0] sm:$0xff]  ;;  %v2123_v18 = vld [vmem:[#allocation8 + $0x388] sm:$0xff] }
 0x196   :  { %2062 = vmatpush.msrb.mxu2 %v1494_v7  ;;  %2091 = vmatpush.msrb.mxu3 %v1520_v20  ;;  %v2120_v7 = vld [vmem:[#allocation8 + $0x370] sm:$0xff]  ;;  %v2158_v20 = vld [vmem:[#allocation8 + $0x4a0] sm:$0xff] }
 0x197   :  { %2014 = vmatpush.msrb.mxu0 %v1517_v9  ;;  %2037 = vmatpush.msrb.mxu1 %v1460_v42  ;;  %v2190_v9 = vld [vmem:[#allocation8 + $0x5a0] sm:$0xff]  ;;  %v2121_v42 = vld [vmem:[#allocation8 + $0x378] sm:$0xff] }
 0x198   :  { %2063 = vmatpush.msrb.mxu2 %v1492_v55  ;;  %2092 = vmatpush.msrb.mxu3 %v1518_v3  ;;  %v2118_v55 = vld [vmem:[#allocation8 + $0x360] sm:$0xff]  ;;  %v2156_v3 = vld [vmem:[#allocation8 + $0x490] sm:$0xff] }
 0x199   :  { %2015 = vmatpush.msrb.mxu0 %v1515_v17  ;;  %2038 = vmatpush.msrb.mxu1 %v1458_v52  ;;  %v2188_v17 = vld [vmem:[#allocation8 + $0x590] sm:$0xff]  ;;  %v2119_v52 = vld [vmem:[#allocation8 + $0x368] sm:$0xff] }
 0x19a   :  { %2064 = vmatpush.msrb.mxu2 %v1490_v39  ;;  %2093 = vmatpush.msrb.mxu3 %v1516_v43  ;;  %v2116_v39 = vld [vmem:[#allocation8 + $0x350] sm:$0xff]  ;;  %v2154_v43 = vld [vmem:[#allocation8 + $0x480] sm:$0xff] }
 0x19b   :  { %1939 = vmatmul.f32.vlgmr.msra.gmra.mxu1 %v5175_v50  ;;  %1965 = vmatmul.f32.vlgmr.msra.gmra.mxu2 %v5098_v38 }
 0x19c   :  { %2016 = vmatpush.msrb.mxu0 %v1513_v14  ;;  %2039 = vmatpush.msrb.mxu1 %v1456_v63  ;;  %v2186_v14 = vld [vmem:[#allocation8 + $0x580] sm:$0xff]  ;;  %v2117_v63 = vld [vmem:[#allocation8 + $0x358] sm:$0xff] }
 0x19d   :  { %2065 = vmatpush.msrb.mxu2 %v1488_v8  ;;  %2094 = vmatpush.msrb.mxu3 %v1514_v21  ;;  %v2114_v8 = vld [vmem:[#allocation8 + $0x340] sm:$0xff]  ;;  %v2152_v21 = vld [vmem:[#allocation8 + $0x470] sm:$0xff] }
 0x19e   :  { %2202 = vmatpush.msra.mxu0 %v2136_v24  ;;  %1994 = vmatmul.f32.gmra.mxu3 %v5157_v44  ;;  %v2184_v24 = vld [vmem:[#allocation8 + $0x570] sm:$0xff] }
 0x19f   :  { %2280 = vmatpush.msra.mxu3 %v2137_v25  ;;  %1916 = vmatmul.f32.gmra.mxu0 %v5196_v37  ;;  %v2115_v25 = vld [vmem:[#allocation8 + $0x348] sm:$0xff] }
 0x1a0   :  { %2040 = vmatpush.msrb.mxu1 %v1454_v27  ;;  %2066 = vmatpush.msrb.mxu2 %v1486_v58  ;;  %v2112_v27 = vld [vmem:[#allocation8 + $0x330] sm:$0xff]  ;;  %v2182_v58 = vld [vmem:[#allocation8 + $0x560] sm:$0xff] }
 0x1a1   :  { %2203 = vmatpush.msra.mxu0 %v2134_v35  ;;  %2281 = vmatpush.msra.mxu3 %v2135_v40  ;;  %v2113_v35 = vld [vmem:[#allocation8 + $0x338] sm:$0xff]  ;;  %v2110_v40 = vld [vmem:[#allocation8 + $0x320] sm:$0xff] }
 0x1a2   :  { %2041 = vmatpush.msrb.mxu1 %v1452_v28  ;;  %2067 = vmatpush.msrb.mxu2 %v1484_v41  ;;  %v2148_v28 = vld [vmem:[#allocation8 + $0x450] sm:$0xff] }
 0x1a3   :  { %2204 = vmatpush.msra.mxu0 %v2132_v60  ;;  %2282 = vmatpush.msra.mxu3 %v2133_v29  ;;  %v2180_v41 = vld [vmem:[#allocation8 + $0x550] sm:$0xff]  ;;  %v2111_v60 = vld [vmem:[#allocation8 + $0x328] sm:$0xff] }
 0x1a4   :  { %2042 = vmatpush.msrb.mxu1 %v1450_v46  ;;  %2068 = vmatpush.msrb.mxu2 %v1482_v59  ;;  %v2108_v29 = vld [vmem:[#allocation8 + $0x310] sm:$0xff]  ;;  %v2146_v46 = vld [vmem:[#allocation8 + $0x440] sm:$0xff] }
 0x1a5   :  { %2205 = vmatpush.msra.mxu0 %v2130_v5  ;;  %2283 = vmatpush.msra.mxu3 %v2131_v19  ;;  %v2178_v59 = vld [vmem:[#allocation8 + $0x540] sm:$0xff]  ;;  %v2144_v5 = vld [vmem:[#allocation8 + $0x430] sm:$0xff]  ;;  %v2169_v19 = vld [vmem:[#allocation8 + $0x4f8] sm:$0xff] }
 0x1a6   :  { %2228 = vmatpush.msra.mxu1 %v2168_v22  ;;  %2254 = vmatpush.msra.mxu2 %v2200_v13  ;;  %v2176_v22 = vld [vmem:[#allocation8 + $0x530] sm:$0xff]  ;;  %v2107_v13 = vld [vmem:[#allocation8 + $0x308] sm:$0xff] }
 0x1a7   :  { %1942 = vmatmul.f32.gmra.mxu1 %v5199_v36  ;;  %1968 = vmatmul.f32.gmra.mxu2 %v5135_v61 }
 0x1a8   :  { %2206 = vmatpush.msra.mxu0 %v2128_v51  ;;  %2229 = vmatpush.msra.mxu1 %v2166_v6  ;;  %v2142_v51 = vld [vmem:[#allocation8 + $0x420] sm:$0xff] }
 0x1a9   :  { %2255 = vmatpush.msra.mxu2 %v2198_v16  ;;  %2284 = vmatpush.msra.mxu3 %v2129_v1  ;;  %v2174_v6 = vld [vmem:[#allocation8 + $0x520] sm:$0xff]  ;;  %v2167_v16 = vld [vmem:[#allocation8 + $0x4e8] sm:$0xff] }
 0x1aa   :  { %1919 = vmatmul.f32.gmra.mxu0 %v5211_v49  ;;  %1997 = vmatmul.f32.gmra.mxu3 %v5185_v4  ;;  %v1605_v1 = vld [vmem:[#allocation8 + $0x1e0] sm:$0xff] }
 0x1ab   :  { %2207 = vmatpush.msra.mxu0 %v2126_v10  ;;  %2230 = vmatpush.msra.mxu1 %v2164_v23  ;;  %v2140_v10 = vld [vmem:[#allocation8 + $0x410] sm:$0xff] }
 0x1ac   :  { %2256 = vmatpush.msra.mxu2 %v2196_v53  ;;  %2285 = vmatpush.msra.mxu3 %v2127_v45  ;;  %v2172_v23 = vld [vmem:[#allocation8 + $0x510] sm:$0xff]  ;;  %v2165_v53 = vld [vmem:[#allocation8 + $0x4d8] sm:$0xff] }
 0x1ad   :  { %2208 = vmatpush.msra.mxu0 %v2124_v56  ;;  %2231 = vmatpush.msra.mxu1 %v2162_v48  ;;  %v1603_v45 = vld [vmem:[#allocation8 + $0x1d0] sm:$0xff]  ;;  %v2138_v56 = vld [vmem:[#allocation8 + $0x400] sm:$0xff]  ;;  %v2163_v48 = vld [vmem:[#allocation8 + $0x4c8] sm:$0xff] }
 0x1ae   :  { %2257 = vmatpush.msra.mxu2 %v2194_v15  ;;  %2286 = vmatpush.msra.mxu3 %v2125_v33  ;;  %v2201_v15 = vld [vmem:[#allocation8 + $0x5f8] sm:$0xff]  ;;  %v1575_v33 = vld [vmem:[#allocation8 + $0xf0] sm:$0xff] }
 0x1af   :  { %2209 = vmatpush.msra.mxu0 %v2122_v47  ;;  %2232 = vmatpush.msra.mxu1 %v2160_v26  ;;  %v1601_v47 = vld [vmem:[#allocation8 + $0x1c0] sm:$0xff]  ;;  %v2161_v26 = vld [vmem:[#allocation8 + $0x4b8] sm:$0xff] }
 0x1b0   :  { %2258 = vmatpush.msra.mxu2 %v2192_v0  ;;  %2287 = vmatpush.msra.mxu3 %v2123_v18  ;;  %v1573_v0 = vld [vmem:[#allocation8 + $0xe0] sm:$0xff]  ;;  %v1599_v18 = vld [vmem:[#allocation8 + $0x1b0] sm:$0xff] }
 0x1b1   :  { %1945 = vmatmul.f32.gmra.mxu1 %v5214_v2  ;;  %1971 = vmatmul.f32.gmra.mxu2 %v5162_v30 }
 0x1b2   :  { %2210 = vmatpush.msra.mxu0 %v2120_v7  ;;  %2233 = vmatpush.msra.mxu1 %v2158_v20  ;;  %v2159_v7 = vld [vmem:[#allocation8 + $0x4a8] sm:$0xff]  ;;  %v2197_v20 = vld [vmem:[#allocation8 + $0x5d8] sm:$0xff] }
 0x1b3   :  { %2259 = vmatpush.msra.mxu2 %v2190_v9  ;;  %2288 = vmatpush.msra.mxu3 %v2121_v42  ;;  %v1571_v9 = vld [vmem:[#allocation8 + $0xd0] sm:$0xff]  ;;  %v1597_v42 = vld [vmem:[#allocation8 + $0x1a0] sm:$0xff] }
 0x1b4   :  { %2017 = vmatmul.f32.vlgmr.msrb.gmra.mxu0 %v5128_v57  ;;  %2095 = vmatmul.f32.vlgmr.msrb.gmra.mxu3 %v5128_v57  ;;  %v2150_v57 = vld [vmem:[#allocation8 + $0x460] sm:$0xff] }
 0x1b5   :  { %2211 = vmatpush.msra.mxu0 %v2118_v55  ;;  %2234 = vmatpush.msra.mxu1 %v2156_v3  ;;  %v2157_v55 = vld [vmem:[#allocation8 + $0x498] sm:$0xff]  ;;  %v2195_v3 = vld [vmem:[#allocation8 + $0x5c8] sm:$0xff] }
 0x1b6   :  { %2260 = vmatpush.msra.mxu2 %v2188_v17  ;;  %2289 = vmatpush.msra.mxu3 %v2119_v52  ;;  %v1569_v17 = vld [vmem:[#allocation8 + $0xc0] sm:$0xff]  ;;  %v2155_v52 = vld [vmem:[#allocation8 + $0x488] sm:$0xff] }
 0x1b7   :  { %2212 = vmatpush.msra.mxu0 %v2116_v39  ;;  %2235 = vmatpush.msra.mxu1 %v2154_v43  ;;  %v2193_v39 = vld [vmem:[#allocation8 + $0x5b8] sm:$0xff]  ;;  %v1567_v43 = vld [vmem:[#allocation8 + $0xb0] sm:$0xff] }
 0x1b8   :  { %2261 = vmatpush.msra.mxu2 %v2186_v14  ;;  %2290 = vmatpush.msra.mxu3 %v2117_v63  ;;  %v1593_v14 = vld [vmem:[#allocation8 + $0x180] sm:$0xff]  ;;  %v2153_v63 = vld [vmem:[#allocation8 + $0x478] sm:$0xff] }
 0x1b9   :  { %2213 = vmatpush.msra.mxu0 %v2114_v8  ;;  %2236 = vmatpush.msra.mxu1 %v2152_v21  ;;  %v1565_v8 = vld [vmem:[#allocation8 + $0xa0] sm:$0xff]  ;;  %v1591_v21 = vld [vmem:[#allocation8 + $0x170] sm:$0xff] }
 0x1ba   :  { %2262 = vmatpush.msra.mxu2 %v2184_v24  ;;  %2291 = vmatpush.msra.mxu3 %v2115_v25  ;;  %v2151_v24 = vld [vmem:[#allocation8 + $0x468] sm:$0xff]  ;;  %v2189_v25 = vld [vmem:[#allocation8 + $0x598] sm:$0xff] }
 0x1bb   :  { %2043 = vmatmul.f32.vlgmr.msrb.gmra.mxu1 %v5098_v38  ;;  %2069 = vmatmul.f32.vlgmr.msrb.gmra.mxu2 %v5126_v62  ;;  %v2109_v38 = vld [vmem:[#allocation8 + $0x318] sm:$0xff]  ;;  %v2106_v62 = vld [vmem:[#allocation8 + $0x300] sm:$0xff] }
 0x1bc   :  { %2214 = vmatpush.msra.mxu0 %v2112_v27  ;;  %2237 = vmatpush.msra.mxu1 %v2150_v57  ;;  %v1563_v27 = vld [vmem:[#allocation8 + $0x90] sm:$0xff]  ;;  %v1589_v57 = vld [vmem:[#allocation8 + $0x160] sm:$0xff] }
 0x1bd   :  { %2263 = vmatpush.msra.mxu2 %v2182_v58  ;;  %2292 = vmatpush.msra.mxu3 %v2113_v35  ;;  %v2149_v58 = vld [vmem:[#allocation8 + $0x458] sm:$0xff]  ;;  %v2187_v35 = vld [vmem:[#allocation8 + $0x588] sm:$0xff] }
 0x1be   :  { %2020 = vmatmul.f32.gmra.mxu0 %v5159_v12  ;;  %2098 = vmatmul.f32.gmra.mxu3 %v5159_v12  ;;  %v1607_v12 = vld [vmem:[#allocation8 + $0x1f0] sm:$0xff] }
 0x1bf   :  { %2215 = vmatpush.msra.mxu0 %v2110_v40  ;;  %2238 = vmatpush.msra.mxu1 %v2148_v28  ;;  %v1561_v40 = vld [vmem:[#allocation8 + $0x80] sm:$0xff]  ;;  %v1587_v28 = vld [vmem:[#allocation8 + $0x150] sm:$0xff] }
 0x1c0   :  { %2264 = vmatpush.msra.mxu2 %v2180_v41  ;;  %2293 = vmatpush.msra.mxu3 %v2111_v60  ;;  %v2147_v41 = vld [vmem:[#allocation8 + $0x448] sm:$0xff]  ;;  %v2185_v60 = vld [vmem:[#allocation8 + $0x578] sm:$0xff] }
 0x1c1   :  { %2216 = vmatpush.msra.mxu0 %v2108_v29  ;;  %2239 = vmatpush.msra.mxu1 %v2146_v46  ;;  %v1559_v29 = vld [vmem:[#allocation8 + $0x70] sm:$0xff]  ;;  %v1585_v46 = vld [vmem:[#allocation8 + $0x140] sm:$0xff] }
 0x1c2   :  { %2265 = vmatpush.msra.mxu2 %v2178_v59  ;;  %2294 = vmatpush.msra.mxu3 %v2109_v38  ;;  %v2145_v59 = vld [vmem:[#allocation8 + $0x438] sm:$0xff]  ;;  %v1557_v38 = vld [vmem:[#allocation8 + $0x60] sm:$0xff] }
 0x1c3   :  { %2217 = vmatpush.msra.mxu0 %v2106_v62  ;;  %2240 = vmatpush.msra.mxu1 %v2144_v5  ;;  %v1583_v62 = vld [vmem:[#allocation8 + $0x130] sm:$0xff]  ;;  %v2143_v5 = vld [vmem:[#allocation8 + $0x428] sm:$0xff] }
 0x1c4   :  { %2266 = vmatpush.msra.mxu2 %v2176_v22  ;;  %2295 = vmatpush.msra.mxu3 %v2107_v13  ;;  %v2181_v22 = vld [vmem:[#allocation8 + $0x558] sm:$0xff]  ;;  %v1555_v13 = vld [vmem:[#allocation8 + $0x50] sm:$0xff] }
 0x1c5   :  { %2046 = vmatmul.f32.gmra.mxu1 %v5135_v61  ;;  %2072 = vmatmul.f32.gmra.mxu2 %v5157_v44  ;;  %v2170_v61 = vld [vmem:[#allocation8 + $0x500] sm:$0xff] }
 0x1c6   :  { %2306 = vmatpush.msrb.mxu0 %v2169_v19  ;;  %2384 = vmatpush.msrb.mxu3 %v1607_v12  ;;  %v1581_v19 = vld [vmem:[#allocation8 + $0x120] sm:$0xff]  ;;  %v2141_v12 = vld [vmem:[#allocation8 + $0x418] sm:$0xff] }
 0x1c7   :  { %2241 = vmatpush.msra.mxu1 %v2142_v51  ;;  %2267 = vmatpush.msra.mxu2 %v2174_v6  ;;  %v2179_v51 = vld [vmem:[#allocation8 + $0x548] sm:$0xff]  ;;  %v1553_v6 = vld [vmem:[#allocation8 + $0x40] sm:$0xff] }
 0x1c8   :  { %2023 = vmatmul.f32.gmra.mxu0 %v5187_v31  ;;  %2101 = vmatmul.f32.gmra.mxu3 %v5187_v31  ;;  %v2199_v31 = vld [vmem:[#allocation8 + $0x5e8] sm:$0xff] }
 0x1c9   :  { %2307 = vmatpush.msrb.mxu0 %v2167_v16  ;;  %2385 = vmatpush.msrb.mxu3 %v1605_v1  ;;  %v1579_v16 = vld [vmem:[#allocation8 + $0x110] sm:$0xff]  ;;  %v2139_v1 = vld [vmem:[#allocation8 + $0x408] sm:$0xff] }
 0x1ca   :  { %2242 = vmatpush.msra.mxu1 %v2140_v10  ;;  %2268 = vmatpush.msra.mxu2 %v2172_v23  ;;  %v2177_v10 = vld [vmem:[#allocation8 + $0x538] sm:$0xff]  ;;  %v1551_v23 = vld [vmem:[#allocation8 + $0x30] sm:$0xff] }
 0x1cb   :  { %2308 = vmatpush.msrb.mxu0 %v2165_v53  ;;  %2386 = vmatpush.msrb.mxu3 %v1603_v45  ;;  %v1577_v53 = vld [vmem:[#allocation8 + $0x100] sm:$0xff]  ;;  %v1639_v45 = vld [vmem:[#allocation8 + $0x2f0] sm:$0xff] }
 0x1cc   :  { %2243 = vmatpush.msra.mxu1 %v2138_v56  ;;  %2269 = vmatpush.msra.mxu2 %v2170_v61  ;;  %v1640_v56 = vld [vmem:[#allocation8 + $0x2f8] sm:$0xff]  ;;  %v1549_v61 = vld [vmem:[#allocation8 + $0x20] sm:$0xff] }
 0x1cd   :  { %2309 = vmatpush.msrb.mxu0 %v2163_v48  ;;  %2387 = vmatpush.msrb.mxu3 %v1601_v47  ;;  %v1637_v48 = vld [vmem:[#allocation8 + $0x2e0] sm:$0xff]  ;;  %v1547_v47 = vld [vmem:[#allocation8 + $0x10] sm:$0xff] }
 0x1ce   :  { %2332 = vmatpush.msrb.mxu1 %v2201_v15  ;;  %2358 = vmatpush.msrb.mxu2 %v1575_v33  ;;  %v1638_v15 = vld [vmem:[#allocation8 + $0x2e8] sm:$0xff]  ;;  %v2173_v33 = vld [vmem:[#allocation8 + $0x518] sm:$0xff] }
 0x1cf   :  { %2049 = vmatmul.f32.gmra.mxu1 %v5162_v30  ;;  %2075 = vmatmul.f32.gmra.mxu2 %v5185_v4  ;;  %v1595_v30 = vld [vmem:[#allocation8 + $0x190] sm:$0xff] }
 0x1d0   :  { %2310 = vmatpush.msrb.mxu0 %v2161_v26  ;;  %2333 = vmatpush.msrb.mxu1 %v2199_v31  ;;  %v1635_v26 = vld [vmem:[#allocation8 + $0x2d0] sm:$0xff]  ;;  %v1636_v31 = vld [vmem:[#allocation8 + $0x2d8] sm:$0xff] }
 0x1d1   :  { %2359 = vmatpush.msrb.mxu2 %v1573_v0  ;;  %2388 = vmatpush.msrb.mxu3 %v1599_v18  ;;  %v2171_v0 = vld [vmem:[#allocation8 + $0x508] sm:$0xff]  ;;  %v1545_v18 = vld [vmem:[#allocation8] sm:$0xff] }
 0x1d2   :  { %2218 = vmatmul.f32.vlgmr.msra.gmra.mxu0 %v5148_v11  ;;  %2296 = vmatmul.f32.vlgmr.msra.gmra.mxu3 %v5148_v11  ;;  %v2191_v11 = vld [vmem:[#allocation8 + $0x5a8] sm:$0xff] }
 0x1d3   :  { %2311 = vmatpush.msrb.mxu0 %v2159_v7  ;;  %2334 = vmatpush.msrb.mxu1 %v2197_v20  ;;  %v5255_v7 = vld [vmem:[#allocation2] sm:$0xff] }
 0x1d4   :  { %2360 = vmatpush.msrb.mxu2 %v1571_v9  ;;  %2389 = vmatpush.msrb.mxu3 %v1597_v42  ;;  %v1633_v20 = vld [vmem:[#allocation8 + $0x2c0] sm:$0xff]  ;;  %v1576_v9 = vld [vmem:[#allocation8 + $0xf8] sm:$0xff] }
 0x1d5   :  { %2312 = vmatpush.msrb.mxu0 %v2157_v55  ;;  %2335 = vmatpush.msrb.mxu1 %v2195_v3  ;;  %v1608_v42 = vld [vmem:[#allocation8 + $0x1f8] sm:$0xff]  ;;  %v1634_v55 = vld [vmem:[#allocation8 + $0x2c8] sm:$0xff]  ;;  %v1631_v3 = vld [vmem:[#allocation8 + $0x2b0] sm:$0xff] }
 0x1d6   :  { %2361 = vmatpush.msrb.mxu2 %v1569_v17  ;;  %2390 = vmatpush.msrb.mxu3 %v1595_v30  ;;  %v1574_v17 = vld [vmem:[#allocation8 + $0xe8] sm:$0xff]  ;;  %v1632_v30 = vld [vmem:[#allocation8 + $0x2b8] sm:$0xff] }
 0x1d7   :  { %2313 = vmatpush.msrb.mxu0 %v2155_v52  ;;  %2336 = vmatpush.msrb.mxu1 %v2193_v39  ;;  %v1629_v52 = vld [vmem:[#allocation8 + $0x2a0] sm:$0xff]  ;;  %v1572_v39 = vld [vmem:[#allocation8 + $0xd8] sm:$0xff] }
 0x1d8   :  { %2362 = vmatpush.msrb.mxu2 %v1567_v43  ;;  %2391 = vmatpush.msrb.mxu3 %v1593_v14  ;;  %v1604_v43 = vld [vmem:[#allocation8 + $0x1d8] sm:$0xff]  ;;  %v1630_v14 = vld [vmem:[#allocation8 + $0x2a8] sm:$0xff] }
 0x1d9   :  { %2244 = vmatmul.f32.vlgmr.msra.gmra.mxu1 %v5171_v54  ;;  %2270 = vmatmul.f32.vlgmr.msra.gmra.mxu2 %v5175_v50 }
 0x1da   :  { %2314 = vmatpush.msrb.mxu0 %v2153_v63  ;;  %2337 = vmatpush.msrb.mxu1 %v2191_v11  ;;  %v5259_v63 = vld [vmem:[#allocation2 + $0x30] sm:$0xff] }
 0x1db   :  { %2363 = vmatpush.msrb.mxu2 %v1565_v8  ;;  %2392 = vmatpush.msrb.mxu3 %v1591_v21  ;;  %v1627_v11 = vld [vmem:[#allocation8 + $0x290] sm:$0xff]  ;;  %v1570_v8 = vld [vmem:[#allocation8 + $0xc8] sm:$0xff] }
 0x1dc   :  { %2221 = vmatmul.f32.gmra.mxu0 %v5180_v34  ;;  %2299 = vmatmul.f32.gmra.mxu3 %v5180_v34  ;;  %v2183_v34 = vld [vmem:[#allocation8 + $0x568] sm:$0xff] }
 0x1dd   :  { %2315 = vmatpush.msrb.mxu0 %v2151_v24  ;;  %2338 = vmatpush.msrb.mxu1 %v2189_v25  ;;  %v1602_v21 = vld [vmem:[#allocation8 + $0x1c8] sm:$0xff]  ;;  %v1628_v24 = vld [vmem:[#allocation8 + $0x298] sm:$0xff]  ;;  %v1625_v25 = vld [vmem:[#allocation8 + $0x280] sm:$0xff] }
 0x1de   :  { %2364 = vmatpush.msrb.mxu2 %v1563_v27  ;;  %2393 = vmatpush.msrb.mxu3 %v1589_v57  ;;  %v1568_v27 = vld [vmem:[#allocation8 + $0xb8] sm:$0xff]  ;;  %v1626_v57 = vld [vmem:[#allocation8 + $0x288] sm:$0xff] }
 0x1df   :  { %2316 = vmatpush.msrb.mxu0 %v2149_v58  ;;  %2339 = vmatpush.msrb.mxu1 %v2187_v35  ;;  %v1623_v58 = vld [vmem:[#allocation8 + $0x270] sm:$0xff]  ;;  %v1566_v35 = vld [vmem:[#allocation8 + $0xa8] sm:$0xff] }
 0x1e0   :  { %2365 = vmatpush.msrb.mxu2 %v1561_v40  ;;  %2394 = vmatpush.msrb.mxu3 %v1587_v28  ;;  %v1598_v40 = vld [vmem:[#allocation8 + $0x1a8] sm:$0xff]  ;;  %v1624_v28 = vld [vmem:[#allocation8 + $0x278] sm:$0xff] }
 0x1e1   :  { %2317 = vmatpush.msrb.mxu0 %v2147_v41  ;;  %2340 = vmatpush.msrb.mxu1 %v2185_v60  ;;  %v1596_v41 = vld [vmem:[#allocation8 + $0x198] sm:$0xff]  ;;  %v1622_v60 = vld [vmem:[#allocation8 + $0x268] sm:$0xff] }
 0x1e2   :  { %2366 = vmatpush.msrb.mxu2 %v1559_v29  ;;  %2395 = vmatpush.msrb.mxu3 %v1585_v46  ;;  %v5265_v29 = vld [vmem:[#allocation2 + $0x18] sm:$0xff] }
 0x1e3   :  { %2247 = vmatmul.f32.gmra.mxu1 %v5196_v37  ;;  %2273 = vmatmul.f32.gmra.mxu2 %v5199_v36  ;;  %v1619_v46 = vld [vmem:[#allocation8 + $0x250] sm:$0xff] }
 0x1e4   :  { %2318 = vmatpush.msrb.mxu0 %v2145_v59  ;;  %2341 = vmatpush.msrb.mxu1 %v2183_v34  ;;  %v1562_v59 = vld [vmem:[#allocation8 + $0x88] sm:$0xff] }
 0x1e5   :  { %2367 = vmatpush.msrb.mxu2 %v1557_v38  ;;  %2396 = vmatpush.msrb.mxu3 %v1583_v62  ;;  %v1594_v34 = vld [vmem:[#allocation8 + $0x188] sm:$0xff]  ;;  %v1620_v38 = vld [vmem:[#allocation8 + $0x258] sm:$0xff]  ;;  %v1617_v62 = vld [vmem:[#allocation8 + $0x240] sm:$0xff] }
 0x1e6   :  { %2224 = vmatmul.f32.gmra.mxu0 %v5206_v32  ;;  %2302 = vmatmul.f32.gmra.mxu3 %v5206_v32  ;;  %v2175_v32 = vld [vmem:[#allocation8 + $0x528] sm:$0xff] }
 0x1e7   :  { %2319 = vmatpush.msrb.mxu0 %v2143_v5  ;;  %2342 = vmatpush.msrb.mxu1 %v2181_v22  ;;  %v1560_v5 = vld [vmem:[#allocation8 + $0x78] sm:$0xff]  ;;  %v1618_v22 = vld [vmem:[#allocation8 + $0x248] sm:$0xff] }
 0x1e8   :  { %2368 = vmatpush.msrb.mxu2 %v1555_v13  ;;  %2397 = vmatpush.msrb.mxu3 %v1581_v19  ;;  %v1615_v13 = vld [vmem:[#allocation8 + $0x230] sm:$0xff]  ;;  %v1558_v19 = vld [vmem:[#allocation8 + $0x68] sm:$0xff] }
 0x1e9   :  { %2320 = vmatpush.msrb.mxu0 %v2141_v12  ;;  %2343 = vmatpush.msrb.mxu1 %v2179_v51  ;;  %v1590_v12 = vld [vmem:[#allocation8 + $0x168] sm:$0xff]  ;;  %v1616_v51 = vld [vmem:[#allocation8 + $0x238] sm:$0xff] }
 0x1ea   :  { %2369 = vmatpush.msrb.mxu2 %v1553_v6  ;;  %2398 = vmatpush.msrb.mxu3 %v1579_v16  ;;  %v1588_v6 = vld [vmem:[#allocation8 + $0x158] sm:$0xff]  ;;  %v1614_v16 = vld [vmem:[#allocation8 + $0x228] sm:$0xff] }
 0x1eb   :  { %2321 = vmatpush.msrb.mxu0 %v2139_v1  ;;  %2344 = vmatpush.msrb.mxu1 %v2177_v10  ;;  %v5271_v1 = vld [vmem:[#allocation2 + $0x8] sm:$0xff]  ;;  %v1611_v10 = vld [vmem:[#allocation8 + $0x210] sm:$0xff] }
 0x1ec   :  { %2370 = vmatpush.msrb.mxu2 %v1551_v23  ;;  %2399 = vmatpush.msrb.mxu3 %v1577_v53  ;;  %v1554_v23 = vld [vmem:[#allocation8 + $0x48] sm:$0xff] }
 0x1ed   :  { %2410 = vmatpush.msra.mxu0 %v1639_v45  ;;  %2250 = vmatmul.f32.gmra.mxu1 %v5211_v49  ;;  %v1586_v53 = vld [vmem:[#allocation8 + $0x148] sm:$0xff]  ;;  %v1612_v45 = vld [vmem:[#allocation8 + $0x218] sm:$0xff] }
 0x1ee   :  { %2488 = vmatpush.msra.mxu3 %v1640_v56  ;;  %2276 = vmatmul.f32.gmra.mxu2 %v5214_v2  ;;  %v1609_v56 = vld [vmem:[#allocation8 + $0x200] sm:$0xff] }
 0x1ef   :  { %2345 = vmatpush.msrb.mxu1 %v2175_v32  ;;  %2371 = vmatpush.msrb.mxu2 %v1549_v61  ;;  %v1552_v32 = vld [vmem:[#allocation8 + $0x38] sm:$0xff] }
 0x1f0   :  { %2411 = vmatpush.msra.mxu0 %v1637_v48  ;;  %2489 = vmatpush.msra.mxu3 %v1638_v15  ;;  %v1584_v61 = vld [vmem:[#allocation8 + $0x138] sm:$0xff]  ;;  %v1610_v48 = vld [vmem:[#allocation8 + $0x208] sm:$0xff] }
 0x1f1   :  { %2322 = vmatmul.f32.vlgmr.msrb.gmra.mxu0 %v5171_v54  ;;  %2346 = vmatpush.msrb.mxu1 %v2173_v33  ;;  %v1606_v54 = vld [vmem:[#allocation8 + $0x1e8] sm:$0xff]  ;;  %v2552_v15 = vld [vmem:[#allocation7 + $0x6f8] sm:$0xff] }
 0x1f2   :  { %2372 = vmatpush.msrb.mxu2 %v1547_v47  ;;  %2400 = vmatmul.f32.vlgmr.msrb.gmra.mxu3 %v5255_v7  ;;  %v1550_v33 = vld [vmem:[#allocation8 + $0x28] sm:$0xff] }
 0x1f3   :  { %2412 = vmatpush.msra.mxu0 %v1635_v26  ;;  %2490 = vmatpush.msra.mxu3 %v1636_v31  ;;  %v1582_v47 = vld [vmem:[#allocation8 + $0x128] sm:$0xff]  ;;  %v4362_v26 = vld [vmem:[#allocation2 + $0x58] sm:$0xff]  ;;  %v5274_v31 = vpop.f32.mrf.mxu0 }
 0x1f4   :  { %2347 = vmatpush.msrb.mxu1 %v2171_v0  ;;  %2373 = vmatpush.msrb.mxu2 %v1545_v18  ;;  %6057 = vst [vmem:[#allocation29_spill] sm:$0xff] %v5274_v31  ;;  %v2549_v0 = vld [vmem:[#allocation7 + $0x6e0] sm:$0xff]  ;;  %v2550_v18 = vld [vmem:[#allocation7 + $0x6e8] sm:$0xff] }
 0x1f5   :  { %2413 = vmatpush.msra.mxu0 %v1633_v20  ;;  %2491 = vmatpush.msra.mxu3 %v1634_v55  ;;  %v1548_v20 = vld [vmem:[#allocation8 + $0x18] sm:$0xff] }
 0x1f6   :  { %2436 = vmatpush.msra.mxu1 %v1576_v9  ;;  %2462 = vmatpush.msra.mxu2 %v1608_v42  ;;  %v1580_v9 = vld [vmem:[#allocation8 + $0x118] sm:$0xff]  ;;  %v2547_v42 = vld [vmem:[#allocation7 + $0x6d0] sm:$0xff] }
 0x1f7   :  { %2414 = vmatpush.msra.mxu0 %v1631_v3  ;;  %2492 = vmatpush.msra.mxu3 %v1632_v30  ;;  %v2548_v55 = vld [vmem:[#allocation7 + $0x6d8] sm:$0xff]  ;;  %v1546_v3 = vld [vmem:[#allocation8 + $0x8] sm:$0xff]  ;;  %v2545_v30 = vld [vmem:[#allocation7 + $0x6c0] sm:$0xff] }
 0x1f8   :  { %2437 = vmatpush.msra.mxu1 %v1574_v17  ;;  %2463 = vmatpush.msra.mxu2 %v1606_v54  ;;  %v1578_v17 = vld [vmem:[#allocation8 + $0x108] sm:$0xff] }
 0x1f9   :  { %2348 = vmatmul.f32.vlgmr.msrb.gmra.mxu1 %v5175_v50  ;;  %2374 = vmatmul.f32.vlgmr.msrb.gmra.mxu2 %v5259_v63  ;;  %v1600_v50 = vld [vmem:[#allocation8 + $0x1b8] sm:$0xff] }
 0x1fa   :  { %2415 = vmatpush.msra.mxu0 %v1629_v52  ;;  %2438 = vmatpush.msra.mxu1 %v1572_v39  ;;  %v5276_v54 = vpop.f32.mrf.mxu1  ;;  %v2583_v52 = vld [vmem:[#allocation7 + $0x7f0] sm:$0xff] }
 0x1fb   :  { %2464 = vmatpush.msra.mxu2 %v1604_v43  ;;  %2493 = vmatpush.msra.mxu3 %v1630_v14  ;;  %6058 = vst [vmem:[#allocation36_spill] sm:$0xff] %v5276_v54  ;;  %v2615_v39 = vld [vmem:[#allocation7 + $0x8f0] sm:$0xff]  ;;  %v2546_v43 = vld [vmem:[#allocation7 + $0x6c8] sm:$0xff]  ;;  %v5522_v54 = vld [vmem:[#allocation2 + $0x20] sm:$0xff] }
 0x1fc   :  { %2325 = vmatmul.f32.gmra.mxu0 %v5196_v37  ;;  %2403 = vmatmul.f32.gmra.mxu3 %v5157_v44  ;;  %v1621_v37 = vld [vmem:[#allocation8 + $0x260] sm:$0xff]  ;;  %v1564_v44 = vld [vmem:[#allocation8 + $0x98] sm:$0xff]  ;;  %v2543_v14 = vld [vmem:[#allocation7 + $0x6b0] sm:$0xff]  ;;  %v5977_v31 = vrot.slane %v5522_v54, 3 }
 0x1fd   :  { %2416 = vmatpush.msra.mxu0 %v1627_v11  ;;  %2439 = vmatpush.msra.mxu1 %v1570_v8  ;;  %v2581_v11 = vld [vmem:[#allocation7 + $0x7e0] sm:$0xff]  ;;  %v5280_v8 = vpop.f32.mrf.mxu3 }
 0x1fe   :  { %2465 = vmatpush.msra.mxu2 %v1602_v21  ;;  %2494 = vmatpush.msra.mxu3 %v1628_v24  ;;  %v2613_v21 = vld [vmem:[#allocation7 + $0x8e0] sm:$0xff]  ;;  %v2544_v24 = vld [vmem:[#allocation7 + $0x6b8] sm:$0xff] }
 0x1ff   :  { %2417 = vmatpush.msra.mxu0 %v1625_v25  ;;  %2440 = vmatpush.msra.mxu1 %v1568_v27  ;;  %v5282_v25 = vld [vmem:[#allocation2 + $0x20] sm:$0xff]  ;;  %v5286_v27 = vpop.f32.mrf.mxu0 }
 0x200   :  { %2466 = vmatpush.msra.mxu2 %v1600_v50  ;;  %2495 = vmatpush.msra.mxu3 %v1626_v57  ;;  %6059 = vst [vmem:[#allocation37_spill] sm:$0xff] %v5286_v27  ;;  %v2611_v57 = vld [vmem:[#allocation7 + $0x8d0] sm:$0xff] }
 0x201   :  { %2418 = vmatpush.msra.mxu0 %v1623_v58  ;;  %2441 = vmatpush.msra.mxu1 %v1566_v35  ;;  %v5288_v50 = vpop.f32.mrf.mxu2  ;;  %v2542_v58 = vld [vmem:[#allocation7 + $0x6a8] sm:$0xff]  ;;  %v2539_v35 = vld [vmem:[#allocation7 + $0x690] sm:$0xff] }
 0x202   :  { %2467 = vmatpush.msra.mxu2 %v1598_v40  ;;  %2496 = vmatpush.msra.mxu3 %v1624_v28  ;;  %6060 = vst [vmem:[#allocation16_spill] sm:$0xff] %v5288_v50  ;;  %v2577_v40 = vld [vmem:[#allocation7 + $0x7c0] sm:$0xff]  ;;  %v5519_v27 = vld [vmem:[#allocation2 + $0x50] sm:$0xff] }
 0x203   :  { %2351 = vmatmul.f32.gmra.mxu1 %v5199_v36  ;;  %2377 = vmatmul.f32.gmra.mxu2 %v5265_v29  ;;  %v1592_v36 = vld [vmem:[#allocation8 + $0x178] sm:$0xff]  ;;  %v2609_v28 = vld [vmem:[#allocation7 + $0x8c0] sm:$0xff] }
 0x204   :  { %2419 = vmatpush.msra.mxu0 %v1621_v37  ;;  %2442 = vmatpush.msra.mxu1 %v1564_v44  ;;  %v2540_v37 = vld [vmem:[#allocation7 + $0x698] sm:$0xff]  ;;  %v5290_v44 = vpop.f32.mrf.mxu1 }
 0x205   :  { %2468 = vmatpush.msra.mxu2 %v1596_v41  ;;  %2497 = vmatpush.msra.mxu3 %v1622_v60  ;;  %6061 = vst [vmem:[#allocation18_spill] sm:$0xff] %v5290_v44  ;;  %v2537_v41 = vld [vmem:[#allocation7 + $0x680] sm:$0xff]  ;;  %v2575_v60 = vld [vmem:[#allocation7 + $0x7b0] sm:$0xff] }
 0x206   :  { %2328 = vmatmul.f32.gmra.mxu0 %v5211_v49  ;;  %2406 = vmatmul.f32.gmra.mxu3 %v5185_v4  ;;  %v1613_v49 = vld [vmem:[#allocation8 + $0x220] sm:$0xff]  ;;  %v1556_v4 = vld [vmem:[#allocation8 + $0x58] sm:$0xff] }
 0x207   :  { %2420 = vmatpush.msra.mxu0 %v1619_v46  ;;  %2443 = vmatpush.msra.mxu1 %v1562_v59  ;;  %v2607_v46 = vld [vmem:[#allocation7 + $0x8b0] sm:$0xff]  ;;  %v2538_v59 = vld [vmem:[#allocation7 + $0x688] sm:$0xff] }
 0x208   :  { %2469 = vmatpush.msra.mxu2 %v1594_v34  ;;  %2498 = vmatpush.msra.mxu3 %v1620_v38  ;;  %v5293_v34 = vld [vmem:[#allocation2 + $0x50] sm:$0xff]  ;;  %v3077_v44 = vld [vmem:[#allocation2 + $0x58] sm:$0xf8] }
 0x209   :  { %2421 = vmatpush.msra.mxu0 %v1617_v62  ;;  %2444 = vmatpush.msra.mxu1 %v1560_v5  ;;  %v2535_v38 = vld [vmem:[#allocation7 + $0x670] sm:$0xff]  ;;  %v2573_v62 = vld [vmem:[#allocation7 + $0x7a0] sm:$0xff]  ;;  %v5296_v5 = vpop.f32.mrf.mxu3  ;;  %v3191_v50 = vrot.slane %v3077_v44, 3 }
 0x20a   :  { %2470 = vmatpush.msra.mxu2 %v1592_v36  ;;  %2499 = vmatpush.msra.mxu3 %v1618_v22  ;;  %v2605_v36 = vld [vmem:[#allocation7 + $0x8a0] sm:$0xff]  ;;  %v2536_v22 = vld [vmem:[#allocation7 + $0x678] sm:$0xff] }
 0x20b   :  { %2422 = vmatpush.msra.mxu0 %v1615_v13  ;;  %2445 = vmatpush.msra.mxu1 %v1558_v19  ;;  %v5298_v13 = vld [vmem:[#allocation2 + $0x28] sm:$0xff]  ;;  %v5302_v19 = vpop.f32.mrf.mxu0 }
 0x20c   :  { %2471 = vmatpush.msra.mxu2 %v1590_v12  ;;  %2500 = vmatpush.msra.mxu3 %v1616_v51  ;;  %6062 = vst [vmem:[#allocation17_spill] sm:$0xff] %v5302_v19  ;;  %v2533_v12 = vld [vmem:[#allocation7 + $0x660] sm:$0xff]  ;;  %v2571_v51 = vld [vmem:[#allocation7 + $0x790] sm:$0xff]  ;;  %v3087_v19 = vld [vmem:[#allocation7 + $0x928] sm:$0xff] }
 0x20d   :  { %2354 = vmatmul.f32.gmra.mxu1 %v5214_v2  ;;  %2380 = vmatmul.f32.gmra.mxu2 %v5271_v1  ;;  %v2551_v2 = vld [vmem:[#allocation7 + $0x6f0] sm:$0xff] }
 0x20e   :  { %2423 = vmatpush.msra.mxu0 %v1613_v49  ;;  %2446 = vmatpush.msra.mxu1 %v1556_v4  ;;  %v5304_v49 = vpop.f32.mrf.mxu2  ;;  %v2603_v4 = vld [vmem:[#allocation7 + $0x890] sm:$0xff] }
 0x20f   :  { %2472 = vmatpush.msra.mxu2 %v1588_v6  ;;  %2501 = vmatpush.msra.mxu3 %v1614_v16  ;;  %6063 = vst [vmem:[#allocation19_spill] sm:$0xff] %v5304_v49  ;;  %v2534_v6 = vld [vmem:[#allocation7 + $0x668] sm:$0xff]  ;;  %v2531_v16 = vld [vmem:[#allocation7 + $0x650] sm:$0xff] }
 0x210   :  { %2424 = vmatpush.msra.mxu0 %v1611_v10  ;;  %2447 = vmatpush.msra.mxu1 %v1554_v23  ;;  %v2569_v10 = vld [vmem:[#allocation7 + $0x780] sm:$0xff]  ;;  %v3152_v49 = vld [vmem:[#allocation7 + $0xb30] sm:$0xff] }
 0x211   :  { %2473 = vmatpush.msra.mxu2 %v1586_v53  ;;  %2502 = vmatpush.msra.mxu3 %v1612_v45  ;;  %v2601_v23 = vld [vmem:[#allocation7 + $0x880] sm:$0xff]  ;;  %v2532_v53 = vld [vmem:[#allocation7 + $0x658] sm:$0xff]  ;;  %v5306_v45 = vpop.f32.mrf.mxu1 }
 0x212   :  { %2425 = vmatpush.msra.mxu0 %v1609_v56  ;;  %2448 = vmatpush.msra.mxu1 %v1552_v32  ;;  %6064 = vst [vmem:[#allocation20_spill] sm:$0xff] %v5306_v45  ;;  %v2529_v56 = vld [vmem:[#allocation7 + $0x640] sm:$0xff]  ;;  %v2567_v32 = vld [vmem:[#allocation7 + $0x770] sm:$0xff] }
 0x213   :  { %2474 = vmatpush.msra.mxu2 %v1584_v61  ;;  %2503 = vmatpush.msra.mxu3 %v1610_v48  ;;  %v2599_v61 = vld [vmem:[#allocation7 + $0x870] sm:$0xff]  ;;  %v2530_v48 = vld [vmem:[#allocation7 + $0x648] sm:$0xff] }
 0x214   :  { %2426 = vmatmul.f32.vlgmr.msra.gmra.mxu0 %v4362_v26  ;;  %2504 = vmatmul.f32.vlgmr.msra.gmra.mxu3 %v4362_v26  ;;  %v2528_v26 = vld [vmem:[#allocation7 + $0x638] sm:$0xff]  ;;  %v3128_v45 = vld [vmem:[#allocation7 + $0xa70] sm:$0xff] }
 0x215   :  { %2654 = vmatpush.msrb.mxu0 %v2551_v2  ;;  %2732 = vmatpush.msrb.mxu3 %v2552_v15  ;;  %v5309_v2 = vld [vmem:[#allocation2 + $0x38] sm:$0xff] }
 0x216   :  { %2449 = vmatpush.msra.mxu1 %v1550_v33  ;;  %2475 = vmatpush.msra.mxu2 %v1582_v47  ;;  %v2527_v15 = vld [vmem:[#allocation7 + $0x630] sm:$0xff]  ;;  %v2565_v33 = vld [vmem:[#allocation7 + $0x760] sm:$0xff] }
 0x217   :  { %2655 = vmatpush.msrb.mxu0 %v2549_v0  ;;  %2733 = vmatpush.msrb.mxu3 %v2550_v18  ;;  %v2597_v47 = vld [vmem:[#allocation7 + $0x860] sm:$0xff]  ;;  %v5312_v0 = vpop.f32.mrf.mxu3 }
 0x218   :  { %2450 = vmatpush.msra.mxu1 %v1548_v20  ;;  %2476 = vmatpush.msra.mxu2 %v1580_v9  ;;  %v2525_v18 = vld [vmem:[#allocation7 + $0x620] sm:$0xff]  ;;  %v2563_v20 = vld [vmem:[#allocation7 + $0x750] sm:$0xff]  ;;  %v5314_v9 = vpop.f32.mrf.mxu0 }
 0x219   :  { %2656 = vmatpush.msrb.mxu0 %v2547_v42  ;;  %2734 = vmatpush.msrb.mxu3 %v2548_v55  ;;  %v2595_v42 = vld [vmem:[#allocation7 + $0x850] sm:$0xff]  ;;  %v2526_v55 = vld [vmem:[#allocation7 + $0x628] sm:$0xff] }
 0x21a   :  { %2451 = vmatpush.msra.mxu1 %v1546_v3  ;;  %2477 = vmatpush.msra.mxu2 %v1578_v17  ;;  %v5316_v3 = vpop.f32.mrf.mxu2  ;;  %v2514_v17 = vld [vmem:[#allocation2 + $0x30] sm:$0xfc] }
 0x21b   :  { %2452 = vmatmul.f32.vlgmr.msra.gmra.mxu1 %v5259_v63  ;;  %2478 = vmatmul.f32.vlgmr.msra.gmra.mxu2 %v5255_v7  ;;  %v2541_v63 = vld [vmem:[#allocation7 + $0x6a0] sm:$0xff]  ;;  %v2579_v7 = vld [vmem:[#allocation7 + $0x7d0] sm:$0xff]  ;;  %6065 = vst [vmem:[#allocation21_spill] sm:$0xff] %v5316_v3 }
 0x21c   :  { %2657 = vmatpush.msrb.mxu0 %v2545_v30  ;;  %2680 = vmatpush.msrb.mxu1 %v2583_v52  ;;  %v2523_v30 = vld [vmem:[#allocation7 + $0x610] sm:$0xff]  ;;  %v2561_v52 = vld [vmem:[#allocation7 + $0x740] sm:$0xff] }
 0x21d   :  { %2706 = vmatpush.msrb.mxu2 %v2615_v39  ;;  %2735 = vmatpush.msrb.mxu3 %v2546_v43  ;;  %v2593_v39 = vld [vmem:[#allocation7 + $0x840] sm:$0xff]  ;;  %v2524_v43 = vld [vmem:[#allocation7 + $0x618] sm:$0xff]  ;;  %v3144_v3 = vld [vmem:[#allocation7 + $0xaf0] sm:$0xff] }
 0x21e   :  { %2429 = vmatmul.f32.gmra.mxu0 %v5282_v25  ;;  %2507 = vmatmul.f32.gmra.mxu3 %v5282_v25 }
 0x21f   :  { %2658 = vmatpush.msrb.mxu0 %v2543_v14  ;;  %2681 = vmatpush.msrb.mxu1 %v2581_v11  ;;  %v2521_v14 = vld [vmem:[#allocation7 + $0x600] sm:$0xff]  ;;  %v2559_v11 = vld [vmem:[#allocation7 + $0x730] sm:$0xff] }
 0x220   :  { %2707 = vmatpush.msrb.mxu2 %v2613_v21  ;;  %2736 = vmatpush.msrb.mxu3 %v2544_v24  ;;  %v2624_v21 = vrot.slane %v2514_v17, 2  ;;  %v2625_v24 = vrot.slane %v5265_v29, 2  ;;  %v2845_v17 = vld [vmem:[#allocation8 + $0x6e0] sm:$0xff] }
 0x221   :  { %2659 = vmatpush.msrb.mxu0 %v2541_v63  ;;  %2682 = vmatpush.msrb.mxu1 %v2579_v7  ;;  %v2591_v63 = vld [vmem:[#allocation7 + $0x830] sm:$0xff]  ;;  %v2522_v7 = vld [vmem:[#allocation7 + $0x608] sm:$0xff] }
 0x222   :  { %2708 = vmatpush.msrb.mxu2 %v2611_v57  ;;  %2737 = vmatpush.msrb.mxu3 %v2542_v58  ;;  %v5319_v57 = vpop.f32.mrf.mxu1  ;;  %v2584_v58 = vld [vmem:[#allocation7 + $0x7f8] sm:$0xff] }
 0x223   :  { %2660 = vmatpush.msrb.mxu0 %v2539_v35  ;;  %2683 = vmatpush.msrb.mxu1 %v2577_v40  ;;  %v2879_v35 = vld [vmem:[#allocation8 + $0x7f0] sm:$0xff]  ;;  %v2515_v40 = vld [vmem:[#allocation2] sm:$0xfc] }
 0x224   :  { %2709 = vmatpush.msrb.mxu2 %v2609_v28  ;;  %2738 = vmatpush.msrb.mxu3 %v2540_v37  ;;  %v5324_v28 = vsel %vm2623_vm2, %v2624_v21, %v2625_v24  ;;  %v2557_v37 = vld [vmem:[#allocation7 + $0x720] sm:$0xff]  ;;  %v2572_v21 = vld [vmem:[#allocation7 + $0x798] sm:$0xff] }
 0x225   :  { %2455 = vmatmul.f32.gmra.mxu1 %v5265_v29  ;;  %2481 = vmatmul.f32.gmra.mxu2 %v5293_v34 }
 0x226   :  { %2661 = vmatpush.msrb.mxu0 %v2537_v41  ;;  %2684 = vmatpush.msrb.mxu1 %v2575_v60  ;;  %v2589_v41 = vld [vmem:[#allocation7 + $0x820] sm:$0xff]  ;;  %v2516_v60 = vld [vmem:[#allocation2 + $0x58] sm:$0xfc] }
 0x227   :  { %2710 = vmatpush.msrb.mxu2 %v2607_v46  ;;  %2739 = vmatpush.msrb.mxu3 %v2538_v59  ;;  %v2582_v46 = vld [vmem:[#allocation7 + $0x7e8] sm:$0xff]  ;;  %v2877_v59 = vld [vmem:[#allocation8 + $0x7e0] sm:$0xff] }
 0x228   :  { %2432 = vmatmul.f32.gmra.mxu0 %v5298_v13  ;;  %2510 = vmatmul.f32.gmra.mxu3 %v5298_v13 }
 0x229   :  { %2662 = vmatpush.msrb.mxu0 %v2535_v38  ;;  %2685 = vmatpush.msrb.mxu1 %v2573_v62  ;;  %v5328_v38 = vpop.f32.mrf.mxu3  ;;  %v2555_v62 = vld [vmem:[#allocation7 + $0x710] sm:$0xff] }
 0x22a   :  { %2711 = vmatpush.msrb.mxu2 %v2605_v36  ;;  %2740 = vmatpush.msrb.mxu3 %v2536_v22  ;;  %6066 = vst [vmem:[#allocation22_spill] sm:$0xff] %v5328_v38  ;;  %v2587_v36 = vld [vmem:[#allocation7 + $0x810] sm:$0xff]  ;;  %v5330_v22 = vpop.f32.mrf.mxu0  ;;  %v3150_v38 = vld [vmem:[#allocation7 + $0xb20] sm:$0xff] }
 0x22b   :  { %2663 = vmatpush.msrb.mxu0 %v2533_v12  ;;  %2686 = vmatpush.msrb.mxu1 %v2571_v51  ;;  %v2580_v12 = vld [vmem:[#allocation7 + $0x7d8] sm:$0xff]  ;;  %v2875_v51 = vld [vmem:[#allocation8 + $0x7d0] sm:$0xff] }
 0x22c   :  { %2712 = vmatpush.msrb.mxu2 %v2603_v4  ;;  %2741 = vmatpush.msrb.mxu3 %v2534_v6  ;;  %v5332_v4 = vpop.f32.mrf.mxu2  ;;  %v2627_v6 = vrot.slane %v2515_v40, 2  ;;  %v2841_v40 = vld [vmem:[#allocation8 + $0x6c0] sm:$0xff] }
 0x22d   :  { %2664 = vmatpush.msrb.mxu0 %v2531_v16  ;;  %2687 = vmatpush.msrb.mxu1 %v2569_v10  ;;  %6067 = vst [vmem:[#allocation45_spill] sm:$0xff] %v5332_v4  ;;  %v2628_v16 = vrot.slane %v5293_v34, 2  ;;  %v2630_v10 = vrot.slane %v2516_v60, 2  ;;  %v2608_v60 = vld [vmem:[#allocation7 + $0x8b8] sm:$0xff]  ;;  %v5978_v4 = vrot.slane %v5519_v27, 3 }
 0x22e   :  { %2713 = vmatpush.msrb.mxu2 %v2601_v23  ;;  %2742 = vmatpush.msrb.mxu3 %v2532_v53  ;;  %v2631_v23 = vrot.slane %v5282_v25, 2  ;;  %v2553_v53 = vld [vmem:[#allocation7 + $0x700] sm:$0xff]  ;;  %v2568_v34 = vld [vmem:[#allocation7 + $0x778] sm:$0xff] }
 0x22f   :  { %2458 = vmatmul.f32.gmra.mxu1 %v5271_v1  ;;  %2484 = vmatmul.f32.gmra.mxu2 %v5309_v2 }
 0x230   :  { %2665 = vmatpush.msrb.mxu0 %v2529_v56  ;;  %2688 = vmatpush.msrb.mxu1 %v2567_v32  ;;  %v2585_v56 = vld [vmem:[#allocation7 + $0x800] sm:$0xff]  ;;  %v2578_v32 = vld [vmem:[#allocation7 + $0x7c8] sm:$0xff] }
 0x231   :  { %2714 = vmatpush.msrb.mxu2 %v2599_v61  ;;  %2743 = vmatpush.msrb.mxu3 %v2530_v48  ;;  %v2616_v61 = vld [vmem:[#allocation7 + $0x8f8] sm:$0xff]  ;;  %v2633_v48 = vrot.slane %v5271_v1, 2 }
 0x232   :  { %2666 = vmatpush.msrb.mxu0 %v2527_v15  ;;  %2689 = vmatpush.msrb.mxu1 %v2565_v33  ;;  %v5340_v15 = vsel %vm2623_vm2, %v2627_v6, %v2628_v16  ;;  %v5345_v33 = vsel %vm2623_vm2, %v2630_v10, %v2631_v23  ;;  %v5362_v29 = vpop.f32.mrf.mxu0  ;;  %v2606_v6 = vld [vmem:[#allocation7 + $0x8a8] sm:$0xff]  ;;  %v2837_v10 = vld [vmem:[#allocation8 + $0x6a0] sm:$0xff] }
 0x233   :  { %2715 = vmatpush.msrb.mxu2 %v2597_v47  ;;  %2744 = vmatpush.msrb.mxu3 %v2528_v26  ;;  %v2847_v47 = vld [vmem:[#allocation8 + $0x6f0] sm:$0xff]  ;;  %v2873_v26 = vld [vmem:[#allocation8 + $0x7c0] sm:$0xff] }
 0x234   :  { %2667 = vmatpush.msrb.mxu0 %v2525_v18  ;;  %2690 = vmatpush.msrb.mxu1 %v2563_v20  ;;  %v5347_v18 = vpop.f32.mrf.mxu1  ;;  %v2576_v20 = vld [vmem:[#allocation7 + $0x7b8] sm:$0xff] }
 0x235   :  { %2716 = vmatpush.msrb.mxu2 %v2595_v42  ;;  %2745 = vmatpush.msrb.mxu3 %v2526_v55  ;;  %v2614_v42 = vld [vmem:[#allocation7 + $0x8e8] sm:$0xff]  ;;  %v5356_v55 = vsel %vm2623_vm2, %v2625_v24, %v2633_v48 }
 0x236   :  { %2668 = vmatpush.msrb.mxu0 %v2523_v30  ;;  %2691 = vmatpush.msrb.mxu1 %v2561_v52  ;;  %v2871_v30 = vld [vmem:[#allocation8 + $0x7b0] sm:$0xff]  ;;  %v2574_v52 = vld [vmem:[#allocation7 + $0x7a8] sm:$0xff] }
 0x237   :  { %2717 = vmatpush.msrb.mxu2 %v2593_v39  ;;  %2746 = vmatpush.msrb.mxu3 %v2524_v43  ;;  %v2612_v39 = vld [vmem:[#allocation7 + $0x8d8] sm:$0xff]  ;;  %v5360_v43 = vpop.f32.mrf.mxu3  ;;  %v2610_v24 = vld [vmem:[#allocation7 + $0x8c8] sm:$0xff] }
 0x238   :  { %2669 = vmatpush.msrb.mxu0 %v2521_v14  ;;  %2692 = vmatpush.msrb.mxu1 %v2559_v11  ;;  %6068 = vst [vmem:[#allocation47_spill] sm:$0xff] %v5360_v43  ;;  %v2843_v14 = vld [vmem:[#allocation8 + $0x6d0] sm:$0xff]  ;;  %v2869_v11 = vld [vmem:[#allocation8 + $0x7a0] sm:$0xff] }
 0x239   :  { %2718 = vmatpush.msrb.mxu2 %v2591_v63  ;;  %2747 = vmatpush.msrb.mxu3 %v2522_v7  ;;  %v5364_v63 = vpop.f32.mrf.mxu2  ;;  %v2635_v7 = vrot.slane %v5309_v2, 2  ;;  %v2829_v2 = vld [vmem:[#allocation8 + $0x660] sm:$0xff]  ;;  %v3136_v43 = vld [vmem:[#allocation7 + $0xab0] sm:$0xff] }
 0x23a   :  { %2670 = vmatmul.f32.vlgmr.msrb.gmra.mxu0 %v5324_v28  ;;  %2748 = vmatmul.f32.vlgmr.msrb.gmra.mxu3 %v5324_v28  ;;  %6069 = vst [vmem:[#allocation46_spill] sm:$0xff] %v5364_v63  ;;  %v5395_v1 = vpop.f32.mrf.mxu0  ;;  %v3075_v63 = vld [vmem:[#allocation2 + $0x30] sm:$0xf8] }
 0x23b   :  { %2758 = vmatpush.msra.mxu0 %v2584_v58  ;;  %2939 = vmatpush.msra.mxu3 %v2879_v35  ;;  %v2637_v58 = vrot.slane %v5298_v13, 2  ;;  %v2517_v35 = vld [vmem:[#allocation2 + $0x48] sm:$0x3]  ;;  %6071 = vst [vmem:[#allocation23_spill] sm:$0xff] %v5395_v1  ;;  %v2558_v13 = vld [vmem:[#allocation7 + $0x728] sm:$0xff]  ;;  %v3185_v1 = vrot.slane %v3075_v63, 3 }
 0x23c   :  { %2693 = vmatpush.msrb.mxu1 %v2557_v37  ;;  %2719 = vmatpush.msrb.mxu2 %v2589_v41  ;;  %v2867_v37 = vld [vmem:[#allocation8 + $0x790] sm:$0xff]  ;;  %v2570_v41 = vld [vmem:[#allocation7 + $0x788] sm:$0xff] }
 0x23d   :  { %2759 = vmatpush.msra.mxu0 %v2582_v46  ;;  %2940 = vmatpush.msra.mxu3 %v2877_v59  ;;  %v2639_v46 = vrot.slane %v2517_v35, 2  ;;  %v5373_v59 = vsel %vm2623_vm2, %v2628_v16, %v2635_v7  ;;  %v2518_v16 = vld [vmem:[#allocation2 + $0x10] sm:$0x3]  ;;  %v2831_v35 = vld [vmem:[#allocation8 + $0x670] sm:$0xff] }
 0x23e   :  { %2694 = vmatpush.msrb.mxu1 %v2555_v62  ;;  %2720 = vmatpush.msrb.mxu2 %v2587_v36  ;;  %v5380_v62 = vsel %vm2623_vm2, %v2631_v23, %v2637_v58  ;;  %v2839_v36 = vld [vmem:[#allocation8 + $0x6b0] sm:$0xff] }
 0x23f   :  { %2760 = vmatpush.msra.mxu0 %v2580_v12  ;;  %2941 = vmatpush.msra.mxu3 %v2875_v51  ;;  %v2865_v12 = vld [vmem:[#allocation8 + $0x780] sm:$0xff]  ;;  %v5382_v51 = vpop.f32.mrf.mxu1  ;;  %v5389_v25 = vsel %vm2623_vm2, %v2633_v48, %v2639_v46  ;;  %v2863_v23 = vld [vmem:[#allocation8 + $0x770] sm:$0xff]  ;;  %v2564_v48 = vld [vmem:[#allocation7 + $0x758] sm:$0xff] }
 0x240   :  { %2695 = vmatpush.msrb.mxu1 %v2553_v53  ;;  %2721 = vmatpush.msrb.mxu2 %v2585_v56  ;;  %v2519_v53 = vld [vmem:[#allocation2 + $0x40] sm:$0x3]  ;;  %v2566_v56 = vld [vmem:[#allocation7 + $0x768] sm:$0xff] }
 0x241   :  { %2696 = vmatmul.f32.vlgmr.msrb.gmra.mxu1 %v5340_v15  ;;  %2722 = vmatmul.f32.vlgmr.msrb.gmra.mxu2 %v5345_v33  ;;  %v2596_v46 = vld [vmem:[#allocation7 + $0x858] sm:$0xff] }
 0x242   :  { %2761 = vmatpush.msra.mxu0 %v2578_v32  ;;  %2784 = vmatpush.msra.mxu1 %v2616_v61  ;;  %v2604_v32 = vld [vmem:[#allocation7 + $0x898] sm:$0xff]  ;;  %v5393_v61 = vpop.f32.mrf.mxu3 }
 0x243   :  { %2913 = vmatpush.msra.mxu2 %v2847_v47  ;;  %2942 = vmatpush.msra.mxu3 %v2873_v26  ;;  %6070 = vst [vmem:[#allocation40_spill] sm:$0xff] %v5393_v61  ;;  %v2835_v47 = vld [vmem:[#allocation8 + $0x690] sm:$0xff]  ;;  %v2861_v26 = vld [vmem:[#allocation8 + $0x760] sm:$0xff] }
 0x244   :  { %2673 = vmatmul.f32.gmra.mxu0 %v5356_v55  ;;  %2751 = vmatmul.f32.gmra.mxu3 %v5356_v55 }
 0x245   :  { %2762 = vmatpush.msra.mxu0 %v2576_v20  ;;  %2785 = vmatpush.msra.mxu1 %v2614_v42  ;;  %v2602_v20 = vld [vmem:[#allocation7 + $0x888] sm:$0xff]  ;;  %v5397_v42 = vpop.f32.mrf.mxu2 }
 0x246   :  { %2914 = vmatpush.msra.mxu2 %v2845_v17  ;;  %2943 = vmatpush.msra.mxu3 %v2871_v30  ;;  %6072 = vst [vmem:[#allocation30_spill] sm:$0xff] %v5397_v42  ;;  %v2641_v17 = vrot.slane %v2518_v16, 2  ;;  %v2643_v30 = vrot.slane %v2519_v53, 2  ;;  %v5415_v16 = vpop.f32.mrf.mxu0 }
 0x247   :  { %2763 = vmatpush.msra.mxu0 %v2574_v52  ;;  %2786 = vmatpush.msra.mxu1 %v2612_v39  ;;  %v2833_v52 = vld [vmem:[#allocation8 + $0x680] sm:$0xff]  ;;  %v2859_v39 = vld [vmem:[#allocation8 + $0x750] sm:$0xff]  ;;  %6073 = vst [vmem:[#allocation28_spill] sm:$0xff] %v5415_v16 }
 0x248   :  { %2915 = vmatpush.msra.mxu2 %v2843_v14  ;;  %2944 = vmatpush.msra.mxu3 %v2869_v11  ;;  %v2562_v14 = vld [vmem:[#allocation7 + $0x748] sm:$0xff]  ;;  %v2600_v11 = vld [vmem:[#allocation7 + $0x878] sm:$0xff] }
 0x249   :  { %2764 = vmatpush.msra.mxu0 %v2572_v21  ;;  %2787 = vmatpush.msra.mxu1 %v2610_v24  ;;  %v5402_v21 = vsel %vm2623_vm2, %v2635_v7, %v2641_v17  ;;  %v5407_v24 = vsel %vm2623_vm2, %v2637_v58, %v2643_v30  ;;  %v2855_v7 = vld [vmem:[#allocation8 + $0x730] sm:$0xff]  ;;  %v2590_v30 = vld [vmem:[#allocation7 + $0x828] sm:$0xff] }
 0x24a   :  { %2916 = vmatpush.msra.mxu2 %v2841_v40  ;;  %2945 = vmatpush.msra.mxu3 %v2867_v37  ;;  %v2857_v40 = vld [vmem:[#allocation8 + $0x740] sm:$0xff]  ;;  %v5409_v37 = vpop.f32.mrf.mxu1  ;;  %v2827_v58 = vld [vmem:[#allocation8 + $0x650] sm:$0xff] }
 0x24b   :  { %2699 = vmatmul.f32.gmra.mxu1 %v5373_v59  ;;  %2725 = vmatmul.f32.gmra.mxu2 %v5380_v62 }
 0x24c   :  { %2765 = vmatpush.msra.mxu0 %v2570_v41  ;;  %2788 = vmatpush.msra.mxu1 %v2608_v60  ;;  %v2560_v41 = vld [vmem:[#allocation7 + $0x738] sm:$0xff]  ;;  %v2598_v60 = vld [vmem:[#allocation7 + $0x868] sm:$0xff] }
 0x24d   :  { %2917 = vmatpush.msra.mxu2 %v2839_v36  ;;  %2946 = vmatpush.msra.mxu3 %v2865_v12  ;;  %v2853_v36 = vld [vmem:[#allocation8 + $0x720] sm:$0xff]  ;;  %v5413_v12 = vpop.f32.mrf.mxu3  ;;  %v5417_v53 = vpop.f32.mrf.mxu2 }
 0x24e   :  { %2676 = vmatmul.f32.gmra.mxu0 %v5389_v25  ;;  %2754 = vmatmul.f32.gmra.mxu3 %v5389_v25 }
 0x24f   :  { %2766 = vmatpush.msra.mxu0 %v2568_v34  ;;  %2789 = vmatpush.msra.mxu1 %v2606_v6  ;;  %v2556_v34 = vld [vmem:[#allocation7 + $0x718] sm:$0xff]  ;;  %v2594_v6 = vld [vmem:[#allocation7 + $0x848] sm:$0xff] }
 0x250   :  { %2918 = vmatpush.msra.mxu2 %v2837_v10  ;;  %2947 = vmatpush.msra.mxu3 %v2863_v23  ;;  %v2825_v10 = vld [vmem:[#allocation8 + $0x640] sm:$0xff]  ;;  %v2851_v23 = vld [vmem:[#allocation8 + $0x710] sm:$0xff] }
 0x251   :  { %2767 = vmatpush.msra.mxu0 %v2566_v56  ;;  %2790 = vmatpush.msra.mxu1 %v2604_v32  ;;  %v2554_v56 = vld [vmem:[#allocation7 + $0x708] sm:$0xff]  ;;  %v2592_v32 = vld [vmem:[#allocation7 + $0x838] sm:$0xff] }
 0x252   :  { %2919 = vmatpush.msra.mxu2 %v2835_v47  ;;  %2948 = vmatpush.msra.mxu3 %v2861_v26  ;;  %v2823_v47 = vld [vmem:[#allocation8 + $0x630] sm:$0xff]  ;;  %v2849_v26 = vld [vmem:[#allocation8 + $0x700] sm:$0xff]  ;;  %v5419_v17 = vpop.f32.mrf.mxu1 }
 0x253   :  { %2768 = vmatpush.msra.mxu0 %v2564_v48  ;;  %2791 = vmatpush.msra.mxu1 %v2602_v20  ;;  %v2911_v48 = vld [vmem:[#allocation8 + $0x8f0] sm:$0xff]  ;;  %v2912_v20 = vld [vmem:[#allocation8 + $0x8f8] sm:$0xff] }
 0x254   :  { %2920 = vmatpush.msra.mxu2 %v2833_v52  ;;  %2949 = vmatpush.msra.mxu3 %v2859_v39  ;;  %v2821_v52 = vld [vmem:[#allocation8 + $0x620] sm:$0xff] }
 0x255   :  { %2702 = vmatmul.f32.gmra.mxu1 %v5402_v21  ;;  %2728 = vmatmul.f32.gmra.mxu2 %v5407_v24  ;;  %v2909_v39 = vld [vmem:[#allocation8 + $0x8e0] sm:$0xff] }
 0x256   :  { %2769 = vmatpush.msra.mxu0 %v2562_v14  ;;  %2792 = vmatpush.msra.mxu1 %v2600_v11  ;;  %v2910_v14 = vld [vmem:[#allocation8 + $0x8e8] sm:$0xff]  ;;  %v2588_v11 = vld [vmem:[#allocation7 + $0x818] sm:$0xff] }
 0x257   :  { %2921 = vmatpush.msra.mxu2 %v2831_v35  ;;  %2950 = vmatpush.msra.mxu3 %v2857_v40  ;;  %v2819_v35 = vld [vmem:[#allocation8 + $0x610] sm:$0xff] }
 0x258   :  { %2770 = vmatpush.msra.mxu0 %v2560_v41  ;;  %2793 = vmatpush.msra.mxu1 %v2598_v60  ;;  %v2907_v40 = vld [vmem:[#allocation8 + $0x8d0] sm:$0xff]  ;;  %v2908_v41 = vld [vmem:[#allocation8 + $0x8d8] sm:$0xff]  ;;  %v5423_v60 = vpop.f32.mrf.mxu3 }
 0x259   :  { %2922 = vmatpush.msra.mxu2 %v2829_v2  ;;  %2951 = vmatpush.msra.mxu3 %v2855_v7  ;;  %v2586_v2 = vld [vmem:[#allocation7 + $0x808] sm:$0xff]  ;;  %v2817_v7 = vld [vmem:[#allocation8 + $0x600] sm:$0xff] }
 0x25a   :  { %2771 = vmatpush.msra.mxu0 %v2558_v13  ;;  %2794 = vmatpush.msra.mxu1 %v2596_v46  ;;  %v5425_v13 = vpop.f32.mrf.mxu0  ;;  %v5427_v46 = vpop.f32.mrf.mxu2 }
 0x25b   :  { %2923 = vmatpush.msra.mxu2 %v2827_v58  ;;  %2952 = vmatpush.msra.mxu3 %v2853_v36  ;;  %6074 = vst [vmem:[#allocation31_spill] sm:$0xff] %v5425_v13  ;;  %v2905_v58 = vld [vmem:[#allocation8 + $0x8c0] sm:$0xff]  ;;  %v2848_v36 = vld [vmem:[#allocation8 + $0x6f8] sm:$0xff]  ;;  %v2826_v13 = vld [vmem:[#allocation8 + $0x648] sm:$0xff] }
 0x25c   :  { %2772 = vmatpush.msra.mxu0 %v2556_v34  ;;  %2795 = vmatpush.msra.mxu1 %v2594_v6  ;;  %v2880_v34 = vld [vmem:[#allocation8 + $0x7f8] sm:$0xff]  ;;  %v2906_v6 = vld [vmem:[#allocation8 + $0x8c8] sm:$0xff] }
 0x25d   :  { %2924 = vmatpush.msra.mxu2 %v2825_v10  ;;  %2953 = vmatpush.msra.mxu3 %v2851_v23  ;;  %v2903_v10 = vld [vmem:[#allocation8 + $0x8b0] sm:$0xff]  ;;  %v2846_v23 = vld [vmem:[#allocation8 + $0x6e8] sm:$0xff] }
 0x25e   :  { %2773 = vmatpush.msra.mxu0 %v2554_v56  ;;  %2796 = vmatpush.msra.mxu1 %v2592_v32  ;;  %v5431_v56 = vpop.f32.mrf.mxu1  ;;  %v2878_v32 = vld [vmem:[#allocation8 + $0x7e8] sm:$0xff] }
 0x25f   :  { %2925 = vmatpush.msra.mxu2 %v2823_v47  ;;  %2954 = vmatpush.msra.mxu3 %v2849_v26  ;;  %v2904_v47 = vld [vmem:[#allocation8 + $0x8b8] sm:$0xff]  ;;  %v2901_v26 = vld [vmem:[#allocation8 + $0x8a0] sm:$0xff] }
 0x260   :  { %2774 = vmatmul.f32.vlgmr.msra.gmra.mxu0 %v5340_v15  ;;  %2955 = vmatmul.f32.vlgmr.msra.gmra.mxu3 %v5340_v15 }
 0x261   :  { %2965 = vmatpush.msrb.mxu0 %v2911_v48  ;;  %3043 = vmatpush.msrb.mxu3 %v2912_v20  ;;  %v2844_v48 = vld [vmem:[#allocation8 + $0x6d8] sm:$0xff] }
 0x262   :  { %2797 = vmatpush.msra.mxu1 %v2590_v30  ;;  %2926 = vmatpush.msra.mxu2 %v2821_v52  ;;  %v2876_v20 = vld [vmem:[#allocation8 + $0x7d8] sm:$0xff]  ;;  %v2902_v30 = vld [vmem:[#allocation8 + $0x8a8] sm:$0xff]  ;;  %v2899_v52 = vld [vmem:[#allocation8 + $0x890] sm:$0xff] }
 0x263   :  { %2966 = vmatpush.msrb.mxu0 %v2909_v39  ;;  %3044 = vmatpush.msrb.mxu3 %v2910_v14  ;;  %v2842_v39 = vld [vmem:[#allocation8 + $0x6c8] sm:$0xff]  ;;  %v5435_v14 = vpop.f32.mrf.mxu3 }
 0x264   :  { %2798 = vmatpush.msra.mxu1 %v2588_v11  ;;  %2927 = vmatpush.msra.mxu2 %v2819_v35  ;;  %v2874_v11 = vld [vmem:[#allocation8 + $0x7c8] sm:$0xff]  ;;  %v2900_v35 = vld [vmem:[#allocation8 + $0x898] sm:$0xff] }
 0x265   :  { %2967 = vmatpush.msrb.mxu0 %v2907_v40  ;;  %3045 = vmatpush.msrb.mxu3 %v2908_v41  ;;  %v5437_v40 = vpop.f32.mrf.mxu0  ;;  %v5439_v41 = vpop.f32.mrf.mxu2 }
 0x266   :  { %2799 = vmatpush.msra.mxu1 %v2586_v2  ;;  %2928 = vmatpush.msra.mxu2 %v2817_v7  ;;  %v2897_v2 = vld [vmem:[#allocation8 + $0x880] sm:$0xff]  ;;  %v2840_v7 = vld [vmem:[#allocation8 + $0x6b8] sm:$0xff] }
 0x267   :  { %2800 = vmatmul.f32.vlgmr.msra.gmra.mxu1 %v5345_v33  ;;  %2929 = vmatmul.f32.vlgmr.msra.gmra.mxu2 %v5324_v28 }
 0x268   :  { %2968 = vmatpush.msrb.mxu0 %v2905_v58  ;;  %2991 = vmatpush.msrb.mxu1 %v2848_v36  ;;  %v2872_v58 = vld [vmem:[#allocation8 + $0x7b8] sm:$0xff]  ;;  %v2898_v36 = vld [vmem:[#allocation8 + $0x888] sm:$0xff] }
 0x269   :  { %3017 = vmatpush.msrb.mxu2 %v2880_v34  ;;  %3046 = vmatpush.msrb.mxu3 %v2906_v6  ;;  %v2895_v34 = vld [vmem:[#allocation8 + $0x870] sm:$0xff]  ;;  %v2838_v6 = vld [vmem:[#allocation8 + $0x6a8] sm:$0xff] }
 0x26a   :  { %2777 = vmatmul.f32.gmra.mxu0 %v5373_v59  ;;  %2958 = vmatmul.f32.gmra.mxu3 %v5373_v59 }
 0x26b   :  { %2969 = vmatpush.msrb.mxu0 %v2903_v10  ;;  %2992 = vmatpush.msrb.mxu1 %v2846_v23  ;;  %v5443_v10 = vpop.f32.mrf.mxu1  ;;  %v2870_v23 = vld [vmem:[#allocation8 + $0x7a8] sm:$0xff] }
 0x26c   :  { %3018 = vmatpush.msrb.mxu2 %v2878_v32  ;;  %3047 = vmatpush.msrb.mxu3 %v2904_v47  ;;  %v2896_v32 = vld [vmem:[#allocation8 + $0x878] sm:$0xff]  ;;  %v2893_v47 = vld [vmem:[#allocation8 + $0x860] sm:$0xff] }
 0x26d   :  { %2970 = vmatpush.msrb.mxu0 %v2901_v26  ;;  %2993 = vmatpush.msrb.mxu1 %v2844_v48  ;;  %v2836_v26 = vld [vmem:[#allocation8 + $0x698] sm:$0xff] }
 0x26e   :  { %3019 = vmatpush.msrb.mxu2 %v2876_v20  ;;  %3048 = vmatpush.msrb.mxu3 %v2902_v30  ;;  %v2868_v48 = vld [vmem:[#allocation8 + $0x798] sm:$0xff]  ;;  %v2894_v20 = vld [vmem:[#allocation8 + $0x868] sm:$0xff]  ;;  %v2891_v30 = vld [vmem:[#allocation8 + $0x850] sm:$0xff] }
 0x26f   :  { %2971 = vmatpush.msrb.mxu0 %v2899_v52  ;;  %2994 = vmatpush.msrb.mxu1 %v2842_v39  ;;  %v2834_v52 = vld [vmem:[#allocation8 + $0x688] sm:$0xff]  ;;  %v5447_v39 = vpop.f32.mrf.mxu3 }
 0x270   :  { %3020 = vmatpush.msrb.mxu2 %v2874_v11  ;;  %3049 = vmatpush.msrb.mxu3 %v2900_v35  ;;  %6075 = vst [vmem:[#allocation26_spill] sm:$0xff] %v5447_v39  ;;  %v2866_v11 = vld [vmem:[#allocation8 + $0x788] sm:$0xff]  ;;  %v2892_v35 = vld [vmem:[#allocation8 + $0x858] sm:$0xff]  ;;  %v3444_v39 = vld [vmem:[#allocation8 + $0xb10] sm:$0xff] }
 0x271   :  { %2803 = vmatmul.f32.gmra.mxu1 %v5380_v62  ;;  %2932 = vmatmul.f32.gmra.mxu2 %v5356_v55 }
 0x272   :  { %2972 = vmatpush.msrb.mxu0 %v2897_v2  ;;  %2995 = vmatpush.msrb.mxu1 %v2840_v7  ;;  %v5449_v2 = vpop.f32.mrf.mxu0  ;;  %v5451_v7 = vpop.f32.mrf.mxu2 }
 0x273   :  { %3021 = vmatpush.msrb.mxu2 %v2872_v58  ;;  %3050 = vmatpush.msrb.mxu3 %v2898_v36  ;;  %v2889_v58 = vld [vmem:[#allocation8 + $0x840] sm:$0xff]  ;;  %v2832_v36 = vld [vmem:[#allocation8 + $0x678] sm:$0xff] }
 0x274   :  { %2780 = vmatmul.f32.gmra.mxu0 %v5402_v21  ;;  %2961 = vmatmul.f32.gmra.mxu3 %v5402_v21 }
 0x275   :  { %2973 = vmatpush.msrb.mxu0 %v2895_v34  ;;  %2996 = vmatpush.msrb.mxu1 %v2838_v6  ;;  %v2864_v34 = vld [vmem:[#allocation8 + $0x778] sm:$0xff]  ;;  %v2890_v6 = vld [vmem:[#allocation8 + $0x848] sm:$0xff] }
 0x276   :  { %3022 = vmatpush.msrb.mxu2 %v2870_v23  ;;  %3051 = vmatpush.msrb.mxu3 %v2896_v32  ;;  %v2887_v23 = vld [vmem:[#allocation8 + $0x830] sm:$0xff]  ;;  %v2830_v32 = vld [vmem:[#allocation8 + $0x668] sm:$0xff] }
 0x277   :  { %2974 = vmatpush.msrb.mxu0 %v2893_v47  ;;  %2997 = vmatpush.msrb.mxu1 %v2836_v26  ;;  %v2862_v47 = vld [vmem:[#allocation8 + $0x768] sm:$0xff]  ;;  %v2888_v26 = vld [vmem:[#allocation8 + $0x838] sm:$0xff]  ;;  %v5457_v61 = vpop.f32.mrf.mxu3 }
 0x278   :  { %3023 = vmatpush.msrb.mxu2 %v2868_v48  ;;  %3052 = vmatpush.msrb.mxu3 %v2894_v20  ;;  %v5455_v48 = vpop.f32.mrf.mxu1  ;;  %v2885_v20 = vld [vmem:[#allocation8 + $0x820] sm:$0xff]  ;;  %6076 = vst [vmem:[#allocation33_spill] sm:$0xff] %v5457_v61 }
 0x279   :  { %2975 = vmatpush.msrb.mxu0 %v2891_v30  ;;  %2998 = vmatpush.msrb.mxu1 %v2834_v52  ;;  %v2828_v30 = vld [vmem:[#allocation8 + $0x658] sm:$0xff] }
 0x27a   :  { %3024 = vmatpush.msrb.mxu2 %v2866_v11  ;;  %3053 = vmatpush.msrb.mxu3 %v2892_v35  ;;  %v2860_v52 = vld [vmem:[#allocation8 + $0x758] sm:$0xff]  ;;  %v2886_v11 = vld [vmem:[#allocation8 + $0x828] sm:$0xff]  ;;  %v2883_v35 = vld [vmem:[#allocation8 + $0x810] sm:$0xff]  ;;  %v5459_v42 = vpop.f32.mrf.mxu0 }
 0x27b   :  { %2806 = vmatmul.f32.gmra.mxu1 %v5407_v24  ;;  %2935 = vmatmul.f32.gmra.mxu2 %v5389_v25  ;;  %6077 = vst [vmem:[#allocation38_spill] sm:$0xff] %v5459_v42 }
 0x27c   :  { %2976 = vmatpush.msrb.mxu0 %v2889_v58  ;;  %2999 = vmatpush.msrb.mxu1 %v2832_v36  ;;  %v2858_v58 = vld [vmem:[#allocation8 + $0x748] sm:$0xff]  ;;  %v2884_v36 = vld [vmem:[#allocation8 + $0x818] sm:$0xff] }
 0x27d   :  { %3025 = vmatpush.msrb.mxu2 %v2864_v34  ;;  %3054 = vmatpush.msrb.mxu3 %v2890_v6  ;;  %v2881_v34 = vld [vmem:[#allocation8 + $0x800] sm:$0xff]  ;;  %v2824_v6 = vld [vmem:[#allocation8 + $0x638] sm:$0xff] }
 0x27e   :  { %2977 = vmatpush.msrb.mxu0 %v2887_v23  ;;  %3000 = vmatpush.msrb.mxu1 %v2830_v32  ;;  %v2856_v23 = vld [vmem:[#allocation8 + $0x738] sm:$0xff]  ;;  %v2882_v32 = vld [vmem:[#allocation8 + $0x808] sm:$0xff] }
 0x27f   :  { %3026 = vmatpush.msrb.mxu2 %v2862_v47  ;;  %3055 = vmatpush.msrb.mxu3 %v2888_v26  ;;  %v5461_v47 = vpop.f32.mrf.mxu2  ;;  %v3112_v26 = vld [vmem:[#allocation7 + $0x9f0] sm:$0xff]  ;;  %v5467_v16 = vpop.f32.mrf.mxu3 }
 0x280   :  { %2978 = vmatpush.msrb.mxu0 %v2885_v20  ;;  %3001 = vmatpush.msrb.mxu1 %v2828_v30  ;;  %v3113_v20 = vld [vmem:[#allocation7 + $0x9f8] sm:$0xff]  ;;  %v2822_v30 = vld [vmem:[#allocation8 + $0x628] sm:$0xff]  ;;  %6079 = vst [vmem:[#allocation39_spill] sm:$0xff] %v5467_v16 }
 0x281   :  { %3027 = vmatpush.msrb.mxu2 %v2860_v52  ;;  %3056 = vmatpush.msrb.mxu3 %v2886_v11  ;;  %v2854_v52 = vld [vmem:[#allocation8 + $0x728] sm:$0xff]  ;;  %v5465_v11 = vpop.f32.mrf.mxu1  ;;  %v3133_v16 = vld [vmem:[#allocation7 + $0xa98] sm:$0xff] }
 0x282   :  { %2979 = vmatpush.msrb.mxu0 %v2883_v35  ;;  %3002 = vmatpush.msrb.mxu1 %v2826_v13  ;;  %6078 = vst [vmem:[#allocation24_spill] sm:$0xff] %v5465_v11  ;;  %v3110_v13 = vld [vmem:[#allocation7 + $0x9e0] sm:$0xff]  ;;  %v3111_v35 = vld [vmem:[#allocation7 + $0x9e8] sm:$0xff]  ;;  %v3420_v11 = vld [vmem:[#allocation8 + $0xa50] sm:$0xff] }
 0x283   :  { %3028 = vmatpush.msrb.mxu2 %v2858_v58  ;;  %3057 = vmatpush.msrb.mxu3 %v2884_v36  ;;  %v2820_v58 = vld [vmem:[#allocation8 + $0x618] sm:$0xff] }
 0x284   :  { %2980 = vmatpush.msrb.mxu0 %v2881_v34  ;;  %3003 = vmatpush.msrb.mxu1 %v2824_v6  ;;  %v2852_v36 = vld [vmem:[#allocation8 + $0x718] sm:$0xff]  ;;  %v3108_v34 = vld [vmem:[#allocation7 + $0x9d0] sm:$0xff] }
 0x285   :  { %3029 = vmatpush.msrb.mxu2 %v2856_v23  ;;  %3058 = vmatpush.msrb.mxu3 %v2882_v32  ;;  %v3109_v6 = vld [vmem:[#allocation7 + $0x9d8] sm:$0xff]  ;;  %v2818_v23 = vld [vmem:[#allocation8 + $0x608] sm:$0xff] }
 0x286   :  { %2981 = vmatmul.f32.vlgmr.msrb.gmra.mxu0 %v5345_v33  ;;  %3059 = vmatmul.f32.vlgmr.msrb.gmra.mxu3 %v5345_v33  ;;  %v2850_v32 = vld [vmem:[#allocation8 + $0x708] sm:$0xff]  ;;  %v3106_v33 = vld [vmem:[#allocation7 + $0x9c0] sm:$0xff] }
 0x287   :  { %3215 = vmatpush.msra.mxu0 %v3112_v26  ;;  %3293 = vmatpush.msra.mxu3 %v3113_v20  ;;  %v5469_v26 = vpop.f32.mrf.mxu0  ;;  %v3176_v20 = vld [vmem:[#allocation7 + $0xbf0] sm:$0xff] }
 0x288   :  { %3004 = vmatpush.msrb.mxu1 %v2822_v30  ;;  %3030 = vmatpush.msrb.mxu2 %v2854_v52  ;;  %6080 = vst [vmem:[#allocation25_spill] sm:$0xff] %v5469_v26  ;;  %v3107_v30 = vld [vmem:[#allocation7 + $0x9c8] sm:$0xff]  ;;  %v5471_v52 = vpop.f32.mrf.mxu2 }
 0x289   :  { %3216 = vmatpush.msra.mxu0 %v3110_v13  ;;  %3294 = vmatpush.msra.mxu3 %v3111_v35  ;;  %6081 = vst [vmem:[#allocation27_spill] sm:$0xff] %v5471_v52  ;;  %v3104_v13 = vld [vmem:[#allocation7 + $0x9b0] sm:$0xff]  ;;  %v3142_v35 = vld [vmem:[#allocation7 + $0xae0] sm:$0xff]  ;;  %v3125_v52 = vld [vmem:[#allocation7 + $0xa58] sm:$0xff] }
 0x28a   :  { %3005 = vmatpush.msrb.mxu1 %v2820_v58  ;;  %3031 = vmatpush.msrb.mxu2 %v2852_v36  ;;  %v3174_v58 = vld [vmem:[#allocation7 + $0xbe0] sm:$0xff]  ;;  %v3105_v36 = vld [vmem:[#allocation7 + $0x9b8] sm:$0xff]  ;;  %v3447_v26 = vld [vmem:[#allocation8 + $0xb28] sm:$0xff] }
 0x28b   :  { %3217 = vmatpush.msra.mxu0 %v3108_v34  ;;  %3295 = vmatpush.msra.mxu3 %v3109_v6  ;;  %v5477_v34 = vpop.f32.mrf.mxu1  ;;  %v3102_v6 = vld [vmem:[#allocation7 + $0x9a0] sm:$0xff] }
 0x28c   :  { %3006 = vmatpush.msrb.mxu1 %v2818_v23  ;;  %3032 = vmatpush.msrb.mxu2 %v2850_v32  ;;  %6082 = vst [vmem:[#allocation34_spill] sm:$0xff] %v5477_v34  ;;  %v3140_v23 = vld [vmem:[#allocation7 + $0xad0] sm:$0xff]  ;;  %v3138_v32 = vld [vmem:[#allocation7 + $0xac0] sm:$0xff] }
 0x28d   :  { %3007 = vmatmul.f32.vlgmr.msrb.gmra.mxu1 %v5324_v28  ;;  %3033 = vmatmul.f32.vlgmr.msrb.gmra.mxu2 %v5340_v15  ;;  %v3172_v28 = vld [vmem:[#allocation7 + $0xbd0] sm:$0xff]  ;;  %v3103_v15 = vld [vmem:[#allocation7 + $0x9a8] sm:$0xff]  ;;  %v3450_v34 = vld [vmem:[#allocation8 + $0xb40] sm:$0xff] }
 0x28e   :  { %3218 = vmatpush.msra.mxu0 %v3106_v33  ;;  %3241 = vmatpush.msra.mxu1 %v3144_v3  ;;  %v3100_v3 = vld [vmem:[#allocation7 + $0x990] sm:$0xff]  ;;  %v3170_v33 = vld [vmem:[#allocation7 + $0xbc0] sm:$0xff] }
 0x28f   :  { %3267 = vmatpush.msra.mxu2 %v3176_v20  ;;  %3296 = vmatpush.msra.mxu3 %v3107_v30  ;;  %v3101_v20 = vld [vmem:[#allocation7 + $0x998] sm:$0xff]  ;;  %v5479_v30 = vpop.f32.mrf.mxu3 }
 0x290   :  { %2984 = vmatmul.f32.gmra.mxu0 %v5380_v62  ;;  %3062 = vmatmul.f32.gmra.mxu3 %v5380_v62  ;;  %v3098_v62 = vld [vmem:[#allocation7 + $0x980] sm:$0xff] }
 0x291   :  { %3219 = vmatpush.msra.mxu0 %v3104_v13  ;;  %3242 = vmatpush.msra.mxu1 %v3142_v35  ;;  %v5481_v13 = vpop.f32.mrf.mxu0  ;;  %v3168_v35 = vld [vmem:[#allocation7 + $0xbb0] sm:$0xff] }
 0x292   :  { %3268 = vmatpush.msra.mxu2 %v3174_v58  ;;  %3297 = vmatpush.msra.mxu3 %v3105_v36  ;;  %6083 = vst [vmem:[#allocation41_spill] sm:$0xff] %v5481_v13  ;;  %v3099_v58 = vld [vmem:[#allocation7 + $0x988] sm:$0xff]  ;;  %v5483_v36 = vpop.f32.mrf.mxu2  ;;  %v3078_v13 = vld [vmem:[#allocation2 + $0x48] sm:$0x7] }
 0x293   :  { %3220 = vmatpush.msra.mxu0 %v3102_v6  ;;  %3243 = vmatpush.msra.mxu1 %v3140_v23  ;;  %v3096_v6 = vld [vmem:[#allocation7 + $0x970] sm:$0xff]  ;;  %v3134_v23 = vld [vmem:[#allocation7 + $0xaa0] sm:$0xff]  ;;  %v3200_v61 = vrot.slane %v3078_v13, 3 }
 0x294   :  { %3269 = vmatpush.msra.mxu2 %v3172_v28  ;;  %3298 = vmatpush.msra.mxu3 %v3103_v15  ;;  %v3166_v28 = vld [vmem:[#allocation7 + $0xba0] sm:$0xff]  ;;  %v3097_v15 = vld [vmem:[#allocation7 + $0x978] sm:$0xff] }
 0x295   :  { %3221 = vmatpush.msra.mxu0 %v3100_v3  ;;  %3244 = vmatpush.msra.mxu1 %v3138_v32  ;;  %v5489_v3 = vpop.f32.mrf.mxu1  ;;  %v3094_v32 = vld [vmem:[#allocation7 + $0x960] sm:$0xff] }
 0x296   :  { %3270 = vmatpush.msra.mxu2 %v3170_v33  ;;  %3299 = vmatpush.msra.mxu3 %v3101_v20  ;;  %6084 = vst [vmem:[#allocation48_spill] sm:$0xff] %v5489_v3  ;;  %v3132_v33 = vld [vmem:[#allocation7 + $0xa90] sm:$0xff]  ;;  %v3130_v20 = vld [vmem:[#allocation7 + $0xa80] sm:$0xff] }
 0x297   :  { %3010 = vmatmul.f32.gmra.mxu1 %v5356_v55  ;;  %3036 = vmatmul.f32.gmra.mxu2 %v5373_v59  ;;  %v3164_v55 = vld [vmem:[#allocation7 + $0xb90] sm:$0xff]  ;;  %v3095_v59 = vld [vmem:[#allocation7 + $0x968] sm:$0xff] }
 0x298   :  { %3222 = vmatpush.msra.mxu0 %v3098_v62  ;;  %3245 = vmatpush.msra.mxu1 %v3136_v43  ;;  %v3092_v43 = vld [vmem:[#allocation7 + $0x950] sm:$0xff]  ;;  %v3162_v62 = vld [vmem:[#allocation7 + $0xb80] sm:$0xff] }
 0x299   :  { %3271 = vmatpush.msra.mxu2 %v3168_v35  ;;  %3300 = vmatpush.msra.mxu3 %v3099_v58  ;;  %v3093_v35 = vld [vmem:[#allocation7 + $0x958] sm:$0xff]  ;;  %v5491_v58 = vpop.f32.mrf.mxu3  ;;  %v5560_v3 = vld [vmem:[#allocation2 + $0x28] sm:$0xff] }
 0x29a   :  { %2987 = vmatmul.f32.gmra.mxu0 %v5407_v24  ;;  %3065 = vmatmul.f32.gmra.mxu3 %v5407_v24  ;;  %6085 = vst [vmem:[#allocation49_spill] sm:$0xff] %v5491_v58  ;;  %v3090_v24 = vld [vmem:[#allocation7 + $0x940] sm:$0xff]  ;;  %v3401_v58 = vld [vmem:[#allocation8 + $0x9b8] sm:$0xff] }
 0x29b   :  { %3223 = vmatpush.msra.mxu0 %v3096_v6  ;;  %3246 = vmatpush.msra.mxu1 %v3134_v23  ;;  %v5493_v6 = vpop.f32.mrf.mxu0  ;;  %v3160_v23 = vld [vmem:[#allocation7 + $0xb70] sm:$0xff] }
 0x29c   :  { %3272 = vmatpush.msra.mxu2 %v3166_v28  ;;  %3301 = vmatpush.msra.mxu3 %v3097_v15  ;;  %6086 = vst [vmem:[#allocation32_spill] sm:$0xff] %v5493_v6  ;;  %v3091_v28 = vld [vmem:[#allocation7 + $0x948] sm:$0xff]  ;;  %v5495_v15 = vpop.f32.mrf.mxu2 }
 0x29d   :  { %3224 = vmatpush.msra.mxu0 %v3094_v32  ;;  %3247 = vmatpush.msra.mxu1 %v3132_v33  ;;  %6087 = vst [vmem:[#allocation35_spill] sm:$0xff] %v5495_v15  ;;  %v3088_v32 = vld [vmem:[#allocation7 + $0x930] sm:$0xff]  ;;  %v3126_v33 = vld [vmem:[#allocation7 + $0xa60] sm:$0xff]  ;;  %v3135_v6 = vld [vmem:[#allocation7 + $0xaa8] sm:$0xff] }
 0x29e   :  { %3273 = vmatpush.msra.mxu2 %v3164_v55  ;;  %3302 = vmatpush.msra.mxu3 %v3095_v59  ;;  %v3158_v55 = vld [vmem:[#allocation7 + $0xb60] sm:$0xff]  ;;  %v3089_v59 = vld [vmem:[#allocation7 + $0x938] sm:$0xff]  ;;  %v3387_v15 = vld [vmem:[#allocation8 + $0x948] sm:$0xff] }
 0x29f   :  { %3225 = vmatpush.msra.mxu0 %v3092_v43  ;;  %3248 = vmatpush.msra.mxu1 %v3130_v20  ;;  %v3086_v43 = vld [vmem:[#allocation7 + $0x920] sm:$0xff]  ;;  %v3124_v20 = vld [vmem:[#allocation7 + $0xa50] sm:$0xff] }
 0x2a0   :  { %3274 = vmatpush.msra.mxu2 %v3162_v62  ;;  %3303 = vmatpush.msra.mxu3 %v3093_v35  ;;  %v5499_v62 = vpop.f32.mrf.mxu1  ;;  %v3156_v35 = vld [vmem:[#allocation7 + $0xb50] sm:$0xff] }
 0x2a1   :  { %3013 = vmatmul.f32.gmra.mxu1 %v5389_v25  ;;  %3039 = vmatmul.f32.gmra.mxu2 %v5402_v21  ;;  %6088 = vst [vmem:[#allocation44_spill] sm:$0xff] %v5499_v62  ;;  %v3084_v25 = vld [vmem:[#allocation7 + $0x910] sm:$0xff]  ;;  %v3122_v21 = vld [vmem:[#allocation7 + $0xa40] sm:$0xff] }
 0x2a2   :  { %3226 = vmatpush.msra.mxu0 %v3090_v24  ;;  %3249 = vmatpush.msra.mxu1 %v3128_v45  ;;  %v3154_v45 = vld [vmem:[#allocation7 + $0xb40] sm:$0xff]  ;;  %v3085_v24 = vld [vmem:[#allocation7 + $0x918] sm:$0xff] }
 0x2a3   :  { %3275 = vmatpush.msra.mxu2 %v3160_v23  ;;  %3304 = vmatpush.msra.mxu3 %v3091_v28  ;;  %v3082_v23 = vld [vmem:[#allocation7 + $0x900] sm:$0xff]  ;;  %v3120_v28 = vld [vmem:[#allocation7 + $0xa30] sm:$0xff] }
 0x2a4   :  { %3227 = vmatpush.msra.mxu0 %v3088_v32  ;;  %3250 = vmatpush.msra.mxu1 %v3126_v33  ;;  %v5501_v32 = vld [vmem:[#allocation2 + $0x18] sm:$0xff]  ;;  %v5508_v63 = vpop.f32.mrf.mxu2  ;;  %v5527_v62 = vld [vmem:[#allocation2 + $0x8] sm:$0xff] }
 0x2a5   :  { %3276 = vmatpush.msra.mxu2 %v3158_v55  ;;  %3305 = vmatpush.msra.mxu3 %v3089_v59  ;;  %v5976_v33 = vrot.slane %v5501_v32, 3  ;;  %v3083_v55 = vld [vmem:[#allocation7 + $0x908] sm:$0xff]  ;;  %v5504_v59 = vpop.f32.mrf.mxu0  ;;  %6090 = vst [vmem:[#allocation15_spill] sm:$0xff] %v5508_v63  ;;  %v5979_v44 = vrot.slane %v5527_v62, 3  ;;  %v3080_v63 = vld [vmem:[#allocation2 + $0x40] sm:$0x7] }
 0x2a6   :  { %3228 = vmatpush.msra.mxu0 %v3086_v43  ;;  %3251 = vmatpush.msra.mxu1 %v3124_v20  ;;  %v5506_v43 = vpop.f32.mrf.mxu3  ;;  %v3440_v20 = vld [vmem:[#allocation8 + $0xaf0] sm:$0xff] }
 0x2a7   :  { %3277 = vmatpush.msra.mxu2 %v3156_v35  ;;  %3306 = vmatpush.msra.mxu3 %v3087_v19  ;;  %6089 = vst [vmem:[#allocation14_spill] sm:$0xff] %v5506_v43  ;;  %v3145_v19 = vld [vmem:[#allocation7 + $0xaf8] sm:$0xff]  ;;  %v3171_v43 = vld [vmem:[#allocation7 + $0xbc8] sm:$0xff] }
 0x2a8   :  { %3229 = vmatpush.msra.mxu0 %v3084_v25  ;;  %3252 = vmatpush.msra.mxu1 %v3122_v21  ;;  %v3076_v35 = vld [vmem:[#allocation2] sm:$0xf8]  ;;  %v5513_v25 = vsel %vm3184_vm3, %v3185_v1, %v5976_v33  ;;  %v3436_v1 = vld [vmem:[#allocation8 + $0xad0] sm:$0xff] }
 0x2a9   :  { %3278 = vmatpush.msra.mxu2 %v3154_v45  ;;  %3307 = vmatpush.msra.mxu3 %v3085_v24  ;;  %v3118_v21 = vld [vmem:[#allocation7 + $0xa20] sm:$0xff]  ;;  %v3143_v45 = vld [vmem:[#allocation7 + $0xae8] sm:$0xff]  ;;  %v3188_v33 = vrot.slane %v3076_v35, 3 }
 0x2aa   :  { %3230 = vmatpush.msra.mxu0 %v3082_v23  ;;  %3253 = vmatpush.msra.mxu1 %v3120_v28  ;;  %v3438_v24 = vld [vmem:[#allocation8 + $0xae0] sm:$0xff]  ;;  %v5517_v23 = vpop.f32.mrf.mxu1  ;;  %v3148_v28 = vld [vmem:[#allocation7 + $0xb10] sm:$0xff] }
 0x2ab   :  { %3279 = vmatpush.msra.mxu2 %v3152_v49  ;;  %3308 = vmatpush.msra.mxu3 %v3083_v55  ;;  %6091 = vst [vmem:[#allocation42_spill] sm:$0xff] %v5517_v23  ;;  %v3116_v49 = vld [vmem:[#allocation7 + $0xa10] sm:$0xff]  ;;  %v3141_v55 = vld [vmem:[#allocation7 + $0xad8] sm:$0xff] }
 0x2ac   :  { %3231 = vmatmul.f32.vlgmr.msra.gmra.mxu0 %v5513_v25  ;;  %3309 = vmatmul.f32.vlgmr.msra.gmra.mxu3 %v5513_v25 }
 0x2ad   :  { %3319 = vmatpush.msrb.mxu0 %v3145_v19  ;;  %3500 = vmatpush.msrb.mxu3 %v3440_v20  ;;  %v3114_v19 = vld [vmem:[#allocation7 + $0xa00] sm:$0xff] }
 0x2ae   :  { %3254 = vmatpush.msra.mxu1 %v3118_v21  ;;  %3280 = vmatpush.msra.mxu2 %v3150_v38  ;;  %v3146_v20 = vld [vmem:[#allocation7 + $0xb00] sm:$0xff]  ;;  %v3139_v38 = vld [vmem:[#allocation7 + $0xac8] sm:$0xff]  ;;  %v3177_v21 = vld [vmem:[#allocation7 + $0xbf8] sm:$0xff]  ;;  %v5525_v35 = vpop.f32.mrf.mxu3 }
 0x2af   :  { %3320 = vmatpush.msrb.mxu0 %v3143_v45  ;;  %3501 = vmatpush.msrb.mxu3 %v3438_v24  ;;  %6092 = vst [vmem:[#allocation43_spill] sm:$0xff] %v5525_v35  ;;  %v5533_v45 = vsel %vm3184_vm3, %v3188_v33, %v5978_v4  ;;  %v5538_v24 = vsel %vm3184_vm3, %v3191_v50, %v5977_v31  ;;  %v3175_v33 = vld [vmem:[#allocation7 + $0xbe8] sm:$0xff]  ;;  %v6095_v50 = vrot.slane %v5501_v32, 3  ;;  %v3406_v31 = vld [vmem:[#allocation8 + $0x9e0] sm:$0xff]  ;;  %v3432_v4 = vld [vmem:[#allocation8 + $0xab0] sm:$0xff]  ;;  %v6098_v35 = vrot.slane %v5519_v27, 3 }
 0x2b0   :  { %3255 = vmatpush.msra.mxu1 %v3116_v49  ;;  %3281 = vmatpush.msra.mxu2 %v3148_v28  ;;  %v3408_v49 = vld [vmem:[#allocation8 + $0x9f0] sm:$0xff]  ;;  %v3434_v28 = vld [vmem:[#allocation8 + $0xac0] sm:$0xff] }
 0x2b1   :  { %3321 = vmatpush.msrb.mxu0 %v3141_v55  ;;  %3502 = vmatpush.msrb.mxu3 %v3436_v1  ;;  %v5540_v55 = vpop.f32.mrf.mxu0  ;;  %v5542_v1 = vpop.f32.mrf.mxu2 }
 0x2b2   :  { %3256 = vmatpush.msra.mxu1 %v3114_v19  ;;  %3282 = vmatpush.msra.mxu2 %v3146_v20  ;;  %6093 = vst [vmem:[#allocation50_spill] sm:$0xff] %v5540_v55  ;;  %v3137_v19 = vld [vmem:[#allocation7 + $0xab8] sm:$0xff]  ;;  %v5551_v20 = vsel %vm3184_vm3, %v6095_v50, %v5979_v44  ;;  %v3394_v55 = vld [vmem:[#allocation8 + $0x980] sm:$0xff] }
 0x2b3   :  { %6094 = vst [vmem:[#allocation51_spill] sm:$0xff] %v5542_v1  ;;  %3257 = vmatmul.f32.vlgmr.msra.gmra.mxu1 %v5533_v45  ;;  %3283 = vmatmul.f32.vlgmr.msra.gmra.mxu2 %v5538_v24  ;;  %v5557_v50 = vld [vmem:[#allocation2 + $0x38] sm:$0xff]  ;;  %v3204_v1 = vrot.slane %v3080_v63, 3 }
 0x2b4   :  { %3322 = vmatpush.msrb.mxu0 %v3139_v38  ;;  %3345 = vmatpush.msrb.mxu1 %v3177_v21  ;;  %v3173_v38 = vld [vmem:[#allocation7 + $0xbd8] sm:$0xff]  ;;  %v5555_v21 = vpop.f32.mrf.mxu1  ;;  %v5980_v44 = vrot.slane %v5557_v50, 3 }
 0x2b5   :  { %3474 = vmatpush.msrb.mxu2 %v3408_v49  ;;  %3503 = vmatpush.msrb.mxu3 %v3434_v28  ;;  %6096 = vst [vmem:[#allocation52_spill] sm:$0xff] %v5555_v21  ;;  %v3404_v49 = vld [vmem:[#allocation8 + $0x9d0] sm:$0xff]  ;;  %v3430_v28 = vld [vmem:[#allocation8 + $0xaa0] sm:$0xff] }
 0x2b6   :  { %3234 = vmatmul.f32.gmra.mxu0 %v5551_v20  ;;  %3312 = vmatmul.f32.gmra.mxu3 %v5551_v20  ;;  %v3402_v21 = vld [vmem:[#allocation8 + $0x9c0] sm:$0xff] }
 0x2b7   :  { %3323 = vmatpush.msrb.mxu0 %v3137_v19  ;;  %3346 = vmatpush.msrb.mxu1 %v3175_v33  ;;  %v3428_v19 = vld [vmem:[#allocation8 + $0xa90] sm:$0xff]  ;;  %v5563_v33 = vpop.f32.mrf.mxu3 }
 0x2b8   :  { %3475 = vmatpush.msrb.mxu2 %v3406_v31  ;;  %3504 = vmatpush.msrb.mxu3 %v3432_v4  ;;  %v3131_v31 = vld [vmem:[#allocation7 + $0xa88] sm:$0xff]  ;;  %v3169_v4 = vld [vmem:[#allocation7 + $0xbb8] sm:$0xff]  ;;  %6097 = vst [vmem:[#allocation53_spill] sm:$0xff] %v5563_v33 }
 0x2b9   :  { %3324 = vmatpush.msrb.mxu0 %v3135_v6  ;;  %3347 = vmatpush.msrb.mxu1 %v3173_v38  ;;  %v5570_v6 = vsel %vm3184_vm3, %v6098_v35, %v5980_v44  ;;  %v6099_v38 = vrot.slane %v5560_v3, 3  ;;  %v5579_v33 = vpop.f32.mrf.mxu0  ;;  %v5581_v13 = vpop.f32.mrf.mxu2  ;;  %v3129_v35 = vld [vmem:[#allocation7 + $0xa78] sm:$0xff]  ;;  %v3398_v44 = vld [vmem:[#allocation8 + $0x9a0] sm:$0xff] }
 0x2ba   :  { %3476 = vmatpush.msrb.mxu2 %v3404_v49  ;;  %3505 = vmatpush.msrb.mxu3 %v3430_v28  ;;  %v6100_v49 = vrot.slane %v5522_v54, 3  ;;  %v3426_v28 = vld [vmem:[#allocation8 + $0xa80] sm:$0xff]  ;;  %6101 = vst [vmem:[#allocation54_spill] sm:$0xff] %v5579_v33  ;;  %v3424_v33 = vld [vmem:[#allocation8 + $0xa70] sm:$0xff] }
 0x2bb   :  { %3325 = vmatpush.msrb.mxu0 %v3133_v16  ;;  %3348 = vmatpush.msrb.mxu1 %v3171_v43  ;;  %v3400_v43 = vld [vmem:[#allocation8 + $0x9b0] sm:$0xff]  ;;  %6102 = vst [vmem:[#allocation55_spill] sm:$0xff] %v5581_v13  ;;  %v3127_v13 = vld [vmem:[#allocation7 + $0xa68] sm:$0xff] }
 0x2bc   :  { %3477 = vmatpush.msrb.mxu2 %v3402_v21  ;;  %3506 = vmatpush.msrb.mxu3 %v3428_v19  ;;  %v5577_v16 = vsel %vm3184_vm3, %v6100_v49, %v6099_v38  ;;  %v3167_v21 = vld [vmem:[#allocation7 + $0xba8] sm:$0xff]  ;;  %v6103_v38 = vrot.slane %v5527_v62, 3 }
 0x2bd   :  { %3260 = vmatmul.f32.gmra.mxu1 %v5570_v6  ;;  %3286 = vmatmul.f32.gmra.mxu2 %v5577_v16  ;;  %v3079_v19 = vld [vmem:[#allocation2 + $0x10] sm:$0x7] }
 0x2be   :  { %3326 = vmatpush.msrb.mxu0 %v3131_v31  ;;  %3349 = vmatpush.msrb.mxu1 %v3169_v4  ;;  %v5588_v49 = vsel %vm3184_vm3, %v6103_v38, %v3200_v61  ;;  %v3165_v31 = vld [vmem:[#allocation7 + $0xb98] sm:$0xff]  ;;  %v5592_v4 = vpop.f32.mrf.mxu1  ;;  %v3163_v61 = vld [vmem:[#allocation7 + $0xb88] sm:$0xff]  ;;  %v3202_v38 = vrot.slane %v3079_v19, 3  ;;  %v3392_v19 = vld [vmem:[#allocation8 + $0x970] sm:$0xff] }
 0x2bf   :  { %3478 = vmatpush.msrb.mxu2 %v3400_v43  ;;  %3507 = vmatpush.msrb.mxu3 %v3426_v28  ;;  %6104 = vst [vmem:[#allocation56_spill] sm:$0xff] %v5592_v4  ;;  %v3396_v43 = vld [vmem:[#allocation8 + $0x990] sm:$0xff]  ;;  %v3422_v28 = vld [vmem:[#allocation8 + $0xa60] sm:$0xff]  ;;  %v5596_v4 = vpop.f32.mrf.mxu3 }
 0x2c0   :  { %3237 = vmatmul.f32.gmra.mxu0 %v5588_v49  ;;  %3315 = vmatmul.f32.gmra.mxu3 %v5588_v49  ;;  %6106 = vst [vmem:[#allocation58_spill] sm:$0xff] %v5596_v4  ;;  %v3155_v4 = vld [vmem:[#allocation7 + $0xb48] sm:$0xff] }
 0x2c1   :  { %3327 = vmatpush.msrb.mxu0 %v3129_v35  ;;  %3350 = vmatpush.msrb.mxu1 %v3167_v21  ;;  %v5594_v42 = vpop.f32.mrf.mxu0  ;;  %v3123_v35 = vld [vmem:[#allocation7 + $0xa48] sm:$0xff]  ;;  %v3161_v21 = vld [vmem:[#allocation7 + $0xb78] sm:$0xff] }
 0x2c2   :  { %3479 = vmatpush.msrb.mxu2 %v3398_v44  ;;  %3508 = vmatpush.msrb.mxu3 %v3424_v33  ;;  %6105 = vst [vmem:[#allocation57_spill] sm:$0xff] %v5594_v42  ;;  %v6107_v44 = vrot.slane %v5557_v50, 3  ;;  %v6108_v33 = vrot.slane %v5560_v3, 3  ;;  %v3117_v42 = vld [vmem:[#allocation7 + $0xa18] sm:$0xff] }
 0x2c3   :  { %3328 = vmatpush.msrb.mxu0 %v3127_v13  ;;  %3351 = vmatpush.msrb.mxu1 %v3165_v31  ;;  %v3418_v31 = vld [vmem:[#allocation8 + $0xa40] sm:$0xff] }
 0x2c4   :  { %3480 = vmatpush.msrb.mxu2 %v3396_v43  ;;  %3509 = vmatpush.msrb.mxu3 %v3422_v28  ;;  %v5601_v63 = vsel %vm3184_vm3, %v6107_v44, %v3202_v38  ;;  %v5606_v13 = vsel %vm3184_vm3, %v6108_v33, %v3204_v1  ;;  %v3390_v43 = vld [vmem:[#allocation8 + $0x960] sm:$0xff]  ;;  %v3416_v28 = vld [vmem:[#allocation8 + $0xa30] sm:$0xff]  ;;  %v3119_v1 = vld [vmem:[#allocation7 + $0xa28] sm:$0xff] }
 0x2c5   :  { %3329 = vmatpush.msrb.mxu0 %v3125_v52  ;;  %3352 = vmatpush.msrb.mxu1 %v3163_v61  ;;  %v5608_v52 = vpop.f32.mrf.mxu2  ;;  %v3157_v38 = vld [vmem:[#allocation7 + $0xb58] sm:$0xff]  ;;  %v3388_v44 = vld [vmem:[#allocation8 + $0x950] sm:$0xff]  ;;  %v3414_v33 = vld [vmem:[#allocation8 + $0xa20] sm:$0xff] }
 0x2c6   :  { %3481 = vmatpush.msrb.mxu2 %v3394_v55  ;;  %3510 = vmatpush.msrb.mxu3 %v3420_v11  ;;  %6109 = vst [vmem:[#allocation59_spill] sm:$0xff] %v5608_v52  ;;  %v3121_v55 = vld [vmem:[#allocation7 + $0xa38] sm:$0xff]  ;;  %v3159_v11 = vld [vmem:[#allocation7 + $0xb68] sm:$0xff]  ;;  %v5612_v61 = vpop.f32.mrf.mxu1 }
 0x2c7   :  { %3263 = vmatmul.f32.gmra.mxu1 %v5601_v63  ;;  %3289 = vmatmul.f32.gmra.mxu2 %v5606_v13  ;;  %6110 = vst [vmem:[#allocation60_spill] sm:$0xff] %v5612_v61  ;;  %v3115_v52 = vld [vmem:[#allocation7 + $0xa08] sm:$0xff]  ;;  %v3153_v61 = vld [vmem:[#allocation7 + $0xb38] sm:$0xff] }
 0x2c8   :  { %3330 = vmatpush.msrb.mxu0 %v3123_v35  ;;  %3353 = vmatpush.msrb.mxu1 %v3161_v21  ;;  %v3386_v35 = vld [vmem:[#allocation8 + $0x940] sm:$0xff]  ;;  %v3412_v21 = vld [vmem:[#allocation8 + $0xa10] sm:$0xff] }
 0x2c9   :  { %3482 = vmatpush.msrb.mxu2 %v3392_v19  ;;  %3511 = vmatpush.msrb.mxu3 %v3418_v31  ;;  %v5614_v19 = vpop.f32.mrf.mxu3  ;;  %v3384_v31 = vld [vmem:[#allocation8 + $0x930] sm:$0xff] }
 0x2ca   :  { %3331 = vmatpush.msrb.mxu0 %v3121_v55  ;;  %3354 = vmatpush.msrb.mxu1 %v3159_v11  ;;  %v3410_v55 = vld [vmem:[#allocation8 + $0xa00] sm:$0xff]  ;;  %v5616_v11 = vpop.f32.mrf.mxu0 }
 0x2cb   :  { %3483 = vmatpush.msrb.mxu2 %v3390_v43  ;;  %3512 = vmatpush.msrb.mxu3 %v3416_v28  ;;  %6111 = vst [vmem:[#allocation61_spill] sm:$0xff] %v5616_v11  ;;  %v3472_v28 = vld [vmem:[#allocation8 + $0xbf0] sm:$0xff]  ;;  %v3466_v11 = vld [vmem:[#allocation8 + $0xbc0] sm:$0xff] }
 0x2cc   :  { %3332 = vmatpush.msrb.mxu0 %v3119_v1  ;;  %3355 = vmatpush.msrb.mxu1 %v3157_v38  ;;  %v3473_v1 = vld [vmem:[#allocation8 + $0xbf8] sm:$0xff]  ;;  %v3151_v38 = vld [vmem:[#allocation7 + $0xb28] sm:$0xff] }
 0x2cd   :  { %3484 = vmatpush.msrb.mxu2 %v3388_v44  ;;  %3513 = vmatpush.msrb.mxu3 %v3414_v33  ;;  %v5618_v43 = vpop.f32.mrf.mxu2  ;;  %v3382_v44 = vld [vmem:[#allocation8 + $0x920] sm:$0xff] }
 0x2ce   :  { %3333 = vmatpush.msrb.mxu0 %v3117_v42  ;;  %3356 = vmatpush.msrb.mxu1 %v3155_v4  ;;  %6112 = vst [vmem:[#allocation62_spill] sm:$0xff] %v5618_v43  ;;  %v3470_v42 = vld [vmem:[#allocation8 + $0xbe0] sm:$0xff]  ;;  %v3471_v4 = vld [vmem:[#allocation8 + $0xbe8] sm:$0xff]  ;;  %v5622_v33 = vpop.f32.mrf.mxu1  ;;  %v3409_v43 = vld [vmem:[#allocation8 + $0x9f8] sm:$0xff] }
 0x2cf   :  { %3485 = vmatpush.msrb.mxu2 %v3386_v35  ;;  %3514 = vmatpush.msrb.mxu3 %v3412_v21  ;;  %6113 = vst [vmem:[#allocation63_spill] sm:$0xff] %v5622_v33  ;;  %v3149_v35 = vld [vmem:[#allocation7 + $0xb18] sm:$0xff]  ;;  %v3380_v21 = vld [vmem:[#allocation8 + $0x910] sm:$0xff]  ;;  %v3458_v33 = vld [vmem:[#allocation8 + $0xb80] sm:$0xff] }
 0x2d0   :  { %3334 = vmatpush.msrb.mxu0 %v3115_v52  ;;  %3357 = vmatpush.msrb.mxu1 %v3153_v61  ;;  %v3468_v52 = vld [vmem:[#allocation8 + $0xbd0] sm:$0xff]  ;;  %v3469_v61 = vld [vmem:[#allocation8 + $0xbd8] sm:$0xff] }
 0x2d1   :  { %3486 = vmatpush.msrb.mxu2 %v3384_v31  ;;  %3515 = vmatpush.msrb.mxu3 %v3410_v55  ;;  %v3147_v31 = vld [vmem:[#allocation7 + $0xb08] sm:$0xff]  ;;  %v3378_v55 = vld [vmem:[#allocation8 + $0x900] sm:$0xff]  ;;  %v5624_v23 = vpop.f32.mrf.mxu3 }
 0x2d2   :  { %3335 = vmatmul.f32.vlgmr.msrb.gmra.mxu0 %v5533_v45  ;;  %3516 = vmatmul.f32.vlgmr.msrb.gmra.mxu3 %v5533_v45 }
 0x2d3   :  { %3526 = vmatpush.msra.mxu0 %v3472_v28  ;;  %3604 = vmatpush.msra.mxu3 %v3473_v1  ;;  %v3441_v28 = vld [vmem:[#allocation8 + $0xaf8] sm:$0xff]  ;;  %v3467_v1 = vld [vmem:[#allocation8 + $0xbc8] sm:$0xff] }
 0x2d4   :  { %3358 = vmatpush.msrb.mxu1 %v3151_v38  ;;  %3487 = vmatpush.msrb.mxu2 %v3382_v44  ;;  %v5626_v38 = vpop.f32.mrf.mxu0 }
 0x2d5   :  { %3527 = vmatpush.msra.mxu0 %v3470_v42  ;;  %3605 = vmatpush.msra.mxu3 %v3471_v4  ;;  %6114 = vst [vmem:[#allocation64_spill] sm:$0xff] %v5626_v38  ;;  %v5628_v44 = vpop.f32.mrf.mxu2  ;;  %v3464_v42 = vld [vmem:[#allocation8 + $0xbb0] sm:$0xff]  ;;  %v3407_v4 = vld [vmem:[#allocation8 + $0x9e8] sm:$0xff] }
 0x2d6   :  { %3359 = vmatpush.msrb.mxu1 %v3149_v35  ;;  %3488 = vmatpush.msrb.mxu2 %v3380_v21  ;;  %6115 = vst [vmem:[#allocation65_spill] sm:$0xff] %v5628_v44  ;;  %v3439_v35 = vld [vmem:[#allocation8 + $0xae8] sm:$0xff]  ;;  %v3465_v21 = vld [vmem:[#allocation8 + $0xbb8] sm:$0xff] }
 0x2d7   :  { %3528 = vmatpush.msra.mxu0 %v3468_v52  ;;  %3606 = vmatpush.msra.mxu3 %v3469_v61  ;;  %v3462_v52 = vld [vmem:[#allocation8 + $0xba0] sm:$0xff]  ;;  %v3405_v61 = vld [vmem:[#allocation8 + $0x9d8] sm:$0xff]  ;;  %v3463_v38 = vld [vmem:[#allocation8 + $0xba8] sm:$0xff] }
 0x2d8   :  { %3360 = vmatpush.msrb.mxu1 %v3147_v31  ;;  %3489 = vmatpush.msrb.mxu2 %v3378_v55  ;;  %v5634_v31 = vpop.f32.mrf.mxu1  ;;  %v3437_v55 = vld [vmem:[#allocation8 + $0xad8] sm:$0xff] }
 0x2d9   :  { %3361 = vmatmul.f32.vlgmr.msrb.gmra.mxu1 %v5538_v24  ;;  %3490 = vmatmul.f32.vlgmr.msrb.gmra.mxu2 %v5513_v25  ;;  %6116 = vst [vmem:[#allocation66_spill] sm:$0xff] %v5634_v31  ;;  %v5636_v31 = vpop.f32.mrf.mxu3 }
 0x2da   :  { %3529 = vmatpush.msra.mxu0 %v3466_v11  ;;  %3552 = vmatpush.msra.mxu1 %v3409_v43  ;;  %v3460_v11 = vld [vmem:[#allocation8 + $0xb90] sm:$0xff]  ;;  %v3403_v43 = vld [vmem:[#allocation8 + $0x9c8] sm:$0xff] }
 0x2db   :  { %3578 = vmatpush.msra.mxu2 %v3441_v28  ;;  %3607 = vmatpush.msra.mxu3 %v3467_v1  ;;  %v3435_v28 = vld [vmem:[#allocation8 + $0xac8] sm:$0xff]  ;;  %v3461_v1 = vld [vmem:[#allocation8 + $0xb98] sm:$0xff] }
 0x2dc   :  { %3338 = vmatmul.f32.gmra.mxu0 %v5570_v6  ;;  %3519 = vmatmul.f32.gmra.mxu3 %v5570_v6 }
 0x2dd   :  { %3530 = vmatpush.msra.mxu0 %v3464_v42  ;;  %3553 = vmatpush.msra.mxu1 %v3407_v4  ;;  %v2775_v44 = vpop.f32.mrf.mxu0  ;;  %v3433_v42 = vld [vmem:[#allocation8 + $0xab8] sm:$0xff]  ;;  %v3459_v4 = vld [vmem:[#allocation8 + $0xb88] sm:$0xff] }
 0x2de   :  { %3579 = vmatpush.msra.mxu2 %v3439_v35  ;;  %3608 = vmatpush.msra.mxu3 %v3465_v21  ;;  %v5638_v35 = vpop.f32.mrf.mxu2  ;;  %v2776_v21 = vadd.f32 %v2775_v44, %v5614_v19  ;;  %v3429_v19 = vld [vmem:[#allocation8 + $0xa98] sm:$0xff]  ;;  %v3395_v44 = vld [vmem:[#allocation8 + $0x988] sm:$0xff] }
 0x2df   :  { %3531 = vmatpush.msra.mxu0 %v3462_v52  ;;  %3554 = vmatpush.msra.mxu1 %v3405_v61  ;;  %6117 = vst [vmem:[#allocation67_spill] sm:$0xff] %v5638_v35  ;;  %v3399_v52 = vld [vmem:[#allocation8 + $0x9a8] sm:$0xff] }
 0x2e0   :  { %3580 = vmatpush.msra.mxu2 %v3437_v55  ;;  %3609 = vmatpush.msra.mxu3 %v3463_v38  ;;  %v3456_v38 = vld [vmem:[#allocation8 + $0xb70] sm:$0xff]  ;;  %v3431_v55 = vld [vmem:[#allocation8 + $0xaa8] sm:$0xff] }
 0x2e1   :  { %3532 = vmatpush.msra.mxu0 %v3460_v11  ;;  %3555 = vmatpush.msra.mxu1 %v3403_v43  ;;  %v3457_v11 = vld [vmem:[#allocation8 + $0xb78] sm:$0xff] }
 0x2e2   :  { %3581 = vmatpush.msra.mxu2 %v3435_v28  ;;  %3610 = vmatpush.msra.mxu3 %v3461_v1  ;;  %v3454_v28 = vld [vmem:[#allocation8 + $0xb60] sm:$0xff]  ;;  %v3397_v1 = vld [vmem:[#allocation8 + $0x998] sm:$0xff] }
 0x2e3   :  { %3364 = vmatmul.f32.gmra.mxu1 %v5577_v16  ;;  %3493 = vmatmul.f32.gmra.mxu2 %v5551_v20 }
 0x2e4   :  { %3533 = vmatpush.msra.mxu0 %v3458_v33  ;;  %3556 = vmatpush.msra.mxu1 %v3401_v58  ;;  %v2801_v61 = vpop.f32.mrf.mxu1  ;;  %v3455_v33 = vld [vmem:[#allocation8 + $0xb68] sm:$0xff]  ;;  %v3452_v58 = vld [vmem:[#allocation8 + $0xb50] sm:$0xff] }
 0x2e5   :  { %3582 = vmatpush.msra.mxu2 %v3433_v42  ;;  %3611 = vmatpush.msra.mxu3 %v3459_v4  ;;  %v5643_v43 = vadd.f32 %v2801_v61, %v2776_v21  ;;  %v3427_v42 = vld [vmem:[#allocation8 + $0xa88] sm:$0xff]  ;;  %v3453_v4 = vld [vmem:[#allocation8 + $0xb58] sm:$0xff]  ;;  %v2956_v21 = vpop.f32.mrf.mxu3 }
 0x2e6   :  { %3341 = vmatmul.f32.gmra.mxu0 %v5601_v63  ;;  %3522 = vmatmul.f32.gmra.mxu3 %v5601_v63 }
 0x2e7   :  { %3534 = vmatpush.msra.mxu0 %v3456_v38  ;;  %3557 = vmatpush.msra.mxu1 %v3399_v52  ;;  %v2778_v61 = vpop.f32.mrf.mxu0  ;;  %v3393_v38 = vld [vmem:[#allocation8 + $0x978] sm:$0xff] }
 0x2e8   :  { %3583 = vmatpush.msra.mxu2 %v3431_v55  ;;  %3612 = vmatpush.msra.mxu3 %v3457_v11  ;;  %v3425_v55 = vld [vmem:[#allocation8 + $0xa78] sm:$0xff]  ;;  %v3451_v11 = vld [vmem:[#allocation8 + $0xb48] sm:$0xff] }
 0x2e9   :  { %3535 = vmatpush.msra.mxu0 %v3454_v28  ;;  %3558 = vmatpush.msra.mxu1 %v3397_v1  ;;  %v3448_v28 = vld [vmem:[#allocation8 + $0xb30] sm:$0xff]  ;;  %v3391_v1 = vld [vmem:[#allocation8 + $0x968] sm:$0xff] }
 0x2ea   :  { %3584 = vmatpush.msra.mxu2 %v3429_v19  ;;  %3613 = vmatpush.msra.mxu3 %v3455_v33  ;;  %v2930_v35 = vpop.f32.mrf.mxu2  ;;  %v2779_v19 = vadd.f32 %v2778_v61, %v5624_v23  ;;  %v3423_v33 = vld [vmem:[#allocation8 + $0xa68] sm:$0xff]  ;;  %v3445_v23 = vld [vmem:[#allocation8 + $0xb18] sm:$0xff]  ;;  %v3442_v61 = vld [vmem:[#allocation8 + $0xb00] sm:$0xff] }
 0x2eb   :  { %3536 = vmatpush.msra.mxu0 %v3452_v58  ;;  %3559 = vmatpush.msra.mxu1 %v3395_v44  ;;  %v5647_v52 = vadd.f32 %v2956_v21, %v2930_v35  ;;  %v3449_v58 = vld [vmem:[#allocation8 + $0xb38] sm:$0xff]  ;;  %v3446_v35 = vld [vmem:[#allocation8 + $0xb20] sm:$0xff] }
 0x2ec   :  { %3585 = vmatpush.msra.mxu2 %v3427_v42  ;;  %3614 = vmatpush.msra.mxu3 %v3453_v4  ;;  %v3389_v42 = vld [vmem:[#allocation8 + $0x958] sm:$0xff] }
 0x2ed   :  { %3367 = vmatmul.f32.gmra.mxu1 %v5606_v13  ;;  %3496 = vmatmul.f32.gmra.mxu2 %v5588_v49  ;;  %v3421_v21 = vld [vmem:[#allocation8 + $0xa58] sm:$0xff] }
 0x2ee   :  { %3537 = vmatpush.msra.mxu0 %v3450_v34  ;;  %3560 = vmatpush.msra.mxu1 %v3393_v38  ;;  %v2804_v44 = vpop.f32.mrf.mxu1  ;;  %v3419_v34 = vld [vmem:[#allocation8 + $0xa48] sm:$0xff]  ;;  %v3385_v38 = vld [vmem:[#allocation8 + $0x938] sm:$0xff] }
 0x2ef   :  { %3586 = vmatpush.msra.mxu2 %v3425_v55  ;;  %3615 = vmatpush.msra.mxu3 %v3451_v11  ;;  %v5652_v4 = vadd.f32 %v2804_v44, %v2779_v19  ;;  %v2959_v55 = vpop.f32.mrf.mxu3  ;;  %v3417_v11 = vld [vmem:[#allocation8 + $0xa38] sm:$0xff] }
 0x2f0   :  { %3538 = vmatpush.msra.mxu0 %v3448_v28  ;;  %3561 = vmatpush.msra.mxu1 %v3391_v1  ;;  %v3443_v28 = vld [vmem:[#allocation8 + $0xb08] sm:$0xff]  ;;  %v3674_v44 = vld [vmem:[#allocation7 + $0xcf8] sm:$0xff] }
 0x2f1   :  { %3587 = vmatpush.msra.mxu2 %v3423_v33  ;;  %3616 = vmatpush.msra.mxu3 %v3449_v58  ;;  %v2781_v1 = vpop.f32.mrf.mxu0  ;;  %v3673_v58 = vld [vmem:[#allocation7 + $0xcf0] sm:$0xff] }
 0x2f2   :  { %3539 = vmatpush.msra.mxu0 %v3446_v35  ;;  %3562 = vmatpush.msra.mxu1 %v3389_v42  ;;  %v3415_v35 = vld [vmem:[#allocation8 + $0xa28] sm:$0xff]  ;;  %v2782_v42 = vadd.f32 %v2781_v1, %v5636_v31  ;;  %v3737_v1 = vld [vmem:[#allocation7 + $0xef0] sm:$0xff] }
 0x2f3   :  { %3588 = vmatpush.msra.mxu2 %v3421_v21  ;;  %3617 = vmatpush.msra.mxu3 %v3447_v26  ;;  %v3383_v26 = vld [vmem:[#allocation8 + $0x928] sm:$0xff] }
 0x2f4   :  { %3540 = vmatpush.msra.mxu0 %v3444_v39  ;;  %3563 = vmatpush.msra.mxu1 %v3387_v15  ;;  %v2933_v19 = vpop.f32.mrf.mxu2  ;;  %v3671_v39 = vld [vmem:[#allocation7 + $0xce0] sm:$0xff]  ;;  %v3672_v15 = vld [vmem:[#allocation7 + $0xce8] sm:$0xff] }
 0x2f5   :  { %3589 = vmatpush.msra.mxu2 %v3419_v34  ;;  %3618 = vmatpush.msra.mxu3 %v3445_v23  ;;  %v5654_v33 = vadd.f32 %v2959_v55, %v2933_v19  ;;  %v3381_v34 = vld [vmem:[#allocation8 + $0x918] sm:$0xff]  ;;  %v3379_v31 = vld [vmem:[#allocation8 + $0x908] sm:$0xff] }
 0x2f6   :  { %3541 = vmatpush.msra.mxu0 %v3442_v61  ;;  %3564 = vmatpush.msra.mxu1 %v3385_v38  ;;  %v3413_v23 = vld [vmem:[#allocation8 + $0xa18] sm:$0xff]  ;;  %v3669_v38 = vld [vmem:[#allocation7 + $0xcd0] sm:$0xff]  ;;  %v3668_v19 = vld [vmem:[#allocation7 + $0xcc8] sm:$0xff] }
 0x2f7   :  { %3590 = vmatpush.msra.mxu2 %v3417_v11  ;;  %3619 = vmatpush.msra.mxu3 %v3443_v28  ;;  %v3670_v55 = vld [vmem:[#allocation7 + $0xcd8] sm:$0xff]  ;;  %v3411_v11 = vld [vmem:[#allocation8 + $0xa08] sm:$0xff]  ;;  %v3705_v28 = vld [vmem:[#allocation7 + $0xdf0] sm:$0xff] }
 0x2f8   :  { %3542 = vmatmul.f32.vlgmr.msra.gmra.mxu0 %v5538_v24  ;;  %3620 = vmatmul.f32.vlgmr.msra.gmra.mxu3 %v5538_v24  ;;  %v2807_v21 = vpop.f32.mrf.mxu1  ;;  %v3667_v24 = vld [vmem:[#allocation7 + $0xcc0] sm:$0xff] }
 0x2f9   :  { %3776 = vmatpush.msrb.mxu0 %v3673_v58  ;;  %3854 = vmatpush.msrb.mxu3 %v3674_v44  ;;  %v5659_v61 = vadd.f32 %v2807_v21, %v2782_v42  ;;  %v2962_v58 = vpop.f32.mrf.mxu3  ;;  %v3703_v42 = vld [vmem:[#allocation7 + $0xde0] sm:$0xff] }
 0x2fa   :  { %3565 = vmatpush.msra.mxu1 %v3383_v26  ;;  %3591 = vmatpush.msra.mxu2 %v3415_v35  ;;  %v3665_v35 = vld [vmem:[#allocation7 + $0xcb0] sm:$0xff]  ;;  %v3663_v21 = vld [vmem:[#allocation7 + $0xca0] sm:$0xff] }
 0x2fb   :  { %3777 = vmatpush.msrb.mxu0 %v3671_v39  ;;  %3855 = vmatpush.msrb.mxu3 %v3672_v15  ;;  %v3735_v39 = vld [vmem:[#allocation7 + $0xee0] sm:$0xff]  ;;  %v3666_v15 = vld [vmem:[#allocation7 + $0xcb8] sm:$0xff] }
 0x2fc   :  { %3566 = vmatpush.msra.mxu1 %v3381_v34  ;;  %3592 = vmatpush.msra.mxu2 %v3413_v23  ;;  %v3701_v34 = vld [vmem:[#allocation7 + $0xdd0] sm:$0xff] }
 0x2fd   :  { %3778 = vmatpush.msrb.mxu0 %v3669_v38  ;;  %3856 = vmatpush.msrb.mxu3 %v3670_v55  ;;  %v3661_v38 = vld [vmem:[#allocation7 + $0xc90] sm:$0xff]  ;;  %v3699_v55 = vld [vmem:[#allocation7 + $0xdc0] sm:$0xff] }
 0x2fe   :  { %3567 = vmatpush.msra.mxu1 %v3379_v31  ;;  %3593 = vmatpush.msra.mxu2 %v3411_v11  ;;  %v2936_v44 = vpop.f32.mrf.mxu2  ;;  %v3731_v11 = vld [vmem:[#allocation7 + $0xec0] sm:$0xff] }
 0x2ff   :  { %3568 = vmatmul.f32.vlgmr.msra.gmra.mxu1 %v5513_v25  ;;  %3594 = vmatmul.f32.vlgmr.msra.gmra.mxu2 %v5533_v45  ;;  %v5663_v26 = vadd.f32 %v2962_v58, %v2936_v44  ;;  %v3733_v25 = vld [vmem:[#allocation7 + $0xed0] sm:$0xff]  ;;  %v3664_v45 = vld [vmem:[#allocation7 + $0xca8] sm:$0xff]  ;;  %v3695_v58 = vld [vmem:[#allocation7 + $0xda0] sm:$0xff] }
 0x300   :  { %3779 = vmatpush.msrb.mxu0 %v3667_v24  ;;  %3802 = vmatpush.msrb.mxu1 %v3705_v28  ;;  %v3662_v24 = vld [vmem:[#allocation7 + $0xc98] sm:$0xff]  ;;  %v3697_v28 = vld [vmem:[#allocation7 + $0xdb0] sm:$0xff]  ;;  %v3727_v44 = vld [vmem:[#allocation7 + $0xea0] sm:$0xff] }
 0x301   :  { %3828 = vmatpush.msrb.mxu2 %v3737_v1  ;;  %3857 = vmatpush.msrb.mxu3 %v3668_v19  ;;  %v3729_v1 = vld [vmem:[#allocation7 + $0xeb0] sm:$0xff]  ;;  %v3660_v19 = vld [vmem:[#allocation7 + $0xc88] sm:$0xff] }
 0x302   :  { %3545 = vmatmul.f32.gmra.mxu0 %v5577_v16  ;;  %3623 = vmatmul.f32.gmra.mxu3 %v5577_v16  ;;  %v3659_v16 = vld [vmem:[#allocation7 + $0xc80] sm:$0xff] }
 0x303   :  { %3780 = vmatpush.msrb.mxu0 %v3665_v35  ;;  %3803 = vmatpush.msrb.mxu1 %v3703_v42  ;;  %v2982_v23 = vpop.f32.mrf.mxu0  ;;  %v3658_v35 = vld [vmem:[#allocation7 + $0xc78] sm:$0xff]  ;;  %v3655_v42 = vld [vmem:[#allocation7 + $0xc60] sm:$0xff] }
 0x304   :  { %3829 = vmatpush.msrb.mxu2 %v3735_v39  ;;  %3858 = vmatpush.msrb.mxu3 %v3666_v15  ;;  %v5668_v31 = vadd.f32 %v2982_v23, %v5647_v52  ;;  %v3657_v52 = vld [vmem:[#allocation7 + $0xc70] sm:$0xff]  ;;  %v3654_v23 = vld [vmem:[#allocation7 + $0xc58] sm:$0xff] }
 0x305   :  { %3781 = vmatpush.msrb.mxu0 %v3663_v21  ;;  %3804 = vmatpush.msrb.mxu1 %v3701_v34  ;;  %v3693_v39 = vld [vmem:[#allocation7 + $0xd90] sm:$0xff]  ;;  %v3691_v34 = vld [vmem:[#allocation7 + $0xd80] sm:$0xff] }
 0x306   :  { %3830 = vmatpush.msrb.mxu2 %v3733_v25  ;;  %3859 = vmatpush.msrb.mxu3 %v3664_v45  ;;  %v3725_v15 = vld [vmem:[#allocation7 + $0xe90] sm:$0xff]  ;;  %v3723_v45 = vld [vmem:[#allocation7 + $0xe80] sm:$0xff] }
 0x307   :  { %3782 = vmatpush.msrb.mxu0 %v3661_v38  ;;  %3805 = vmatpush.msrb.mxu1 %v3699_v55  ;;  %v3651_v55 = vld [vmem:[#allocation7 + $0xc40] sm:$0xff] }
 0x308   :  { %3831 = vmatpush.msrb.mxu2 %v3731_v11  ;;  %3860 = vmatpush.msrb.mxu3 %v3662_v24  ;;  %v3689_v11 = vld [vmem:[#allocation7 + $0xd70] sm:$0xff] }
 0x309   :  { %3571 = vmatmul.f32.gmra.mxu1 %v5551_v20  ;;  %3597 = vmatmul.f32.gmra.mxu2 %v5570_v6  ;;  %v3656_v20 = vld [vmem:[#allocation7 + $0xc68] sm:$0xff]  ;;  %v3653_v6 = vld [vmem:[#allocation7 + $0xc50] sm:$0xff] }
 0x30a   :  { %3783 = vmatpush.msrb.mxu0 %v3659_v16  ;;  %3806 = vmatpush.msrb.mxu1 %v3697_v28  ;;  %v3721_v16 = vld [vmem:[#allocation7 + $0xe70] sm:$0xff]  ;;  %v3652_v28 = vld [vmem:[#allocation7 + $0xc48] sm:$0xff] }
 0x30b   :  { %3832 = vmatpush.msrb.mxu2 %v3729_v1  ;;  %3861 = vmatpush.msrb.mxu3 %v3660_v19  ;;  %v3060_v1 = vpop.f32.mrf.mxu3  ;;  %v3687_v19 = vld [vmem:[#allocation7 + $0xd60] sm:$0xff] }
 0x30c   :  { %3548 = vmatmul.f32.gmra.mxu0 %v5606_v13  ;;  %3626 = vmatmul.f32.gmra.mxu3 %v5606_v13  ;;  %v3008_v13 = vpop.f32.mrf.mxu1 }
 0x30d   :  { %3784 = vmatpush.msrb.mxu0 %v3657_v52  ;;  %3807 = vmatpush.msrb.mxu1 %v3695_v58  ;;  %v2985_v21 = vpop.f32.mrf.mxu0  ;;  %v3719_v58 = vld [vmem:[#allocation7 + $0xe60] sm:$0xff] }
 0x30e   :  { %3833 = vmatpush.msrb.mxu2 %v3727_v44  ;;  %3862 = vmatpush.msrb.mxu3 %v3658_v35  ;;  %v5675_v25 = vadd.f32 %v2985_v21, %v5654_v33  ;;  %v3649_v33 = vld [vmem:[#allocation7 + $0xc30] sm:$0xff]  ;;  %v3650_v44 = vld [vmem:[#allocation7 + $0xc38] sm:$0xff]  ;;  %v3647_v35 = vld [vmem:[#allocation7 + $0xc20] sm:$0xff] }
 0x30f   :  { %3785 = vmatpush.msrb.mxu0 %v3655_v42  ;;  %3808 = vmatpush.msrb.mxu1 %v3693_v39  ;;  %v3685_v42 = vld [vmem:[#allocation7 + $0xd50] sm:$0xff] }
 0x310   :  { %3834 = vmatpush.msrb.mxu2 %v3725_v15  ;;  %3863 = vmatpush.msrb.mxu3 %v3656_v20  ;;  %v3034_v38 = vpop.f32.mrf.mxu2  ;;  %v3717_v39 = vld [vmem:[#allocation7 + $0xe50] sm:$0xff]  ;;  %v3648_v15 = vld [vmem:[#allocation7 + $0xc28] sm:$0xff] }
 0x311   :  { %3786 = vmatpush.msrb.mxu0 %v3653_v6  ;;  %3809 = vmatpush.msrb.mxu1 %v3691_v34  ;;  %v3035_v24 = vadd.f32 %v3034_v38, %v3008_v13  ;;  %v3636_v20 = vld [vmem:[#allocation2 + $0x30] sm:$0xf0]  ;;  %v3715_v6 = vld [vmem:[#allocation7 + $0xe40] sm:$0xff]  ;;  %v3646_v34 = vld [vmem:[#allocation7 + $0xc18] sm:$0xff] }
 0x312   :  { %3835 = vmatpush.msrb.mxu2 %v3723_v45  ;;  %3864 = vmatpush.msrb.mxu3 %v3654_v23  ;;  %v3643_v23 = vld [vmem:[#allocation7 + $0xc00] sm:$0xff]  ;;  %v3681_v13 = vld [vmem:[#allocation7 + $0xd30] sm:$0xff]  ;;  %v3746_v38 = vrot.slane %v3636_v20, 4  ;;  %v3704_v20 = vld [vmem:[#allocation7 + $0xde8] sm:$0xff] }
 0x313   :  { %3574 = vmatmul.f32.gmra.mxu1 %v5588_v49  ;;  %3600 = vmatmul.f32.gmra.mxu2 %v5601_v63  ;;  %v5679_v52 = vadd.f32 %v3060_v1, %v3035_v24  ;;  %v3645_v49 = vld [vmem:[#allocation7 + $0xc10] sm:$0xff]  ;;  %v3683_v63 = vld [vmem:[#allocation7 + $0xd40] sm:$0xff]  ;;  %v3644_v24 = vld [vmem:[#allocation7 + $0xc08] sm:$0xff] }
 0x314   :  { %3787 = vmatpush.msrb.mxu0 %v3651_v55  ;;  %3810 = vmatpush.msrb.mxu1 %v3689_v11  ;;  %v3747_v55 = vrot.slane %v5501_v32, 4  ;;  %v3713_v11 = vld [vmem:[#allocation7 + $0xe30] sm:$0xff]  ;;  %v3694_v32 = vld [vmem:[#allocation7 + $0xd98] sm:$0xff] }
 0x315   :  { %3836 = vmatpush.msrb.mxu2 %v3721_v16  ;;  %3865 = vmatpush.msrb.mxu3 %v3652_v28  ;;  %v3011_v16 = vpop.f32.mrf.mxu1 }
 0x316   :  { %3788 = vmatpush.msrb.mxu0 %v3649_v33  ;;  %3811 = vmatpush.msrb.mxu1 %v3687_v19  ;;  %v4001_v33 = vld [vmem:[#allocation8 + $0xdf0] sm:$0xff]  ;;  %v3637_v19 = vld [vmem:[#allocation2] sm:$0xf0] }
 0x317   :  { %3837 = vmatpush.msrb.mxu2 %v3719_v58  ;;  %3866 = vmatpush.msrb.mxu3 %v3650_v44  ;;  %v2988_v21 = vpop.f32.mrf.mxu0  ;;  %v3063_v58 = vpop.f32.mrf.mxu3  ;;  %v5688_v44 = vsel %vm3745_vm4, %v3746_v38, %v3747_v55 }
 0x318   :  { %3789 = vmatpush.msrb.mxu0 %v3647_v35  ;;  %3812 = vmatpush.msrb.mxu1 %v3685_v42  ;;  %v5682_v45 = vadd.f32 %v2988_v21, %v5663_v26  ;;  %v3706_v26 = vld [vmem:[#allocation7 + $0xdf8] sm:$0xff]  ;;  %v3679_v35 = vld [vmem:[#allocation7 + $0xd20] sm:$0xff]  ;;  %v3709_v21 = vld [vmem:[#allocation7 + $0xe10] sm:$0xff] }
 0x319   :  { %3838 = vmatpush.msrb.mxu2 %v3717_v39  ;;  %3867 = vmatpush.msrb.mxu3 %v3648_v15  ;;  %v3711_v42 = vld [vmem:[#allocation7 + $0xe20] sm:$0xff]  ;;  %v3638_v39 = vld [vmem:[#allocation2 + $0x58] sm:$0xf0] }
 0x31a   :  { %3790 = vmatpush.msrb.mxu0 %v3645_v49  ;;  %3813 = vmatpush.msrb.mxu1 %v3683_v63  ;;  %v3037_v28 = vpop.f32.mrf.mxu2  ;;  %v3999_v49 = vld [vmem:[#allocation8 + $0xde0] sm:$0xff]  ;;  %v3677_v63 = vld [vmem:[#allocation7 + $0xd10] sm:$0xff]  ;;  %v3752_v38 = vrot.slane %v3638_v39, 4 }
 0x31b   :  { %3839 = vmatpush.msrb.mxu2 %v3715_v6  ;;  %3868 = vmatpush.msrb.mxu3 %v3646_v34  ;;  %v3038_v1 = vadd.f32 %v3037_v28, %v3011_v16  ;;  %v3702_v6 = vld [vmem:[#allocation7 + $0xdd8] sm:$0xff]  ;;  %v3997_v34 = vld [vmem:[#allocation8 + $0xdd0] sm:$0xff]  ;;  %v3707_v16 = vld [vmem:[#allocation7 + $0xe00] sm:$0xff] }
 0x31c   :  { %3791 = vmatpush.msrb.mxu0 %v3643_v23  ;;  %3814 = vmatpush.msrb.mxu1 %v3681_v13  ;;  %v3749_v23 = vrot.slane %v3637_v19, 4  ;;  %v3750_v13 = vrot.slane %v5519_v27, 4  ;;  %v3700_v28 = vld [vmem:[#allocation7 + $0xdc8] sm:$0xff] }
 0x31d   :  { %3840 = vmatpush.msrb.mxu2 %v3713_v11  ;;  %3869 = vmatpush.msrb.mxu3 %v3644_v24  ;;  %v5690_v15 = vadd.f32 %v3063_v58, %v3038_v1  ;;  %v3753_v11 = vrot.slane %v5522_v54, 4  ;;  %v3675_v24 = vld [vmem:[#allocation7 + $0xd00] sm:$0xff]  ;;  %v3738_v1 = vld [vmem:[#allocation7 + $0xef8] sm:$0xff]  ;;  %v3969_v58 = vld [vmem:[#allocation8 + $0xcf0] sm:$0xff] }
 0x31e   :  { %3792 = vmatmul.f32.vlgmr.msrb.gmra.mxu0 %v5688_v44  ;;  %3870 = vmatmul.f32.vlgmr.msrb.gmra.mxu3 %v5688_v44  ;;  %v3728_v27 = vld [vmem:[#allocation7 + $0xea8] sm:$0xff] }
 0x31f   :  { %3880 = vmatpush.msra.mxu0 %v3706_v26  ;;  %4061 = vmatpush.msra.mxu3 %v4001_v33  ;;  %v3755_v26 = vrot.slane %v5527_v62, 4  ;;  %v5700_v33 = vsel %vm3745_vm4, %v3749_v23, %v3750_v13  ;;  %v5705_v19 = vsel %vm3745_vm4, %v3752_v38, %v3753_v11  ;;  %v3993_v23 = vld [vmem:[#allocation8 + $0xdb0] sm:$0xff]  ;;  %v3686_v62 = vld [vmem:[#allocation7 + $0xd58] sm:$0xff] }
 0x320   :  { %3815 = vmatpush.msrb.mxu1 %v3679_v35  ;;  %3841 = vmatpush.msrb.mxu2 %v3711_v42  ;;  %v3995_v35 = vld [vmem:[#allocation8 + $0xdc0] sm:$0xff]  ;;  %v3014_v42 = vpop.f32.mrf.mxu1 }
 0x321   :  { %3881 = vmatpush.msra.mxu0 %v3704_v20  ;;  %4062 = vmatpush.msra.mxu3 %v3999_v49  ;;  %v3698_v49 = vld [vmem:[#allocation7 + $0xdb8] sm:$0xff] }
 0x322   :  { %3816 = vmatpush.msrb.mxu1 %v3677_v63  ;;  %3842 = vmatpush.msrb.mxu2 %v3709_v21  ;;  %v3736_v63 = vld [vmem:[#allocation7 + $0xee8] sm:$0xff]  ;;  %v3066_v21 = vpop.f32.mrf.mxu3 }
 0x323   :  { %3882 = vmatpush.msra.mxu0 %v3702_v6  ;;  %4063 = vmatpush.msra.mxu3 %v3997_v34  ;;  %v5714_v6 = vsel %vm3745_vm4, %v3747_v55, %v3755_v26  ;;  %v3967_v34 = vld [vmem:[#allocation8 + $0xce0] sm:$0xff]  ;;  %v5982_v55 = vrot.slane %v5557_v50, 4 }
 0x324   :  { %3817 = vmatpush.msrb.mxu1 %v3675_v24  ;;  %3843 = vmatpush.msrb.mxu2 %v3707_v16  ;;  %v3040_v39 = vpop.f32.mrf.mxu2  ;;  %v3696_v24 = vld [vmem:[#allocation7 + $0xda8] sm:$0xff]  ;;  %v3734_v16 = vld [vmem:[#allocation7 + $0xed8] sm:$0xff] }
 0x325   :  { %3818 = vmatmul.f32.vlgmr.msrb.gmra.mxu1 %v5700_v33  ;;  %3844 = vmatmul.f32.vlgmr.msrb.gmra.mxu2 %v5705_v19  ;;  %v3041_v20 = vadd.f32 %v3040_v39, %v3014_v42  ;;  %v3639_v42 = vld [vmem:[#allocation2 + $0x48] sm:$0xf] }
 0x326   :  { %3883 = vmatpush.msra.mxu0 %v3700_v28  ;;  %3906 = vmatpush.msra.mxu1 %v3738_v1  ;;  %v3965_v28 = vld [vmem:[#allocation8 + $0xcd0] sm:$0xff]  ;;  %v3991_v1 = vld [vmem:[#allocation8 + $0xda0] sm:$0xff] }
 0x327   :  { %4035 = vmatpush.msra.mxu2 %v3969_v58  ;;  %4064 = vmatpush.msra.mxu3 %v3995_v35  ;;  %v5716_v38 = vadd.f32 %v3066_v21, %v3041_v20  ;;  %v3732_v58 = vld [vmem:[#allocation7 + $0xec8] sm:$0xff]  ;;  %v5981_v35 = vrot.slane %v5560_v3, 4  ;;  %v3963_v39 = vld [vmem:[#allocation8 + $0xcc0] sm:$0xff]  ;;  %v3989_v20 = vld [vmem:[#allocation8 + $0xd90] sm:$0xff]  ;;  %v3761_v21 = vrot.slane %v3639_v42, 4 }
 0x328   :  { %3795 = vmatmul.f32.gmra.mxu0 %v5714_v6  ;;  %3873 = vmatmul.f32.gmra.mxu3 %v5714_v6  ;;  %v3641_v42 = vld [vmem:[#allocation2 + $0x40] sm:$0xf] }
 0x329   :  { %3884 = vmatpush.msra.mxu0 %v3698_v49  ;;  %3907 = vmatpush.msra.mxu1 %v3736_v63  ;;  %v3692_v49 = vld [vmem:[#allocation7 + $0xd88] sm:$0xff]  ;;  %v3730_v63 = vld [vmem:[#allocation7 + $0xeb8] sm:$0xff]  ;;  %v5741_v54 = vsel %vm3745_vm4, %v3755_v26, %v3761_v21  ;;  %v3765_v21 = vrot.slane %v3641_v42, 4 }
 0x32a   :  { %4036 = vmatpush.msra.mxu2 %v3967_v34  ;;  %4065 = vmatpush.msra.mxu3 %v3993_v23  ;;  %v5727_v34 = vsel %vm3745_vm4, %v3750_v13, %v5982_v55  ;;  %v5734_v23 = vsel %vm3745_vm4, %v3753_v11, %v5981_v35  ;;  %v3232_v13 = vpop.f32.mrf.mxu0  ;;  %v3959_v11 = vld [vmem:[#allocation8 + $0xca0] sm:$0xff]  ;;  %v3684_v55 = vld [vmem:[#allocation7 + $0xd48] sm:$0xff] }
 0x32b   :  { %3885 = vmatpush.msra.mxu0 %v3696_v24  ;;  %3908 = vmatpush.msra.mxu1 %v3734_v16  ;;  %v3961_v24 = vld [vmem:[#allocation8 + $0xcb0] sm:$0xff]  ;;  %v3987_v16 = vld [vmem:[#allocation8 + $0xd80] sm:$0xff] }
 0x32c   :  { %4037 = vmatpush.msra.mxu2 %v3965_v28  ;;  %4066 = vmatpush.msra.mxu3 %v3991_v1  ;;  %v3690_v28 = vld [vmem:[#allocation7 + $0xd78] sm:$0xff]  ;;  %v3640_v1 = vld [vmem:[#allocation2 + $0x10] sm:$0xf]  ;;  %v3955_v35 = vld [vmem:[#allocation8 + $0xc80] sm:$0xff] }
 0x32d   :  { %3886 = vmatpush.msra.mxu0 %v3694_v32  ;;  %3909 = vmatpush.msra.mxu1 %v3732_v58  ;;  %v3985_v58 = vld [vmem:[#allocation8 + $0xd70] sm:$0xff]  ;;  %v3763_v26 = vrot.slane %v3640_v1, 4 }
 0x32e   :  { %4038 = vmatpush.msra.mxu2 %v3963_v39  ;;  %4067 = vmatpush.msra.mxu3 %v3989_v20  ;;  %v3688_v20 = vld [vmem:[#allocation7 + $0xd68] sm:$0xff] }
 0x32f   :  { %3821 = vmatmul.f32.gmra.mxu1 %v5727_v34  ;;  %3847 = vmatmul.f32.gmra.mxu2 %v5734_v23 }
 0x330   :  { %3887 = vmatpush.msra.mxu0 %v3692_v49  ;;  %3910 = vmatpush.msra.mxu1 %v3730_v63  ;;  %v3258_v32 = vpop.f32.mrf.mxu1  ;;  %v3726_v49 = vld [vmem:[#allocation7 + $0xe98] sm:$0xff]  ;;  %v3957_v63 = vld [vmem:[#allocation8 + $0xc90] sm:$0xff] }
 0x331   :  { %4039 = vmatpush.msra.mxu2 %v3961_v24  ;;  %4068 = vmatpush.msra.mxu3 %v3987_v16  ;;  %v3259_v39 = vadd.f32 %v3258_v32, %v3232_v13  ;;  %v3983_v24 = vld [vmem:[#allocation8 + $0xd60] sm:$0xff]  ;;  %v3724_v16 = vld [vmem:[#allocation7 + $0xe88] sm:$0xff]  ;;  %v3981_v13 = vld [vmem:[#allocation8 + $0xd50] sm:$0xff] }
 0x332   :  { %3798 = vmatmul.f32.gmra.mxu0 %v5741_v54  ;;  %3876 = vmatmul.f32.gmra.mxu3 %v5741_v54 }
 0x333   :  { %3888 = vmatpush.msra.mxu0 %v3690_v28  ;;  %3911 = vmatpush.msra.mxu1 %v3728_v27  ;;  %v3722_v28 = vld [vmem:[#allocation7 + $0xe78] sm:$0xff] }
 0x334   :  { %4040 = vmatpush.msra.mxu2 %v3959_v11  ;;  %4069 = vmatpush.msra.mxu3 %v3985_v58  ;;  %v6119_v11 = vrot.slane %v5557_v50, 4  ;;  %v6120_v58 = vrot.slane %v5560_v3, 4  ;;  %v3977_v50 = vld [vmem:[#allocation8 + $0xd30] sm:$0xff]  ;;  %v3680_v3 = vld [vmem:[#allocation7 + $0xd28] sm:$0xff] }
 0x335   :  { %3889 = vmatpush.msra.mxu0 %v3688_v20  ;;  %3912 = vmatpush.msra.mxu1 %v3726_v49  ;;  %v3953_v20 = vld [vmem:[#allocation8 + $0xc70] sm:$0xff]  ;;  %v3979_v49 = vld [vmem:[#allocation8 + $0xd40] sm:$0xff] }
 0x336   :  { %4041 = vmatpush.msra.mxu2 %v3957_v63  ;;  %4070 = vmatpush.msra.mxu3 %v3983_v24  ;;  %v3284_v32 = vpop.f32.mrf.mxu2  ;;  %v5750_v1 = vsel %vm3745_vm4, %v6119_v11, %v3763_v26  ;;  %v5755_v42 = vsel %vm3745_vm4, %v6120_v58, %v3765_v21  ;;  %v3720_v63 = vld [vmem:[#allocation7 + $0xe68] sm:$0xff]  ;;  %v3235_v24 = vpop.f32.mrf.mxu0  ;;  %v3949_v21 = vld [vmem:[#allocation8 + $0xc50] sm:$0xff] }
 0x337   :  { %3890 = vmatpush.msra.mxu0 %v3686_v62  ;;  %3913 = vmatpush.msra.mxu1 %v3724_v16  ;;  %v5745_v27 = vadd.f32 %v3284_v32, %v3259_v39  ;;  %v3682_v39 = vld [vmem:[#allocation7 + $0xd38] sm:$0xff]  ;;  %v3716_v11 = vld [vmem:[#allocation7 + $0xe48] sm:$0xff] }
 0x338   :  { %4042 = vmatpush.msra.mxu2 %v3955_v35  ;;  %4071 = vmatpush.msra.mxu3 %v3981_v13  ;;  %v3951_v35 = vld [vmem:[#allocation8 + $0xc60] sm:$0xff]  ;;  %v3718_v16 = vld [vmem:[#allocation7 + $0xe58] sm:$0xff]  ;;  %v3676_v58 = vld [vmem:[#allocation7 + $0xd08] sm:$0xff] }
 0x339   :  { %6118 = vst [vmem:[#allocation68_spill] sm:$0xff] %v5745_v27  ;;  %3824 = vmatmul.f32.gmra.mxu1 %v5750_v1  ;;  %3850 = vmatmul.f32.gmra.mxu2 %v5755_v42  ;;  %v3975_v13 = vld [vmem:[#allocation8 + $0xd20] sm:$0xff]  ;;  %v3678_v32 = vld [vmem:[#allocation7 + $0xd18] sm:$0xff] }
 0x33a   :  { %3891 = vmatpush.msra.mxu0 %v3684_v55  ;;  %3914 = vmatpush.msra.mxu1 %v3722_v28  ;;  %v3261_v62 = vpop.f32.mrf.mxu1  ;;  %v3947_v55 = vld [vmem:[#allocation8 + $0xc40] sm:$0xff]  ;;  %v3973_v28 = vld [vmem:[#allocation8 + $0xd10] sm:$0xff] }
 0x33b   :  { %4043 = vmatpush.msra.mxu2 %v3953_v20  ;;  %4072 = vmatpush.msra.mxu3 %v3979_v49  ;;  %v3262_v26 = vadd.f32 %v3261_v62, %v3235_v24  ;;  %v3714_v20 = vld [vmem:[#allocation7 + $0xe38] sm:$0xff]  ;;  %v3945_v49 = vld [vmem:[#allocation8 + $0xc30] sm:$0xff]  ;;  %v3971_v24 = vld [vmem:[#allocation8 + $0xd00] sm:$0xff] }
 0x33c   :  { %3892 = vmatpush.msra.mxu0 %v3682_v39  ;;  %3915 = vmatpush.msra.mxu1 %v3720_v63  ;;  %v5759_v39 = vpop.f32.mrf.mxu3  ;;  %v4034_v62 = vld [vmem:[#allocation8 + $0xef8] sm:$0xff] }
 0x33d   :  { %4044 = vmatpush.msra.mxu2 %v3951_v35  ;;  %4073 = vmatpush.msra.mxu3 %v3977_v50  ;;  %v4033_v50 = vld [vmem:[#allocation8 + $0xef0] sm:$0xff] }
 0x33e   :  { %3893 = vmatpush.msra.mxu0 %v3680_v3  ;;  %3916 = vmatpush.msra.mxu1 %v3718_v16  ;;  %v3712_v3 = vld [vmem:[#allocation7 + $0xe28] sm:$0xff]  ;;  %v3943_v16 = vld [vmem:[#allocation8 + $0xc20] sm:$0xff] }
 0x33f   :  { %4045 = vmatpush.msra.mxu2 %v3949_v21  ;;  %4074 = vmatpush.msra.mxu3 %v3975_v13  ;;  %v4031_v21 = vld [vmem:[#allocation8 + $0xee0] sm:$0xff]  ;;  %v4032_v13 = vld [vmem:[#allocation8 + $0xee8] sm:$0xff] }
 0x340   :  { %3894 = vmatpush.msra.mxu0 %v3678_v32  ;;  %3917 = vmatpush.msra.mxu1 %v3716_v11  ;;  %v3287_v63 = vpop.f32.mrf.mxu2  ;;  %v3238_v32 = vpop.f32.mrf.mxu0 }
 0x341   :  { %4046 = vmatpush.msra.mxu2 %v3947_v55  ;;  %4075 = vmatpush.msra.mxu3 %v3973_v28  ;;  %v5761_v35 = vadd.f32 %v3287_v63, %v3262_v26  ;;  %v3710_v26 = vld [vmem:[#allocation7 + $0xe18] sm:$0xff]  ;;  %v3941_v55 = vld [vmem:[#allocation8 + $0xc10] sm:$0xff]  ;;  %v4027_v63 = vld [vmem:[#allocation8 + $0xec0] sm:$0xff] }
 0x342   :  { %3895 = vmatpush.msra.mxu0 %v3676_v58  ;;  %3918 = vmatpush.msra.mxu1 %v3714_v20  ;;  %v4029_v58 = vld [vmem:[#allocation8 + $0xed0] sm:$0xff]  ;;  %v4030_v20 = vld [vmem:[#allocation8 + $0xed8] sm:$0xff] }
 0x343   :  { %6121 = vst [vmem:[#allocation69_spill] sm:$0xff] %v5761_v35  ;;  %4047 = vmatpush.msra.mxu2 %v3945_v49  ;;  %4076 = vmatpush.msra.mxu3 %v3971_v24  ;;  %v3708_v49 = vld [vmem:[#allocation7 + $0xe08] sm:$0xff]  ;;  %v3939_v24 = vld [vmem:[#allocation8 + $0xc00] sm:$0xff]  ;;  %v3970_v35 = vld [vmem:[#allocation8 + $0xcf8] sm:$0xff] }
 0x344   :  { %3896 = vmatmul.f32.vlgmr.msra.gmra.mxu0 %v5700_v33  ;;  %4077 = vmatmul.f32.vlgmr.msra.gmra.mxu3 %v5700_v33  ;;  %v3264_v11 = vpop.f32.mrf.mxu1  ;;  %v5765_v27 = vpop.f32.mrf.mxu3 }
 0x345   :  { %4087 = vmatpush.msrb.mxu0 %v4033_v50  ;;  %4165 = vmatpush.msrb.mxu3 %v4034_v62  ;;  %v3265_v28 = vadd.f32 %v3264_v11, %v3238_v32  ;;  %v4002_v50 = vld [vmem:[#allocation8 + $0xdf8] sm:$0xff]  ;;  %v4028_v62 = vld [vmem:[#allocation8 + $0xec8] sm:$0xff] }
 0x346   :  { %3919 = vmatpush.msra.mxu1 %v3712_v3  ;;  %4048 = vmatpush.msra.mxu2 %v3943_v16  ;;  %v1915_v16 = vadd.f32 %v5314_v9, %v5280_v8  ;;  %v3968_v32 = vld [vmem:[#allocation8 + $0xce8] sm:$0xff]  ;;  %v4023_v8 = vld [vmem:[#allocation8 + $0xea0] sm:$0xff]  ;;  %v3966_v9 = vld [vmem:[#allocation8 + $0xcd8] sm:$0xff] }
 0x347   :  { %4088 = vmatpush.msrb.mxu0 %v4031_v21  ;;  %4166 = vmatpush.msrb.mxu3 %v4032_v13  ;;  %v4025_v13 = vld [vmem:[#allocation8 + $0xeb0] sm:$0xff] }
 0x348   :  { %3920 = vmatpush.msra.mxu1 %v3710_v26  ;;  %4049 = vmatpush.msra.mxu2 %v3941_v55  ;;  %v1941_v11 = vadd.f32 %v5319_v57, %v1915_v16  ;;  %v4000_v26 = vld [vmem:[#allocation8 + $0xde8] sm:$0xff]  ;;  %v4026_v55 = vld [vmem:[#allocation8 + $0xeb8] sm:$0xff]  ;;  %v4021_v57 = vld [vmem:[#allocation8 + $0xe90] sm:$0xff] }
 0x349   :  { %4089 = vmatpush.msrb.mxu0 %v4029_v58  ;;  %4167 = vmatpush.msrb.mxu3 %v4030_v20  ;;  %v3994_v16 = vld [vmem:[#allocation8 + $0xdb8] sm:$0xff] }
 0x34a   :  { %3921 = vmatpush.msra.mxu1 %v3708_v49  ;;  %4050 = vmatpush.msra.mxu2 %v3939_v24  ;;  %v3290_v3 = vpop.f32.mrf.mxu2  ;;  %v2045_v58 = vadd.f32 %v5409_v37, %v1941_v11  ;;  %v3964_v49 = vld [vmem:[#allocation8 + $0xcc8] sm:$0xff]  ;;  %v4019_v37 = vld [vmem:[#allocation8 + $0xe80] sm:$0xff]  ;;  %v4017_v11 = vld [vmem:[#allocation8 + $0xe70] sm:$0xff] }
 0x34b   :  { %3922 = vmatmul.f32.vlgmr.msra.gmra.mxu1 %v5705_v19  ;;  %4051 = vmatmul.f32.vlgmr.msra.gmra.mxu2 %v5688_v44  ;;  %v5771_v21 = vadd.f32 %v3290_v3, %v3265_v28  ;;  %v3998_v28 = vld [vmem:[#allocation8 + $0xdd8] sm:$0xff] }
 0x34c   :  { %4090 = vmatpush.msrb.mxu0 %v4027_v63  ;;  %4113 = vmatpush.msrb.mxu1 %v3970_v35  ;;  %v4024_v35 = vld [vmem:[#allocation8 + $0xea8] sm:$0xff]  ;;  %v2071_v63 = vadd.f32 %v5417_v53, %v2045_v58  ;;  %v3962_v3 = vld [vmem:[#allocation8 + $0xcb8] sm:$0xff] }
 0x34d   :  { %4139 = vmatpush.msrb.mxu2 %v4002_v50  ;;  %4168 = vmatpush.msrb.mxu3 %v4028_v62  ;;  %v3996_v50 = vld [vmem:[#allocation8 + $0xdc8] sm:$0xff]  ;;  %v4022_v62 = vld [vmem:[#allocation8 + $0xe98] sm:$0xff] }
 0x34e   :  { %3899 = vmatmul.f32.gmra.mxu0 %v5727_v34  ;;  %4080 = vmatmul.f32.gmra.mxu3 %v5727_v34  ;;  %v2097_v53 = vadd.f32 %v5413_v12, %v2071_v63  ;;  %v3992_v58 = vld [vmem:[#allocation8 + $0xda8] sm:$0xff]  ;;  %v3958_v12 = vld [vmem:[#allocation8 + $0xc98] sm:$0xff] }
 0x34f   :  { %4091 = vmatpush.msrb.mxu0 %v4025_v13  ;;  %4114 = vmatpush.msrb.mxu1 %v3968_v32  ;;  %v3336_v20 = vpop.f32.mrf.mxu0  ;;  %v4020_v13 = vld [vmem:[#allocation8 + $0xe88] sm:$0xff]  ;;  %v5779_v32 = vpop.f32.mrf.mxu3 }
 0x350   :  { %4140 = vmatpush.msrb.mxu2 %v4000_v26  ;;  %4169 = vmatpush.msrb.mxu3 %v4026_v55  ;;  %v3337_v24 = vadd.f32 %v3336_v20, %v5759_v39  ;;  %v1918_v39 = vadd.f32 %v5330_v22, %v5296_v5  ;;  %v3960_v26 = vld [vmem:[#allocation8 + $0xca8] sm:$0xff]  ;;  %v4015_v22 = vld [vmem:[#allocation8 + $0xe60] sm:$0xff]  ;;  %v3990_v20 = vld [vmem:[#allocation8 + $0xd98] sm:$0xff] }
 0x351   :  { %4092 = vmatpush.msrb.mxu0 %v4023_v8  ;;  %4115 = vmatpush.msrb.mxu1 %v3966_v9  ;;  %v2811_v9 = vadd.f32 %v5643_v43, %v2097_v53  ;;  %v3956_v63 = vld [vmem:[#allocation8 + $0xc88] sm:$0xff]  ;;  %v3986_v53 = vld [vmem:[#allocation8 + $0xd78] sm:$0xff] }
 0x352   :  { %4141 = vmatpush.msrb.mxu2 %v3998_v28  ;;  %4170 = vmatpush.msrb.mxu3 %v4024_v35  ;;  %v1944_v8 = vadd.f32 %v5347_v18, %v1918_v39  ;;  %v4018_v28 = vld [vmem:[#allocation8 + $0xe78] sm:$0xff] }
 0x353   :  { %4093 = vmatpush.msrb.mxu0 %v4021_v57  ;;  %4116 = vmatpush.msrb.mxu1 %v3964_v49  ;;  %v4016_v57 = vld [vmem:[#allocation8 + $0xe68] sm:$0xff]  ;;  %v4013_v49 = vld [vmem:[#allocation8 + $0xe50] sm:$0xff] }
 0x354   :  { %4142 = vmatpush.msrb.mxu2 %v3996_v50  ;;  %4171 = vmatpush.msrb.mxu3 %v4022_v62  ;;  %v2048_v35 = vadd.f32 %v5419_v17, %v1944_v8  ;;  %v3988_v62 = vld [vmem:[#allocation8 + $0xd88] sm:$0xff] }
 0x355   :  { %3925 = vmatmul.f32.gmra.mxu1 %v5734_v23  ;;  %4054 = vmatmul.f32.gmra.mxu2 %v5714_v6  ;;  %v3984_v8 = vld [vmem:[#allocation8 + $0xd68] sm:$0xff] }
 0x356   :  { %4094 = vmatpush.msrb.mxu0 %v4019_v37  ;;  %4117 = vmatpush.msrb.mxu1 %v3962_v3  ;;  %v3362_v55 = vpop.f32.mrf.mxu1  ;;  %v2074_v50 = vadd.f32 %v5427_v46, %v2048_v35  ;;  %v4014_v37 = vld [vmem:[#allocation8 + $0xe58] sm:$0xff]  ;;  %v1921_v46 = vadd.f32 %v5362_v29, %v5312_v0  ;;  %v4007_v0 = vld [vmem:[#allocation8 + $0xe20] sm:$0xff] }
 0x357   :  { %4143 = vmatpush.msrb.mxu2 %v3994_v16  ;;  %4172 = vmatpush.msrb.mxu3 %v4020_v13  ;;  %v3363_v5 = vadd.f32 %v3362_v55, %v3337_v24  ;;  %v3517_v17 = vpop.f32.mrf.mxu3  ;;  %v4011_v16 = vld [vmem:[#allocation8 + $0xe40] sm:$0xff]  ;;  %v3954_v13 = vld [vmem:[#allocation8 + $0xc78] sm:$0xff]  ;;  %v3952_v55 = vld [vmem:[#allocation8 + $0xc68] sm:$0xff] }
 0x358   :  { %3902 = vmatmul.f32.gmra.mxu0 %v5750_v1  ;;  %4083 = vmatmul.f32.gmra.mxu3 %v5750_v1  ;;  %v3950_v29 = vld [vmem:[#allocation8 + $0xc58] sm:$0xff] }
 0x359   :  { %4095 = vmatpush.msrb.mxu0 %v4017_v11  ;;  %4118 = vmatpush.msrb.mxu1 %v3960_v26  ;;  %v5791_v18 = vadd.f32 %v3363_v5, %v2811_v9  ;;  %v3339_v43 = vpop.f32.mrf.mxu0  ;;  %v2100_v11 = vadd.f32 %v5423_v60, %v2074_v50  ;;  %v4009_v26 = vld [vmem:[#allocation8 + $0xe30] sm:$0xff]  ;;  %v4010_v9 = vld [vmem:[#allocation8 + $0xe38] sm:$0xff]  ;;  %v4003_v50 = vld [vmem:[#allocation8 + $0xe00] sm:$0xff] }
 0x35a   :  { %4144 = vmatpush.msrb.mxu2 %v3992_v58  ;;  %4173 = vmatpush.msrb.mxu3 %v4018_v28  ;;  %v3340_v24 = vadd.f32 %v3339_v43, %v5765_v27  ;;  %v4012_v27 = vld [vmem:[#allocation8 + $0xe48] sm:$0xff]  ;;  %v1947_v28 = vadd.f32 %v5382_v51, %v1921_v46  ;;  %v3974_v46 = vld [vmem:[#allocation8 + $0xd18] sm:$0xff] }
 0x35b   :  { %4096 = vmatpush.msrb.mxu0 %v4015_v22  ;;  %4119 = vmatpush.msrb.mxu1 %v3958_v12  ;;  %v2813_v5 = vadd.f32 %v5652_v4, %v2100_v11  ;;  %v3982_v22 = vld [vmem:[#allocation8 + $0xd58] sm:$0xff]  ;;  %v4008_v12 = vld [vmem:[#allocation8 + $0xe28] sm:$0xff] }
 0x35c   :  { %4145 = vmatpush.msrb.mxu2 %v3990_v20  ;;  %4174 = vmatpush.msrb.mxu3 %v4016_v57  ;;  %v3491_v3 = vpop.f32.mrf.mxu2  ;;  %v2051_v35 = vadd.f32 %v5431_v56, %v1947_v28  ;;  %v4005_v20 = vld [vmem:[#allocation8 + $0xe10] sm:$0xff]  ;;  %v3948_v57 = vld [vmem:[#allocation8 + $0xc48] sm:$0xff]  ;;  %v3978_v56 = vld [vmem:[#allocation8 + $0xd38] sm:$0xff] }
 0x35d   :  { %4097 = vmatpush.msrb.mxu0 %v4013_v49  ;;  %4120 = vmatpush.msrb.mxu1 %v3956_v63  ;;  %v5795_v39 = vadd.f32 %v3517_v17, %v3491_v3  ;;  %v3980_v4 = vld [vmem:[#allocation8 + $0xd48] sm:$0xff]  ;;  %v4006_v49 = vld [vmem:[#allocation8 + $0xe18] sm:$0xff] }
 0x35e   :  { %4146 = vmatpush.msrb.mxu2 %v3988_v62  ;;  %4175 = vmatpush.msrb.mxu3 %v4014_v37  ;;  %v3946_v62 = vld [vmem:[#allocation8 + $0xc38] sm:$0xff]  ;;  %v4004_v37 = vld [vmem:[#allocation8 + $0xe08] sm:$0xff] }
 0x35f   :  { %3928 = vmatmul.f32.gmra.mxu1 %v5755_v42  ;;  %4057 = vmatmul.f32.gmra.mxu2 %v5741_v54  ;;  %v3520_v17 = vpop.f32.mrf.mxu3 }
 0x360   :  { %4098 = vmatpush.msrb.mxu0 %v4011_v16  ;;  %4121 = vmatpush.msrb.mxu1 %v3954_v13  ;;  %v3365_v58 = vpop.f32.mrf.mxu1  ;;  %v3944_v13 = vld [vmem:[#allocation8 + $0xc28] sm:$0xff] }
 0x361   :  { %4147 = vmatpush.msrb.mxu2 %v3986_v53  ;;  %4176 = vmatpush.msrb.mxu3 %v4012_v27  ;;  %v3366_v60 = vadd.f32 %v3365_v58, %v3340_v24  ;;  %v2077_v24 = vadd.f32 %v5439_v41, %v2051_v35  ;;  %v3976_v53 = vld [vmem:[#allocation8 + $0xd28] sm:$0xff]  ;;  %v2246_v41 = vadd.f32 %v5443_v10, %v5437_v40  ;;  %v3942_v27 = vld [vmem:[#allocation8 + $0xc18] sm:$0xff] }
 0x362   :  { %4099 = vmatpush.msrb.mxu0 %v4009_v26  ;;  %4122 = vmatpush.msrb.mxu1 %v3952_v55  ;;  %v6128_v35 = vld [vmem:[#allocation38_spill] sm:$0xff] }
 0x363   :  { %4148 = vmatpush.msrb.mxu2 %v3984_v8  ;;  %4177 = vmatpush.msrb.mxu3 %v4010_v9  ;;  %v5805_v43 = vadd.f32 %v3366_v60, %v2813_v5  ;;  %v3342_v51 = vpop.f32.mrf.mxu0  ;;  %v2272_v8 = vadd.f32 %v5451_v7, %v2246_v41  ;;  %v3972_v9 = vld [vmem:[#allocation8 + $0xd08] sm:$0xff]  ;;  %v2249_v7 = vadd.f32 %v5455_v48, %v5449_v2 }
 0x364   :  { %4100 = vmatpush.msrb.mxu0 %v4007_v0  ;;  %4123 = vmatpush.msrb.mxu1 %v3950_v29  ;;  %v3343_v63 = vadd.f32 %v3342_v51, %v5779_v32  ;;  %v2103_v32 = vadd.f32 %v5435_v14, %v2077_v24  ;;  %v3940_v14 = vld [vmem:[#allocation8 + $0xc08] sm:$0xff] }
 0x365   :  { %4149 = vmatpush.msrb.mxu2 %v3982_v22  ;;  %4178 = vmatpush.msrb.mxu3 %v4008_v12  ;;  %v2376_v40 = vadd.f32 %v5483_v36, %v2272_v8  ;;  %v2275_v0 = vadd.f32 %v5461_v47, %v2249_v7  ;;  %v6122_v29 = vld [vmem:[#allocation35_spill] sm:$0xff]  ;;  %v6124_v22 = vld [vmem:[#allocation25_spill] sm:$0xff]  ;;  %v6125_v48 = vld [vmem:[#allocation34_spill] sm:$0xff] }
 0x366   :  { %4101 = vmatpush.msrb.mxu0 %v4005_v20  ;;  %4124 = vmatpush.msrb.mxu1 %v3948_v57  ;;  %v3494_v3 = vpop.f32.mrf.mxu2  ;;  %v2815_v26 = vadd.f32 %v5659_v61, %v2103_v32  ;;  %v6129_v20 = vld [vmem:[#allocation24_spill] sm:$0xff]  ;;  %v6130_v57 = vld [vmem:[#allocation50_spill] sm:$0xff]  ;;  %v6131_v51 = vld [vmem:[#allocation51_spill] sm:$0xff] }
 0x367   :  { %4150 = vmatpush.msrb.mxu2 %v3980_v4  ;;  %4179 = vmatpush.msrb.mxu3 %v4006_v49  ;;  %v3521_v16 = vadd.f32 %v3520_v17, %v3494_v3  ;;  %v2402_v28 = vadd.f32 %v5479_v30, %v2376_v40  ;;  %v2379_v60 = vadd.f32 %v6122_v29, %v2275_v0  ;;  %v6136_v41 = vld [vmem:[#allocation43_spill] sm:$0xff]  ;;  %v6139_v8 = vld [vmem:[#allocation52_spill] sm:$0xff]  ;;  %v6140_v40 = vld [vmem:[#allocation54_spill] sm:$0xff] }
 0x368   :  { %4102 = vmatpush.msrb.mxu0 %v4003_v50  ;;  %4125 = vmatpush.msrb.mxu1 %v3946_v62  ;;  %v6133_v62 = vld [vmem:[#allocation15_spill] sm:$0xff]  ;;  %v6143_v29 = vld [vmem:[#allocation32_spill] sm:$0xff] }
 0x369   :  { %4151 = vmatpush.msrb.mxu2 %v3978_v56  ;;  %4180 = vmatpush.msrb.mxu3 %v4004_v37  ;;  %v3523_v10 = vpop.f32.mrf.mxu3  ;;  %v2428_v36 = vadd.f32 %v5504_v59, %v2402_v28  ;;  %v6126_v59 = vld [vmem:[#allocation49_spill] sm:$0xff] }
 0x36a   :  { %4103 = vmatmul.f32.vlgmr.msrb.gmra.mxu0 %v5705_v19  ;;  %4181 = vmatmul.f32.vlgmr.msrb.gmra.mxu3 %v5705_v19  ;;  %v3368_v11 = vpop.f32.mrf.mxu1 }
 0x36b   :  { %4126 = vmatpush.msrb.mxu1 %v3944_v13  ;;  %4152 = vmatpush.msrb.mxu2 %v3976_v53  ;;  %v3369_v55 = vadd.f32 %v3368_v11, %v3343_v63  ;;  %v6132_v63 = vld [vmem:[#allocation27_spill] sm:$0xff]  ;;  %v6134_v13 = vld [vmem:[#allocation33_spill] sm:$0xff] }
 0x36c   :  { %v6135_v53 = vld [vmem:[#allocation41_spill] sm:$0xff] }
 0x36d   :  { %4127 = vmatpush.msrb.mxu1 %v3942_v27  ;;  %4153 = vmatpush.msrb.mxu2 %v3974_v46  ;;  %v5816_v58 = vadd.f32 %v3369_v55, %v2815_v26  ;;  %v2327_v32 = vadd.f32 %v6135_v53, %v6134_v13  ;;  %v6137_v26 = vld [vmem:[#allocation48_spill] sm:$0xff] }
 0x36f   :  { %4128 = vmatpush.msrb.mxu1 %v3940_v14  ;;  %4154 = vmatpush.msrb.mxu2 %v3972_v9 }
 0x370   :  { %4129 = vmatmul.f32.vlgmr.msrb.gmra.mxu1 %v5688_v44  ;;  %4155 = vmatmul.f32.vlgmr.msrb.gmra.mxu2 %v5700_v33  ;;  %v3497_v61 = vpop.f32.mrf.mxu2  ;;  %v3069_v44 = vadd.f32 %v5668_v31, %v2428_v36  ;;  %v2405_v31 = vadd.f32 %v6126_v59, %v2379_v60 }
 0x371   :  { %v3524_v19 = vadd.f32 %v3523_v10, %v3497_v61  ;;  %v6141_v61 = vld [vmem:[#allocation55_spill] sm:$0xff] }
 0x372   :  { %4106 = vmatmul.f32.gmra.mxu0 %v5734_v23  ;;  %4184 = vmatmul.f32.gmra.mxu3 %v5734_v23  ;;  %v6123_v23 = vld [vmem:[#allocation26_spill] sm:$0xff] }
 0x373   :  { %v2324_v2 = vadd.f32 %v6124_v22, %v6123_v23  ;;  %v6144_v23 = vld [vmem:[#allocation53_spill] sm:$0xff] }
 0x375   :  { %v3543_v5 = vpop.f32.mrf.mxu0  ;;  %v2350_v47 = vadd.f32 %v6125_v48, %v2324_v2 }
 0x376   :  { %v3544_v33 = vadd.f32 %v3543_v5, %v5795_v39  ;;  %v6127_v39 = vld [vmem:[#allocation42_spill] sm:$0xff] }
 0x377   :  { %v2454_v12 = vadd.f32 %v6127_v39, %v2350_v47  ;;  %v6145_v47 = vld [vmem:[#allocation44_spill] sm:$0xff] }
 0x378   :  { %4132 = vmatmul.f32.gmra.mxu1 %v5714_v6  ;;  %4158 = vmatmul.f32.gmra.mxu2 %v5727_v34  ;;  %v5833_v30 = vadd.f32 %v3544_v33, %v3069_v44  ;;  %v2252_v6 = vadd.f32 %v6129_v20, %v6128_v35  ;;  %v2431_v34 = vadd.f32 %v6130_v57, %v2405_v31 }
 0x379   :  { %v2480_v4 = vadd.f32 %v6131_v51, %v2454_v12  ;;  %v6146_v12 = vld [vmem:[#allocation56_spill] sm:$0xff] }
 0x37a   :  { %4109 = vmatmul.f32.gmra.mxu0 %v5755_v42  ;;  %4187 = vmatmul.f32.gmra.mxu3 %v5755_v42  ;;  %v2278_v24 = vadd.f32 %v6132_v63, %v2252_v6  ;;  %v3071_v50 = vadd.f32 %v5675_v25, %v2431_v34  ;;  %v2353_v25 = vadd.f32 %v6137_v26, %v2327_v32  ;;  %v6148_v34 = vld [vmem:[#allocation58_spill] sm:$0xff] }
 0x37b   :  { %v2506_v27 = vadd.f32 %v6136_v41, %v2480_v4  ;;  %v3621_v11 = vpop.f32.mrf.mxu3 }
 0x37c   :  { %v2382_v56 = vadd.f32 %v6133_v62, %v2278_v24  ;;  %v3569_v37 = vpop.f32.mrf.mxu1  ;;  %v2457_v14 = vadd.f32 %v6139_v8, %v2353_v25  ;;  %v6151_v8 = vld [vmem:[#allocation16_spill] sm:$0xff] }
 0x37e   :  { %v2483_v28 = vadd.f32 %v6141_v61, %v2457_v14 }
 0x37f   :  { %v3546_v49 = vpop.f32.mrf.mxu0 }
 0x380   :  { %4135 = vmatmul.f32.gmra.mxu1 %v5741_v54  ;;  %4161 = vmatmul.f32.gmra.mxu2 %v5750_v1  ;;  %v3547_v42 = vadd.f32 %v3546_v49, %v3521_v16  ;;  %v3070_v54 = vadd.f32 %v5679_v52, %v2506_v27  ;;  %v6138_v1 = vld [vmem:[#allocation14_spill] sm:$0xff]  ;;  %v6142_v52 = vld [vmem:[#allocation39_spill] sm:$0xff]  ;;  %v2509_v22 = vadd.f32 %v6144_v23, %v2483_v28 }
 0x381   :  { %v2408_v16 = vadd.f32 %v6138_v1, %v2382_v56  ;;  %v2330_v60 = vadd.f32 %v6143_v29, %v6142_v52  ;;  %v6150_v1 = vld [vmem:[#allocation36_spill] sm:$0xff]  ;;  %v6156_v52 = vld [vmem:[#allocation18_spill] sm:$0xff] }
 0x382   :  { %v5851_v17 = vadd.f32 %v3547_v42, %v3071_v50  ;;  %v3595_v3 = vpop.f32.mrf.mxu2  ;;  %v3072_v31 = vadd.f32 %v5690_v15, %v2509_v22  ;;  %v6157_v23 = vld [vmem:[#allocation22_spill] sm:$0xff] }
 0x383   :  { %v3596_v46 = vadd.f32 %v3595_v3, %v3569_v37  ;;  %v2434_v10 = vadd.f32 %v6140_v40, %v2408_v16  ;;  %v2356_v59 = vadd.f32 %v6145_v47, %v2330_v60  ;;  %v6159_v47 = vld [vmem:[#allocation19_spill] sm:$0xff] }
 0x385   :  { %v3622_v55 = vadd.f32 %v3621_v11, %v3596_v46  ;;  %v3073_v36 = vadd.f32 %v5682_v45, %v2434_v10  ;;  %v3624_v48 = vpop.f32.mrf.mxu3  ;;  %v2460_v35 = vadd.f32 %v6146_v12, %v2356_v59  ;;  %v6152_v10 = vld [vmem:[#allocation45_spill] sm:$0xff] }
 0x386   :  { %v3572_v0 = vpop.f32.mrf.mxu1 }
 0x387   :  { %v5860_v9 = vadd.f32 %v3622_v55, %v3070_v54  ;;  %v6149_v55 = vld [vmem:[#allocation29_spill] sm:$0xff] }
 0x388   :  { %v1837_v16 = vadd.f32 %v6150_v1, %v6149_v55  ;;  %v6164_v55 = vld [vmem:[#allocation68_spill] sm:$0xff] }
 0x389   :  { %v3549_v7 = vpop.f32.mrf.mxu0 }
 0x38a   :  { %v3550_v5 = vadd.f32 %v3549_v7, %v3524_v19  ;;  %v6147_v19 = vld [vmem:[#allocation59_spill] sm:$0xff]  ;;  %v1863_v14 = vadd.f32 %v6151_v8, %v1837_v16  ;;  %v6165_v8 = vld [vmem:[#allocation17_spill] sm:$0xff] }
 0x38b   :  { %v2486_v20 = vadd.f32 %v6147_v19, %v2460_v35  ;;  %v6161_v35 = vld [vmem:[#allocation46_spill] sm:$0xff] }
 0x38c   :  { %v5865_v44 = vadd.f32 %v3550_v5, %v3073_v36  ;;  %v3598_v33 = vpop.f32.mrf.mxu2  ;;  %v1967_v61 = vadd.f32 %v6152_v10, %v1863_v14  ;;  %v6153_v36 = vld [vmem:[#allocation57_spill] sm:$0xff]  ;;  %v6154_v5 = vld [vmem:[#allocation60_spill] sm:$0xff] }
 0x38d   :  { %v3599_v2 = vadd.f32 %v3598_v33, %v3572_v0  ;;  %v2512_v51 = vadd.f32 %v6148_v34, %v2486_v20  ;;  %v2698_v0 = vadd.f32 %v6154_v5, %v6153_v36  ;;  %v6155_v33 = vld [vmem:[#allocation37_spill] sm:$0xff]  ;;  %v6166_v14 = vld [vmem:[#allocation20_spill] sm:$0xff] }
 0x38e   :  { %v1840_v29 = vadd.f32 %v6156_v52, %v6155_v33  ;;  %v1993_v22 = vadd.f32 %v6157_v23, %v1967_v61  ;;  %v1843_v10 = vadd.f32 %v6166_v14, %v6165_v8  ;;  %v6167_v61 = vld [vmem:[#allocation47_spill] sm:$0xff]  ;;  %v6168_v36 = vld [vmem:[#allocation65_spill] sm:$0xff] }
 0x38f   :  { %v3625_v39 = vadd.f32 %v3624_v48, %v3599_v2  ;;  %v3627_v49 = vpop.f32.mrf.mxu3  ;;  %v3074_v63 = vadd.f32 %v5716_v38, %v2512_v51  ;;  %v6158_v2 = vld [vmem:[#allocation62_spill] sm:$0xff] }
 0x390   :  { %v3575_v6 = vpop.f32.mrf.mxu1  ;;  %v2724_v48 = vadd.f32 %v6158_v2, %v2698_v0  ;;  %v1866_v59 = vadd.f32 %v6159_v47, %v1840_v29  ;;  %v6169_v0 = vld [vmem:[#allocation21_spill] sm:$0xff]  ;;  %v6170_v29 = vld [vmem:[#allocation28_spill] sm:$0xff] }
 0x391   :  { %v5873_v45 = vadd.f32 %v3625_v39, %v3072_v31  ;;  %v6160_v31 = vld [vmem:[#allocation23_spill] sm:$0xff]  ;;  %v1869_v33 = vadd.f32 %v6169_v0, %v1843_v10 }
 0x392   :  { %v2019_v39 = vadd.f32 %v6160_v31, %v1993_v22  ;;  %v1970_v19 = vadd.f32 %v6161_v35, %v1866_v59  ;;  %v6172_v35 = vld [vmem:[#allocation64_spill] sm:$0xff] }
 0x394   :  { %v2810_v20 = vadd.f32 %v2724_v48, %v2019_v39  ;;  %v6171_v48 = vld [vmem:[#allocation30_spill] sm:$0xff] }
 0x395   :  { %v1973_v47 = vadd.f32 %v6171_v48, %v1869_v33 }
 0x396   :  { %v3601_v57 = vpop.f32.mrf.mxu2  ;;  %v3371_v1 = vadd.f32 %v6164_v55, %v2810_v20 }
 0x397   :  { %v3602_v4 = vadd.f32 %v3601_v57, %v3575_v6 }
 0x399   :  { %v3628_v24 = vadd.f32 %v3627_v49, %v3602_v4  ;;  %v4203_v4 = vld [vmem:[#allocation10] sm:$0x3] }
 0x39a   :  { %v6162_v49 = vld [vmem:[#allocation61_spill] sm:$0xff] }
 0x39b   :  { %v5878_v50 = vadd.f32 %v3628_v24, %v3074_v63  ;;  %v3793_v42 = vpop.f32.mrf.mxu0  ;;  %v6163_v63 = vld [vmem:[#allocation63_spill] sm:$0xff] }
 0x39c   :  { %v2701_v24 = vadd.f32 %v6163_v63, %v6162_v49 }
 0x39e   :  { %v2727_v5 = vadd.f32 %v6168_v36, %v2701_v24  ;;  %v6175_v24 = vld [vmem:[#allocation40_spill] sm:$0xff] }
 0x39f   :  { %v1999_v55 = vadd.f32 %v6175_v24, %v1973_v47 }
 0x3a1   :  { %v5880_v62 = vpop.f32.mrf.mxu3 }
 0x3a2   :  { %v3819_v15 = vpop.f32.mrf.mxu1 }
 0x3a3   :  { %v3820_v12 = vadd.f32 %v3819_v15, %v3793_v42  ;;  %v1996_v42 = vadd.f32 %v6167_v61, %v1970_v19  ;;  %v6173_v19 = vld [vmem:[#allocation66_spill] sm:$0xff] }
 0x3a4   :  { %v2704_v20 = vadd.f32 %v6173_v19, %v6172_v35 }
 0x3a5   :  { %v3796_v56 = vpop.f32.mrf.mxu0  ;;  %v2022_v23 = vadd.f32 %v6170_v29, %v1996_v42 }
 0x3a7   :  { %v2812_v59 = vadd.f32 %v2727_v5, %v2022_v23  ;;  %v4206_v23 = vperm.slane %v4203_v4, 1 }
 0x3a8   :  { %v3845_v37 = vpop.f32.mrf.mxu2 }
 0x3a9   :  { %v3846_v6 = vadd.f32 %v3845_v37, %v3820_v12 }
 0x3ab   :  { %v5882_v13 = vpop.f32.mrf.mxu3  ;;  %v3932_v37 = vadd.f32 %v3846_v6, %v3371_v1  ;;  %v6176_v1 = vld [vmem:[#allocation67_spill] sm:$0xff] }
 0x3ac   :  { %v3822_v3 = vpop.f32.mrf.mxu1 }
 0x3ad   :  { %v3823_v22 = vadd.f32 %v3822_v3, %v3796_v56  ;;  %v2730_v56 = vadd.f32 %v6176_v1, %v2704_v20 }
 0x3af   :  { %v5884_v53 = vpop.f32.mrf.mxu0 }
 0x3b2   :  { %v3848_v32 = vpop.f32.mrf.mxu2 }
 0x3b3   :  { %v3849_v31 = vadd.f32 %v3848_v32, %v3823_v22 }
 0x3b5   :  { %v5888_v46 = vpop.f32.mrf.mxu3 }
 0x3b6   :  { %v5886_v41 = vpop.f32.mrf.mxu1 }
 0x3b7   :  { %v3826_v61 = vadd.f32 %v5886_v41, %v5884_v53 }
 0x3bc   :  { %v5890_v38 = vpop.f32.mrf.mxu2 }
 0x3c1   :  { %v3897_v27 = vpop.f32.mrf.mxu0 }
 0x3c2   :  { %v3898_v3 = vadd.f32 %v3897_v27, %v5880_v62  ;;  %v3852_v62 = vadd.f32 %v5890_v38, %v3826_v61 }
 0x3c7   :  { %v4078_v26 = vpop.f32.mrf.mxu3 }
 0x3c8   :  { %v3923_v11 = vpop.f32.mrf.mxu1 }
 0x3c9   :  { %v3924_v14 = vadd.f32 %v3923_v11, %v3898_v3 }
 0x3cb   :  { %v5892_v25 = vpop.f32.mrf.mxu0  ;;  %v3933_v33 = vadd.f32 %v3924_v14, %v5791_v18 }
 0x3cc   :  { %v3901_v41 = vadd.f32 %v5892_v25, %v5882_v13 }
 0x3ce   :  { %v4052_v54 = vpop.f32.mrf.mxu2 }
 0x3cf   :  { %v4079_v57 = vadd.f32 %v4078_v26, %v4052_v54  ;;  %v4205_v54 = vperm.slane %v4203_v4, 0 }
 0x3d1   :  { %v4081_v28 = vpop.f32.mrf.mxu3 }
 0x3d2   :  { %v5897_v40 = vpop.f32.mrf.mxu1 }
 0x3d5   :  { %v5900_v7 = vpop.f32.mrf.mxu0 }
 0x3d8   :  { %v4055_v60 = vpop.f32.mrf.mxu2 }
 0x3d9   :  { %v4082_v39 = vadd.f32 %v4081_v28, %v4055_v60  ;;  %v6177_v28 = vld [vmem:[#allocation31_spill] sm:$0xff] }
 0x3da   :  { %v2025_v60 = vadd.f32 %v6177_v28, %v1999_v55 }
 0x3db   :  { %v4084_v15 = vpop.f32.mrf.mxu3 }
 0x3dc   :  { %v5911_v34 = vpop.f32.mrf.mxu1  ;;  %v2814_v5 = vadd.f32 %v2730_v56, %v2025_v60 }
 0x3de   :  { %v3375_v0 = vadd.f32 %v5771_v21, %v2814_v5 }
 0x3e0   :  { %v3936_v53 = vadd.f32 %v3852_v62, %v3375_v0 }
 0x3e2   :  { %v4058_v52 = vpop.f32.mrf.mxu2 }
 0x3e3   :  { %v4085_v27 = vadd.f32 %v4084_v15, %v4058_v52  ;;  %v3927_v52 = vadd.f32 %v5897_v40, %v3901_v41 }
 0x3e7   :  { %v4104_v51 = vpop.f32.mrf.mxu0 }
 0x3e8   :  { %v4105_v16 = vadd.f32 %v4104_v51, %v4079_v57 }
 0x3ea   :  { %v4191_v26 = vadd.f32 %v4105_v16, %v5833_v30  ;;  %v6174_v30 = vld [vmem:[#allocation69_spill] sm:$0xff] }
 0x3eb   :  { %v3373_v51 = vadd.f32 %v6174_v30, %v2812_v59 }
 0x3ec   :  { %v4197_v2 = vmax.f32 %v3932_v37, %v4191_v26 }
 0x3ed   :  { %v4130_v6 = vpop.f32.mrf.mxu1  ;;  %v4182_v16 = vpop.f32.mrf.mxu3  ;;  %v3934_v8 = vadd.f32 %v3849_v31, %v3373_v51 }
 0x3ee   :  { %v4209_v12 = vadd.f32 %v4205_v54, %v4197_v2 }
 0x3ef   :  { %v4107_v57 = vpop.f32.mrf.mxu0 }
 0x3f0   :  { %v4215_v49 = vmax.f32 %v4209_v12, 0.0  ;;  %v4108_v63 = vadd.f32 %v4107_v57, %v4082_v39  ;;  %v3935_v39 = vadd.f32 %v3927_v52, %v5805_v43 }
 0x3f2   :  { %4221 = vst [vmem:[%s5975_s8] sm:$0xff] %v4215_v49  ;;  %v4193_v32 = vadd.f32 %v4108_v63, %v5851_v17 }
 0x3f3   :  { %v4156_v10 = vpop.f32.mrf.mxu2 }
 0x3f4   :  { %v4199_v42 = vmax.f32 %v3934_v8, %v4193_v32  ;;  %v4157_v36 = vadd.f32 %v4156_v10, %v4130_v6 }
 0x3f5   :  { %v4133_v2 = vpop.f32.mrf.mxu1  ;;  %v4185_v15 = vpop.f32.mrf.mxu3 }
 0x3f6   :  { %v4211_v37 = vadd.f32 %v4205_v54, %v4199_v42  ;;  %v4183_v26 = vadd.f32 %v4182_v16, %v4157_v36 }
 0x3f7   :  { %v4110_v17 = vpop.f32.mrf.mxu0 }
 0x3f8   :  { %v4217_v29 = vmax.f32 %v4211_v37, 0.0  ;;  %v4192_v11 = vadd.f32 %v4183_v26, %v5860_v9  ;;  %v4111_v22 = vadd.f32 %v4110_v17, %v4085_v27 }
 0x3fa   :  { %4223 = vst [vmem:[%s5975_s8 + $0x10] sm:$0xff] %v4217_v29  ;;  %v4198_v38 = vmax.f32 %v3933_v33, %v4192_v11  ;;  %v4195_v21 = vadd.f32 %v4111_v22, %v5865_v44  ;;  %v3904_v44 = vadd.f32 %v5900_v7, %v5888_v46 }
 0x3fb   :  { %v4159_v18 = vpop.f32.mrf.mxu2 }
 0x3fc   :  { %v4210_v48 = vadd.f32 %v4206_v23, %v4198_v38  ;;  %v4201_v9 = vmax.f32 %v3936_v53, %v4195_v21  ;;  %v4160_v4 = vadd.f32 %v4159_v18, %v4133_v2  ;;  %v3930_v35 = vadd.f32 %v5911_v34, %v3904_v44 }
 0x3fd   :  { %v4136_v12 = vpop.f32.mrf.mxu1  ;;  %v4188_v20 = vpop.f32.mrf.mxu3 }
 0x3fe   :  { %v4216_v47 = vmax.f32 %v4210_v48, 0.0  ;;  %v4213_v59 = vadd.f32 %v4205_v54, %v4201_v9  ;;  %v4186_v31 = vadd.f32 %v4185_v15, %v4160_v4  ;;  %v3937_v30 = vadd.f32 %v3930_v35, %v5816_v58 }
 0x400   :  { %4222 = vst [vmem:[%s5975_s8 + $0x8] sm:$0xff] %v4216_v47  ;;  %v4219_v13 = vmax.f32 %v4213_v59, 0.0  ;;  %v4194_v25 = vadd.f32 %v4186_v31, %v5873_v45 }
 0x402   :  { %4225 = vst [vmem:[%s5975_s8 + $0x20] sm:$0xff] %v4219_v13  ;;  %v4200_v40 = vmax.f32 %v3935_v39, %v4194_v25 }
 0x403   :  { %v4162_v54 = vpop.f32.mrf.mxu2 }
 0x404   :  { %v4212_v43 = vadd.f32 %v4206_v23, %v4200_v40  ;;  %v4163_v19 = vadd.f32 %v4162_v54, %v4136_v12 }
 0x406   :  { %v4218_v6 = vmax.f32 %v4212_v43, 0.0  ;;  %v4189_v57 = vadd.f32 %v4188_v20, %v4163_v19 }
 0x408   :  { %4224 = vst [vmem:[%s5975_s8 + $0x18] sm:$0xff] %v4218_v6  ;;  %v4196_v45 = vadd.f32 %v4189_v57, %v5878_v50 }
 0x40a   :  { %v4202_v46 = vmax.f32 %v3937_v30, %v4196_v45 }
 0x40c   :  { %v4214_v7 = vadd.f32 %v4206_v23, %v4202_v46 }
 0x40e   :  { %v4220_v51 = vmax.f32 %v4214_v7, 0.0 }
 0x410   :  { %4226 = vst [vmem:[%s5975_s8 + $0x28] sm:$0xff] %v4220_v51 }
 0x411   :  { %4231 = vsyncpa [#allocation4], 1 }
 0x412   :  { %4232 = vsyncpa [#allocation6], 1 }
 0x413   :  { %4233 = vsyncpa [#allocation9], 1 }

</bundles_post_ra>
